<compile_context>
chip_gen: v5e
topology: v5e:2x2
jax: 0.10.0
libtpu: 0.0.40
codegen_flags: <defaults>
</compile_context>

<pallas_src>
import math

import jax
import jax.numpy as jnp
from jax import lax
from jax.experimental import pallas as pl
from jax.experimental.pallas import tpu as pltpu


def _round_up(v, m):
    return (v + m - 1) // m * m


def _geom(H, W):
    """Padded-width compute grid + zero-guard geometry shared by kernel/wrapper."""
    W_pad = _round_up(W + 2, 8)        # >= W+2, sublane-aligned rows
    n_rows = H * W_pad                 # flat compute rows (cols >= W are junk)
    guard = W_pad + 8                  # zero halo rows above/below (>= W_pad+1)
    rows_alloc = n_rows + 2 * guard
    return W_pad, n_rows, guard, rows_alloc


# --------------------------------------------------------------------------
# Fused kernel:  x -> out1 (1x1) -> out2 (3x3) -> out3 (3x3);  o = cat(out1,out2,out3)
#   x_ref  : (1, H, W, Cin)            input dtype (cast to bf16 in-kernel)
#   w0     : (Cin, C_half)       bf16  (BN scale folded in)
#   w1     : (3, C_half, 3*C_q)  bf16  (per-ky, kx-concatenated on lanes)
#   w2     : (3, C_q,   3*C_q)   bf16
#   b0/b1/b2 : (1, Cout)         f32   (folded BN bias)
#   o_ref  : (1, H, W, C_half + 2*C_q)
#   ix/p1/p2 : VMEM scratch on the flat (rows, C) W_pad grid with zero guards.
# --------------------------------------------------------------------------
def _make_fused_kernel(H, W, Cin, C_half, C_q):
    W_pad, NR, G, R = _geom(H, W)
    NRx = NR + 8          # a few extra GEMM rows so the kx shift is a pure slice

    def kernel(x_ref, w0_ref, w1_ref, w2_ref, b0_ref, b1_ref, b2_ref,
               o_ref, ix_ref, p1_ref, p2_ref):
        # --- (re)write only the zero halo; interiors are overwritten below ----
        zc1 = jnp.zeros((G, C_half), p1_ref.dtype)
        zc2 = jnp.zeros((G, C_q), p2_ref.dtype)
        p1_ref[0:G, :] = zc1
        p1_ref[G + NR:R, :] = zc1
        p2_ref[0:G, :] = zc2
        p2_ref[G + NR:R, :] = zc2
        ix_ref[:, W:W_pad, :] = jnp.zeros((H, W_pad - W, Cin), ix_ref.dtype)

        # valid-column mask on the (H, W_pad) grid (columns >= W are junk)
        mask = lax.broadcasted_iota(jnp.int32, (H, W_pad, 1), 1) < W

        # --- stage the image on the W_pad-wide grid ----------------------------
        ix_ref[:, 0:W, :] = x_ref[0].astype(ix_ref.dtype)
        ix = ix_ref[...].reshape(NR, Cin)           # free: W_pad % 8 == 0

        # --- conv0: 1x1 pointwise GEMM -----------------------------------------
        a0 = jnp.dot(ix, w0_ref[...], preferred_element_type=jnp.float32)
        out1 = jnp.where(
            mask, jnp.maximum(a0.reshape(H, W_pad, C_half) + b0_ref[...], 0.0), 0.0)
        # store this branch immediately (no concat epilogue, short live range)
        o_ref[0, :, :, 0:C_half] = out1[:, 0:W, :].astype(o_ref.dtype)
        p1_ref[G:G + NR, :] = out1.reshape(NR, C_half).astype(p1_ref.dtype)

        # --- 3x3 conv: 3 GEMMs (one per ky); kx taps fused on the lane dim -----
        def conv3x3(p_ref, w_ref, b_ref, cout):
            acc = None
            for ky in range(3):
                base = G + (ky - 1) * W_pad - 1        # static, >= 7
                tap = p_ref[base:base + NRx, :]        # pure row-offset slice
                y = jnp.dot(tap, w_ref[ky], preferred_element_type=jnp.float32)
                for kx in range(3):
                    # shift by kx rows + pick the kx-th output chunk
                    part = y[kx:kx + NR, kx * cout:(kx + 1) * cout]
                    acc = part if acc is None else acc + part
            acc = acc.reshape(H, W_pad, cout)
            return jnp.where(mask, jnp.maximum(acc + b_ref[...], 0.0), 0.0)

        out2 = conv3x3(p1_ref, w1_ref, b1_ref, C_q)
        o_ref[0, :, :, C_half:C_half + C_q] = out2[:, 0:W, :].astype(o_ref.dtype)
        p2_ref[G:G + NR, :] = out2.reshape(NR, C_q).astype(p2_ref.dtype)

        out3 = conv3x3(p2_ref, w2_ref, b2_ref, C_q)
        o_ref[0, :, :, C_half + C_q:C_half + 2 * C_q] = \
            out3[:, 0:W, :].astype(o_ref.dtype)

    return kernel


# --------------------------------------------------------------------------
# Parameter folding: Conv2d(bias=False) + BatchNorm2d(eval) -> scaled weights + bias
# --------------------------------------------------------------------------
def _fold_convbn(w_oihw, gamma, beta, mean, var, eps=1e-5):
    inv = gamma / jnp.sqrt(var + eps)                   # (Cout,)
    w_hwio = jnp.transpose(w_oihw, (2, 3, 1, 0)) * inv  # BN scale folded in
    bias = (beta - mean * inv).reshape(1, -1).astype(jnp.float32)
    return w_hwio.astype(jnp.bfloat16), bias


def fold_cat_bottleneck_params(params, eps=1e-5):
    """One-time transform of (conv, BN) params into kernel operands."""
    w0, b0 = _fold_convbn(*params[0], eps=eps)          # (1,1,Cin,Ch)
    w1, b1 = _fold_convbn(*params[1], eps=eps)          # (3,3,Ch,Cq)
    w2, b2 = _fold_convbn(*params[2], eps=eps)          # (3,3,Cq,Cq)
    w0 = w0[0, 0]                                       # (Cin, Ch)
    # per-ky concat of the 3 kx taps along the output/lane dim -> one GEMM per ky
    w1c = jnp.concatenate([w1[:, kx] for kx in range(3)], axis=-1)   # (3, Ch, 3*Cq)
    w2c = jnp.concatenate([w2[:, kx] for kx in range(3)], axis=-1)   # (3, Cq, 3*Cq)
    return (w0, w1c, w2c, b0, b1, b2)


# --------------------------------------------------------------------------
# Fused NHWC entry point (no layout shims, no separate cast pass).
# --------------------------------------------------------------------------
def cat_bottleneck_fused(x_nhwc, folded, *, out_dtype=jnp.bfloat16):
    w0, w1c, w2c, b0, b1, b2 = folded
    N, H, W, Cin = x_nhwc.shape
    C_half = w0.shape[-1]
    C_q = w1c.shape[-1] // 3
    C_total = C_half + 2 * C_q
    W_pad, NR, G, R = _geom(H, W)

    kernel = _make_fused_kernel(H, W, Cin, C_half, C_q)

    in_item = x_nhwc.dtype.itemsize
    out_item = jnp.dtype(out_dtype).itemsize
    flops = 2 * N * NR * (Cin * C_half + 9 * C_half * C_q + 9 * C_q * C_q)
    bytes_accessed = int(
        x_nhwc.size * in_item
        + (w0.size + w1c.size + w2c.size) * 2
        + (b0.size + b1.size + b2.size) * 4
        + N * H * W * C_total * out_item)

    # rough per-step VMEM footprint -> scoped-vmem request (clamped, v7x-safe)
    step_bytes = (2 * (H * W * Cin * in_item + H * W * C_total * out_item)
                  + 2 * (w0.size + w1c.size + w2c.size) * 2
                  + (H * W_pad * Cin + R * (C_half + C_q)) * 2
                  + 3 * NR * (C_half + 6 * C_q) * 4)
    vmem_limit = int(min(64 * 2 ** 20, max(32 * 2 ** 20, 2 * step_bytes)))

    # TODO(synk): add a "parallel" row-band grid axis (with 1-row halo recompute)
    # for segmentation-scale H*W on v7x (64 MiB VMEM / 2 TCs); classification-
    # scale STDC tiles fit a single per-image step comfortably.
    out = pl.pallas_call(
        kernel,
        out_shape=jax.ShapeDtypeStruct((N, H, W, C_total), out_dtype),
        grid=(N,),
        in_specs=[
            pl.BlockSpec((1, H, W, Cin), lambda n: (n, 0, 0, 0)),
            pl.BlockSpec((Cin, C_half), lambda n: (0, 0)),
            pl.BlockSpec((3, C_half, 3 * C_q), lambda n: (0, 0, 0)),
            pl.BlockSpec((3, C_q, 3 * C_q), lambda n: (0, 0, 0)),
            pl.BlockSpec((1, C_half), lambda n: (0, 0)),
            pl.BlockSpec((1, C_q), lambda n: (0, 0)),
            pl.BlockSpec((1, C_q), lambda n: (0, 0)),
        ],
        out_specs=pl.BlockSpec((1, H, W, C_total), lambda n: (n, 0, 0, 0)),
        scratch_shapes=[
            pltpu.VMEM((H, W_pad, Cin), jnp.bfloat16),   # input on the W_pad grid
            pltpu.VMEM((R, C_half), jnp.bfloat16),       # out1 + zero halo (conv1 taps)
            pltpu.VMEM((R, C_q), jnp.bfloat16),          # out2 + zero halo (conv2 taps)
        ],
        compiler_params=pltpu.CompilerParams(
            dimension_semantics=("parallel",),
            vmem_limit_bytes=vmem_limit,
        ),
        cost_estimate=pl.CostEstimate(
            flops=flops, transcendentals=0, bytes_accessed=bytes_accessed),
    )(x_nhwc, w0, w1c, w2c, b0, b1, b2)
    return out


# --------------------------------------------------------------------------
# NCHW wrapper -- layout shim only, for parity with the PyTorch interface.
# (Chained CatBottlenecks should call cat_bottleneck_fused with NHWC/bf16.)
# --------------------------------------------------------------------------
def cat_bottleneck_forward(x_nchw, params, eps=1e-5, out_dtype=jnp.bfloat16):
    folded = fold_cat_bottleneck_params(params, eps=eps)
    x = jnp.transpose(x_nchw, (0, 2, 3, 1))             # NCHW -> NHWC
    out = cat_bottleneck_fused(x, folded, out_dtype=out_dtype)
    return jnp.transpose(out, (0, 3, 1, 2))             # NHWC -> NCHW


# --------------------------------------------------------------------------
# CatBottleneck (in_planes -> out_planes, block_num=3, stride=1) parameters
# --------------------------------------------------------------------------
def init_convx_params(key, cin, cout, kernel):
    k1, k2, k3, k4, k5 = jax.random.split(key, 5)
    fan_in = cin * kernel * kernel
    w = jax.random.normal(k1, (cout, cin, kernel, kernel), jnp.float32) / math.sqrt(fan_in)
    gamma = 0.5 + jax.random.uniform(k2, (cout,), jnp.float32)
    beta = 0.1 * jax.random.normal(k3, (cout,), jnp.float32)
    mean = 0.1 * jax.random.normal(k4, (cout,), jnp.float32)
    var = 0.5 + jax.random.uniform(k5, (cout,), jnp.float32)
    return (w, gamma, beta, mean, var)


def init_cat_bottleneck(key, in_planes, out_planes):
    # TODO(synk): stride=2 variant (depthwise avd_layer + AvgPool skip) not implemented.
    k0, k1, k2 = jax.random.split(key, 3)
    return [
        init_convx_params(k0, in_planes, out_planes // 2, 1),
        init_convx_params(k1, out_planes // 2, out_planes // 4, 3),
        init_convx_params(k2, out_planes // 4, out_planes // 4, 3),
    ]


# --------------------------------------------------------------------------
# Plain-JAX reference (lax.conv, f32) for the correctness cross-check.
# --------------------------------------------------------------------------
def _convx_ref(x_nhwc, w_oihw, gamma, beta, mean, var, kernel, eps=1e-5):
    pad = kernel // 2
    y = lax.conv_general_dilated(
        x_nhwc, jnp.transpose(w_oihw, (2, 3, 1, 0)),
        window_strides=(1, 1), padding=((pad, pad), (pad, pad)),
        dimension_numbers=("NHWC", "HWIO", "NHWC"))
    scale = gamma / jnp.sqrt(var + eps)
    return jnp.maximum(y * scale + (beta - mean * scale), 0.0)


def cat_bottleneck_ref(x_nchw, params):
    x = jnp.transpose(x_nchw, (0, 2, 3, 1))
    out1 = _convx_ref(x, *params[0], kernel=1)
    out2 = _convx_ref(out1, *params[1], kernel=3)
    out3 = _convx_ref(out2, *params[2], kernel=3)
    out = jnp.concatenate([out1, out2, out3], axis=-1)
    return jnp.transpose(out, (0, 3, 1, 2))


if __name__ == "__main__":
    key = jax.random.PRNGKey(0)

    # (N, in_planes, out_planes, H, W): small shapes, incl. W not a multiple of 8
    for (N, in_planes, out_planes, H, W) in [(2, 4, 8, 16, 16), (1, 16, 32, 14, 14)]:
        key, kx_key, kp_key = jax.random.split(key, 3)
        x = jax.random.normal(kx_key, (N, in_planes, H, W), jnp.float32)   # NCHW
        params = init_cat_bottleneck(kp_key, in_planes, out_planes)

        out = jax.block_until_ready(cat_bottleneck_forward(x, params))
        assert out.shape == (N, out_planes, H, W), out.shape

        ref = jax.block_until_ready(cat_bottleneck_ref(x, params))
        out_f32 = out.astype(jnp.float32)
        max_err = float(jnp.max(jnp.abs(out_f32 - ref)))
        # bf16 MXU operands + bf16 intermediates/output vs. an all-f32 reference
        # -> loose-ish tolerance (inference-grade; documented compounding).
        assert jnp.allclose(out_f32, ref, atol=7.5e-2, rtol=7.5e-2), max_err

    print("KERNEL_OK")
</pallas_src>

<mosaic_0001>
module attributes {stable_mosaic.version = 11 : i64} {
  func.func @kernel(%arg0: i32, %arg1: memref<1x16x16x4xf32, #tpu.memory_space<vmem>>, %arg2: memref<4x4xbf16, #tpu.memory_space<vmem>>, %arg3: memref<3x4x6xbf16, #tpu.memory_space<vmem>>, %arg4: memref<3x2x6xbf16, #tpu.memory_space<vmem>>, %arg5: memref<1x4xf32, #tpu.memory_space<vmem>>, %arg6: memref<1x2xf32, #tpu.memory_space<vmem>>, %arg7: memref<1x2xf32, #tpu.memory_space<vmem>>, %arg8: memref<1x16x16x8xbf16, #tpu.memory_space<vmem>>, %arg9: memref<16x24x4xbf16, #tpu.memory_space<vmem>>, %arg10: memref<448x4xbf16, #tpu.memory_space<vmem>>, %arg11: memref<448x2xbf16, #tpu.memory_space<vmem>>) attributes {dimension_semantics = [#tpu.dimension_semantics<parallel>], iteration_bounds = array<i64: 2>, scalar_prefetch = 0 : i64, scratch_operands = 3 : i64, tpu.core_type = #tpu.core_type<tc>, window_params = [{transform_indices = @transform_0, window_bounds = array<i64: 1, 16, 16, 4>}, {pipeline_mode = #tpu.pipeline_mode<synchronous>, transform_indices = @transform_1, window_bounds = array<i64: 4, 4>}, {pipeline_mode = #tpu.pipeline_mode<synchronous>, transform_indices = @transform_2, window_bounds = array<i64: 3, 4, 6>}, {pipeline_mode = #tpu.pipeline_mode<synchronous>, transform_indices = @transform_3, window_bounds = array<i64: 3, 2, 6>}, {pipeline_mode = #tpu.pipeline_mode<synchronous>, transform_indices = @transform_4, window_bounds = array<i64: 1, 4>}, {pipeline_mode = #tpu.pipeline_mode<synchronous>, transform_indices = @transform_5, window_bounds = array<i64: 1, 2>}, {pipeline_mode = #tpu.pipeline_mode<synchronous>, transform_indices = @transform_6, window_bounds = array<i64: 1, 2>}, {transform_indices = @transform_7, window_bounds = array<i64: 1, 16, 16, 8>}]} {
    %cst = arith.constant 0.000000e+00 : bf16
    %0 = vector.broadcast %cst : bf16 to vector<32x4xbf16>
    %cst_0 = arith.constant 0.000000e+00 : bf16
    %1 = vector.broadcast %cst_0 : bf16 to vector<32x2xbf16>
    %c0 = arith.constant 0 : index
    %c0_1 = arith.constant 0 : index
    %2 = vector.load %arg10[%c0, %c0_1] : memref<448x4xbf16, #tpu.memory_space<vmem>>, vector<32x4xbf16>
    tpu.vector_store %arg10[%c0, %c0_1], %0 {strides = array<i32>} : memref<448x4xbf16, #tpu.memory_space<vmem>>, vector<32x4xbf16>,
    %c416 = arith.constant 416 : index
    %c0_2 = arith.constant 0 : index
    %3 = vector.load %arg10[%c416, %c0_2] : memref<448x4xbf16, #tpu.memory_space<vmem>>, vector<32x4xbf16>
    tpu.vector_store %arg10[%c416, %c0_2], %0 {strides = array<i32>} : memref<448x4xbf16, #tpu.memory_space<vmem>>, vector<32x4xbf16>,
    %c0_3 = arith.constant 0 : index
    %c0_4 = arith.constant 0 : index
    %4 = vector.load %arg11[%c0_3, %c0_4] : memref<448x2xbf16, #tpu.memory_space<vmem>>, vector<32x2xbf16>
    tpu.vector_store %arg11[%c0_3, %c0_4], %1 {strides = array<i32>} : memref<448x2xbf16, #tpu.memory_space<vmem>>, vector<32x2xbf16>,
    %c416_5 = arith.constant 416 : index
    %c0_6 = arith.constant 0 : index
    %5 = vector.load %arg11[%c416_5, %c0_6] : memref<448x2xbf16, #tpu.memory_space<vmem>>, vector<32x2xbf16>
    tpu.vector_store %arg11[%c416_5, %c0_6], %1 {strides = array<i32>} : memref<448x2xbf16, #tpu.memory_space<vmem>>, vector<32x2xbf16>,
    %cst_7 = arith.constant 0.000000e+00 : bf16
    %6 = vector.broadcast %cst_7 : bf16 to vector<16x8x4xbf16>
    %c0_8 = arith.constant 0 : index
    %c16 = arith.constant 16 : index
    %c0_9 = arith.constant 0 : index
    %7 = vector.load %arg9[%c0_8, %c16, %c0_9] : memref<16x24x4xbf16, #tpu.memory_space<vmem>>, vector<16x8x4xbf16>
    tpu.vector_store %arg9[%c0_8, %c16, %c0_9], %6 {strides = array<i32>} : memref<16x24x4xbf16, #tpu.memory_space<vmem>>, vector<16x8x4xbf16>,
    %8 = tpu.iota {dimensions = array<i32: 1>} : vector<16x24x1xi32>
    %c16_i32 = arith.constant 16 : i32
    %9 = vector.broadcast %c16_i32 : i32 to vector<16x24x1xi32>
    %10 = arith.cmpi slt, %8, %9 : vector<16x24x1xi32>
    %c0_10 = arith.constant 0 : index
    %c0_11 = arith.constant 0 : index
    %c0_12 = arith.constant 0 : index
    %c0_13 = arith.constant 0 : index
    %11 = vector.load %arg1[%c0_10, %c0_11, %c0_12, %c0_13] : memref<1x16x16x4xf32, #tpu.memory_space<vmem>>, vector<1x16x16x4xf32>
    %12 = vector.shape_cast %11 : vector<1x16x16x4xf32> to vector<16x16x4xf32>
    %13 = arith.truncf %12 : vector<16x16x4xf32> to vector<16x16x4xbf16>
    %c0_14 = arith.constant 0 : index
    %c0_15 = arith.constant 0 : index
    %c0_16 = arith.constant 0 : index
    %14 = vector.load %arg9[%c0_14, %c0_15, %c0_16] : memref<16x24x4xbf16, #tpu.memory_space<vmem>>, vector<16x16x4xbf16>
    tpu.vector_store %arg9[%c0_14, %c0_15, %c0_16], %13 {strides = array<i32>} : memref<16x24x4xbf16, #tpu.memory_space<vmem>>, vector<16x16x4xbf16>,
    %c0_17 = arith.constant 0 : index
    %c0_18 = arith.constant 0 : index
    %c0_19 = arith.constant 0 : index
    %15 = vector.load %arg9[%c0_17, %c0_18, %c0_19] : memref<16x24x4xbf16, #tpu.memory_space<vmem>>, vector<16x24x4xbf16>
    %16 = vector.shape_cast %15 : vector<16x24x4xbf16> to vector<384x4xbf16>
    %c0_20 = arith.constant 0 : index
    %c0_21 = arith.constant 0 : index
    %17 = vector.load %arg2[%c0_20, %c0_21] : memref<4x4xbf16, #tpu.memory_space<vmem>>, vector<4x4xbf16>
    %cst_22 = arith.constant dense<0.000000e+00> : vector<384x4xf32>
    %18 = tpu.matmul %16, %17, %cst_22 {dimension_numbers = #tpu.dot_dimension_numbers<[1], [0], [0], [1], [0, 0, 1, 1], [], []>} : vector<384x4xbf16>, vector<4x4xbf16>, vector<384x4xf32> -> vector<384x4xf32>
    %19 = vector.shape_cast %18 : vector<384x4xf32> to vector<16x24x4xf32>
    %c0_23 = arith.constant 0 : index
    %c0_24 = arith.constant 0 : index
    %20 = vector.load %arg5[%c0_23, %c0_24] : memref<1x4xf32, #tpu.memory_space<vmem>>, vector<1x4xf32>
    %21 = vector.shape_cast %20 : vector<1x4xf32> to vector<1x1x4xf32>
    %22 = vector.broadcast %21 : vector<1x1x4xf32> to vector<16x24x4xf32>
    %23 = arith.addf %19, %22 : vector<16x24x4xf32>
    %cst_25 = arith.constant 0.000000e+00 : f32
    %24 = vector.broadcast %cst_25 : f32 to vector<16x24x4xf32>
    %25 = arith.maximumf %23, %24 : vector<16x24x4xf32>
    %cst_26 = arith.constant 0.000000e+00 : f32
    %26 = vector.shape_cast %10 : vector<16x24x1xi1> to vector<16x24x1xi1>
    %27 = vector.broadcast %26 : vector<16x24x1xi1> to vector<16x24x4xi1>
    %28 = vector.broadcast %cst_26 : f32 to vector<16x24x4xf32>
    %29 = arith.select %27, %25, %28 : vector<16x24x4xi1>, vector<16x24x4xf32>
    %30 = vector.extract_strided_slice %29 {offsets = [0, 0, 0], sizes = [16, 16, 4], strides = [1, 1, 1]} : vector<16x24x4xf32> to vector<16x16x4xf32>
    %31 = arith.truncf %30 : vector<16x16x4xf32> to vector<16x16x4xbf16>
    %c0_27 = arith.constant 0 : index
    %c0_28 = arith.constant 0 : index
    %c0_29 = arith.constant 0 : index
    %c0_30 = arith.constant 0 : index
    %32 = vector.load %arg8[%c0_27, %c0_28, %c0_29, %c0_30] : memref<1x16x16x8xbf16, #tpu.memory_space<vmem>>, vector<1x16x16x4xbf16>
    %33 = vector.shape_cast %32 : vector<1x16x16x4xbf16> to vector<16x16x4xbf16>
    %34 = vector.shape_cast %31 : vector<16x16x4xbf16> to vector<1x16x16x4xbf16>
    tpu.vector_store %arg8[%c0_27, %c0_28, %c0_29, %c0_30], %34 {strides = array<i32>} : memref<1x16x16x8xbf16, #tpu.memory_space<vmem>>, vector<1x16x16x4xbf16>,
    %35 = vector.shape_cast %29 : vector<16x24x4xf32> to vector<384x4xf32>
    %36 = arith.truncf %35 : vector<384x4xf32> to vector<384x4xbf16>
    %c32 = arith.constant 32 : index
    %c0_31 = arith.constant 0 : index
    %37 = vector.load %arg10[%c32, %c0_31] : memref<448x4xbf16, #tpu.memory_space<vmem>>, vector<384x4xbf16>
    tpu.vector_store %arg10[%c32, %c0_31], %36 {strides = array<i32>} : memref<448x4xbf16, #tpu.memory_space<vmem>>, vector<384x4xbf16>,
    %c7 = arith.constant 7 : index
    %c0_32 = arith.constant 0 : index
    %38 = vector.load %arg10[%c7, %c0_32] : memref<448x4xbf16, #tpu.memory_space<vmem>>, vector<392x4xbf16>
    %c0_33 = arith.constant 0 : index
    %c0_34 = arith.constant 0 : index
    %c0_35 = arith.constant 0 : index
    %39 = vector.load %arg3[%c0_33, %c0_34, %c0_35] : memref<3x4x6xbf16, #tpu.memory_space<vmem>>, vector<1x4x6xbf16>
    %40 = vector.shape_cast %39 : vector<1x4x6xbf16> to vector<4x6xbf16>
    %cst_36 = arith.constant dense<0.000000e+00> : vector<392x6xf32>
    %41 = tpu.matmul %38, %40, %cst_36 {dimension_numbers = #tpu.dot_dimension_numbers<[1], [0], [0], [1], [0, 0, 1, 1], [], []>} : vector<392x4xbf16>, vector<4x6xbf16>, vector<392x6xf32> -> vector<392x6xf32>
    %42 = vector.extract_strided_slice %41 {offsets = [0, 0], sizes = [384, 2], strides = [1, 1]} : vector<392x6xf32> to vector<384x2xf32>
    %43 = vector.extract_strided_slice %41 {offsets = [1, 2], sizes = [384, 2], strides = [1, 1]} : vector<392x6xf32> to vector<384x2xf32>
    %44 = arith.addf %42, %43 : vector<384x2xf32>
    %45 = vector.extract_strided_slice %41 {offsets = [2, 4], sizes = [384, 2], strides = [1, 1]} : vector<392x6xf32> to vector<384x2xf32>
    %46 = arith.addf %44, %45 : vector<384x2xf32>
    %c31 = arith.constant 31 : index
    %c0_37 = arith.constant 0 : index
    %47 = vector.load %arg10[%c31, %c0_37] : memref<448x4xbf16, #tpu.memory_space<vmem>>, vector<392x4xbf16>
    %c1 = arith.constant 1 : index
    %c0_38 = arith.constant 0 : index
    %c0_39 = arith.constant 0 : index
    %48 = vector.load %arg3[%c1, %c0_38, %c0_39] : memref<3x4x6xbf16, #tpu.memory_space<vmem>>, vector<1x4x6xbf16>
    %49 = vector.shape_cast %48 : vector<1x4x6xbf16> to vector<4x6xbf16>
    %cst_40 = arith.constant dense<0.000000e+00> : vector<392x6xf32>
    %50 = tpu.matmul %47, %49, %cst_40 {dimension_numbers = #tpu.dot_dimension_numbers<[1], [0], [0], [1], [0, 0, 1, 1], [], []>} : vector<392x4xbf16>, vector<4x6xbf16>, vector<392x6xf32> -> vector<392x6xf32>
    %51 = vector.extract_strided_slice %50 {offsets = [0, 0], sizes = [384, 2], strides = [1, 1]} : vector<392x6xf32> to vector<384x2xf32>
    %52 = arith.addf %46, %51 : vector<384x2xf32>
    %53 = vector.extract_strided_slice %50 {offsets = [1, 2], sizes = [384, 2], strides = [1, 1]} : vector<392x6xf32> to vector<384x2xf32>
    %54 = arith.addf %52, %53 : vector<384x2xf32>
    %55 = vector.extract_strided_slice %50 {offsets = [2, 4], sizes = [384, 2], strides = [1, 1]} : vector<392x6xf32> to vector<384x2xf32>
    %56 = arith.addf %54, %55 : vector<384x2xf32>
    %c55 = arith.constant 55 : index
    %c0_41 = arith.constant 0 : index
    %57 = vector.load %arg10[%c55, %c0_41] : memref<448x4xbf16, #tpu.memory_space<vmem>>, vector<392x4xbf16>
    %c2 = arith.constant 2 : index
    %c0_42 = arith.constant 0 : index
    %c0_43 = arith.constant 0 : index
    %58 = vector.load %arg3[%c2, %c0_42, %c0_43] : memref<3x4x6xbf16, #tpu.memory_space<vmem>>, vector<1x4x6xbf16>
    %59 = vector.shape_cast %58 : vector<1x4x6xbf16> to vector<4x6xbf16>
    %cst_44 = arith.constant dense<0.000000e+00> : vector<392x6xf32>
    %60 = tpu.matmul %57, %59, %cst_44 {dimension_numbers = #tpu.dot_dimension_numbers<[1], [0], [0], [1], [0, 0, 1, 1], [], []>} : vector<392x4xbf16>, vector<4x6xbf16>, vector<392x6xf32> -> vector<392x6xf32>
    %61 = vector.extract_strided_slice %60 {offsets = [0, 0], sizes = [384, 2], strides = [1, 1]} : vector<392x6xf32> to vector<384x2xf32>
    %62 = arith.addf %56, %61 : vector<384x2xf32>
    %63 = vector.extract_strided_slice %60 {offsets = [1, 2], sizes = [384, 2], strides = [1, 1]} : vector<392x6xf32> to vector<384x2xf32>
    %64 = arith.addf %62, %63 : vector<384x2xf32>
    %65 = vector.extract_strided_slice %60 {offsets = [2, 4], sizes = [384, 2], strides = [1, 1]} : vector<392x6xf32> to vector<384x2xf32>
    %66 = arith.addf %64, %65 : vector<384x2xf32>
    %67 = vector.shape_cast %66 : vector<384x2xf32> to vector<16x24x2xf32>
    %c0_45 = arith.constant 0 : index
    %c0_46 = arith.constant 0 : index
    %68 = vector.load %arg6[%c0_45, %c0_46] : memref<1x2xf32, #tpu.memory_space<vmem>>, vector<1x2xf32>
    %69 = vector.shape_cast %68 : vector<1x2xf32> to vector<1x1x2xf32>
    %70 = vector.broadcast %69 : vector<1x1x2xf32> to vector<16x24x2xf32>
    %71 = arith.addf %67, %70 : vector<16x24x2xf32>
    %cst_47 = arith.constant 0.000000e+00 : f32
    %72 = vector.broadcast %cst_47 : f32 to vector<16x24x2xf32>
    %73 = arith.maximumf %71, %72 : vector<16x24x2xf32>
    %cst_48 = arith.constant 0.000000e+00 : f32
    %74 = vector.shape_cast %10 : vector<16x24x1xi1> to vector<16x24x1xi1>
    %75 = vector.broadcast %74 : vector<16x24x1xi1> to vector<16x24x2xi1>
    %76 = vector.broadcast %cst_48 : f32 to vector<16x24x2xf32>
    %77 = arith.select %75, %73, %76 : vector<16x24x2xi1>, vector<16x24x2xf32>
    %78 = vector.extract_strided_slice %77 {offsets = [0, 0, 0], sizes = [16, 16, 2], strides = [1, 1, 1]} : vector<16x24x2xf32> to vector<16x16x2xf32>
    %79 = arith.truncf %78 : vector<16x16x2xf32> to vector<16x16x2xbf16>
    %c0_49 = arith.constant 0 : index
    %c0_50 = arith.constant 0 : index
    %c0_51 = arith.constant 0 : index
    %c4 = arith.constant 4 : index
    %80 = vector.load %arg8[%c0_49, %c0_50, %c0_51, %c4] : memref<1x16x16x8xbf16, #tpu.memory_space<vmem>>, vector<1x16x16x2xbf16>
    %81 = vector.shape_cast %80 : vector<1x16x16x2xbf16> to vector<16x16x2xbf16>
    %82 = vector.shape_cast %79 : vector<16x16x2xbf16> to vector<1x16x16x2xbf16>
    tpu.vector_store %arg8[%c0_49, %c0_50, %c0_51, %c4], %82 {strides = array<i32>} : memref<1x16x16x8xbf16, #tpu.memory_space<vmem>>, vector<1x16x16x2xbf16>,
    %83 = vector.shape_cast %77 : vector<16x24x2xf32> to vector<384x2xf32>
    %84 = arith.truncf %83 : vector<384x2xf32> to vector<384x2xbf16>
    %c32_52 = arith.constant 32 : index
    %c0_53 = arith.constant 0 : index
    %85 = vector.load %arg11[%c32_52, %c0_53] : memref<448x2xbf16, #tpu.memory_space<vmem>>, vector<384x2xbf16>
    tpu.vector_store %arg11[%c32_52, %c0_53], %84 {strides = array<i32>} : memref<448x2xbf16, #tpu.memory_space<vmem>>, vector<384x2xbf16>,
    %c7_54 = arith.constant 7 : index
    %c0_55 = arith.constant 0 : index
    %86 = vector.load %arg11[%c7_54, %c0_55] : memref<448x2xbf16, #tpu.memory_space<vmem>>, vector<392x2xbf16>
    %c0_56 = arith.constant 0 : index
    %c0_57 = arith.constant 0 : index
    %c0_58 = arith.constant 0 : index
    %87 = vector.load %arg4[%c0_56, %c0_57, %c0_58] : memref<3x2x6xbf16, #tpu.memory_space<vmem>>, vector<1x2x6xbf16>
    %88 = vector.shape_cast %87 : vector<1x2x6xbf16> to vector<2x6xbf16>
    %cst_59 = arith.constant dense<0.000000e+00> : vector<392x6xf32>
    %89 = tpu.matmul %86, %88, %cst_59 {dimension_numbers = #tpu.dot_dimension_numbers<[1], [0], [0], [1], [0, 0, 1, 1], [], []>} : vector<392x2xbf16>, vector<2x6xbf16>, vector<392x6xf32> -> vector<392x6xf32>
    %90 = vector.extract_strided_slice %89 {offsets = [0, 0], sizes = [384, 2], strides = [1, 1]} : vector<392x6xf32> to vector<384x2xf32>
    %91 = vector.extract_strided_slice %89 {offsets = [1, 2], sizes = [384, 2], strides = [1, 1]} : vector<392x6xf32> to vector<384x2xf32>
    %92 = arith.addf %90, %91 : vector<384x2xf32>
    %93 = vector.extract_strided_slice %89 {offsets = [2, 4], sizes = [384, 2], strides = [1, 1]} : vector<392x6xf32> to vector<384x2xf32>
    %94 = arith.addf %92, %93 : vector<384x2xf32>
    %c31_60 = arith.constant 31 : index
    %c0_61 = arith.constant 0 : index
    %95 = vector.load %arg11[%c31_60, %c0_61] : memref<448x2xbf16, #tpu.memory_space<vmem>>, vector<392x2xbf16>
    %c1_62 = arith.constant 1 : index
    %c0_63 = arith.constant 0 : index
    %c0_64 = arith.constant 0 : index
    %96 = vector.load %arg4[%c1_62, %c0_63, %c0_64] : memref<3x2x6xbf16, #tpu.memory_space<vmem>>, vector<1x2x6xbf16>
    %97 = vector.shape_cast %96 : vector<1x2x6xbf16> to vector<2x6xbf16>
    %cst_65 = arith.constant dense<0.000000e+00> : vector<392x6xf32>
    %98 = tpu.matmul %95, %97, %cst_65 {dimension_numbers = #tpu.dot_dimension_numbers<[1], [0], [0], [1], [0, 0, 1, 1], [], []>} : vector<392x2xbf16>, vector<2x6xbf16>, vector<392x6xf32> -> vector<392x6xf32>
    %99 = vector.extract_strided_slice %98 {offsets = [0, 0], sizes = [384, 2], strides = [1, 1]} : vector<392x6xf32> to vector<384x2xf32>
    %100 = arith.addf %94, %99 : vector<384x2xf32>
    %101 = vector.extract_strided_slice %98 {offsets = [1, 2], sizes = [384, 2], strides = [1, 1]} : vector<392x6xf32> to vector<384x2xf32>
    %102 = arith.addf %100, %101 : vector<384x2xf32>
    %103 = vector.extract_strided_slice %98 {offsets = [2, 4], sizes = [384, 2], strides = [1, 1]} : vector<392x6xf32> to vector<384x2xf32>
    %104 = arith.addf %102, %103 : vector<384x2xf32>
    %c55_66 = arith.constant 55 : index
    %c0_67 = arith.constant 0 : index
    %105 = vector.load %arg11[%c55_66, %c0_67] : memref<448x2xbf16, #tpu.memory_space<vmem>>, vector<392x2xbf16>
    %c2_68 = arith.constant 2 : index
    %c0_69 = arith.constant 0 : index
    %c0_70 = arith.constant 0 : index
    %106 = vector.load %arg4[%c2_68, %c0_69, %c0_70] : memref<3x2x6xbf16, #tpu.memory_space<vmem>>, vector<1x2x6xbf16>
    %107 = vector.shape_cast %106 : vector<1x2x6xbf16> to vector<2x6xbf16>
    %cst_71 = arith.constant dense<0.000000e+00> : vector<392x6xf32>
    %108 = tpu.matmul %105, %107, %cst_71 {dimension_numbers = #tpu.dot_dimension_numbers<[1], [0], [0], [1], [0, 0, 1, 1], [], []>} : vector<392x2xbf16>, vector<2x6xbf16>, vector<392x6xf32> -> vector<392x6xf32>
    %109 = vector.extract_strided_slice %108 {offsets = [0, 0], sizes = [384, 2], strides = [1, 1]} : vector<392x6xf32> to vector<384x2xf32>
    %110 = arith.addf %104, %109 : vector<384x2xf32>
    %111 = vector.extract_strided_slice %108 {offsets = [1, 2], sizes = [384, 2], strides = [1, 1]} : vector<392x6xf32> to vector<384x2xf32>
    %112 = arith.addf %110, %111 : vector<384x2xf32>
    %113 = vector.extract_strided_slice %108 {offsets = [2, 4], sizes = [384, 2], strides = [1, 1]} : vector<392x6xf32> to vector<384x2xf32>
    %114 = arith.addf %112, %113 : vector<384x2xf32>
    %115 = vector.shape_cast %114 : vector<384x2xf32> to vector<16x24x2xf32>
    %c0_72 = arith.constant 0 : index
    %c0_73 = arith.constant 0 : index
    %116 = vector.load %arg7[%c0_72, %c0_73] : memref<1x2xf32, #tpu.memory_space<vmem>>, vector<1x2xf32>
    %117 = vector.shape_cast %116 : vector<1x2xf32> to vector<1x1x2xf32>
    %118 = vector.broadcast %117 : vector<1x1x2xf32> to vector<16x24x2xf32>
    %119 = arith.addf %115, %118 : vector<16x24x2xf32>
    %cst_74 = arith.constant 0.000000e+00 : f32
    %120 = vector.broadcast %cst_74 : f32 to vector<16x24x2xf32>
    %121 = arith.maximumf %119, %120 : vector<16x24x2xf32>
    %cst_75 = arith.constant 0.000000e+00 : f32
    %122 = vector.shape_cast %10 : vector<16x24x1xi1> to vector<16x24x1xi1>
    %123 = vector.broadcast %122 : vector<16x24x1xi1> to vector<16x24x2xi1>
    %124 = vector.broadcast %cst_75 : f32 to vector<16x24x2xf32>
    %125 = arith.select %123, %121, %124 : vector<16x24x2xi1>, vector<16x24x2xf32>
    %126 = vector.extract_strided_slice %125 {offsets = [0, 0, 0], sizes = [16, 16, 2], strides = [1, 1, 1]} : vector<16x24x2xf32> to vector<16x16x2xf32>
    %127 = arith.truncf %126 : vector<16x16x2xf32> to vector<16x16x2xbf16>
    %c0_76 = arith.constant 0 : index
    %c0_77 = arith.constant 0 : index
    %c0_78 = arith.constant 0 : index
    %c6 = arith.constant 6 : index
    %128 = vector.load %arg8[%c0_76, %c0_77, %c0_78, %c6] : memref<1x16x16x8xbf16, #tpu.memory_space<vmem>>, vector<1x16x16x2xbf16>
    %129 = vector.shape_cast %128 : vector<1x16x16x2xbf16> to vector<16x16x2xbf16>
    %130 = vector.shape_cast %127 : vector<16x16x2xbf16> to vector<1x16x16x2xbf16>
    tpu.vector_store %arg8[%c0_76, %c0_77, %c0_78, %c6], %130 {strides = array<i32>} : memref<1x16x16x8xbf16, #tpu.memory_space<vmem>>, vector<1x16x16x2xbf16>,
    return
  }
  func.func @transform_0(%arg0: i32) -> (i32, i32, i32, i32) {
    %c0_i32 = arith.constant 0 : i32
    %c0_i32_0 = arith.constant 0 : i32
    %c0_i32_1 = arith.constant 0 : i32
    %c0_i32_2 = arith.constant 0 : i32
    return %arg0, %c0_i32, %c0_i32_0, %c0_i32_1 : i32, i32, i32, i32
  }
  func.func @transform_1(%arg0: i32) -> (i32, i32) {
    %c0_i32 = arith.constant 0 : i32
    %c0_i32_0 = arith.constant 0 : i32
    %c0_i32_1 = arith.constant 0 : i32
    return %c0_i32, %c0_i32_0 : i32, i32
  }
  func.func @transform_2(%arg0: i32) -> (i32, i32, i32) {
    %c0_i32 = arith.constant 0 : i32
    %c0_i32_0 = arith.constant 0 : i32
    %c0_i32_1 = arith.constant 0 : i32
    %c0_i32_2 = arith.constant 0 : i32
    return %c0_i32, %c0_i32_0, %c0_i32_1 : i32, i32, i32
  }
  func.func @transform_3(%arg0: i32) -> (i32, i32, i32) {
    %c0_i32 = arith.constant 0 : i32
    %c0_i32_0 = arith.constant 0 : i32
    %c0_i32_1 = arith.constant 0 : i32
    %c0_i32_2 = arith.constant 0 : i32
    return %c0_i32, %c0_i32_0, %c0_i32_1 : i32, i32, i32
  }
  func.func @transform_4(%arg0: i32) -> (i32, i32) {
    %c0_i32 = arith.constant 0 : i32
    %c0_i32_0 = arith.constant 0 : i32
    %c0_i32_1 = arith.constant 0 : i32
    return %c0_i32, %c0_i32_0 : i32, i32
  }
  func.func @transform_5(%arg0: i32) -> (i32, i32) {
    %c0_i32 = arith.constant 0 : i32
    %c0_i32_0 = arith.constant 0 : i32
    %c0_i32_1 = arith.constant 0 : i32
    return %c0_i32, %c0_i32_0 : i32, i32
  }
  func.func @transform_6(%arg0: i32) -> (i32, i32) {
    %c0_i32 = arith.constant 0 : i32
    %c0_i32_0 = arith.constant 0 : i32
    %c0_i32_1 = arith.constant 0 : i32
    return %c0_i32, %c0_i32_0 : i32, i32
  }
  func.func @transform_7(%arg0: i32) -> (i32, i32, i32, i32) {
    %c0_i32 = arith.constant 0 : i32
    %c0_i32_0 = arith.constant 0 : i32
    %c0_i32_1 = arith.constant 0 : i32
    %c0_i32_2 = arith.constant 0 : i32
    return %arg0, %c0_i32, %c0_i32_0, %c0_i32_1 : i32, i32, i32, i32
  }
}

</mosaic_0001>

<bundles_post_ra>
// kernel: tpu_custom_call.1
= control target key start
LH: loop header
LB: loop body
LE: loop exit
PB: predicated region body
PF: predicated region fallthrough
CT: control target
= control target key end

     0   :  { %s10073_s24 = smov 0   ;;  %s14517_s0 = inlined_call_operand.vmem [shape: f32[2,16,16,4], index: 0, kind: input, shape index: {}]   ;;  %s14518_s1 = inlined_call_operand.vmem [shape: bf16[4,4], index: 1, kind: input, shape index: {}]   ;;  %s14519_s2 = inlined_call_operand.vmem [shape: bf16[3,4,6], index: 2, kind: input, shape index: {}]   ;;  %s14520_s3 = inlined_call_operand.vmem [shape: bf16[3,2,6], index: 3, kind: input, shape index: {}]   ;;  %s14521_s4 = inlined_call_operand.vmem [shape: f32[1,4], index: 4, kind: input, shape index: {}]   ;;  %s14522_s5 = inlined_call_operand.vmem [shape: f32[1,2], index: 5, kind: input, shape index: {}]   ;;  %s14523_s6 = inlined_call_operand.vmem [shape: f32[1,2], index: 6, kind: input, shape index: {}]   ;;  %s14524_s7 = inlined_call_operand.vmem [shape: bf16[2,16,16,8], index: 7, kind: output, shape index: {}]  }
   0x1 LB: > { %s8932_s25 = sadd.s32 4294967295, %s10025_s24   ;;  %p8936_p0 = scmp.ge.s32.totalorder %s10025_s24, 1  ;;  %s10025_s24 = sphi %s10073_s24, %s17_s24  }
   0x2   : > { %p237_p1 = scmp.lt.s32.totalorder %s10025_s24, 3 }
   0x4   : > { %p238_p2 = pnand %p8936_p0, %p237_p1 }
   0x6   : > { %241 = sbr.rel (%p238_p2) target bundleno = 1952 (0x7a0), region = 48 }
   0xb   : > { %v465_v0 = vld [vmem:[%s14518_s1] sm:$0x3]  ;;  %vm659_vm0 = vcmask 1041408   ;;  %p269_p3 = scmp.lt.s32.totalorder %s8932_s25, 1  ;;  %vm280_vm1 = vcmask 27648   ;;  %v10027_v2 = vmov 0  }
   0xc   : > { %v661_v1 = vsel %vm659_vm0, %v465_v0, 0  ;;  %298 = vst.msk [vmem:[#allocation2 + $0x8] sm:$0xf] %vm280_vm1, %v10027_v2  ;;  %v1124_v3 = vld [vmem:[%s14519_s2] sm:$0x3]  ;;  %vm586_vm2 = vcmask 31744  }
   0xd   : > { %670 = vmatpush.bf16.msra.mxu0 %v661_v1  ;;  %s15273_s25 = smov (!%p269_p3, %s8932_s25), 1  ;;  %9993 = vmatpush.bf16.msra.mxu3 %v661_v1  ;;  %281 = vst.msk [vmem:[#allocation3] sm:$0xf] %vm280_vm1, %v10027_v2  ;;  %v1551_v4 = vsel %vm659_vm0, %v1124_v3, 0  ;;  %vm1250_vm3 = vsmask.f32 4352 }
   0xe   : > { %s9817_s30 = sshll.u32 %s15273_s25, 8  ;;  %282 = vst.msk [vmem:[#allocation3 + $0x4] sm:$0xf] %vm280_vm1, %v10027_v2  ;;  %1560 = vmatpush.bf16.msra.mxu1 %v1551_v4  ;;  %v5344_v56 = vld [vmem:[%s14520_s3] sm:$0x1]  ;;  %vm5770_vm4 = vcmask 1040384  }
   0xf   : > { %s10101_s10 = scalar_lea.vmem %s14517_s0, %s9817_s30  ;;  %283 = vst.msk [vmem:[#allocation3 + $0x8] sm:$0xf] %vm280_vm1, %v10027_v2  ;;  %v10028_v57 = vmov 0.0|0.0   ;;  %v5772_v58 = vsel %vm5770_vm4, %v5344_v56, 0  ;;  %v9186_v60 = vld [vmem:[%s14519_s2 + $0x2] sm:$0x3] }
  0x10   : > { %v321_v5 = vld [vmem:[%s10101_s10] sm:$0xff]  ;;  %v322_v6 = vld [vmem:[%s10101_s10 + $0x8] sm:$0xff]  ;;  %v323_v7 = vld [vmem:[%s10101_s10 + $0x10] sm:$0xff]  ;;  %284 = vst.msk [vmem:[#allocation3 + $0xc] sm:$0xf] %vm280_vm1, %v10027_v2  ;;  %v10219_v61 = vsel %vm659_vm0, %v9186_v60, 0 }
  0x11   : > { %9994 = vmatpush.bf16.msrb.mxu3 %v1551_v4  ;;  %v353_v8 = vpack.c.bf16 %v321_v5, %v321_v5  ;;  %v354_v9 = vpack.c.bf16 %v322_v6, %v322_v6  ;;  %v355_v10 = vpack.c.bf16 %v323_v7, %v323_v7  ;;  %285 = vst.msk [vmem:[#allocation3 + $0xd0] sm:$0xf] %vm280_vm1, %v10027_v2  ;;  %v324_v26 = vld [vmem:[%s10101_s10 + $0x18] sm:$0xff]  ;;  %v325_v28 = vld [vmem:[%s10101_s10 + $0x20] sm:$0xff]  ;;  %v326_v29 = vld [vmem:[%s10101_s10 + $0x28] sm:$0xff]  ;;  %s9818_s17 = sshll.u32 %s15273_s25, 7 }
  0x12   : > { %286 = vst.msk [vmem:[#allocation3 + $0xd4] sm:$0xf] %vm280_vm1, %v10027_v2  ;;  %v356_v30 = vpack.c.bf16 %v324_v26, %v324_v26  ;;  %v357_v31 = vpack.c.bf16 %v325_v28, %v325_v28  ;;  %v358_v32 = vpack.c.bf16 %v326_v29, %v326_v29  ;;  %v327_v34 = vld [vmem:[%s10101_s10 + $0x30] sm:$0xff]  ;;  %v328_v37 = vld [vmem:[%s10101_s10 + $0x38] sm:$0xff]  ;;  %v329_v40 = vld [vmem:[%s10101_s10 + $0x40] sm:$0xff]  ;;  %5781 = vmatpush.bf16.msrb.mxu0 %v5772_v58  ;;  %s10242_s20 = scalar_lea.vmem %s14524_s7, %s9818_s17  ;;  %vm1735_vm5 = vcmask 1046528  }
  0x13   : > { %385 = vst.msk [vmem:[#allocation2] sm:$0xf] %vm280_vm1, %v353_v8  ;;  %v359_v35 = vpack.c.bf16 %v327_v34, %v327_v34  ;;  %v360_v38 = vpack.c.bf16 %v328_v37, %v328_v37  ;;  %v330_v41 = vld [vmem:[%s10101_s10 + $0x48] sm:$0xff]  ;;  %v361_v42 = vpack.c.bf16 %v329_v40, %v329_v40  ;;  %v331_v45 = vld [vmem:[%s10101_s10 + $0x50] sm:$0xff]  ;;  %v332_v48 = vld [vmem:[%s10101_s10 + $0x58] sm:$0xff]  ;;  %2801 = vmatpush.bf16.msra.mxu2 %v10219_v61  ;;  %s10029_s21 = smov 126  }
  0x14   : > { %386 = vst.msk [vmem:[#allocation2 + $0x4] sm:$0xf] %vm280_vm1, %v354_v9  ;;  %v9063_v11 = vld [vmem:[#allocation3] sm:$0x8]  ;;  %v362_v43 = vpack.c.bf16 %v330_v41, %v330_v41  ;;  %v363_v46 = vpack.c.bf16 %v331_v45, %v331_v45  ;;  %v364_v49 = vpack.c.bf16 %v332_v48, %v332_v48  ;;  %v334_v52 = vld [vmem:[%s10101_s10 + $0x68] sm:$0xff]  ;;  %v335_v59 = vld [vmem:[%s10101_s10 + $0x70] sm:$0xff] }
  0x15   : > { %387 = vst.msk [vmem:[#allocation2 + $0xc] sm:$0xf] %vm280_vm1, %v355_v10  ;;  %v9843_v12 = vld [vmem:[#allocation3] sm:$0xf0]  ;;  %v366_v54 = vpack.c.bf16 %v334_v52, %v334_v52  ;;  %v367_v62 = vpack.c.bf16 %v335_v59, %v335_v59  ;;  %v10226_v63 = vld [vmem:[%s14521_s4] ss:$0 sm:$0xff] }
  0x16   : > { %287 = vst.msk [vmem:[#allocation3 + $0xd8] sm:$0xf] %vm280_vm1, %v10027_v2  ;;  %v9064_v13 = vor.u32 %v9843_v12, %v9063_v11  ;;  %v333_v51 = vld [vmem:[%s10101_s10 + $0x60] sm:$0xff]  ;;  %v336_v9 = vld [vmem:[%s10101_s10 + $0x78] sm:$0xff]  ;;  %v338_v34 = vld [vmem:[%s10101_s10 + $0x88] sm:$0xff]  ;;  %vm2025_vm6 = vcmask 1045504  }
  0x17   : > { %288 = vst.msk [vmem:[#allocation3 + $0xdc] sm:$0xf] %vm280_vm1, %v10027_v2  ;;  %v9844_v14 = vld [vmem:[#allocation3 + $0x8] sm:$0xff]  ;;  %v365_v53 = vpack.c.bf16 %v333_v51, %v333_v51  ;;  %v368_v10 = vpack.c.bf16 %v336_v9, %v336_v9  ;;  %s10030_s22 = smov 124   ;;  %vm289_vm7 = vcmask 11264   ;;  %vm5694_vm8 = vcmask 15360  }
  0x18   : > { %299 = vst.msk [vmem:[#allocation2 + $0x14] sm:$0xf] %vm280_vm1, %v10027_v2  ;;  %v1252_v15 = vshrl.u32 %v9064_v13, 16  ;;  %v1255_v16 = vshll.u32 %v9064_v13, 16  ;;  %v1260_v17 = vshrl.u32 %v9844_v14, 16  ;;  %v1263_v18 = vshll.u32 %v9844_v14, 16 }
  0x19   : > { %300 = vst.msk [vmem:[#allocation2 + $0x20] sm:$0xf] %vm280_vm1, %v10027_v2  ;;  %s10031_s11 = smov 4   ;;  %vm5197_vm9 = vcmask 44064   ;;  %s10032_s23 = smov 6   ;;  %vm8844_vm10 = vcmask 60464  }
  0x1a   : > { %301 = vst.msk [vmem:[#allocation2 + $0x2c] sm:$0xf] %vm280_vm1, %v10027_v2  ;;  %v1254_v19 = vrot.slane %v1252_v15, 3  ;;  %v1257_v20 = vrot.slane %v1255_v16, 4  ;;  %v1262_v22 = vrot.slane %v1260_v17, 3  ;;  %v1265_v24 = vrot.slane %v1263_v18, 4 }
  0x1b   : > { %v9819_v21 = vld [vmem:[#allocation2] sm:$0xff]  ;;  %302 = vst.msk [vmem:[#allocation2 + $0x38] sm:$0xf] %vm280_vm1, %v10027_v2  ;;  %v9189_v15 = vld [vmem:[#allocation3 + $0xc] sm:$0x8] }
  0x1c   : > { %303 = vst.msk [vmem:[#allocation2 + $0x44] sm:$0xf] %vm280_vm1, %v10027_v2  ;;  %v1258_v23 = vor.u32 %v1257_v20, %v1254_v19  ;;  %9037 = vmatmul.msk.bf16.vlgmr.msra.gmra.mxu0 %vm586_vm2, %v9819_v21  ;;  %v10136_v25 = vor.u32 %v1265_v24, %v1262_v22  ;;  %v9820_v33 = vld [vmem:[#allocation2 + $0x8] sm:$0xff] }
  0x1d   : > { %304 = vst.msk [vmem:[#allocation2 + $0x50] sm:$0xf] %vm280_vm1, %v10027_v2 }
  0x1e   : > { %305 = vst.msk [vmem:[#allocation2 + $0x5c] sm:$0xf] %vm280_vm1, %v10027_v2  ;;  %v1267_v27 = vsel %vm1250_vm3, %v1258_v23, %v10136_v25 }
  0x1f   : > { %306 = vst.msk [vmem:[#allocation2 + $0x68] sm:$0xf] %vm280_vm1, %v10027_v2  ;;  %9161 = vmatmul.msk.bf16.vlgmr.msra.gmra.mxu1 %vm586_vm2, %v1267_v27 }
  0x20   : > { %307 = vst.msk [vmem:[#allocation2 + $0x74] sm:$0xf] %vm280_vm1, %v10027_v2 }
  0x21   : > { %308 = vst.msk [vmem:[#allocation2 + $0x80] sm:$0xf] %vm280_vm1, %v10027_v2 }
  0x22   : > { %309 = vst.msk [vmem:[#allocation2 + $0x8c] sm:$0xf] %vm280_vm1, %v10027_v2 }
  0x23   : > { %310 = vst.msk [vmem:[#allocation2 + $0x98] sm:$0xf] %vm280_vm1, %v10027_v2 }
  0x24   : > { %311 = vst.msk [vmem:[#allocation2 + $0xa4] sm:$0xf] %vm280_vm1, %v10027_v2 }
  0x25   : > { %312 = vst.msk [vmem:[#allocation2 + $0xb0] sm:$0xf] %vm280_vm1, %v10027_v2 }
  0x26   : > { %313 = vst.msk [vmem:[#allocation2 + $0xbc] sm:$0xf] %vm280_vm1, %v10027_v2 }
  0x27   : > { %388 = vst.msk [vmem:[#allocation2 + $0x10] sm:$0xf] %vm280_vm1, %v356_v30 }
  0x28   : > { %389 = vst.msk [vmem:[#allocation2 + $0x18] sm:$0xf] %vm280_vm1, %v357_v31 }
  0x29   : > { %390 = vst.msk [vmem:[#allocation2 + $0x1c] sm:$0xf] %vm280_vm1, %v358_v32 }
  0x2a   : > { %391 = vst.msk [vmem:[#allocation2 + $0x24] sm:$0xf] %vm280_vm1, %v359_v35 }
  0x2b   : > { %392 = vst.msk [vmem:[#allocation2 + $0x28] sm:$0xf] %vm280_vm1, %v360_v38  ;;  %v370_v38 = vpack.c.bf16 %v338_v34, %v338_v34 }
  0x2c   : > { %9038 = vmatmul.msk.bf16.gmra.mxu0 %vm586_vm2, %v9820_v33  ;;  %393 = vst.msk [vmem:[#allocation2 + $0x30] sm:$0xf] %vm280_vm1, %v361_v42  ;;  %v337_v33 = vld [vmem:[%s10101_s10 + $0x80] sm:$0xff] }
  0x2d   : > { %394 = vst.msk [vmem:[#allocation2 + $0x34] sm:$0xf] %vm280_vm1, %v362_v43  ;;  %v369_v37 = vpack.c.bf16 %v337_v33, %v337_v33 }
  0x2e   : > { %v9821_v36 = vld [vmem:[#allocation2 + $0x10] sm:$0xff]  ;;  %395 = vst.msk [vmem:[#allocation2 + $0x3c] sm:$0xf] %vm280_vm1, %v363_v46 }
  0x2f   : > { %396 = vst.msk [vmem:[#allocation2 + $0x40] sm:$0xf] %vm280_vm1, %v364_v49 }
  0x30   : > { %v9822_v39 = vld [vmem:[#allocation2 + $0x18] sm:$0xff]  ;;  %397 = vst.msk [vmem:[#allocation2 + $0x48] sm:$0xf] %vm280_vm1, %v365_v53 }
  0x31   : > { %v9823_v44 = vld [vmem:[#allocation2 + $0x20] sm:$0xff]  ;;  %398 = vst.msk [vmem:[#allocation2 + $0x4c] sm:$0xf] %vm280_vm1, %v366_v54 }
  0x32   : > { %v9824_v47 = vld [vmem:[#allocation2 + $0x28] sm:$0xff]  ;;  %1028 = vst.msk [vmem:[#allocation3 + $0x18] sm:$0xf] %vm280_vm1, %v10028_v57 }
  0x33   : > { %1031 = vst.msk [vmem:[#allocation3 + $0x24] sm:$0xf] %vm280_vm1, %v10028_v57 }
  0x34   : > { %v9825_v50 = vld [vmem:[#allocation2 + $0x30] sm:$0xff]  ;;  %1034 = vst.msk [vmem:[#allocation3 + $0x30] sm:$0xf] %vm280_vm1, %v10028_v57 }
  0x35   : > { %v9826_v55 = vld [vmem:[#allocation2 + $0x38] sm:$0xff]  ;;  %1037 = vst.msk [vmem:[#allocation3 + $0x3c] sm:$0xf] %vm280_vm1, %v10028_v57 }
  0x36   : > { %1040 = vst.msk [vmem:[#allocation3 + $0x48] sm:$0xf] %vm280_vm1, %v10028_v57  ;;  %v9827_v0 = vld [vmem:[#allocation2 + $0x40] sm:$0xff] }
  0x37   : > { %1043 = vst.msk [vmem:[#allocation3 + $0x54] sm:$0xf] %vm280_vm1, %v10028_v57 }
  0x38   : > { %1046 = vst.msk [vmem:[#allocation3 + $0x60] sm:$0xf] %vm280_vm1, %v10028_v57  ;;  %v9828_v17 = vld [vmem:[#allocation2 + $0x48] sm:$0xff] }
  0x39   : > { %1049 = vst.msk [vmem:[#allocation3 + $0x6c] sm:$0xf] %vm280_vm1, %v10028_v57 }
  0x3a   : > { %1052 = vst.msk [vmem:[#allocation3 + $0x78] sm:$0xf] %vm280_vm1, %v10028_v57 }
  0x3b   : > { %1055 = vst.msk [vmem:[#allocation3 + $0x84] sm:$0xf] %vm280_vm1, %v10028_v57 }
  0x3c   : > { %9039 = vmatmul.msk.bf16.gmra.mxu0 %vm586_vm2, %v9821_v36  ;;  %1058 = vst.msk [vmem:[#allocation3 + $0x90] sm:$0xf] %vm280_vm1, %v10028_v57 }
  0x3d   : > { %1061 = vst.msk [vmem:[#allocation3 + $0x9c] sm:$0xf] %vm280_vm1, %v10028_v57 }
  0x3e   : > { %1064 = vst.msk [vmem:[#allocation3 + $0xa8] sm:$0xf] %vm280_vm1, %v10028_v57 }
  0x3f   : > { %1067 = vst.msk [vmem:[#allocation3 + $0xb4] sm:$0xf] %vm280_vm1, %v10028_v57 }
  0x40   : > { %1070 = vst.msk [vmem:[#allocation3 + $0xc0] sm:$0xf] %vm280_vm1, %v10028_v57 }
  0x41   : > { %1073 = vst.msk [vmem:[#allocation3 + $0xcc] sm:$0xf] %vm280_vm1, %v10028_v57 }
  0x42   : > { %399 = vst.msk [vmem:[#allocation2 + $0x54] sm:$0xf] %vm280_vm1, %v367_v62 }
  0x43   : > { %400 = vst.msk [vmem:[#allocation2 + $0x58] sm:$0xf] %vm280_vm1, %v368_v10 }
  0x44   : > { %401 = vst.msk [vmem:[#allocation2 + $0x60] sm:$0xf] %vm280_vm1, %v369_v37 }
  0x45   : > { %402 = vst.msk [vmem:[#allocation2 + $0x64] sm:$0xf] %vm280_vm1, %v370_v38 }
  0x46   : > { %290 = vst.msk [vmem:[#allocation4] sm:$0xf] %vm289_vm7, %v10027_v2 }
  0x47   : > { %291 = vst.msk [vmem:[#allocation4 + $0x4] sm:$0xf] %vm289_vm7, %v10027_v2 }
  0x48   : > { %292 = vst.msk [vmem:[#allocation4 + $0x8] sm:$0xf] %vm289_vm7, %v10027_v2 }
  0x49   : > { %v9829_v49 = vld [vmem:[#allocation2 + $0x50] sm:$0xff]  ;;  %293 = vst.msk [vmem:[#allocation4 + $0xc] sm:$0xf] %vm289_vm7, %v10027_v2 }
  0x4a   : > { %294 = vst.msk [vmem:[#allocation4 + $0xd0] sm:$0xf] %vm289_vm7, %v10027_v2 }
  0x4b   : > { %295 = vst.msk [vmem:[#allocation4 + $0xd4] sm:$0xf] %vm289_vm7, %v10027_v2 }
  0x4c   : > { %9040 = vmatmul.msk.bf16.gmra.mxu0 %vm586_vm2, %v9822_v39  ;;  %296 = vst.msk [vmem:[#allocation4 + $0xd8] sm:$0xf] %vm289_vm7, %v10027_v2 }
  0x4d   : > { %297 = vst.msk [vmem:[#allocation4 + $0xdc] sm:$0xf] %vm289_vm7, %v10027_v2 }
  0x4e   : > { %5248 = vst.msk [vmem:[#allocation4 + $0x18] sm:$0xf] %vm289_vm7, %v10028_v57 }
  0x4f   : > { %5251 = vst.msk [vmem:[#allocation4 + $0x24] sm:$0xf] %vm289_vm7, %v10028_v57 }
  0x50   : > { %5254 = vst.msk [vmem:[#allocation4 + $0x30] sm:$0xf] %vm289_vm7, %v10028_v57 }
  0x51   : > { %5257 = vst.msk [vmem:[#allocation4 + $0x3c] sm:$0xf] %vm289_vm7, %v10028_v57 }
  0x52   : > { %5260 = vst.msk [vmem:[#allocation4 + $0x48] sm:$0xf] %vm289_vm7, %v10028_v57 }
  0x53   : > { %5263 = vst.msk [vmem:[#allocation4 + $0x54] sm:$0xf] %vm289_vm7, %v10028_v57 }
  0x54   : > { %5266 = vst.msk [vmem:[#allocation4 + $0x60] sm:$0xf] %vm289_vm7, %v10028_v57 }
  0x55   : > { %5269 = vst.msk [vmem:[#allocation4 + $0x6c] sm:$0xf] %vm289_vm7, %v10028_v57 }
  0x56   : > { %5272 = vst.msk [vmem:[#allocation4 + $0x78] sm:$0xf] %vm289_vm7, %v10028_v57 }
  0x57   : > { %5275 = vst.msk [vmem:[#allocation4 + $0x84] sm:$0xf] %vm289_vm7, %v10028_v57 }
  0x58   : > { %5278 = vst.msk [vmem:[#allocation4 + $0x90] sm:$0xf] %vm289_vm7, %v10028_v57 }
  0x59   : > { %5281 = vst.msk [vmem:[#allocation4 + $0x9c] sm:$0xf] %vm289_vm7, %v10028_v57 }
  0x5a   : > { %5284 = vst.msk [vmem:[#allocation4 + $0xa8] sm:$0xf] %vm289_vm7, %v10028_v57 }
  0x5b   : > { %5287 = vst.msk [vmem:[#allocation4 + $0xb4] sm:$0xf] %vm289_vm7, %v10028_v57 }
  0x5c   : > { %9041 = vmatmul.msk.bf16.gmra.mxu0 %vm586_vm2, %v9823_v44  ;;  %5290 = vst.msk [vmem:[#allocation4 + $0xc0] sm:$0xf] %vm289_vm7, %v10028_v57 }
  0x5d   : > { %5293 = vst.msk [vmem:[#allocation4 + $0xcc] sm:$0xf] %vm289_vm7, %v10028_v57 }
  0x6c   : > { %9042 = vmatmul.msk.bf16.gmra.mxu0 %vm586_vm2, %v9824_v47 }
  0x7c   : > { %9043 = vmatmul.msk.bf16.gmra.mxu0 %vm586_vm2, %v9825_v50 }
  0x8c   : > { %9044 = vmatmul.msk.bf16.gmra.mxu0 %vm586_vm2, %v9826_v55 }
  0x99   : > { %v672_v1 = vpop.f32.mrf.mxu0 }
  0x9a   : > { %v796_v3 = vadd.f32 %v10226_v63, %v672_v1 }
  0x9c   : > { %v844_v4 = vmax.f32 %v796_v3, 0.0  ;;  %9045 = vmatmul.msk.bf16.gmra.mxu0 %vm586_vm2, %v9827_v0  ;;  %v10244_v5 = vpop.f32.mrf.mxu1  ;;  %v339_v0 = vld [vmem:[%s10101_s10 + $0x90] sm:$0xff] }
  0x9d   : > { %v1736_v12 = vrot.slane %v10244_v5, 1  ;;  %v2026_v53 = vrot.slane %v10244_v5, 2  ;;  %v371_v1 = vpack.c.bf16 %v339_v0, %v339_v0 }
  0x9e   : > { %v946_v6 = vpack.c.bf16 %v844_v4, %v844_v4 }
  0x9f   : > { %403 = vst.msk [vmem:[#allocation2 + $0x6c] sm:$0xf] %vm280_vm1, %v371_v1 }
  0xa0   : > { %978 = vst.msk [vmem:[%s10242_s20] sm:$0xf] %vm280_vm1, %v946_v6 }
  0xa1   : > { %1026 = vst.msk [vmem:[#allocation3 + $0x10] sm:$0xf] %vm280_vm1, %v946_v6  ;;  %v674_v7 = vpop.f32.mrf.mxu0 }
  0xa2   : > { %v797_v8 = vadd.f32 %v10226_v63, %v674_v7 }
  0xa4   : > { %v845_v11 = vmax.f32 %v797_v8, 0.0  ;;  %v10252_v13 = vpop.f32.mrf.mxu1  ;;  %v9830_v8 = vld [vmem:[#allocation2 + $0x58] sm:$0xff] }
  0xa5   : > { %v1737_v16 = vrot.slane %v10252_v13, 1 }
  0xa6   : > { %v947_v14 = vpack.c.bf16 %v845_v11, %v845_v11 }
  0xa7   : > { %v1738_v19 = vsel %vm1735_vm5, %v1736_v12, %v1737_v16 }
  0xa8   : > { %979 = vst.msk [vmem:[%s10242_s20 + $0x4] sm:$0xf] %vm280_vm1, %v947_v14  ;;  %v9868_v18 = vld [vmem:[#allocation3 + $0xc] sm:$0xf0]  ;;  %1833 = vrot.lane.b32.xlu0 %v1738_v19, %s10029_s21 }
  0xa9   : > { %1027 = vst.msk [vmem:[#allocation3 + $0x14] sm:$0xf] %vm280_vm1, %v947_v14  ;;  %v677_v20 = vpop.f32.mrf.mxu0  ;;  %v9190_v21 = vor.u32 %v9868_v18, %v9189_v15 }
  0xab   : > { %v2493_v22 = vshrl.u32 %v9190_v21, 16  ;;  %v2496_v23 = vshll.u32 %v9190_v21, 16 }
  0xac   : > { %9046 = vmatmul.msk.bf16.gmra.mxu0 %vm586_vm2, %v9828_v17 }
  0xad   : > { %v2495_v28 = vrot.slane %v2493_v22, 3  ;;  %v2498_v35 = vrot.slane %v2496_v23, 4 }
  0xaf   : > { %v2499_v46 = vor.u32 %v2498_v35, %v2495_v28 }
  0xb0   : > { %v9845_v24 = vld [vmem:[#allocation3 + $0x10] sm:$0xff] }
  0xb1   : > { %v9869_v26 = vld [vmem:[#allocation3 + $0x14] sm:$0xff]  ;;  %v679_v27 = vpop.f32.mrf.mxu0  ;;  %v1269_v30 = vshrl.u32 %v9845_v24, 16  ;;  %v1272_v31 = vshll.u32 %v9845_v24, 16 }
  0xb2   : > { %v799_v29 = vadd.f32 %v10226_v63, %v679_v27  ;;  %v2501_v32 = vshrl.u32 %v9869_v26, 16  ;;  %v2504_v36 = vshll.u32 %v9869_v26, 16 }
  0xb3   : > { %v1271_v40 = vrot.slane %v1269_v30, 3  ;;  %v1274_v41 = vrot.slane %v1272_v31, 4  ;;  %v340_v30 = vld [vmem:[%s10101_s10 + $0x98] sm:$0xff] }
  0xb4   : > { %v847_v39 = vmax.f32 %v799_v29, 0.0  ;;  %v2503_v42 = vrot.slane %v2501_v32, 3  ;;  %v2506_v43 = vrot.slane %v2504_v36, 4  ;;  %v372_v31 = vpack.c.bf16 %v340_v30, %v340_v30  ;;  %v9831_v36 = vld [vmem:[#allocation2 + $0x60] sm:$0xff] }
  0xb5   : > { %v1275_v45 = vor.u32 %v1274_v41, %v1271_v40 }
  0xb6   : > { %v948_v44 = vpack.c.bf16 %v847_v39, %v847_v39  ;;  %v2507_v47 = vor.u32 %v2506_v43, %v2503_v42  ;;  %404 = vst.msk [vmem:[#allocation2 + $0x70] sm:$0xf] %vm280_vm1, %v372_v31 }
  0xb7   : > { %v1276_v48 = vsel %vm1250_vm3, %v10136_v25, %v1275_v45  ;;  %v2027_v25 = vrot.slane %v10252_v13, 2 }
  0xb8   : > { %980 = vst.msk [vmem:[%s10242_s20 + $0x8] sm:$0xf] %vm280_vm1, %v948_v44  ;;  %9162 = vmatmul.msk.bf16.gmra.mxu1 %vm586_vm2, %v1276_v48  ;;  %v2508_v51 = vsel %vm1250_vm3, %v2499_v46, %v2507_v47 }
  0xb9   : > { %1029 = vst.msk [vmem:[#allocation3 + $0x1c] sm:$0xf] %vm280_vm1, %v948_v44  ;;  %v682_v50 = vpop.f32.mrf.mxu0  ;;  %9287 = vmatmul.msk.bf16.vlgmr.msra.gmra.mxu2 %vm586_vm2, %v2508_v51  ;;  %v2028_v56 = vsel %vm2025_vm6, %v2026_v53, %v2027_v25  ;;  %v341_v51 = vld [vmem:[%s10101_s10 + $0xa0] sm:$0xff] }
  0xba   : > { %v800_v52 = vadd.f32 %v10226_v63, %v682_v50  ;;  %2123 = vrot.lane.b32.xlu2 %v2028_v56, %s10030_s22 }
  0xbc   : > { %v848_v54 = vmax.f32 %v800_v52, 0.0  ;;  %9047 = vmatmul.msk.bf16.gmra.mxu0 %vm586_vm2, %v9829_v49  ;;  %v342_v52 = vld [vmem:[%s10101_s10 + $0xa8] sm:$0xff] }
  0xbe   : > { %v949_v55 = vpack.c.bf16 %v848_v54, %v848_v54  ;;  %v373_v54 = vpack.c.bf16 %v341_v51, %v341_v51 }
  0xc0   : > { %981 = vst.msk [vmem:[%s10242_s20 + $0xc] sm:$0xf] %vm280_vm1, %v949_v55  ;;  %v9846_v58 = vld [vmem:[#allocation3 + $0x18] sm:$0xff] }
  0xc1   : > { %1030 = vst.msk [vmem:[#allocation3 + $0x20] sm:$0xf] %vm280_vm1, %v949_v55  ;;  %v684_v59 = vpop.f32.mrf.mxu0  ;;  %v1278_v60 = vshrl.u32 %v9846_v58, 16  ;;  %v1281_v62 = vshll.u32 %v9846_v58, 16  ;;  %v374_v55 = vpack.c.bf16 %v342_v52, %v342_v52 }
  0xc2   : > { %405 = vst.msk [vmem:[#allocation2 + $0x78] sm:$0xf] %vm280_vm1, %v373_v54 }
  0xc3   : > { %v1280_v3 = vrot.slane %v1278_v60, 3  ;;  %v1283_v4 = vrot.slane %v1281_v62, 4  ;;  %406 = vst.msk [vmem:[#allocation2 + $0x7c] sm:$0xf] %vm280_vm1, %v374_v55 }
  0xc5   : > { %v1284_v6 = vor.u32 %v1283_v4, %v1280_v3  ;;  %v9832_v3 = vld [vmem:[#allocation2 + $0x68] sm:$0xff] }
  0xc7   : > { %v1285_v7 = vsel %vm1250_vm3, %v1275_v45, %v1284_v6 }
  0xc8   : > { %v9870_v9 = vld [vmem:[#allocation3 + $0x1c] sm:$0xff]  ;;  %9163 = vmatmul.msk.bf16.gmra.mxu1 %vm586_vm2, %v1285_v7 }
  0xc9   : > { %v9847_v10 = vld [vmem:[#allocation3 + $0x20] sm:$0xff]  ;;  %v687_v11 = vpop.f32.mrf.mxu0  ;;  %v2510_v14 = vshrl.u32 %v9870_v9, 16  ;;  %v2513_v15 = vshll.u32 %v9870_v9, 16 }
  0xca   : > { %v802_v12 = vadd.f32 %v10226_v63, %v687_v11  ;;  %v1287_v17 = vshrl.u32 %v9847_v10, 16  ;;  %v1290_v21 = vshll.u32 %v9847_v10, 16  ;;  %v9834_v54 = vld [vmem:[#allocation2 + $0x78] sm:$0xff] }
  0xcb   : > { %v2512_v19 = vrot.slane %v2510_v14, 3  ;;  %v2515_v20 = vrot.slane %v2513_v15, 4 }
  0xcc   : > { %v850_v18 = vmax.f32 %v802_v12, 0.0  ;;  %9048 = vmatmul.msk.bf16.gmra.mxu0 %vm586_vm2, %v9830_v8  ;;  %v1289_v26 = vrot.slane %v1287_v17, 3  ;;  %v1292_v27 = vrot.slane %v1290_v21, 4 }
  0xcd   : > { %v2516_v23 = vor.u32 %v2515_v20, %v2512_v19  ;;  %v343_v19 = vld [vmem:[%s10101_s10 + $0xb0] sm:$0xff] }
  0xce   : > { %v950_v22 = vpack.c.bf16 %v850_v18, %v850_v18  ;;  %v1293_v33 = vor.u32 %v1292_v27, %v1289_v26  ;;  %v375_v20 = vpack.c.bf16 %v343_v19, %v343_v19  ;;  %v9833_v26 = vld [vmem:[#allocation2 + $0x70] sm:$0xff] }
  0xcf   : > { %v2517_v24 = vsel %vm1250_vm3, %v2507_v47, %v2516_v23 }
  0xd0   : > { %982 = vst.msk [vmem:[%s10242_s20 + $0x10] sm:$0xf] %vm280_vm1, %v950_v22  ;;  %9288 = vmatmul.msk.bf16.gmra.mxu2 %vm586_vm2, %v2517_v24  ;;  %v1294_v35 = vsel %vm1250_vm3, %v1284_v6, %v1293_v33 }
  0xd1   : > { %1032 = vst.msk [vmem:[#allocation3 + $0x28] sm:$0xf] %vm280_vm1, %v950_v22  ;;  %v689_v28 = vpop.f32.mrf.mxu0 }
  0xd2   : > { %v803_v29 = vadd.f32 %v10226_v63, %v689_v28  ;;  %407 = vst.msk [vmem:[#allocation2 + $0x84] sm:$0xf] %vm280_vm1, %v375_v20 }
  0xd4   : > { %v851_v32 = vmax.f32 %v803_v29, 0.0 }
  0xd6   : > { %v951_v34 = vpack.c.bf16 %v851_v32, %v851_v32 }
  0xd8   : > { %983 = vst.msk [vmem:[%s10242_s20 + $0x14] sm:$0xf] %vm280_vm1, %v951_v34  ;;  %v9871_v37 = vld [vmem:[#allocation3 + $0x24] sm:$0xff]  ;;  %9164 = vmatmul.msk.bf16.gmra.mxu1 %vm586_vm2, %v1294_v35 }
  0xd9   : > { %1033 = vst.msk [vmem:[#allocation3 + $0x2c] sm:$0xf] %vm280_vm1, %v951_v34  ;;  %v692_v38 = vpop.f32.mrf.mxu0  ;;  %v2519_v39 = vshrl.u32 %v9871_v37, 16  ;;  %v2522_v40 = vshll.u32 %v9871_v37, 16 }
  0xda   : > { %v347_v38 = vld [vmem:[%s10101_s10 + $0xd0] sm:$0xff] }
  0xdb   : > { %v2521_v41 = vrot.slane %v2519_v39, 3  ;;  %v2524_v42 = vrot.slane %v2522_v40, 4  ;;  %v379_v39 = vpack.c.bf16 %v347_v38, %v347_v38 }
  0xdc   : > { %9049 = vmatmul.msk.bf16.gmra.mxu0 %vm586_vm2, %v9831_v36 }
  0xdd   : > { %v2525_v43 = vor.u32 %v2524_v42, %v2521_v41  ;;  %411 = vst.msk [vmem:[#allocation2 + $0x9c] sm:$0xf] %vm280_vm1, %v379_v39 }
  0xdf   : > { %v2526_v44 = vsel %vm1250_vm3, %v2516_v23, %v2525_v43 }
  0xe0   : > { %v9848_v45 = vld [vmem:[#allocation3 + $0x28] sm:$0xff]  ;;  %9289 = vmatmul.msk.bf16.gmra.mxu2 %vm586_vm2, %v2526_v44 }
  0xe1   : > { %v9872_v46 = vld [vmem:[#allocation3 + $0x2c] sm:$0xff]  ;;  %v694_v47 = vpop.f32.mrf.mxu0  ;;  %v1296_v49 = vshrl.u32 %v9848_v45, 16  ;;  %v1299_v50 = vshll.u32 %v9848_v45, 16 }
  0xe2   : > { %v805_v48 = vadd.f32 %v10226_v63, %v694_v47  ;;  %v2528_v53 = vshrl.u32 %v9872_v46, 16  ;;  %v2531_v60 = vshll.u32 %v9872_v46, 16  ;;  %v344_v47 = vld [vmem:[%s10101_s10 + $0xb8] sm:$0xff] }
  0xe3   : > { %v1298_v58 = vrot.slane %v1296_v49, 3  ;;  %v1301_v59 = vrot.slane %v1299_v50, 4 }
  0xe4   : > { %v853_v56 = vmax.f32 %v805_v48, 0.0  ;;  %v2530_v4 = vrot.slane %v2528_v53, 3  ;;  %v2533_v6 = vrot.slane %v2531_v60, 4  ;;  %v376_v48 = vpack.c.bf16 %v344_v47, %v344_v47  ;;  %v9838_v52 = vld [vmem:[#allocation2 + $0x98] sm:$0xff] }
  0xe5   : > { %v1302_v0 = vor.u32 %v1301_v59, %v1298_v58  ;;  %9056 = vmatmul.msk.bf16.vlgmr.msra.gmra.mxu3 %vm586_vm2, %v9838_v52 }
  0xe6   : > { %v952_v62 = vpack.c.bf16 %v853_v56, %v853_v56  ;;  %v2534_v10 = vor.u32 %v2533_v6, %v2530_v4  ;;  %408 = vst.msk [vmem:[#allocation2 + $0x88] sm:$0xf] %vm280_vm1, %v376_v48  ;;  %9995 = vmatpush.bf16.msra.mxu3 %v10219_v61 }
  0xe7   : > { %v1303_v1 = vsel %vm1250_vm3, %v1293_v33, %v1302_v0 }
  0xe8   : > { %984 = vst.msk [vmem:[%s10242_s20 + $0x18] sm:$0xf] %vm280_vm1, %v952_v62  ;;  %9165 = vmatmul.msk.bf16.gmra.mxu1 %vm586_vm2, %v1303_v1  ;;  %v2535_v12 = vsel %vm1250_vm3, %v2525_v43, %v2534_v10 }
  0xe9   : > { %1035 = vst.msk [vmem:[#allocation3 + $0x34] sm:$0xf] %vm280_vm1, %v952_v62  ;;  %v697_v7 = vpop.f32.mrf.mxu0 }
  0xea   : > { %v806_v8 = vadd.f32 %v10226_v63, %v697_v7 }
  0xec   : > { %v854_v9 = vmax.f32 %v806_v8, 0.0  ;;  %9050 = vmatmul.msk.bf16.gmra.mxu0 %vm586_vm2, %v9832_v3 }
  0xed   : > { %v9836_v48 = vld [vmem:[#allocation2 + $0x88] sm:$0xff] }
  0xee   : > { %v953_v11 = vpack.c.bf16 %v854_v9, %v854_v9 }
  0xf0   : > { %985 = vst.msk [vmem:[%s10242_s20 + $0x1c] sm:$0xf] %vm280_vm1, %v953_v11  ;;  %v9849_v14 = vld [vmem:[#allocation3 + $0x30] sm:$0xff]  ;;  %9290 = vmatmul.msk.bf16.gmra.mxu2 %vm586_vm2, %v2535_v12  ;;  %v346_v12 = vld [vmem:[%s10101_s10 + $0xc8] sm:$0xff] }
  0xf1   : > { %1036 = vst.msk [vmem:[#allocation3 + $0x38] sm:$0xf] %vm280_vm1, %v953_v11  ;;  %v699_v15 = vpop.f32.mrf.mxu0  ;;  %v1305_v17 = vshrl.u32 %v9849_v14, 16  ;;  %v1308_v18 = vshll.u32 %v9849_v14, 16  ;;  %v345_v11 = vld [vmem:[%s10101_s10 + $0xc0] sm:$0xff] }
  0xf2   : > { %v377_v15 = vpack.c.bf16 %v345_v11, %v345_v11 }
  0xf3   : > { %v1307_v21 = vrot.slane %v1305_v17, 3  ;;  %v1310_v22 = vrot.slane %v1308_v18, 4  ;;  %v378_v17 = vpack.c.bf16 %v346_v12, %v346_v12 }
  0xf4   : > { %409 = vst.msk [vmem:[#allocation2 + $0x90] sm:$0xf] %vm280_vm1, %v377_v15 }
  0xf5   : > { %v1311_v23 = vor.u32 %v1310_v22, %v1307_v21  ;;  %410 = vst.msk [vmem:[#allocation2 + $0x94] sm:$0xf] %vm280_vm1, %v378_v17 }
  0xf7   : > { %v1312_v24 = vsel %vm1250_vm3, %v1302_v0, %v1311_v23  ;;  %v348_v0 = vld [vmem:[%s10101_s10 + $0xd8] sm:$0xff] }
  0xf8   : > { %v9873_v27 = vld [vmem:[#allocation3 + $0x34] sm:$0xff]  ;;  %9166 = vmatmul.msk.bf16.gmra.mxu1 %vm586_vm2, %v1312_v24  ;;  %v380_v1 = vpack.c.bf16 %v348_v0, %v348_v0 }
  0xf9   : > { %v9850_v28 = vld [vmem:[#allocation3 + $0x38] sm:$0xff]  ;;  %v702_v29 = vpop.f32.mrf.mxu0  ;;  %v2537_v31 = vshrl.u32 %v9873_v27, 16  ;;  %v2540_v32 = vshll.u32 %v9873_v27, 16  ;;  %v9835_v27 = vld [vmem:[#allocation2 + $0x80] sm:$0xff] }
  0xfa   : > { %v808_v30 = vadd.f32 %v10226_v63, %v702_v29  ;;  %v1314_v33 = vshrl.u32 %v9850_v28, 16  ;;  %v1317_v37 = vshll.u32 %v9850_v28, 16  ;;  %412 = vst.msk [vmem:[#allocation2 + $0xa0] sm:$0xf] %vm280_vm1, %v380_v1 }
  0xfb   : > { %v2539_v35 = vrot.slane %v2537_v31, 3  ;;  %v2542_v36 = vrot.slane %v2540_v32, 4 }
  0xfc   : > { %v856_v34 = vmax.f32 %v808_v30, 0.0  ;;  %9051 = vmatmul.msk.bf16.gmra.mxu0 %vm586_vm2, %v9833_v26  ;;  %v1316_v43 = vrot.slane %v1314_v33, 3  ;;  %v1319_v44 = vrot.slane %v1317_v37, 4 }
  0xfd   : > { %v2543_v41 = vor.u32 %v2542_v36, %v2539_v35  ;;  %v350_v35 = vld [vmem:[%s10101_s10 + $0xe8] sm:$0xff] }
  0xfe   : > { %v954_v40 = vpack.c.bf16 %v856_v34, %v856_v34  ;;  %v1320_v50 = vor.u32 %v1319_v44, %v1316_v43  ;;  %v349_v34 = vld [vmem:[%s10101_s10 + $0xe0] sm:$0xff]  ;;  %v382_v38 = vpack.c.bf16 %v350_v35, %v350_v35 }
  0xff   : > { %v2544_v42 = vsel %vm1250_vm3, %v2534_v10, %v2543_v41  ;;  %v381_v36 = vpack.c.bf16 %v349_v34, %v349_v34 }
 0x100   : > { %986 = vst.msk [vmem:[%s10242_s20 + $0x20] sm:$0xf] %vm280_vm1, %v954_v40  ;;  %9291 = vmatmul.msk.bf16.gmra.mxu2 %vm586_vm2, %v2544_v42  ;;  %v1321_v53 = vsel %vm1250_vm3, %v1311_v23, %v1320_v50 }
 0x101   : > { %1038 = vst.msk [vmem:[#allocation3 + $0x40] sm:$0xf] %vm280_vm1, %v954_v40  ;;  %v704_v45 = vpop.f32.mrf.mxu0  ;;  %v9839_v24 = vld [vmem:[#allocation2 + $0xa0] sm:$0xff] }
 0x102   : > { %v809_v46 = vadd.f32 %v10226_v63, %v704_v45  ;;  %9057 = vmatmul.msk.bf16.gmra.mxu3 %vm586_vm2, %v9839_v24  ;;  %413 = vst.msk [vmem:[#allocation2 + $0xa8] sm:$0xf] %vm280_vm1, %v381_v36 }
 0x103   : > { %414 = vst.msk [vmem:[#allocation2 + $0xac] sm:$0xf] %vm280_vm1, %v382_v38 }
 0x104   : > { %v857_v49 = vmax.f32 %v809_v46, 0.0 }
 0x106   : > { %v955_v51 = vpack.c.bf16 %v857_v49, %v857_v49 }
 0x108   : > { %987 = vst.msk [vmem:[%s10242_s20 + $0x24] sm:$0xf] %vm280_vm1, %v955_v51  ;;  %v9874_v55 = vld [vmem:[#allocation3 + $0x3c] sm:$0xff]  ;;  %9167 = vmatmul.msk.bf16.gmra.mxu1 %vm586_vm2, %v1321_v53 }
 0x109   : > { %1039 = vst.msk [vmem:[#allocation3 + $0x44] sm:$0xf] %vm280_vm1, %v955_v51  ;;  %v707_v56 = vpop.f32.mrf.mxu0  ;;  %v2546_v58 = vshrl.u32 %v9874_v55, 16  ;;  %v2549_v59 = vshll.u32 %v9874_v55, 16 }
 0x10a   : > { %v9840_v52 = vld [vmem:[#allocation2 + $0xa8] sm:$0xff] }
 0x10b   : > { %v2548_v60 = vrot.slane %v2546_v58, 3  ;;  %v2551_v62 = vrot.slane %v2549_v59, 4 }
 0x10c   : > { %9052 = vmatmul.msk.bf16.gmra.mxu0 %vm586_vm2, %v9834_v54 }
 0x10d   : > { %v2552_v3 = vor.u32 %v2551_v62, %v2548_v60 }
 0x10f   : > { %v2553_v4 = vsel %vm1250_vm3, %v2543_v41, %v2552_v3 }
 0x110   : > { %v9851_v6 = vld [vmem:[#allocation3 + $0x40] sm:$0xff]  ;;  %9292 = vmatmul.msk.bf16.gmra.mxu2 %vm586_vm2, %v2553_v4 }
 0x111   : > { %v9875_v7 = vld [vmem:[#allocation3 + $0x44] sm:$0xff]  ;;  %v709_v8 = vpop.f32.mrf.mxu0  ;;  %v1323_v9 = vshrl.u32 %v9851_v6, 16  ;;  %v1326_v10 = vshll.u32 %v9851_v6, 16 }
 0x112   : > { %v811_v61 = vadd.f32 %v10226_v63, %v709_v8  ;;  %v2555_v14 = vshrl.u32 %v9875_v7, 16  ;;  %v2558_v21 = vshll.u32 %v9875_v7, 16  ;;  %9058 = vmatmul.msk.bf16.gmra.mxu3 %vm586_vm2, %v9840_v52  ;;  %v9440_v8 = vld [vmem:[#allocation4] sm:$0x8] }
 0x113   : > { %v1325_v19 = vrot.slane %v1323_v9, 3  ;;  %v1328_v20 = vrot.slane %v1326_v10, 4  ;;  %v9918_v10 = vld [vmem:[#allocation4] sm:$0xf0] }
 0x114   : > { %v859_v18 = vmax.f32 %v811_v61, 0.0  ;;  %v2557_v28 = vrot.slane %v2555_v14, 3  ;;  %v2560_v29 = vrot.slane %v2558_v21, 4  ;;  %v9441_v15 = vor.u32 %v9918_v10, %v9440_v8 }
 0x115   : > { %v1329_v23 = vor.u32 %v1328_v20, %v1325_v19 }
 0x116   : > { %v956_v22 = vpack.c.bf16 %v859_v18, %v859_v18  ;;  %v2561_v33 = vor.u32 %v2560_v29, %v2557_v28  ;;  %v9837_v18 = vld [vmem:[#allocation2 + $0x90] sm:$0xff] }
 0x117   : > { %v1330_v26 = vsel %vm1250_vm3, %v1320_v50, %v1329_v23 }
 0x118   : > { %988 = vst.msk [vmem:[%s10242_s20 + $0x28] sm:$0xf] %vm280_vm1, %v956_v22  ;;  %9168 = vmatmul.msk.bf16.gmra.mxu1 %vm586_vm2, %v1330_v26  ;;  %v2562_v39 = vsel %vm1250_vm3, %v2552_v3, %v2561_v33 }
 0x119   : > { %1041 = vst.msk [vmem:[#allocation3 + $0x4c] sm:$0xf] %vm280_vm1, %v956_v22  ;;  %v712_v30 = vpop.f32.mrf.mxu0  ;;  %v9919_v22 = vld [vmem:[#allocation4 + $0x8] sm:$0xff] }
 0x11a   : > { %v812_v31 = vadd.f32 %v10226_v63, %v712_v30  ;;  %v5474_v30 = vshll.u32 %v9441_v15, 16  ;;  %v5479_v34 = vshrl.u32 %v9919_v22, 16  ;;  %v5482_v35 = vshll.u32 %v9919_v22, 16 }
 0x11c   : > { %v860_v32 = vmax.f32 %v812_v31, 0.0  ;;  %9053 = vmatmul.msk.bf16.gmra.mxu0 %vm586_vm2, %v9835_v27  ;;  %v5471_v27 = vshrl.u32 %v9441_v15, 16  ;;  %v352_v31 = vld [vmem:[%s10101_s10 + $0xf8] sm:$0xff] }
 0x11d   : > { %v384_v36 = vpack.c.bf16 %v352_v31, %v352_v31 }
 0x11e   : > { %v957_v37 = vpack.c.bf16 %v860_v32, %v860_v32 }
 0x11f   : > { %416 = vst.msk [vmem:[#allocation2 + $0xb8] sm:$0xf] %vm280_vm1, %v384_v36 }
 0x120   : > { %989 = vst.msk [vmem:[%s10242_s20 + $0x2c] sm:$0xf] %vm280_vm1, %v957_v37  ;;  %v9852_v40 = vld [vmem:[#allocation3 + $0x48] sm:$0xff]  ;;  %9293 = vmatmul.msk.bf16.gmra.mxu2 %vm586_vm2, %v2562_v39 }
 0x121   : > { %1042 = vst.msk [vmem:[#allocation3 + $0x50] sm:$0xf] %vm280_vm1, %v957_v37  ;;  %v714_v41 = vpop.f32.mrf.mxu0  ;;  %v1332_v42 = vshrl.u32 %v9852_v40, 16  ;;  %v1335_v43 = vshll.u32 %v9852_v40, 16 }
 0x122   : > { %v5473_v41 = vrot.slane %v5471_v27, 3 }
 0x123   : > { %v1334_v44 = vrot.slane %v1332_v42, 3  ;;  %v1337_v45 = vrot.slane %v1335_v43, 4 }
 0x125   : > { %v1338_v46 = vor.u32 %v1337_v45, %v1334_v44  ;;  %v5476_v45 = vrot.slane %v5474_v30, 4 }
 0x127   : > { %v1339_v47 = vsel %vm1250_vm3, %v1329_v23, %v1338_v46  ;;  %v351_v23 = vld [vmem:[%s10101_s10 + $0xf0] sm:$0xff] }
 0x128   : > { %v9876_v49 = vld [vmem:[#allocation3 + $0x4c] sm:$0xff]  ;;  %9169 = vmatmul.msk.bf16.gmra.mxu1 %vm586_vm2, %v1339_v47  ;;  %v5484_v47 = vrot.slane %v5482_v35, 4 }
 0x129   : > { %v9853_v50 = vld [vmem:[#allocation3 + $0x50] sm:$0xff]  ;;  %v717_v51 = vpop.f32.mrf.mxu0  ;;  %v2564_v54 = vshrl.u32 %v9876_v49, 16  ;;  %v2567_v55 = vshll.u32 %v9876_v49, 16 }
 0x12a   : > { %v814_v53 = vadd.f32 %v10226_v63, %v717_v51  ;;  %v1341_v56 = vshrl.u32 %v9853_v50, 16  ;;  %v1344_v62 = vshll.u32 %v9853_v50, 16 }
 0x12b   : > { %v2566_v59 = vrot.slane %v2564_v54, 3  ;;  %v2569_v60 = vrot.slane %v2567_v55, 4 }
 0x12c   : > { %v862_v58 = vmax.f32 %v814_v53, 0.0  ;;  %9054 = vmatmul.msk.bf16.gmra.mxu0 %vm586_vm2, %v9836_v48  ;;  %v1343_v3 = vrot.slane %v1341_v56, 3  ;;  %v1346_v4 = vrot.slane %v1344_v62, 4  ;;  %v5477_v56 = vor.u32 %v5476_v45, %v5473_v41 }
 0x12d   : > { %v2570_v1 = vor.u32 %v2569_v60, %v2566_v59 }
 0x12e   : > { %v958_v0 = vpack.c.bf16 %v862_v58, %v862_v58  ;;  %v10416_v9 = vor.u32 %v1346_v4, %v1343_v3 }
 0x12f   : > { %v2571_v2 = vsel %vm1250_vm3, %v2561_v33, %v2570_v1 }
 0x130   : > { %990 = vst.msk [vmem:[%s10242_s20 + $0x30] sm:$0xf] %vm280_vm1, %v958_v0  ;;  %9294 = vmatmul.msk.bf16.gmra.mxu2 %vm586_vm2, %v2571_v2  ;;  %v1348_v17 = vsel %vm1250_vm3, %v1338_v46, %v10416_v9  ;;  %v5481_v46 = vrot.slane %v5479_v34, 3 }
 0x131   : > { %1044 = vst.msk [vmem:[#allocation3 + $0x58] sm:$0xf] %vm280_vm1, %v958_v0  ;;  %v719_v6 = vpop.f32.mrf.mxu0 }
 0x132   : > { %v815_v7 = vadd.f32 %v10226_v63, %v719_v6  ;;  %v10467_v58 = vor.u32 %v5484_v47, %v5481_v46 }
 0x134   : > { %v863_v61 = vmax.f32 %v815_v7, 0.0 }
 0x135   : > { %v1567_v12 = vpop.f32.mrf.mxu1 }
 0x136   : > { %v959_v11 = vpack.c.bf16 %v863_v61, %v863_v61  ;;  %v1739_v14 = vrot.slane %v1567_v12, 1  ;;  %v2029_v32 = vrot.slane %v1567_v12, 2 }
 0x138   : > { %991 = vst.msk [vmem:[%s10242_s20 + $0x34] sm:$0xf] %vm280_vm1, %v959_v11  ;;  %v9877_v19 = vld [vmem:[#allocation3 + $0x54] sm:$0xff]  ;;  %9170 = vmatmul.msk.bf16.gmra.mxu1 %vm586_vm2, %v1348_v17  ;;  %v1740_v21 = vsel %vm1735_vm5, %v1737_v16, %v1739_v14  ;;  %v383_v16 = vpack.c.bf16 %v351_v23, %v351_v23  ;;  %v2030_v44 = vsel %vm2025_vm6, %v2027_v25, %v2029_v32 }
 0x139   : > { %1045 = vst.msk [vmem:[#allocation3 + $0x5c] sm:$0xf] %vm280_vm1, %v959_v11  ;;  %v722_v20 = vpop.f32.mrf.mxu0  ;;  %1835 = vrot.lane.b32.xlu0 %v1740_v21, %s10029_s21  ;;  %v2573_v24 = vshrl.u32 %v9877_v19, 16  ;;  %v2576_v26 = vshll.u32 %v9877_v19, 16  ;;  %v5486_v11 = vsel %vm1250_vm3, %v5477_v56, %v10467_v58 }
 0x13a   : > { %415 = vst.msk [vmem:[#allocation2 + $0xb4] sm:$0xf] %vm280_vm1, %v383_v16 }
 0x13b   : > { %v2575_v28 = vrot.slane %v2573_v24, 3  ;;  %v2578_v29 = vrot.slane %v2576_v26, 4 }
 0x13c   : > { %9055 = vmatmul.msk.bf16.gmra.mxu0 %vm586_vm2, %v9837_v18  ;;  %v10445_v33 = vpop.f32.mrf.mxu2 }
 0x13d   : > { %v10449_v37 = vpop.f32.mrf.mxu1  ;;  %v2579_v38 = vor.u32 %v2578_v29, %v2575_v28  ;;  %v3024_v55 = vrot.slane %v10445_v33, 1  ;;  %v3313_v2 = vrot.slane %v10445_v33, 2 }
 0x13e   : > { %v1741_v17 = vrot.slane %v10449_v37, 1  ;;  %v2031_v34 = vrot.slane %v10449_v37, 2 }
 0x13f   : > { %v2580_v39 = vsel %vm1250_vm3, %v2570_v1, %v2579_v38 }
 0x140   : > { %v9854_v40 = vld [vmem:[#allocation3 + $0x58] sm:$0xff]  ;;  %9295 = vmatmul.msk.bf16.gmra.mxu2 %vm586_vm2, %v2580_v39 }
 0x141   : > { %v9878_v42 = vld [vmem:[#allocation3 + $0x5c] sm:$0xff]  ;;  %v724_v43 = vpop.f32.mrf.mxu0  ;;  %2125 = vrot.lane.b32.xlu0 %v2030_v44, %s10030_s22  ;;  %v1350_v48 = vshrl.u32 %v9854_v40, 16  ;;  %v1353_v49 = vshll.u32 %v9854_v40, 16  ;;  %v9841_v3 = vld [vmem:[#allocation2 + $0xb0] sm:$0xff] }
 0x142   : > { %v817_v57 = vadd.f32 %v10226_v63, %v724_v43  ;;  %v2582_v50 = vshrl.u32 %v9878_v42, 16  ;;  %v2585_v54 = vshll.u32 %v9878_v42, 16  ;;  %9059 = vmatmul.msk.bf16.gmra.mxu3 %vm586_vm2, %v9841_v3 }
 0x143   : > { %v1352_v52 = vrot.slane %v1350_v48, 3  ;;  %v1355_v53 = vrot.slane %v1353_v49, 4 }
 0x144   : > { %v865_v51 = vmax.f32 %v817_v57, 0.0  ;;  %v10465_v25 = vpop.f32.mrf.mxu2  ;;  %v2584_v7 = vrot.slane %v2582_v50, 3  ;;  %v2587_v8 = vrot.slane %v2585_v54, 4 }
 0x145   : > { %v3314_v60 = vrot.slane %v10465_v25, 2  ;;  %v10470_v62 = vpop.f32.mrf.mxu1  ;;  %v3025_v0 = vrot.slane %v10465_v25, 1  ;;  %v1356_v1 = vor.u32 %v1355_v53, %v1352_v52 }
 0x146   : > { %v960_v59 = vpack.c.bf16 %v865_v51, %v865_v51  ;;  %v1743_v12 = vrot.slane %v10470_v62, 1  ;;  %v2588_v15 = vor.u32 %v2587_v8, %v2584_v7  ;;  %v2033_v20 = vrot.slane %v10470_v62, 2 }
 0x147   : > { %v3026_v4 = vsel %vm1735_vm5, %v3024_v55, %v3025_v0  ;;  %v1357_v6 = vsel %vm1250_vm3, %v10416_v9, %v1356_v1  ;;  %v3315_v10 = vsel %vm2025_vm6, %v3313_v2, %v3314_v60 }
 0x148   : > { %992 = vst.msk [vmem:[%s10242_s20 + $0x38] sm:$0xf] %vm280_vm1, %v960_v59  ;;  %3121 = vrot.lane.b32.xlu1 %v3026_v4, %s10029_s21  ;;  %9171 = vmatmul.msk.bf16.gmra.mxu1 %vm586_vm2, %v1357_v6  ;;  %v1744_v22 = vsel %vm1735_vm5, %v1741_v17, %v1743_v12  ;;  %v2589_v23 = vsel %vm1250_vm3, %v2579_v38, %v2588_v15  ;;  %v9842_v38 = vld [vmem:[#allocation2 + $0xb8] sm:$0xff] }
 0x149   : > { %1047 = vst.msk [vmem:[#allocation3 + $0x64] sm:$0xf] %vm280_vm1, %v960_v59  ;;  %v727_v61 = vpop.f32.mrf.mxu0  ;;  %3410 = vrot.lane.b32.xlu0 %v3315_v10, %s10030_s22  ;;  %v2034_v39 = vsel %vm2025_vm6, %v2031_v34, %v2033_v20 }
 0x14a   : > { %v818_v9 = vadd.f32 %v10226_v63, %v727_v61 }
 0x14c   : > { %v866_v14 = vmax.f32 %v818_v9, 0.0  ;;  %9538 = vmatmul.msk.bf16.vlgmr.msrb.gmra.mxu0 %vm5694_vm8, %v5486_v11 }
 0x14d   : > { %v1574_v19 = vpop.f32.mrf.mxu1 }
 0x14e   : > { %v961_v18 = vpack.c.bf16 %v866_v14, %v866_v14  ;;  %v2035_v21 = vrot.slane %v1574_v19, 2  ;;  %v1745_v57 = vrot.slane %v1574_v19, 1 }
 0x150   : > { %993 = vst.msk [vmem:[%s10242_s20 + $0x3c] sm:$0xf] %vm280_vm1, %v961_v18  ;;  %v9855_v24 = vld [vmem:[#allocation3 + $0x60] sm:$0xff]  ;;  %1839 = vrot.lane.b32.xlu1 %v1744_v22, %s10029_s21  ;;  %9296 = vmatmul.msk.bf16.gmra.mxu2 %vm586_vm2, %v2589_v23  ;;  %v2036_v27 = vsel %vm2025_vm6, %v2033_v20, %v2035_v21  ;;  %v1746_v3 = vsel %vm1735_vm5, %v1743_v12, %v1745_v57 }
 0x151   : > { %1048 = vst.msk [vmem:[#allocation3 + $0x68] sm:$0xf] %vm280_vm1, %v961_v18  ;;  %v729_v26 = vpop.f32.mrf.mxu0  ;;  %2131 = vrot.lane.b32.xlu2 %v2036_v27, %s10030_s22  ;;  %v1359_v28 = vshrl.u32 %v9855_v24, 16  ;;  %v1362_v29 = vshll.u32 %v9855_v24, 16 }
 0x152   : > { %9060 = vmatmul.msk.bf16.gmra.mxu3 %vm586_vm2, %v9842_v38 }
 0x153   : > { %v2808_v30 = vpop.f32.mrf.mxu2  ;;  %v1361_v16 = vrot.slane %v1359_v28, 3  ;;  %v1364_v31 = vrot.slane %v1362_v29, 4 }
 0x154   : > { %v3027_v32 = vrot.slane %v2808_v30, 1  ;;  %v3316_v9 = vrot.slane %v2808_v30, 2 }
 0x155   : > { %v10504_v35 = vpop.f32.mrf.mxu1  ;;  %v1365_v36 = vor.u32 %v1364_v31, %v1361_v16 }
 0x156   : > { %v3028_v44 = vsel %vm1735_vm5, %v3025_v0, %v3027_v32  ;;  %v1747_v59 = vrot.slane %v10504_v35, 1  ;;  %v2037_v0 = vrot.slane %v10504_v35, 2 }
 0x157   : > { %v1366_v40 = vsel %vm1250_vm3, %v1356_v1, %v1365_v36 }
 0x158   : > { %v9879_v41 = vld [vmem:[#allocation3 + $0x64] sm:$0xff]  ;;  %2129 = vrot.lane.b32.xlu1 %v2034_v39, %s10030_s22  ;;  %9172 = vmatmul.msk.bf16.gmra.mxu1 %vm586_vm2, %v1366_v40 }
 0x159   : > { %v9856_v42 = vld [vmem:[#allocation3 + $0x68] sm:$0xff]  ;;  %v732_v43 = vpop.f32.mrf.mxu0  ;;  %3123 = vrot.lane.b32.xlu2 %v3028_v44, %s10029_s21  ;;  %v2591_v46 = vshrl.u32 %v9879_v41, 16  ;;  %v2594_v47 = vshll.u32 %v9879_v41, 16 }
 0x15a   : > { %v820_v45 = vadd.f32 %v10226_v63, %v732_v43  ;;  %v1368_v48 = vshrl.u32 %v9856_v42, 16  ;;  %v1371_v53 = vshll.u32 %v9856_v42, 16 }
 0x15b   : > { %v10514_v50 = vpop.f32.mrf.mxu2  ;;  %v2593_v51 = vrot.slane %v2591_v46, 3  ;;  %v2596_v52 = vrot.slane %v2594_v47, 4  ;;  %v10564_v47 = vld [vmem:[%s14521_s4] ss:$0 sm:$0xff] }
 0x15c   : > { %v868_v49 = vmax.f32 %v820_v45, 0.0  ;;  %v1370_v6 = vrot.slane %v1368_v48, 3  ;;  %v1373_v7 = vrot.slane %v1371_v53, 4  ;;  %v3029_v21 = vrot.slane %v10514_v50, 1 }
 0x15d   : > { %v10516_v55 = vpop.f32.mrf.mxu1  ;;  %v2597_v56 = vor.u32 %v2596_v52, %v2593_v51  ;;  %v3318_v22 = vrot.slane %v10514_v50, 2 }
 0x15e   : > { %v962_v54 = vpack.c.bf16 %v868_v49, %v868_v49  ;;  %v1749_v1 = vrot.slane %v10516_v55, 1  ;;  %v2039_v2 = vrot.slane %v10516_v55, 2 }
 0x15f   : > { %v2598_v4 = vsel %vm1250_vm3, %v2588_v15, %v2597_v56  ;;  %v1374_v15 = vor.u32 %v1373_v7, %v1370_v6 }
 0x160   : > { %994 = vst.msk [vmem:[%s10242_s20 + $0x40] sm:$0xf] %vm280_vm1, %v962_v54  ;;  %1841 = vrot.lane.b32.xlu1 %v1746_v3, %s10029_s21  ;;  %9297 = vmatmul.msk.bf16.gmra.mxu2 %vm586_vm2, %v2598_v4  ;;  %v2040_v61 = vsel %vm2025_vm6, %v2037_v0, %v2039_v2  ;;  %v1750_v10 = vsel %vm1735_vm5, %v1747_v59, %v1749_v1 }
 0x161   : > { %1050 = vst.msk [vmem:[#allocation3 + $0x70] sm:$0xf] %vm280_vm1, %v962_v54  ;;  %v734_v8 = vpop.f32.mrf.mxu0  ;;  %2135 = vrot.lane.b32.xlu0 %v2040_v61, %s10030_s22  ;;  %1845 = vrot.lane.b32.xlu2 %v1750_v10, %s10029_s21  ;;  %v1375_v23 = vsel %vm1250_vm3, %v1365_v36, %v1374_v15 }
 0x162   : > { %v821_v11 = vadd.f32 %v10226_v63, %v734_v8  ;;  %v3317_v63 = vsel %vm2025_vm6, %v3314_v60, %v3316_v9 }
 0x163   : > { %v10534_v14 = vpop.f32.mrf.mxu2 }
 0x164   : > { %v869_v12 = vmax.f32 %v821_v11, 0.0  ;;  %v3031_v17 = vrot.slane %v10534_v14, 1  ;;  %v3320_v18 = vrot.slane %v10534_v14, 2 }
 0x165   : > { %v1582_v20 = vpop.f32.mrf.mxu1 }
 0x166   : > { %v963_v19 = vpack.c.bf16 %v869_v12, %v869_v12  ;;  %v3321_v27 = vsel %vm2025_vm6, %v3318_v22, %v3320_v18  ;;  %v3032_v28 = vsel %vm1735_vm5, %v3029_v21, %v3031_v17  ;;  %v2041_v30 = vrot.slane %v1582_v20, 2 }
 0x167   : > { %v1751_v34 = vrot.slane %v1582_v20, 1 }
 0x168   : > { %995 = vst.msk [vmem:[%s10242_s20 + $0x44] sm:$0xf] %vm280_vm1, %v963_v19  ;;  %v9880_v24 = vld [vmem:[#allocation3 + $0x6c] sm:$0xff]  ;;  %3412 = vrot.lane.b32.xlu1 %v3317_v63, %s10030_s22  ;;  %9173 = vmatmul.msk.bf16.gmra.mxu1 %vm586_vm2, %v1375_v23  ;;  %v2042_v40 = vsel %vm2025_vm6, %v2039_v2, %v2041_v30 }
 0x169   : > { %1051 = vst.msk [vmem:[#allocation3 + $0x74] sm:$0xf] %vm280_vm1, %v963_v19  ;;  %v737_v26 = vpop.f32.mrf.mxu0  ;;  %3416 = vrot.lane.b32.xlu2 %v3321_v27, %s10030_s22  ;;  %3127 = vrot.lane.b32.xlu0 %v3032_v28, %s10029_s21  ;;  %v2600_v29 = vshrl.u32 %v9880_v24, 16  ;;  %v2603_v60 = vshll.u32 %v9880_v24, 16  ;;  %v1752_v46 = vsel %vm1735_vm5, %v1749_v1, %v1751_v34 }
 0x16b   : > { %v2815_v16 = vpop.f32.mrf.mxu2  ;;  %v2602_v31 = vrot.slane %v2600_v29, 3  ;;  %v2605_v32 = vrot.slane %v2603_v60, 4 }
 0x16c   : > { %v3322_v36 = vrot.slane %v2815_v16, 2  ;;  %v3033_v51 = vrot.slane %v2815_v16, 1 }
 0x16d   : > { %v10553_v38 = vpop.f32.mrf.mxu1  ;;  %v2606_v39 = vor.u32 %v2605_v32, %v2602_v31 }
 0x16e   : > { %v3323_v45 = vsel %vm2025_vm6, %v3320_v18, %v3322_v36  ;;  %v1753_v4 = vrot.slane %v10553_v38, 1  ;;  %v2043_v6 = vrot.slane %v10553_v38, 2  ;;  %v3034_v61 = vsel %vm1735_vm5, %v3031_v17, %v3033_v51 }
 0x16f   : > { %v2607_v41 = vsel %vm1250_vm3, %v2597_v56, %v2606_v39 }
 0x170   : > { %v9857_v42 = vld [vmem:[#allocation3 + $0x70] sm:$0xff]  ;;  %2137 = vrot.lane.b32.xlu1 %v2042_v40, %s10030_s22  ;;  %9298 = vmatmul.msk.bf16.gmra.mxu2 %vm586_vm2, %v2607_v41 }
 0x171   : > { %v9881_v43 = vld [vmem:[#allocation3 + $0x74] sm:$0xff]  ;;  %v739_v44 = vpop.f32.mrf.mxu0  ;;  %3418 = vrot.lane.b32.xlu0 %v3323_v45, %s10030_s22  ;;  %1847 = vrot.lane.b32.xlu2 %v1752_v46, %s10029_s21  ;;  %v1377_v48 = vshrl.u32 %v9857_v42, 16  ;;  %v1380_v49 = vshll.u32 %v9857_v42, 16 }
 0x172   : > { %v823_v57 = vadd.f32 %v10564_v47, %v739_v44  ;;  %v2609_v52 = vshrl.u32 %v9881_v43, 16  ;;  %v2612_v0 = vshll.u32 %v9881_v43, 16 }
 0x173   : > { %v10569_v54 = vpop.f32.mrf.mxu2  ;;  %v1379_v56 = vrot.slane %v1377_v48, 3  ;;  %v1382_v59 = vrot.slane %v1380_v49, 4 }
 0x174   : > { %v871_v53 = vmax.f32 %v823_v57, 0.0  ;;  %v2611_v11 = vrot.slane %v2609_v52, 3  ;;  %v2614_v9 = vrot.slane %v2612_v0, 4  ;;  %v3324_v22 = vrot.slane %v10569_v54, 2 }
 0x175   : > { %v10571_v2 = vpop.f32.mrf.mxu1  ;;  %v1383_v3 = vor.u32 %v1382_v59, %v1379_v56  ;;  %v3035_v27 = vrot.slane %v10569_v54, 1 }
 0x176   : > { %v964_v1 = vpack.c.bf16 %v871_v53, %v871_v53  ;;  %v1755_v7 = vrot.slane %v10571_v2, 1  ;;  %v2045_v8 = vrot.slane %v10571_v2, 2  ;;  %v2615_v21 = vor.u32 %v2614_v9, %v2611_v11 }
 0x177   : > { %v1384_v10 = vsel %vm1250_vm3, %v1374_v15, %v1383_v3 }
 0x178   : > { %996 = vst.msk [vmem:[%s10242_s20 + $0x48] sm:$0xf] %vm280_vm1, %v964_v1  ;;  %3129 = vrot.lane.b32.xlu1 %v3034_v61, %s10029_s21  ;;  %9174 = vmatmul.msk.bf16.gmra.mxu1 %vm586_vm2, %v1384_v10  ;;  %v2046_v18 = vsel %vm2025_vm6, %v2043_v6, %v2045_v8  ;;  %v1756_v19 = vsel %vm1735_vm5, %v1753_v4, %v1755_v7  ;;  %v767_v4 = vpop.f32.mrf.mxu3 }
 0x179   : > { %1053 = vst.msk [vmem:[#allocation3 + $0x7c] sm:$0xf] %vm280_vm1, %v964_v1  ;;  %v742_v12 = vpop.f32.mrf.mxu0  ;;  %2141 = vrot.lane.b32.xlu2 %v2046_v18, %s10030_s22  ;;  %1851 = vrot.lane.b32.xlu0 %v1756_v19, %s10029_s21  ;;  %v2616_v60 = vsel %vm1250_vm3, %v2606_v39, %v2615_v21 }
 0x17a   : > { %v824_v20 = vadd.f32 %v10564_v47, %v742_v12 }
 0x17b   : > { %v10589_v17 = vpop.f32.mrf.mxu2 }
 0x17c   : > { %v872_v15 = vmax.f32 %v824_v20, 0.0  ;;  %v3037_v63 = vrot.slane %v10589_v17, 1  ;;  %v3326_v23 = vrot.slane %v10589_v17, 2 }
 0x17d   : > { %v1589_v26 = vpop.f32.mrf.mxu1 }
 0x17e   : > { %v965_v24 = vpack.c.bf16 %v872_v15, %v872_v15  ;;  %v2047_v28 = vrot.slane %v1589_v26, 2  ;;  %v3327_v29 = vsel %vm2025_vm6, %v3324_v22, %v3326_v23  ;;  %v3038_v31 = vsel %vm1735_vm5, %v3035_v27, %v3037_v63 }
 0x17f   : > { %v1757_v40 = vrot.slane %v1589_v26, 1 }
 0x180   : > { %997 = vst.msk [vmem:[%s10242_s20 + $0x4c] sm:$0xf] %vm280_vm1, %v965_v24  ;;  %v9858_v30 = vld [vmem:[#allocation3 + $0x78] sm:$0xff]  ;;  %3422 = vrot.lane.b32.xlu1 %v3327_v29, %s10030_s22  ;;  %9299 = vmatmul.msk.bf16.gmra.mxu2 %vm586_vm2, %v2616_v60  ;;  %v2048_v32 = vsel %vm2025_vm6, %v2045_v8, %v2047_v28  ;;  %v769_v29 = vpop.f32.mrf.mxu3 }
 0x181   : > { %1054 = vst.msk [vmem:[#allocation3 + $0x80] sm:$0xf] %vm280_vm1, %v965_v24  ;;  %v744_v16 = vpop.f32.mrf.mxu0  ;;  %3133 = vrot.lane.b32.xlu2 %v3038_v31, %s10029_s21  ;;  %2143 = vrot.lane.b32.xlu0 %v2048_v32, %s10030_s22  ;;  %v1386_v34 = vshrl.u32 %v9858_v30, 16  ;;  %v1389_v36 = vshll.u32 %v9858_v30, 16  ;;  %v1758_v57 = vsel %vm1735_vm5, %v1755_v7, %v1757_v40 }
 0x182   : > { %v835_v16 = vadd.f32 %v10564_v47, %v769_v29 }
 0x183   : > { %v2823_v39 = vpop.f32.mrf.mxu2  ;;  %v1388_v41 = vrot.slane %v1386_v34, 3  ;;  %v1391_v42 = vrot.slane %v1389_v36, 4 }
 0x184   : > { %v3039_v43 = vrot.slane %v2823_v39, 1  ;;  %v3328_v44 = vrot.slane %v2823_v39, 2  ;;  %v883_v39 = vmax.f32 %v835_v16, 0.0 }
 0x185   : > { %v10606_v45 = vpop.f32.mrf.mxu1  ;;  %v1392_v46 = vor.u32 %v1391_v42, %v1388_v41 }
 0x186   : > { %14690 = vst [vmem:[#allocation5_spill] sm:$0xff] %v10606_v45  ;;  %v3329_v53 = vsel %vm2025_vm6, %v3326_v23, %v3328_v44  ;;  %v3040_v56 = vsel %vm1735_vm5, %v3037_v63, %v3039_v43  ;;  %v1759_v18 = vrot.slane %v10606_v45, 1  ;;  %v2049_v19 = vrot.slane %v10606_v45, 2 }
 0x187   : > { %v1393_v48 = vsel %vm1250_vm3, %v1383_v3, %v1392_v46 }
 0x188   : > { %v9882_v49 = vld [vmem:[#allocation3 + $0x7c] sm:$0xff]  ;;  %1853 = vrot.lane.b32.xlu1 %v1758_v57, %s10029_s21  ;;  %9175 = vmatmul.msk.bf16.gmra.mxu1 %vm586_vm2, %v1393_v48  ;;  %v972_v48 = vpack.c.bf16 %v883_v39, %v883_v39 }
 0x189   : > { %v9859_v51 = vld [vmem:[#allocation3 + $0x80] sm:$0xff]  ;;  %v747_v52 = vpop.f32.mrf.mxu0  ;;  %3424 = vrot.lane.b32.xlu2 %v3329_v53, %s10030_s22  ;;  %3135 = vrot.lane.b32.xlu0 %v3040_v56, %s10029_s21  ;;  %v2618_v0 = vshrl.u32 %v9882_v49, 16  ;;  %v2621_v1 = vshll.u32 %v9882_v49, 16 }
 0x18a   : > { %v826_v59 = vadd.f32 %v10564_v47, %v747_v52  ;;  %v1395_v3 = vshrl.u32 %v9859_v51, 16  ;;  %v1398_v10 = vshll.u32 %v9859_v51, 16  ;;  %1004 = vst.msk [vmem:[%s10242_s20 + $0x68] sm:$0xf] %vm280_vm1, %v972_v48 }
 0x18b   : > { %v10617_v7 = vpop.f32.mrf.mxu2  ;;  %v2620_v8 = vrot.slane %v2618_v0, 3  ;;  %v2623_v61 = vrot.slane %v2621_v1, 4  ;;  %1065 = vst.msk [vmem:[#allocation3 + $0xac] sm:$0xf] %vm280_vm1, %v972_v48 }
 0x18c   : > { %v874_v6 = vmax.f32 %v826_v59, 0.0  ;;  %v1397_v63 = vrot.slane %v1395_v3, 3  ;;  %v1400_v23 = vrot.slane %v1398_v10, 4  ;;  %v3330_v31 = vrot.slane %v10617_v7, 2  ;;  %v772_v59 = vpop.f32.mrf.mxu3 }
 0x18d   : > { %v10619_v9 = vpop.f32.mrf.mxu1  ;;  %v2624_v12 = vor.u32 %v2623_v61, %v2620_v8  ;;  %v3041_v41 = vrot.slane %v10617_v7, 1 }
 0x18e   : > { %v966_v11 = vpack.c.bf16 %v874_v6, %v874_v6  ;;  %14691 = vst [vmem:[#allocation6_spill] sm:$0xff] %v10619_v9  ;;  %v1761_v20 = vrot.slane %v10619_v9, 1  ;;  %v2051_v15 = vrot.slane %v10619_v9, 2  ;;  %v10637_v30 = vor.u32 %v1400_v23, %v1397_v63 }
 0x18f   : > { %v2625_v22 = vsel %vm1250_vm3, %v2615_v21, %v2624_v12  ;;  %v836_v23 = vadd.f32 %v10564_v47, %v772_v59 }
 0x190   : > { %998 = vst.msk [vmem:[%s10242_s20 + $0x50] sm:$0xf] %vm280_vm1, %v966_v11  ;;  %9300 = vmatmul.msk.bf16.gmra.mxu2 %vm586_vm2, %v2625_v22  ;;  %v2052_v26 = vsel %vm2025_vm6, %v2049_v19, %v2051_v15  ;;  %v1762_v27 = vsel %vm1735_vm5, %v1759_v18, %v1761_v20  ;;  %v1402_v44 = vsel %vm1250_vm3, %v1392_v46, %v10637_v30 }
 0x191   : > { %1056 = vst.msk [vmem:[#allocation3 + $0x88] sm:$0xf] %vm280_vm1, %v966_v11  ;;  %v749_v24 = vpop.f32.mrf.mxu0  ;;  %2147 = vrot.lane.b32.xlu1 %v2052_v26, %s10030_s22  ;;  %1857 = vrot.lane.b32.xlu2 %v1762_v27, %s10029_s21  ;;  %v884_v27 = vmax.f32 %v836_v23, 0.0 }
 0x192   : > { %v827_v28 = vadd.f32 %v10564_v47, %v749_v24 }
 0x193   : > { %v10635_v60 = vpop.f32.mrf.mxu2 }
 0x194   : > { %v875_v21 = vmax.f32 %v827_v28, 0.0  ;;  %14692 = vst [vmem:[#allocation7_spill] sm:$0xff] %v10635_v60  ;;  %v3043_v32 = vrot.slane %v10635_v60, 1  ;;  %v3332_v34 = vrot.slane %v10635_v60, 2  ;;  %v774_v28 = vpop.f32.mrf.mxu3 }
 0x195   : > { %v1597_v40 = vpop.f32.mrf.mxu1 }
 0x196   : > { %v967_v36 = vpack.c.bf16 %v875_v21, %v875_v21  ;;  %v2053_v42 = vrot.slane %v1597_v40, 2  ;;  %v3333_v43 = vsel %vm2025_vm6, %v3330_v31, %v3332_v34  ;;  %v3044_v51 = vsel %vm1735_vm5, %v3041_v41, %v3043_v32 }
 0x197   : > { %3428 = vrot.lane.b32.xlu0 %v3333_v43, %s10030_s22  ;;  %v1763_v46 = vrot.slane %v1597_v40, 1 }
 0x198   : > { %999 = vst.msk [vmem:[%s10242_s20 + $0x54] sm:$0xf] %vm280_vm1, %v967_v36  ;;  %v9883_v57 = vld [vmem:[#allocation3 + $0x84] sm:$0xff]  ;;  %9176 = vmatmul.msk.bf16.gmra.mxu1 %vm586_vm2, %v1402_v44  ;;  %v2054_v52 = vsel %vm2025_vm6, %v2051_v15, %v2053_v42 }
 0x199   : > { %1057 = vst.msk [vmem:[#allocation3 + $0x8c] sm:$0xf] %vm280_vm1, %v967_v36  ;;  %v752_v49 = vpop.f32.mrf.mxu0  ;;  %3139 = vrot.lane.b32.xlu1 %v3044_v51, %s10029_s21  ;;  %2149 = vrot.lane.b32.xlu2 %v2054_v52, %s10030_s22  ;;  %v2627_v53 = vshrl.u32 %v9883_v57, 16  ;;  %v2630_v56 = vshll.u32 %v9883_v57, 16  ;;  %v1764_v10 = vsel %vm1735_vm5, %v1761_v20, %v1763_v46 }
 0x19b   : > { %v2830_v0 = vpop.f32.mrf.mxu2  ;;  %v2629_v1 = vrot.slane %v2627_v53, 3  ;;  %v2632_v3 = vrot.slane %v2630_v56, 4 }
 0x19c   : > { %v3045_v4 = vrot.slane %v2830_v0, 1  ;;  %v3334_v6 = vrot.slane %v2830_v0, 2 }
 0x19d   : > { %v10659_v8 = vpop.f32.mrf.mxu1  ;;  %v2633_v61 = vor.u32 %v2632_v3, %v2629_v1 }
 0x19e   : > { %14693 = vst [vmem:[#allocation8_spill] sm:$0xff] %v10659_v8  ;;  %v3335_v22 = vsel %vm2025_vm6, %v3332_v34, %v3334_v6  ;;  %v3046_v63 = vsel %vm1735_vm5, %v3043_v32, %v3045_v4  ;;  %v973_v34 = vpack.c.bf16 %v884_v27, %v884_v27  ;;  %v1765_v41 = vrot.slane %v10659_v8, 1 }
 0x19f   : > { %1859 = vrot.lane.b32.xlu0 %v1764_v10, %s10029_s21  ;;  %v2634_v11 = vsel %vm1250_vm3, %v2624_v12, %v2633_v61  ;;  %v2055_v42 = vrot.slane %v10659_v8, 2  ;;  %v777_v10 = vpop.f32.mrf.mxu3 }
 0x1a0   : > { %v9860_v18 = vld [vmem:[#allocation3 + $0x88] sm:$0xff]  ;;  %9301 = vmatmul.msk.bf16.gmra.mxu2 %vm586_vm2, %v2634_v11  ;;  %1005 = vst.msk [vmem:[%s10242_s20 + $0x6c] sm:$0xf] %vm280_vm1, %v973_v34 }
 0x1a1   : > { %v9884_v19 = vld [vmem:[#allocation3 + $0x8c] sm:$0xff]  ;;  %v754_v15 = vpop.f32.mrf.mxu0  ;;  %3430 = vrot.lane.b32.xlu1 %v3335_v22, %s10030_s22  ;;  %3141 = vrot.lane.b32.xlu2 %v3046_v63, %s10029_s21  ;;  %v1404_v20 = vshrl.u32 %v9860_v18, 16  ;;  %v1407_v26 = vshll.u32 %v9860_v18, 16  ;;  %1066 = vst.msk [vmem:[#allocation3 + $0xb0] sm:$0xf] %vm280_vm1, %v973_v34 }
 0x1a2   : > { %v829_v24 = vadd.f32 %v10564_v47, %v754_v15  ;;  %v2636_v12 = vshrl.u32 %v9884_v19, 16  ;;  %v2639_v32 = vshll.u32 %v9884_v19, 16  ;;  %v838_v19 = vadd.f32 %v10564_v47, %v777_v10 }
 0x1a3   : > { %v10671_v21 = vpop.f32.mrf.mxu2  ;;  %v1406_v16 = vrot.slane %v1404_v20, 3  ;;  %v1409_v31 = vrot.slane %v1407_v26, 4 }
 0x1a4   : > { %v877_v29 = vmax.f32 %v829_v24, 0.0  ;;  %14694 = vst [vmem:[#allocation9_spill] sm:$0xff] %v10671_v21  ;;  %v2638_v48 = vrot.slane %v2636_v12, 3  ;;  %v2641_v49 = vrot.slane %v2639_v32, 4  ;;  %v3336_v0 = vrot.slane %v10671_v21, 2 }
 0x1a5   : > { %v10673_v40 = vpop.f32.mrf.mxu1  ;;  %v1410_v39 = vor.u32 %v1409_v31, %v1406_v16  ;;  %v3047_v11 = vrot.slane %v10671_v21, 1  ;;  %v886_v26 = vmax.f32 %v838_v19, 0.0 }
 0x1a6   : > { %v968_v36 = vpack.c.bf16 %v877_v29, %v877_v29  ;;  %14695 = vst [vmem:[#allocation10_spill] sm:$0xff] %v10673_v40  ;;  %v1767_v43 = vrot.slane %v10673_v40, 1  ;;  %v2057_v44 = vrot.slane %v10673_v40, 2  ;;  %v10693_v46 = vor.u32 %v2641_v49, %v2638_v48 }
 0x1a7   : > { %v1411_v57 = vsel %vm1250_vm3, %v10637_v30, %v1410_v39  ;;  %v974_v27 = vpack.c.bf16 %v886_v26, %v886_v26 }
 0x1a8   : > { %1000 = vst.msk [vmem:[%s10242_s20 + $0x58] sm:$0xf] %vm280_vm1, %v968_v36  ;;  %9177 = vmatmul.msk.bf16.gmra.mxu1 %vm586_vm2, %v1411_v57  ;;  %v2058_v52 = vsel %vm2025_vm6, %v2055_v42, %v2057_v44  ;;  %v1768_v53 = vsel %vm1735_vm5, %v1765_v41, %v1767_v43  ;;  %v2643_v22 = vsel %vm1250_vm3, %v2633_v61, %v10693_v46  ;;  %v779_v42 = vpop.f32.mrf.mxu3 }
 0x1a9   : > { %1059 = vst.msk [vmem:[#allocation3 + $0x94] sm:$0xf] %vm280_vm1, %v968_v36  ;;  %v757_v51 = vpop.f32.mrf.mxu0  ;;  %2153 = vrot.lane.b32.xlu0 %v2058_v52, %s10030_s22  ;;  %1863 = vrot.lane.b32.xlu1 %v1768_v53, %s10029_s21 }
 0x1aa   : > { %v830_v56 = vadd.f32 %v10564_v47, %v757_v51  ;;  %1006 = vst.msk [vmem:[%s10242_s20 + $0x70] sm:$0xf] %vm280_vm1, %v974_v27 }
 0x1ab   : > { %v10695_v59 = vpop.f32.mrf.mxu2  ;;  %1068 = vst.msk [vmem:[#allocation3 + $0xb8] sm:$0xf] %vm280_vm1, %v974_v27 }
 0x1ac   : > { %v878_v30 = vmax.f32 %v830_v56, 0.0  ;;  %14696 = vst [vmem:[#allocation11_spill] sm:$0xff] %v10695_v59  ;;  %v3049_v3 = vrot.slane %v10695_v59, 1  ;;  %v3338_v4 = vrot.slane %v10695_v59, 2 }
 0x1ad   : > { %v1604_v6 = vpop.f32.mrf.mxu1 }
 0x1ae   : > { %v969_v1 = vpack.c.bf16 %v878_v30, %v878_v30  ;;  %v2059_v18 = vrot.slane %v1604_v6, 2  ;;  %v3339_v15 = vsel %vm2025_vm6, %v3336_v0, %v3338_v4  ;;  %v3050_v24 = vsel %vm1735_vm5, %v3047_v11, %v3049_v3 }
 0x1af   : > { %3434 = vrot.lane.b32.xlu2 %v3339_v15, %s10030_s22  ;;  %v1769_v28 = vrot.slane %v1604_v6, 1 }
 0x1b0   : > { %1001 = vst.msk [vmem:[%s10242_s20 + $0x5c] sm:$0xf] %vm280_vm1, %v969_v1  ;;  %v9861_v63 = vld [vmem:[#allocation3 + $0x90] sm:$0xff]  ;;  %9302 = vmatmul.msk.bf16.gmra.mxu2 %vm586_vm2, %v2643_v22  ;;  %v2060_v20 = vsel %vm2025_vm6, %v2057_v44, %v2059_v18  ;;  %v839_v44 = vadd.f32 %v10564_v47, %v779_v42 }
 0x1b1   : > { %1060 = vst.msk [vmem:[#allocation3 + $0x98] sm:$0xf] %vm280_vm1, %v969_v1  ;;  %v759_v23 = vpop.f32.mrf.mxu0  ;;  %3145 = vrot.lane.b32.xlu0 %v3050_v24, %s10029_s21  ;;  %2155 = vrot.lane.b32.xlu1 %v2060_v20, %s10030_s22  ;;  %v1413_v12 = vshrl.u32 %v9861_v63, 16  ;;  %v1416_v61 = vshll.u32 %v9861_v63, 16  ;;  %v1770_v57 = vsel %vm1735_vm5, %v1767_v43, %v1769_v28 }
 0x1b2   : > { %v887_v30 = vmax.f32 %v839_v44, 0.0 }
 0x1b3   : > { %v1415_v29 = vrot.slane %v1413_v12, 3  ;;  %v1418_v16 = vrot.slane %v1416_v61, 4  ;;  %v2838_v31 = vpop.f32.mrf.mxu2 }
 0x1b4   : > { %v3051_v32 = vrot.slane %v2838_v31, 1  ;;  %v3340_v34 = vrot.slane %v2838_v31, 2  ;;  %v975_v6 = vpack.c.bf16 %v887_v30, %v887_v30 }
 0x1b5   : > { %v10716_v36 = vpop.f32.mrf.mxu1  ;;  %v1419_v41 = vor.u32 %v1418_v16, %v1415_v29 }
 0x1b6   : > { %14697 = vst [vmem:[#allocation12_spill] sm:$0xff] %v10716_v36  ;;  %v3341_v53 = vsel %vm2025_vm6, %v3338_v4, %v3340_v34  ;;  %v3052_v56 = vsel %vm1735_vm5, %v3049_v3, %v3051_v32  ;;  %v1771_v3 = vrot.slane %v10716_v36, 1  ;;  %v2061_v63 = vrot.slane %v10716_v36, 2 }
 0x1b7   : > { %v1420_v48 = vsel %vm1250_vm3, %v1410_v39, %v1419_v41  ;;  %1865 = vrot.lane.b32.xlu2 %v1770_v57, %s10029_s21  ;;  %1007 = vst.msk [vmem:[%s10242_s20 + $0x74] sm:$0xf] %vm280_vm1, %v975_v6 }
 0x1b8   : > { %v9885_v49 = vld [vmem:[#allocation3 + $0x94] sm:$0xff]  ;;  %9178 = vmatmul.msk.bf16.gmra.mxu1 %vm586_vm2, %v1420_v48  ;;  %1069 = vst.msk [vmem:[#allocation3 + $0xbc] sm:$0xf] %vm280_vm1, %v975_v6 }
 0x1b9   : > { %v9862_v51 = vld [vmem:[#allocation3 + $0x98] sm:$0xff]  ;;  %v762_v52 = vpop.f32.mrf.mxu0  ;;  %3436 = vrot.lane.b32.xlu0 %v3341_v53, %s10030_s22  ;;  %3147 = vrot.lane.b32.xlu1 %v3052_v56, %s10029_s21  ;;  %v2645_v39 = vshrl.u32 %v9885_v49, 16  ;;  %v2648_v43 = vshll.u32 %v9885_v49, 16 }
 0x1ba   : > { %v832_v0 = vadd.f32 %v10564_v47, %v762_v52  ;;  %v1422_v1 = vshrl.u32 %v9862_v51, 16  ;;  %v1425_v19 = vshll.u32 %v9862_v51, 16 }
 0x1bb   : > { %v2647_v11 = vrot.slane %v2645_v39, 3  ;;  %v2650_v18 = vrot.slane %v2648_v43, 4  ;;  %v10729_v15 = vpop.f32.mrf.mxu2 }
 0x1bc   : > { %v880_v10 = vmax.f32 %v832_v0, 0.0  ;;  %14698 = vst [vmem:[#allocation13_spill] sm:$0xff] %v10729_v15  ;;  %v1424_v26 = vrot.slane %v1422_v1, 3  ;;  %v1427_v12 = vrot.slane %v1425_v19, 4  ;;  %v3342_v42 = vrot.slane %v10729_v15, 2 }
 0x1bd   : > { %v10734_v22 = vpop.f32.mrf.mxu1  ;;  %v2651_v20 = vor.u32 %v2650_v18, %v2647_v11  ;;  %v3053_v49 = vrot.slane %v10729_v15, 1 }
 0x1be   : > { %v970_v4 = vpack.c.bf16 %v880_v10, %v880_v10  ;;  %14699 = vst [vmem:[#allocation14_spill] sm:$0xff] %v10734_v22  ;;  %v1773_v23 = vrot.slane %v10734_v22, 1  ;;  %v2063_v24 = vrot.slane %v10734_v22, 2  ;;  %v1428_v32 = vor.u32 %v1427_v12, %v1424_v26 }
 0x1bf   : > { %v2652_v27 = vsel %vm1250_vm3, %v10693_v46, %v2651_v20 }
 0x1c0   : > { %1002 = vst.msk [vmem:[%s10242_s20 + $0x60] sm:$0xf] %vm280_vm1, %v970_v4  ;;  %v2064_v28 = vsel %vm2025_vm6, %v2061_v63, %v2063_v24  ;;  %v1774_v29 = vsel %vm1735_vm5, %v1771_v3, %v1773_v23  ;;  %9303 = vmatmul.msk.bf16.gmra.mxu2 %vm586_vm2, %v2652_v27  ;;  %v1429_v53 = vsel %vm1250_vm3, %v1419_v41, %v1428_v32 }
 0x1c1   : > { %1062 = vst.msk [vmem:[#allocation3 + $0xa0] sm:$0xf] %vm280_vm1, %v970_v4  ;;  %v764_v61 = vpop.f32.mrf.mxu0  ;;  %2159 = vrot.lane.b32.xlu2 %v2064_v28, %s10030_s22  ;;  %1869 = vrot.lane.b32.xlu0 %v1774_v29, %s10029_s21 }
 0x1c2   : > { %v833_v16 = vadd.f32 %v10564_v47, %v764_v61 }
 0x1c3   : > { %v10751_v34 = vpop.f32.mrf.mxu2 }
 0x1c4   : > { %v881_v31 = vmax.f32 %v833_v16, 0.0  ;;  %14700 = vst [vmem:[#allocation15_spill] sm:$0xff] %v10751_v34  ;;  %v3055_v44 = vrot.slane %v10751_v34, 1  ;;  %v3344_v57 = vrot.slane %v10751_v34, 2 }
 0x1c5   : > { %v1612_v48 = vpop.f32.mrf.mxu1  ;;  %v782_v18 = vpop.f32.mrf.mxu3 }
 0x1c6   : > { %v971_v46 = vpack.c.bf16 %v881_v31, %v881_v31  ;;  %v2065_v51 = vrot.slane %v1612_v48, 2  ;;  %v3345_v52 = vsel %vm2025_vm6, %v3342_v42, %v3344_v57  ;;  %v3056_v30 = vsel %vm1735_vm5, %v3053_v49, %v3055_v44 }
 0x1c7   : > { %3440 = vrot.lane.b32.xlu1 %v3345_v52, %s10030_s22  ;;  %v1775_v41 = vrot.slane %v1612_v48, 1 }
 0x1c8   : > { %1003 = vst.msk [vmem:[%s10242_s20 + $0x64] sm:$0xf] %vm280_vm1, %v971_v46  ;;  %v9886_v56 = vld [vmem:[#allocation3 + $0x9c] sm:$0xff]  ;;  %9179 = vmatmul.msk.bf16.gmra.mxu1 %vm586_vm2, %v1429_v53  ;;  %v2066_v0 = vsel %vm2025_vm6, %v2063_v24, %v2065_v51 }
 0x1c9   : > { %1063 = vst.msk [vmem:[#allocation3 + $0xa4] sm:$0xf] %vm280_vm1, %v971_v46  ;;  %v10766_v39 = vpop.f32.mrf.mxu0  ;;  %3151 = vrot.lane.b32.xlu2 %v3056_v30, %s10029_s21  ;;  %v2654_v43 = vshrl.u32 %v9886_v56, 16  ;;  %v2657_v1 = vshll.u32 %v9886_v56, 16  ;;  %2161 = vrot.lane.b32.xlu0 %v2066_v0, %s10030_s22  ;;  %v1776_v24 = vsel %vm1735_vm5, %v1773_v23, %v1775_v41 }
 0x1ca   : > { %14701 = vst [vmem:[#allocation16_spill] sm:$0xff] %v10766_v39  ;;  %v6162_v61 = vrot.slane %v10766_v39, 2  ;;  %v5954_v42 = vrot.slane %v10766_v39, 1 }
 0x1cb   : > { %v2656_v6 = vrot.slane %v2654_v43, 3  ;;  %v2659_v10 = vrot.slane %v2657_v1, 4  ;;  %v2845_v11 = vpop.f32.mrf.mxu2 }
 0x1cc   : > { %v3057_v19 = vrot.slane %v2845_v11, 1  ;;  %v3346_v3 = vrot.slane %v2845_v11, 2  ;;  %v9864_v11 = vld [vmem:[#allocation3 + $0xa8] sm:$0xff] }
 0x1cd   : > { %v10770_v4 = vpop.f32.mrf.mxu1  ;;  %v2660_v63 = vor.u32 %v2659_v10, %v2656_v6  ;;  %v784_v51 = vpop.f32.mrf.mxu3 }
 0x1ce   : > { %14702 = vst [vmem:[#allocation17_spill] sm:$0xff] %v10770_v4  ;;  %v3347_v27 = vsel %vm2025_vm6, %v3344_v57, %v3346_v3  ;;  %v3058_v16 = vsel %vm1735_vm5, %v3055_v44, %v3057_v19  ;;  %v841_v43 = vadd.f32 %v10564_v47, %v784_v51 }
 0x1cf   : > { %v2661_v26 = vsel %vm1250_vm3, %v2651_v20, %v2660_v63  ;;  %1871 = vrot.lane.b32.xlu1 %v1776_v24, %s10029_s21 }
 0x1d0   : > { %v9863_v12 = vld [vmem:[#allocation3 + $0xa0] sm:$0xff]  ;;  %9304 = vmatmul.msk.bf16.gmra.mxu2 %vm586_vm2, %v2661_v26  ;;  %v889_v41 = vmax.f32 %v841_v43, 0.0 }
 0x1d1   : > { %v10777_v28 = vpop.f32.mrf.mxu0  ;;  %v9887_v29 = vld [vmem:[#allocation3 + $0xa4] sm:$0xff]  ;;  %3442 = vrot.lane.b32.xlu2 %v3347_v27, %s10030_s22  ;;  %v1431_v31 = vshrl.u32 %v9863_v12, 16  ;;  %v1434_v20 = vshll.u32 %v9863_v12, 16  ;;  %3153 = vrot.lane.b32.xlu0 %v3058_v16, %s10029_s21  ;;  %v1440_v12 = vshrl.u32 %v9864_v11, 16  ;;  %v2067_v27 = vrot.slane %v10770_v4, 2 }
 0x1d2   : > { %14703 = vst [vmem:[#allocation18_spill] sm:$0xff] %v10777_v28  ;;  %v14526_v23 = vrot.slane %v10777_v28, 2  ;;  %v14525_v46 = vrot.slane %v10777_v28, 1  ;;  %v2663_v52 = vshrl.u32 %v9887_v29, 16  ;;  %v2666_v53 = vshll.u32 %v9887_v29, 16 }
 0x1d3   : > { %v1433_v57 = vrot.slane %v1431_v31, 3  ;;  %v1436_v48 = vrot.slane %v1434_v20, 4  ;;  %v10786_v49 = vpop.f32.mrf.mxu2  ;;  %v976_v18 = vpack.c.bf16 %v889_v41, %v889_v41 }
 0x1d4   : > { %14704 = vst [vmem:[#allocation19_spill] sm:$0xff] %v10786_v49  ;;  %v6164_v44 = vsel %vm2025_vm6, %v6162_v61, %v14526_v23  ;;  %v5956_v0 = vsel %vm1735_vm5, %v5954_v42, %v14525_v46  ;;  %v2665_v6 = vrot.slane %v2663_v52, 3  ;;  %v2668_v10 = vrot.slane %v2666_v53, 4  ;;  %v10910_v46 = vpop.permute.xlu0 %1833 }
 0x1d5   : > { %v10788_v56 = vpop.f32.mrf.mxu1  ;;  %v1437_v30 = vor.u32 %v1436_v48, %v1433_v57  ;;  %1008 = vst.msk [vmem:[%s10242_s20 + $0x78] sm:$0xf] %vm280_vm1, %v976_v18  ;;  %v787_v26 = vpop.f32.mrf.mxu3  ;;  %v1443_v61 = vshll.u32 %v9864_v11, 16  ;;  %v3348_v29 = vrot.slane %v10786_v49, 2  ;;  %v1777_v42 = vrot.slane %v10770_v4, 1 }
 0x1d6   : > { %14705 = vst [vmem:[#allocation20_spill] sm:$0xff] %v10788_v56  ;;  %v2069_v19 = vrot.slane %v10788_v56, 2  ;;  %v1779_v3 = vrot.slane %v10788_v56, 1  ;;  %v842_v20 = vadd.f32 %v10564_v47, %v787_v26  ;;  %v3059_v11 = vrot.slane %v10786_v49, 1 }
 0x1d7   : > { %v1438_v1 = vsel %vm1250_vm3, %v1428_v32, %v1437_v30  ;;  %6242 = vrot.lane.b32.xlu1 %v6164_v44, %s10030_s22  ;;  %v10807_v32 = vor.u32 %v2668_v10, %v2665_v6  ;;  %1071 = vst.msk [vmem:[#allocation3 + $0xc4] sm:$0xf] %vm280_vm1, %v976_v18  ;;  %v1442_v44 = vrot.slane %v1440_v12, 3 }
 0x1d8   : > { %9180 = vmatmul.msk.bf16.vlgmr.msrb.gmra.mxu3 %vm586_vm2, %v1438_v1  ;;  %v2070_v48 = vsel %vm2025_vm6, %v2067_v27, %v2069_v19  ;;  %v890_v51 = vmax.f32 %v842_v20, 0.0  ;;  %v1780_v53 = vsel %vm1735_vm5, %v1777_v42, %v1779_v3 }
 0x1d9   : > { %6034 = vrot.lane.b32.xlu2 %v5956_v0, %s10029_s21  ;;  %v2670_v52 = vsel %vm1250_vm3, %v2660_v63, %v10807_v32  ;;  %v1445_v0 = vrot.slane %v1443_v61, 4 }
 0x1da   : > { %v977_v47 = vpack.c.bf16 %v890_v51, %v890_v51 }
 0x1db   : > { %v10803_v24 = vpop.f32.mrf.mxu2  ;;  %v1446_v10 = vor.u32 %v1445_v0, %v1442_v44 }
 0x1dc   : > { %14706 = vst [vmem:[#allocation21_spill] sm:$0xff] %v10803_v24  ;;  %v3350_v16 = vrot.slane %v10803_v24, 2  ;;  %v3061_v43 = vrot.slane %v10803_v24, 1 }
 0x1dd   : > { %v1619_v31 = vpop.f32.mrf.mxu1  ;;  %1009 = vst.msk [vmem:[%s10242_s20 + $0x7c] sm:$0xf] %vm280_vm1, %v977_v47  ;;  %v789_v63 = vpop.f32.mrf.mxu3  ;;  %v1447_v61 = vsel %vm1250_vm3, %v1437_v30, %v1446_v10 }
 0x1de   : > { %v3351_v57 = vsel %vm2025_vm6, %v3348_v29, %v3350_v16  ;;  %v1781_v1 = vrot.slane %v1619_v31, 1  ;;  %v2071_v41 = vrot.slane %v1619_v31, 2  ;;  %1072 = vst.msk [vmem:[#allocation3 + $0xc8] sm:$0xf] %vm280_vm1, %v977_v47  ;;  %v3062_v12 = vsel %vm1735_vm5, %v3059_v11, %v3061_v43  ;;  %v9865_v29 = vld [vmem:[#allocation3 + $0xb0] sm:$0xff] }
 0x1df   : > { %3446 = vrot.lane.b32.xlu0 %v3351_v57, %s10030_s22  ;;  %2165 = vrot.lane.b32.xlu1 %v2070_v48, %s10030_s22  ;;  %v1452_v57 = vshll.u32 %v9865_v29, 16 }
 0x1e0   : > { %9305 = vmatmul.msk.bf16.gmra.mxu2 %vm586_vm2, %v2670_v52  ;;  %v1782_v26 = vsel %vm1735_vm5, %v1779_v3, %v1781_v1  ;;  %v2072_v27 = vsel %vm2025_vm6, %v2069_v19, %v2071_v41  ;;  %v1449_v3 = vshrl.u32 %v9865_v29, 16  ;;  %v9866_v29 = vld [vmem:[#allocation3 + $0xb8] sm:$0xff] }
 0x1e1   : > { %1875 = vrot.lane.b32.xlu2 %v1780_v53, %s10029_s21  ;;  %v1454_v0 = vrot.slane %v1452_v57, 4 }
 0x1e2   : > { %v1451_v44 = vrot.slane %v1449_v3, 3 }
 0x1e3   : > { %v2853_v6 = vpop.f32.mrf.mxu2 }
 0x1e4   : > { %v3352_v31 = vrot.slane %v2853_v6, 2  ;;  %v3063_v20 = vrot.slane %v2853_v6, 1  ;;  %v1455_v41 = vor.u32 %v1454_v0, %v1451_v44 }
 0x1e5   : > { %v10829_v18 = vpop.f32.mrf.mxu1 }
 0x1e6   : > { %14707 = vst [vmem:[#allocation22_spill] sm:$0xff] %v10829_v18  ;;  %v2073_v51 = vrot.slane %v10829_v18, 2  ;;  %v3353_v30 = vsel %vm2025_vm6, %v3350_v16, %v3352_v31  ;;  %v3064_v53 = vsel %vm1735_vm5, %v3061_v43, %v3063_v20  ;;  %v1783_v6 = vrot.slane %v10829_v18, 1  ;;  %v10866_v20 = vpop.permute.xlu1 %3121 }
 0x1e7   : > { %1877 = vrot.lane.b32.xlu0 %v1782_v26, %s10029_s21  ;;  %3157 = vrot.lane.b32.xlu1 %v3062_v12, %s10029_s21 }
 0x1e8   : > { %9181 = vmatmul.msk.bf16.gmra.mxu3 %vm586_vm2, %v1447_v61  ;;  %v1456_v61 = vsel %vm1250_vm3, %v1446_v10, %v1455_v41 }
 0x1e9   : > { %2167 = vrot.lane.b32.xlu2 %v2072_v27, %s10030_s22 }
 0x1eb   : > { %v10839_v42 = vpop.f32.mrf.mxu2 }
 0x1ec   : > { %14708 = vst [vmem:[#allocation23_spill] sm:$0xff] %v10839_v42  ;;  %v3065_v43 = vrot.slane %v10839_v42, 1  ;;  %v3354_v26 = vrot.slane %v10839_v42, 2 }
 0x1ed   : > { %v10841_v48 = vpop.f32.mrf.mxu1 }
 0x1ee   : > { %14709 = vst [vmem:[#allocation24_spill] sm:$0xff] %v10841_v48  ;;  %v2075_v52 = vrot.slane %v10841_v48, 2  ;;  %v1785_v47 = vrot.slane %v10841_v48, 1 }
 0x1ef   : > { %3448 = vrot.lane.b32.xlu1 %v3353_v30, %s10030_s22  ;;  %v1461_v30 = vshll.u32 %v9866_v29, 16 }
 0x1f0   : > { %v2076_v19 = vsel %vm2025_vm6, %v2073_v51, %v2075_v52  ;;  %v1786_v12 = vsel %vm1735_vm5, %v1783_v6, %v1785_v47  ;;  %v1458_v51 = vshrl.u32 %v9866_v29, 16 }
 0x1f1   : > { %2171 = vrot.lane.b32.xlu0 %v2076_v19, %s10030_s22  ;;  %3159 = vrot.lane.b32.xlu2 %v3064_v53, %s10029_s21 }
 0x1f2   : > { %v1460_v6 = vrot.slane %v1458_v51, 3 }
 0x1f3   : > { %v10852_v1 = vpop.f32.mrf.mxu2 }
 0x1f4   : > { %14710 = vst [vmem:[#allocation25_spill] sm:$0xff] %v10852_v1  ;;  %v3067_v16 = vrot.slane %v10852_v1, 1  ;;  %v3356_v63 = vrot.slane %v10852_v1, 2 }
 0x1f5   : > { %v1627_v11 = vpop.f32.mrf.mxu1 }
 0x1f6   : > { %v3068_v27 = vsel %vm1735_vm5, %v3065_v43, %v3067_v16  ;;  %v3357_v31 = vsel %vm2025_vm6, %v3354_v26, %v3356_v63  ;;  %v2077_v3 = vrot.slane %v1627_v11, 2  ;;  %v1787_v19 = vrot.slane %v1627_v11, 1  ;;  %v10874_v26 = vpop.permute.xlu2 %2123 }
 0x1f7   : > { %1881 = vrot.lane.b32.xlu1 %v1786_v12, %s10029_s21  ;;  %v1463_v43 = vrot.slane %v1461_v30, 4 }
 0x1f8   : > { %9182 = vmatmul.msk.bf16.gmra.mxu3 %vm586_vm2, %v1456_v61  ;;  %v2078_v44 = vsel %vm2025_vm6, %v2075_v52, %v2077_v3  ;;  %v1788_v12 = vsel %vm1735_vm5, %v1785_v47, %v1787_v19  ;;  %v10879_v61 = vpop.permute.xlu1 %1839 }
 0x1f9   : > { %3163 = vrot.lane.b32.xlu0 %v3068_v27, %s10029_s21  ;;  %3452 = vrot.lane.b32.xlu2 %v3357_v31, %s10030_s22  ;;  %v1464_v52 = vor.u32 %v1463_v43, %v1460_v6 }
 0x1fb   : > { %v2860_v57 = vpop.f32.mrf.mxu2 }
 0x1fc   : > { %v3358_v53 = vrot.slane %v2860_v57, 2  ;;  %v3069_v11 = vrot.slane %v2860_v57, 1  ;;  %v1465_v57 = vsel %vm1250_vm3, %v1455_v41, %v1464_v52 }
 0x1fd   : > { %v10869_v10 = vpop.f32.mrf.mxu1 }
 0x1fe   : > { %14711 = vst [vmem:[#allocation26_spill] sm:$0xff] %v10869_v10  ;;  %v3359_v0 = vsel %vm2025_vm6, %v3356_v63, %v3358_v53  ;;  %v1789_v63 = vrot.slane %v10869_v10, 1  ;;  %v2079_v31 = vrot.slane %v10869_v10, 2  ;;  %v3070_v47 = vsel %vm1735_vm5, %v3067_v16, %v3069_v11  ;;  %v9867_v53 = vld [vmem:[#allocation3 + $0xc0] sm:$0xff] }
 0x1ff   : > { %2173 = vrot.lane.b32.xlu1 %v2078_v44, %s10030_s22  ;;  %v10894_v44 = vpop.permute.xlu2 %2131  ;;  %v1467_v16 = vshrl.u32 %v9867_v53, 16  ;;  %v1470_v6 = vshll.u32 %v9867_v53, 16 }
 0x201   : > { %3454 = vrot.lane.b32.xlu0 %v3359_v0, %s10030_s22  ;;  %1883 = vrot.lane.b32.xlu2 %v1788_v12, %s10029_s21  ;;  %v1472_v53 = vrot.slane %v1470_v6, 4 }
 0x203   : > { %v10881_v27 = vpop.f32.mrf.mxu2 }
 0x204   : > { %14712 = vst [vmem:[#allocation27_spill] sm:$0xff] %v10881_v27  ;;  %v3360_v43 = vrot.slane %v10881_v27, 2 }
 0x205   : > { %v10883_v29 = vpop.f32.mrf.mxu1 }
 0x206   : > { %14713 = vst [vmem:[#allocation28_spill] sm:$0xff] %v10883_v29  ;;  %v1791_v3 = vrot.slane %v10883_v29, 1  ;;  %v2081_v51 = vrot.slane %v10883_v29, 2 }
 0x207   : > { %3165 = vrot.lane.b32.xlu1 %v3070_v47, %s10029_s21  ;;  %v3071_v47 = vrot.slane %v10881_v27, 1  ;;  %v10915_v39 = vpop.permute.xlu2 %3123  ;;  %v9888_v27 = vld [vmem:[#allocation3 + $0xac] sm:$0xff] }
 0x208   : > { %v1792_v30 = vsel %vm1735_vm5, %v1789_v63, %v1791_v3  ;;  %v2082_v19 = vsel %vm2025_vm6, %v2079_v31, %v2081_v51  ;;  %9183 = vmatmul.msk.bf16.gmra.mxu3 %vm586_vm2, %v1465_v57  ;;  %v10904_v63 = vpop.permute.xlu1 %2129  ;;  %v2672_v18 = vshrl.u32 %v9888_v27, 16  ;;  %v2675_v28 = vshll.u32 %v9888_v27, 16 }
 0x209   : > { %1887 = vrot.lane.b32.xlu0 %v1792_v30, %s10029_s21  ;;  %2177 = vrot.lane.b32.xlu2 %v2082_v19, %s10030_s22  ;;  %v1469_v19 = vrot.slane %v1467_v16, 3 }
 0x20b   : > { %v10899_v0 = vpop.f32.mrf.mxu2  ;;  %v1473_v10 = vor.u32 %v1472_v53, %v1469_v19 }
 0x20c   : > { %14714 = vst [vmem:[#allocation29_spill] sm:$0xff] %v10899_v0  ;;  %v3073_v41 = vrot.slane %v10899_v0, 1  ;;  %v3362_v12 = vrot.slane %v10899_v0, 2 }
 0x20d   : > { %v1634_v11 = vpop.f32.mrf.mxu1  ;;  %v1474_v6 = vsel %vm1250_vm3, %v1464_v52, %v1473_v10 }
 0x20e   : > { %v2083_v31 = vrot.slane %v1634_v11, 2  ;;  %v3363_v57 = vsel %vm2025_vm6, %v3360_v43, %v3362_v12  ;;  %v3074_v23 = vsel %vm1735_vm5, %v3071_v47, %v3073_v41  ;;  %v1793_v29 = vrot.slane %v1634_v11, 1 }
 0x20f   : > { %3458 = vrot.lane.b32.xlu1 %v3363_v57, %s10030_s22 }
 0x210   : > { %v2084_v30 = vsel %vm2025_vm6, %v2081_v51, %v2083_v31  ;;  %v1794_v51 = vsel %vm1735_vm5, %v1791_v3, %v1793_v29  ;;  %v10920_v16 = vpop.permute.xlu1 %1841  ;;  %v9312_v29 = vld [vmem:[%s14519_s2 + $0x4] sm:$0x3] }
 0x211   : > { %2179 = vrot.lane.b32.xlu0 %v2084_v30, %s10030_s22  ;;  %3169 = vrot.lane.b32.xlu2 %v3074_v23, %s10029_s21  ;;  %v10925_v23 = vpop.permute.xlu0 %1835  ;;  %v4079_v3 = vsel %vm659_vm0, %v9312_v29, 0 }
 0x212   : > { %4088 = vmatpush.bf16.msrb.mxu3 %v4079_v3 }
 0x213   : > { %v2868_v0 = vpop.f32.mrf.mxu2 }
 0x214   : > { %v3075_v43 = vrot.slane %v2868_v0, 1  ;;  %v3364_v48 = vrot.slane %v2868_v0, 2 }
 0x215   : > { %v10917_v57 = vpop.f32.mrf.mxu1 }
 0x216   : > { %14715 = vst [vmem:[#allocation30_spill] sm:$0xff] %v10917_v57  ;;  %v3076_v31 = vsel %vm1735_vm5, %v3073_v41, %v3075_v43  ;;  %v3365_v0 = vsel %vm2025_vm6, %v3362_v12, %v3364_v48  ;;  %v10937_v41 = vpop.permute.xlu2 %1845  ;;  %v1795_v47 = vrot.slane %v10917_v57, 1  ;;  %v2085_v30 = vrot.slane %v10917_v57, 2 }
 0x217   : > { %1889 = vrot.lane.b32.xlu1 %v1794_v51, %s10029_s21 }
 0x218   : > { %9184 = vmatmul.msk.bf16.gmra.mxu3 %vm586_vm2, %v1474_v6  ;;  %v10948_v43 = vpop.permute.xlu1 %3412 }
 0x219   : > { %3171 = vrot.lane.b32.xlu0 %v3076_v31, %s10029_s21  ;;  %3460 = vrot.lane.b32.xlu2 %v3365_v0, %s10030_s22  ;;  %v10951_v51 = vpop.permute.xlu0 %2125 }
 0x21b   : > { %v10935_v52 = vpop.f32.mrf.mxu2 }
 0x21c   : > { %14716 = vst [vmem:[#allocation31_spill] sm:$0xff] %v10935_v52  ;;  %v3366_v31 = vrot.slane %v10935_v52, 2 }
 0x21d   : > { %v10939_v11 = vpop.f32.mrf.mxu1 }
 0x21e   : > { %14717 = vst [vmem:[#allocation32_spill] sm:$0xff] %v10939_v11  ;;  %v1797_v48 = vrot.slane %v10939_v11, 1  ;;  %v2087_v12 = vrot.slane %v10939_v11, 2  ;;  %v10959_v11 = vpop.permute.xlu2 %3416 }
 0x220   : > { %v2088_v19 = vsel %vm2025_vm6, %v2085_v30, %v2087_v12  ;;  %v1798_v53 = vsel %vm1735_vm5, %v1795_v47, %v1797_v48  ;;  %v3077_v30 = vrot.slane %v10935_v52, 1  ;;  %v10968_v52 = vpop.permute.xlu1 %2137 }
 0x221   : > { %2183 = vrot.lane.b32.xlu1 %v2088_v19, %s10030_s22  ;;  %1893 = vrot.lane.b32.xlu2 %v1798_v53, %s10029_s21 }
 0x223   : > { %v10953_v6 = vpop.f32.mrf.mxu2 }
 0x224   : > { %14718 = vst [vmem:[#allocation33_spill] sm:$0xff] %v10953_v6  ;;  %v3079_v0 = vrot.slane %v10953_v6, 1  ;;  %v3368_v29 = vrot.slane %v10953_v6, 2 }
 0x225   : > { %v1642_v3 = vpop.f32.mrf.mxu1 }
 0x226   : > { %v2089_v47 = vrot.slane %v1642_v3, 2  ;;  %v3369_v19 = vsel %vm2025_vm6, %v3366_v31, %v3368_v29  ;;  %v3080_v53 = vsel %vm1735_vm5, %v3077_v30, %v3079_v0  ;;  %v1799_v6 = vrot.slane %v1642_v3, 1  ;;  %v10970_v31 = vpop.permute.xlu0 %3410  ;;  %v10977_v3 = vpop.permute.xlu2 %1847 }
 0x227   : > { %3464 = vrot.lane.b32.xlu0 %v3369_v19, %s10030_s22 }
 0x228   : > { %v2090_v57 = vsel %vm2025_vm6, %v2087_v12, %v2089_v47  ;;  %9185 = vmatmul.msk.bf16.gmra.mxu3 %vm586_vm2, %v1473_v10  ;;  %v1800_v12 = vsel %vm1735_vm5, %v1797_v48, %v1799_v6  ;;  %v2674_v47 = vrot.slane %v2672_v18, 3  ;;  %v10988_v6 = vpop.permute.xlu1 %3129 }
 0x229   : > { %3175 = vrot.lane.b32.xlu1 %v3080_v53, %s10029_s21  ;;  %2185 = vrot.lane.b32.xlu2 %v2090_v57, %s10030_s22  ;;  %v2677_v57 = vrot.slane %v2675_v28, 4 }
 0x22b   : > { %v2875_v1 = vpop.f32.mrf.mxu2 }
 0x22c   : > { %v3081_v19 = vrot.slane %v2875_v1, 1  ;;  %v3370_v56 = vrot.slane %v2875_v1, 2  ;;  %v2678_v1 = vor.u32 %v2677_v57, %v2674_v47 }
 0x22d   : > { %v10972_v30 = vpop.f32.mrf.mxu1 }
 0x22e   : > { %14719 = vst [vmem:[#allocation34_spill] sm:$0xff] %v10972_v30  ;;  %v3371_v10 = vsel %vm2025_vm6, %v3368_v29, %v3370_v56  ;;  %v3082_v27 = vsel %vm1735_vm5, %v3079_v0, %v3081_v19  ;;  %v10984_v42 = vpop.permute.xlu0 %2135  ;;  %v1801_v56 = vrot.slane %v10972_v30, 1  ;;  %v2091_v28 = vrot.slane %v10972_v30, 2  ;;  %v11001_v47 = vpop.permute.xlu2 %2141 }
 0x22f   : > { %1895 = vrot.lane.b32.xlu0 %v1800_v12, %s10029_s21  ;;  %v2679_v0 = vsel %vm1250_vm3, %v10807_v32, %v2678_v1 }
 0x231   : > { %3466 = vrot.lane.b32.xlu1 %v3371_v10, %s10030_s22  ;;  %3177 = vrot.lane.b32.xlu2 %v3082_v27, %s10029_s21  ;;  %v9889_v10 = vld [vmem:[#allocation3 + $0xb4] sm:$0xff] }
 0x232   : > { %v2681_v27 = vshrl.u32 %v9889_v10, 16 }
 0x233   : > { %v10982_v53 = vpop.f32.mrf.mxu2 }
 0x234   : > { %14720 = vst [vmem:[#allocation35_spill] sm:$0xff] %v10982_v53  ;;  %v3372_v30 = vrot.slane %v10982_v53, 2  ;;  %v3083_v4 = vrot.slane %v10982_v53, 1  ;;  %v2683_v49 = vrot.slane %v2681_v27, 3 }
 0x235   : > { %v10986_v48 = vpop.f32.mrf.mxu1 }
 0x236   : > { %14721 = vst [vmem:[#allocation36_spill] sm:$0xff] %v10986_v48  ;;  %v1803_v18 = vrot.slane %v10986_v48, 1  ;;  %v2093_v29 = vrot.slane %v10986_v48, 2  ;;  %v2684_v48 = vshll.u32 %v9889_v10, 16  ;;  %v11009_v24 = vpop.permute.xlu0 %3127  ;;  %v11019_v40 = vpop.permute.xlu2 %3133 }
 0x238   : > { %v2094_v19 = vsel %vm2025_vm6, %v2091_v28, %v2093_v29  ;;  %v1804_v12 = vsel %vm1735_vm5, %v1801_v56, %v1803_v18  ;;  %9306 = vmatmul.msk.bf16.vlgmr.msra.gmra.mxu3 %vm586_vm2, %v2679_v0  ;;  %v2686_v34 = vrot.slane %v2684_v48, 4 }
 0x239   : > { %2189 = vrot.lane.b32.xlu0 %v2094_v19, %s10030_s22  ;;  %1899 = vrot.lane.b32.xlu1 %v1804_v12, %s10029_s21  ;;  %v11012_v12 = vpop.permute.xlu1 %3422 }
 0x23a   : > { %v2687_v36 = vor.u32 %v2686_v34, %v2683_v49 }
 0x23b   : > { %v11003_v57 = vpop.f32.mrf.mxu2 }
 0x23c   : > { %14722 = vst [vmem:[#allocation37_spill] sm:$0xff] %v11003_v57  ;;  %v3085_v32 = vrot.slane %v11003_v57, 1  ;;  %v3374_v28 = vrot.slane %v11003_v57, 2 }
 0x23d   : > { %v1649_v56 = vpop.f32.mrf.mxu1 }
 0x23e   : > { %v2095_v0 = vrot.slane %v1649_v56, 2  ;;  %v3375_v19 = vsel %vm2025_vm6, %v3372_v30, %v3374_v28  ;;  %v3086_v10 = vsel %vm1735_vm5, %v3083_v4, %v3085_v32  ;;  %v1805_v57 = vrot.slane %v1649_v56, 1  ;;  %v11027_v27 = vpop.permute.xlu0 %3418 }
 0x23f   : > { %3470 = vrot.lane.b32.xlu2 %v3375_v19, %s10030_s22  ;;  %v2688_v4 = vsel %vm1250_vm3, %v2678_v1, %v2687_v36 }
 0x240   : > { %v2096_v22 = vsel %vm2025_vm6, %v2093_v29, %v2095_v0  ;;  %v1806_v19 = vsel %vm1735_vm5, %v1803_v18, %v1805_v57  ;;  %v9890_v29 = vld [vmem:[#allocation3 + $0xbc] sm:$0xff]  ;;  %v11043_v0 = vpop.permute.xlu2 %3424 }
 0x241   : > { %3181 = vrot.lane.b32.xlu0 %v3086_v10, %s10029_s21  ;;  %2191 = vrot.lane.b32.xlu1 %v2096_v22, %s10030_s22  ;;  %v11032_v34 = vpop.permute.xlu1 %1853  ;;  %v2693_v18 = vshll.u32 %v9890_v29, 16 }
 0x243   : > { %v2883_v53 = vpop.f32.mrf.mxu2 }
 0x244   : > { %v3087_v30 = vrot.slane %v2883_v53, 1  ;;  %v3376_v15 = vrot.slane %v2883_v53, 2  ;;  %v2690_v53 = vshrl.u32 %v9890_v29, 16 }
 0x245   : > { %v11021_v8 = vpop.f32.mrf.mxu1 }
 0x246   : > { %14723 = vst [vmem:[#allocation38_spill] sm:$0xff] %v11021_v8  ;;  %v3377_v48 = vsel %vm2025_vm6, %v3374_v28, %v3376_v15  ;;  %v3088_v22 = vsel %vm1735_vm5, %v3085_v32, %v3087_v30  ;;  %v1807_v15 = vrot.slane %v11021_v8, 1  ;;  %v2097_v57 = vrot.slane %v11021_v8, 2 }
 0x247   : > { %1901 = vrot.lane.b32.xlu2 %v1806_v19, %s10029_s21  ;;  %v2692_v30 = vrot.slane %v2690_v53, 3  ;;  %v2695_v19 = vrot.slane %v2693_v18, 4 }
 0x248   : > { %9307 = vmatmul.msk.bf16.gmra.mxu3 %vm586_vm2, %v2688_v4  ;;  %v11063_v59 = vpop.permute.xlu2 %1857 }
 0x249   : > { %3472 = vrot.lane.b32.xlu0 %v3377_v48, %s10030_s22  ;;  %3183 = vrot.lane.b32.xlu1 %v3088_v22, %s10029_s21  ;;  %v11049_v4 = vpop.permute.xlu1 %2147  ;;  %v11051_v48 = vpop.permute.xlu0 %1851  ;;  %v2696_v22 = vor.u32 %v2695_v19, %v2692_v30  ;;  %14728 = vst [vmem:[#allocation43_spill] sm:$0xff] %v11063_v59 }
 0x24a   : > { %14726 = vst [vmem:[#allocation41_spill] sm:$0xff] %v11049_v4 }
 0x24b   : > { %v11035_v49 = vpop.f32.mrf.mxu2 }
 0x24c   : > { %14724 = vst [vmem:[#allocation39_spill] sm:$0xff] %v11035_v49  ;;  %v3089_v53 = vrot.slane %v11035_v49, 1 }
 0x24d   : > { %v11037_v1 = vpop.f32.mrf.mxu1 }
 0x24e   : > { %14725 = vst [vmem:[#allocation40_spill] sm:$0xff] %v11037_v1  ;;  %v1809_v28 = vrot.slane %v11037_v1, 1  ;;  %v2099_v56 = vrot.slane %v11037_v1, 2  ;;  %v3378_v1 = vrot.slane %v11035_v49, 2 }
 0x250   : > { %v1810_v32 = vsel %vm1735_vm5, %v1807_v15, %v1809_v28  ;;  %v2100_v10 = vsel %vm2025_vm6, %v2097_v57, %v2099_v56  ;;  %v2697_v57 = vsel %vm1250_vm3, %v2687_v36, %v2696_v22  ;;  %v11077_v45 = vpop.permute.xlu2 %2149 }
 0x251   : > { %1905 = vrot.lane.b32.xlu0 %v1810_v32, %s10029_s21  ;;  %2195 = vrot.lane.b32.xlu2 %v2100_v10, %s10030_s22  ;;  %v9891_v10 = vld [vmem:[#allocation3 + $0xc4] sm:$0xff]  ;;  %v11067_v19 = vpop.permute.xlu1 %3139  ;;  %14731 = vst [vmem:[#allocation46_spill] sm:$0xff] %v11077_v45 }
 0x252   : > { %14729 = vst [vmem:[#allocation44_spill] sm:$0xff] %v11067_v19  ;;  %v2702_v4 = vshll.u32 %v9891_v10, 16 }
 0x253   : > { %v11053_v29 = vpop.f32.mrf.mxu2 }
 0x254   : > { %14727 = vst [vmem:[#allocation42_spill] sm:$0xff] %v11053_v29  ;;  %v3091_v8 = vrot.slane %v11053_v29, 1  ;;  %v3380_v15 = vrot.slane %v11053_v29, 2  ;;  %v2704_v59 = vrot.slane %v2702_v4, 4  ;;  %v9892_v4 = vld [vmem:[#allocation3 + $0xcc] sm:$0xff] }
 0x256   : > { %v3381_v18 = vsel %vm2025_vm6, %v3378_v1, %v3380_v15  ;;  %v3092_v32 = vsel %vm1735_vm5, %v3089_v53, %v3091_v8  ;;  %v2699_v1 = vshrl.u32 %v9891_v10, 16 }
 0x257   : > { %3476 = vrot.lane.b32.xlu1 %v3381_v18, %s10030_s22  ;;  %v11069_v18 = vpop.permute.xlu0 %2143 }
 0x258   : > { %9308 = vmatmul.msk.bf16.gmra.mxu3 %vm586_vm2, %v2697_v57  ;;  %14730 = vst [vmem:[#allocation45_spill] sm:$0xff] %v11069_v18 }
 0x259   : > { %3187 = vrot.lane.b32.xlu2 %v3092_v32, %s10029_s21  ;;  %v2701_v32 = vrot.slane %v2699_v1, 3  ;;  %v2708_v1 = vshrl.u32 %v9892_v4, 16 }
 0x25b   : > { %v1657_v30 = vpop.f32.mrf.mxu3  ;;  %v2890_v29 = vpop.f32.mrf.mxu2 }
 0x25c   : > { %v1811_v49 = vrot.slane %v1657_v30, 1  ;;  %v2101_v21 = vrot.slane %v1657_v30, 2  ;;  %v3382_v36 = vrot.slane %v2890_v29, 2  ;;  %v3093_v30 = vrot.slane %v2890_v29, 1 }
 0x25e   : > { %v2102_v53 = vsel %vm2025_vm6, %v2099_v56, %v2101_v21  ;;  %v1812_v9 = vsel %vm1735_vm5, %v1809_v28, %v1811_v49  ;;  %v3383_v57 = vsel %vm2025_vm6, %v3380_v15, %v3382_v36  ;;  %v2705_v21 = vor.u32 %v2704_v59, %v2701_v32  ;;  %v11083_v56 = vpop.permute.xlu1 %3430  ;;  %v11095_v59 = vpop.permute.xlu2 %3141 }
 0x25f   : > { %2197 = vrot.lane.b32.xlu0 %v2102_v53, %s10030_s22  ;;  %1907 = vrot.lane.b32.xlu1 %v1812_v9, %s10029_s21  ;;  %14734 = vst [vmem:[#allocation49_spill] sm:$0xff] %v11083_v56  ;;  %v3094_v49 = vsel %vm1735_vm5, %v3091_v8, %v3093_v30  ;;  %v11086_v28 = vpop.permute.xlu0 %3135  ;;  %v2711_v36 = vshll.u32 %v9892_v4, 16 }
 0x260   : > { %v2706_v9 = vsel %vm1250_vm3, %v2696_v22, %v2705_v21  ;;  %14737 = vst [vmem:[#allocation52_spill] sm:$0xff] %v11095_v59 }
 0x261   : > { %3478 = vrot.lane.b32.xlu2 %v3383_v57, %s10030_s22  ;;  %v2713_v56 = vrot.slane %v2711_v36, 4 }
 0x263   : > { %v11079_v10 = vpop.f32.mrf.mxu3  ;;  %v11081_v60 = vpop.f32.mrf.mxu2 }
 0x264   : > { %14732 = vst [vmem:[#allocation47_spill] sm:$0xff] %v11079_v10  ;;  %v1813_v53 = vrot.slane %v11079_v10, 1  ;;  %v2103_v8 = vrot.slane %v11079_v10, 2  ;;  %v3384_v22 = vrot.slane %v11081_v60, 2 }
 0x265   : > { %14733 = vst [vmem:[#allocation48_spill] sm:$0xff] %v11081_v60 }
 0x266   : > { %v11107_v45 = vpop.permute.xlu1 %1863  ;;  %v11116_v18 = vpop.permute.xlu2 %3434 }
 0x267   : > { %3189 = vrot.lane.b32.xlu0 %v3094_v49, %s10029_s21  ;;  %v11103_v49 = vpop.permute.xlu0 %3428  ;;  %14739 = vst [vmem:[#allocation54_spill] sm:$0xff] %v11107_v45 }
 0x268   : > { %9309 = vmatmul.msk.bf16.gmra.mxu3 %vm586_vm2, %v2706_v9  ;;  %14738 = vst [vmem:[#allocation53_spill] sm:$0xff] %v11103_v49 }
 0x269   : > { %14740 = vst [vmem:[#allocation55_spill] sm:$0xff] %v11116_v18 }
 0x26b   : > { %v11091_v29 = vpop.f32.mrf.mxu3  ;;  %v11093_v15 = vpop.f32.mrf.mxu2 }
 0x26c   : > { %14735 = vst [vmem:[#allocation50_spill] sm:$0xff] %v11091_v29  ;;  %v1815_v57 = vrot.slane %v11091_v29, 1  ;;  %v2105_v32 = vrot.slane %v11091_v29, 2  ;;  %v14568_v30 = vrot.slane %v11093_v15, 2  ;;  %v2710_v29 = vrot.slane %v2708_v1, 3 }
 0x26d   : > { %14736 = vst [vmem:[#allocation51_spill] sm:$0xff] %v11093_v15  ;;  %v14567_v59 = vrot.slane %v11093_v15, 1 }
 0x26e   : > { %v2106_v9 = vsel %vm2025_vm6, %v2103_v8, %v2105_v32  ;;  %v1816_v4 = vsel %vm1735_vm5, %v1813_v53, %v1815_v57  ;;  %v3387_v10 = vsel %vm2025_vm6, %v3384_v22, %v14568_v30  ;;  %v2714_v8 = vor.u32 %v2713_v56, %v2710_v29  ;;  %v9563_v22 = vld [vmem:[%s14520_s3 + $0x1] sm:$0x1] }
 0x26f   : > { %2201 = vrot.lane.b32.xlu1 %v2106_v9, %s10030_s22  ;;  %1911 = vrot.lane.b32.xlu2 %v1816_v4, %s10029_s21  ;;  %v3095_v53 = vrot.slane %v11081_v60, 1  ;;  %v6847_v9 = vsel %vm5770_vm4, %v9563_v22, 0  ;;  %v11131_v36 = vpop.permute.xlu0 %1859  ;;  %v9894_v30 = vld [vmem:[#allocation3 + $0x20] sm:$0xff] }
 0x270   : > { %3482 = vrot.lane.b32.xlu0 %v3387_v10, %s10030_s22  ;;  %6856 = vmatpush.bf16.msrb.mxu1 %v6847_v9  ;;  %v2715_v29 = vsel %vm1250_vm3, %v2705_v21, %v2714_v8  ;;  %14741 = vst [vmem:[#allocation56_spill] sm:$0xff] %v11131_v36 }
 0x271   : > { %v3098_v10 = vsel %vm1735_vm5, %v3095_v53, %v14567_v59  ;;  %v9893_v59 = vld [vmem:[#allocation3 + $0x18] sm:$0xf0] }
 0x273   : > { %v1664_v49 = vpop.f32.mrf.mxu3 }
 0x274   : > { %v1817_v45 = vrot.slane %v1664_v49, 1  ;;  %v2107_v19 = vrot.slane %v1664_v49, 2  ;;  %v11135_v49 = vpop.permute.xlu1 %2155 }
 0x275   : > { %14742 = vst [vmem:[#allocation57_spill] sm:$0xff] %v11135_v49 }
 0x276   : > { %v2108_v1 = vsel %vm2025_vm6, %v2105_v32, %v2107_v19  ;;  %v1818_v56 = vsel %vm1735_vm5, %v1815_v57, %v1817_v45  ;;  %v11139_v19 = vpop.permute.xlu2 %1865 }
 0x277   : > { %3193 = vrot.lane.b32.xlu1 %v3098_v10, %s10029_s21  ;;  %2203 = vrot.lane.b32.xlu2 %v2108_v1, %s10030_s22  ;;  %14744 = vst [vmem:[#allocation59_spill] sm:$0xff] %v11139_v19  ;;  %v11141_v45 = vpop.permute.xlu0 %2153  ;;  %v3791_v19 = vshll.u32 %v9894_v30, 16 }
 0x278   : > { %1913 = vrot.lane.b32.xlu0 %v1818_v56, %s10029_s21  ;;  %9310 = vmatmul.msk.bf16.gmra.mxu3 %vm586_vm2, %v2715_v29  ;;  %14745 = vst [vmem:[#allocation60_spill] sm:$0xff] %v11141_v45  ;;  %v9315_v29 = vld [vmem:[#allocation3 + $0x18] sm:$0x8] }
 0x279   : > { %v9316_v60 = vor.u32 %v9893_v59, %v9315_v29 }
 0x27b   : > { %v11137_v4 = vpop.f32.mrf.mxu3  ;;  %v3783_v18 = vshll.u32 %v9316_v60, 16 }
 0x27c   : > { %14743 = vst [vmem:[#allocation58_spill] sm:$0xff] %v11137_v4  ;;  %v11143_v57 = vpop.permute.xlu1 %3147  ;;  %v1819_v21 = vrot.slane %v11137_v4, 1  ;;  %v2109_v53 = vrot.slane %v11137_v4, 2 }
 0x27d   : > { %14746 = vst [vmem:[#allocation61_spill] sm:$0xff] %v11143_v57 }
 0x27e   : > { %v11151_v10 = vpop.permute.xlu2 %2159 }
 0x27f   : > { %14748 = vst [vmem:[#allocation63_spill] sm:$0xff] %v11151_v10  ;;  %v11158_v4 = vpop.permute.xlu0 %3145  ;;  %v3788_v10 = vshrl.u32 %v9894_v30, 16 }
 0x280   : > { %14749 = vst [vmem:[#allocation64_spill] sm:$0xff] %v11158_v4 }
 0x281   : > { %v3790_v59 = vrot.slane %v3788_v10, 3 }
 0x283   : > { %v11145_v32 = vpop.f32.mrf.mxu3 }
 0x284   : > { %14747 = vst [vmem:[#allocation62_spill] sm:$0xff] %v11145_v32  ;;  %v1821_v22 = vrot.slane %v11145_v32, 1  ;;  %v2111_v9 = vrot.slane %v11145_v32, 2  ;;  %v11160_v49 = vpop.permute.xlu1 %3440 }
 0x285   : > { %14750 = vst [vmem:[#allocation65_spill] sm:$0xff] %v11160_v49  ;;  %v3785_v49 = vrot.slane %v3783_v18, 4 }
 0x286   : > { %v2112_v1 = vsel %vm2025_vm6, %v2109_v53, %v2111_v9  ;;  %v1822_v56 = vsel %vm1735_vm5, %v1819_v21, %v1821_v22  ;;  %v3780_v21 = vshrl.u32 %v9316_v60, 16 }
 0x287   : > { %2207 = vrot.lane.b32.xlu0 %v2112_v1, %s10030_s22  ;;  %1917 = vrot.lane.b32.xlu1 %v1822_v56, %s10029_s21  ;;  %v11166_v56 = vpop.permute.xlu2 %3151 }
 0x288   : > { %9311 = vmatmul.msk.bf16.gmra.mxu3 %vm586_vm2, %v2714_v8  ;;  %v3793_v8 = vrot.slane %v3791_v19, 4  ;;  %14751 = vst [vmem:[#allocation66_spill] sm:$0xff] %v11166_v56  ;;  %v3782_v29 = vrot.slane %v3780_v21, 3  ;;  %v9689_v19 = vld [vmem:[%s14520_s3 + $0x2] sm:$0x1] }
 0x28a   : > { %v3794_v30 = vor.u32 %v3793_v8, %v3790_v59 }
 0x28b   : > { %v1672_v32 = vpop.f32.mrf.mxu3 }
 0x28c   : > { %v1823_v53 = vrot.slane %v1672_v32, 1  ;;  %v2113_v45 = vrot.slane %v1672_v32, 2  ;;  %v11170_v32 = vpop.permute.xlu0 %3436  ;;  %v11172_v60 = vpop.permute.xlu1 %1871 }
 0x28d   : > { %14753 = vst [vmem:[#allocation68_spill] sm:$0xff] %v11170_v32 }
 0x28e   : > { %v2114_v57 = vsel %vm2025_vm6, %v2111_v9, %v2113_v45  ;;  %v1824_v1 = vsel %vm1735_vm5, %v1821_v22, %v1823_v53  ;;  %14754 = vst [vmem:[#allocation69_spill] sm:$0xff] %v11172_v60  ;;  %v3786_v45 = vor.u32 %v3785_v49, %v3782_v29  ;;  %v9895_v9 = vld [vmem:[#allocation3 + $0x28] sm:$0xff] }
 0x28f   : > { %2209 = vrot.lane.b32.xlu1 %v2114_v57, %s10030_s22  ;;  %1919 = vrot.lane.b32.xlu2 %v1824_v1, %s10029_s21  ;;  %v7954_v57 = vsel %vm5770_vm4, %v9689_v19, 0  ;;  %v11180_v18 = vpop.permute.xlu2 %3442  ;;  %v3797_v53 = vshrl.u32 %v9895_v9, 16  ;;  %v3800_v21 = vshll.u32 %v9895_v9, 16 }
 0x290   : > { %v3795_v22 = vsel %vm1250_vm3, %v3786_v45, %v3794_v30  ;;  %14755 = vst [vmem:[#allocation70_spill] sm:$0xff] %v11180_v18  ;;  %7963 = vmatpush.bf16.msrb.mxu2 %v7954_v57 }
 0x291   : > { %v3799_v9 = vrot.slane %v3797_v53, 3  ;;  %v3802_v57 = vrot.slane %v3800_v21, 4 }
 0x293   : > { %v11168_v4 = vpop.f32.mrf.mxu3 }
 0x294   : > { %14752 = vst [vmem:[#allocation67_spill] sm:$0xff] %v11168_v4  ;;  %v1825_v49 = vrot.slane %v11168_v4, 1  ;;  %v2115_v1 = vrot.slane %v11168_v4, 2  ;;  %v11188_v29 = vpop.permute.xlu0 %1869  ;;  %v11192_v19 = vpop.permute.xlu1 %6242  ;;  %v3803_v4 = vor.u32 %v3802_v57, %v3799_v9 }
 0x295   : > { %14757 = vst [vmem:[#allocation72_spill] sm:$0xff] %v11188_v29 }
 0x296   : > { %14758 = vst [vmem:[#allocation73_spill] sm:$0xff] %v11192_v19  ;;  %v9897_v19 = vld [vmem:[#allocation3 + $0x38] sm:$0xff] }
 0x297   : > { %v11196_v18 = vpop.permute.xlu2 %6034 }
 0x298   : > { %9413 = vmatmul.msk.bf16.vlgmr.msrb.gmra.mxu3 %vm586_vm2, %v3795_v22  ;;  %14759 = vst [vmem:[#allocation74_spill] sm:$0xff] %v11196_v18 }
 0x29b   : > { %v11182_v10 = vpop.f32.mrf.mxu3 }
 0x29c   : > { %14756 = vst [vmem:[#allocation71_spill] sm:$0xff] %v11182_v10  ;;  %v1827_v59 = vrot.slane %v11182_v10, 1  ;;  %v2117_v8 = vrot.slane %v11182_v10, 2  ;;  %v11206_v53 = vpop.permute.xlu1 %2165 }
 0x29d   : > { %14761 = vst [vmem:[#allocation76_spill] sm:$0xff] %v11206_v53  ;;  %v3818_v53 = vshll.u32 %v9897_v19, 16 }
 0x29e   : > { %v2118_v45 = vsel %vm2025_vm6, %v2115_v1, %v2117_v8  ;;  %v1828_v22 = vsel %vm1735_vm5, %v1825_v49, %v1827_v59  ;;  %v3804_v49 = vsel %vm1250_vm3, %v3794_v30, %v3803_v4 }
 0x29f   : > { %2213 = vrot.lane.b32.xlu2 %v2118_v45, %s10030_s22  ;;  %1923 = vrot.lane.b32.xlu0 %v1828_v22, %s10029_s21  ;;  %v9896_v45 = vld [vmem:[#allocation3 + $0x30] sm:$0xff]  ;;  %v11203_v22 = vpop.permute.xlu0 %2161  ;;  %v11208_v57 = vpop.permute.xlu2 %1875 }
 0x2a0   : > { %14760 = vst [vmem:[#allocation75_spill] sm:$0xff] %v11203_v22  ;;  %v3806_v9 = vshrl.u32 %v9896_v45, 16  ;;  %v14768_v22 = vrot.slane %v11093_v15, 2 }
 0x2a1   : > { %14762 = vst [vmem:[#allocation77_spill] sm:$0xff] %v11208_v57 }
 0x2a3   : > { %v1679_v60 = vpop.f32.mrf.mxu3 }
 0x2a4   : > { %v1829_v56 = vrot.slane %v1679_v60, 1  ;;  %v2119_v10 = vrot.slane %v1679_v60, 2  ;;  %v3809_v60 = vshll.u32 %v9896_v45, 16 }
 0x2a6   : > { %v2120_v29 = vsel %vm2025_vm6, %v2117_v8, %v2119_v10  ;;  %v1830_v1 = vsel %vm1735_vm5, %v1827_v59, %v1829_v56  ;;  %v3808_v10 = vrot.slane %v3806_v9, 3  ;;  %v3811_v56 = vrot.slane %v3809_v60, 4  ;;  %v11212_v8 = vpop.permute.xlu1 %3157 }
 0x2a7   : > { %2215 = vrot.lane.b32.xlu0 %v2120_v29, %s10030_s22  ;;  %1925 = vrot.lane.b32.xlu1 %v1830_v1, %s10029_s21  ;;  %v11210_v59 = vpop.permute.xlu0 %3153  ;;  %14764 = vst [vmem:[#allocation79_spill] sm:$0xff] %v11212_v8  ;;  %v11215_v18 = vpop.permute.xlu2 %2167 }
 0x2a8   : > { %9414 = vmatmul.msk.bf16.gmra.mxu3 %vm586_vm2, %v3804_v49  ;;  %14763 = vst [vmem:[#allocation78_spill] sm:$0xff] %v11210_v59  ;;  %v3812_v30 = vor.u32 %v3811_v56, %v3808_v10 }
 0x2a9   : > { %14765 = vst [vmem:[#allocation80_spill] sm:$0xff] %v11215_v18 }
 0x2aa   : > { %v3813_v1 = vsel %vm1250_vm3, %v3803_v4, %v3812_v30  ;;  %v14769_v4 = vrot.slane %v11093_v15, 1 }
 0x2ab   : > { %v1682_v21 = vpop.f32.mrf.mxu3 }
 0x2ac   : > { %v3815_v21 = vshrl.u32 %v9897_v19, 16 }
 0x2ae   : > { %v11220_v57 = vpop.permute.xlu1 %3448 }
 0x2af   : > { %v11218_v49 = vpop.permute.xlu0 %3446  ;;  %14767 = vst [vmem:[#allocation82_spill] sm:$0xff] %v11220_v57  ;;  %v11230_v18 = vpop.permute.xlu2 %3159 }
 0x2b0   : > { %14766 = vst [vmem:[#allocation81_spill] sm:$0xff] %v11218_v49 }
 0x2b1   : > { %14770 = vst [vmem:[#allocation83_spill] sm:$0xff] %v11230_v18 }
 0x2b3   : > { %v1684_v29 = vpop.f32.mrf.mxu3 }
 0x2b4   : > { %v3817_v29 = vrot.slane %v3815_v21, 3 }
 0x2b6   : > { %v11236_v49 = vpop.permute.xlu1 %1881 }
 0x2b7   : > { %v11234_v57 = vpop.permute.xlu0 %1877  ;;  %14773 = vst [vmem:[#allocation86_spill] sm:$0xff] %v11236_v49  ;;  %v11242_v21 = vpop.permute.xlu2 %3452 }
 0x2b8   : > { %9415 = vmatmul.msk.bf16.gmra.mxu3 %vm586_vm2, %v3813_v1  ;;  %v3820_v1 = vrot.slane %v3818_v53, 4  ;;  %14772 = vst [vmem:[#allocation85_spill] sm:$0xff] %v11234_v57 }
 0x2b9   : > { %14775 = vst [vmem:[#allocation88_spill] sm:$0xff] %v11242_v21 }
 0x2bb   : > { %v2898_v45 = vpop.f32.mrf.mxu3 }
 0x2bc   : > { %v3099_v9 = vrot.slane %v2898_v45, 1  ;;  %v3388_v60 = vrot.slane %v2898_v45, 2  ;;  %v3821_v45 = vor.u32 %v3820_v1, %v3817_v29 }
 0x2be   : > { %v3389_v10 = vsel %vm2025_vm6, %v14768_v22, %v3388_v60  ;;  %v3100_v56 = vsel %vm1735_vm5, %v14769_v4, %v3099_v9  ;;  %v3822_v22 = vsel %vm1250_vm3, %v3812_v30, %v3821_v45  ;;  %v9898_v60 = vld [vmem:[#allocation3 + $0x40] sm:$0xff]  ;;  %v11254_v21 = vpop.permute.xlu1 %2173 }
 0x2bf   : > { %3484 = vrot.lane.b32.xlu1 %v3389_v10, %s10030_s22  ;;  %3195 = vrot.lane.b32.xlu2 %v3100_v56, %s10029_s21  ;;  %v3824_v10 = vshrl.u32 %v9898_v60, 16  ;;  %v3827_v4 = vshll.u32 %v9898_v60, 16  ;;  %v11248_v15 = vpop.permute.xlu0 %2171  ;;  %14777 = vst [vmem:[#allocation90_spill] sm:$0xff] %v11254_v21  ;;  %v11256_v59 = vpop.permute.xlu2 %1883 }
 0x2c0   : > { %14776 = vst [vmem:[#allocation89_spill] sm:$0xff] %v11248_v15 }
 0x2c1   : > { %v3826_v60 = vrot.slane %v3824_v10, 3  ;;  %v3829_v49 = vrot.slane %v3827_v4, 4  ;;  %14778 = vst [vmem:[#allocation91_spill] sm:$0xff] %v11256_v59  ;;  %v9899_v4 = vld [vmem:[#allocation3 + $0x48] sm:$0xff] }
 0x2c3   : > { %v11232_v19 = vpop.f32.mrf.mxu3 }
 0x2c4   : > { %14771 = vst [vmem:[#allocation84_spill] sm:$0xff] %v11232_v19  ;;  %v3101_v53 = vrot.slane %v11232_v19, 1  ;;  %v3390_v56 = vrot.slane %v11232_v19, 2  ;;  %v3830_v19 = vor.u32 %v3829_v49, %v3826_v60 }
 0x2c6   : > { %v3831_v10 = vsel %vm1250_vm3, %v3821_v45, %v3830_v19  ;;  %v11266_v49 = vpop.permute.xlu1 %3165 }
 0x2c7   : > { %v11260_v15 = vpop.permute.xlu0 %3163  ;;  %14780 = vst [vmem:[#allocation93_spill] sm:$0xff] %v11266_v49 }
 0x2c8   : > { %9416 = vmatmul.msk.bf16.gmra.mxu3 %vm586_vm2, %v3822_v22  ;;  %14779 = vst [vmem:[#allocation92_spill] sm:$0xff] %v11260_v15 }
 0x2cb   : > { %v11240_v9 = vpop.f32.mrf.mxu3 }
 0x2cc   : > { %14774 = vst [vmem:[#allocation87_spill] sm:$0xff] %v11240_v9  ;;  %v3103_v29 = vrot.slane %v11240_v9, 1  ;;  %v3392_v1 = vrot.slane %v11240_v9, 2 }
 0x2ce   : > { %v3393_v30 = vsel %vm2025_vm6, %v3390_v56, %v3392_v1  ;;  %v3104_v22 = vsel %vm1735_vm5, %v3101_v53, %v3103_v29  ;;  %v3833_v53 = vshrl.u32 %v9899_v4, 16  ;;  %v11280_v21 = vpop.permute.xlu1 %3458 }
 0x2cf   : > { %3488 = vrot.lane.b32.xlu2 %v3393_v30, %s10030_s22  ;;  %3199 = vrot.lane.b32.xlu0 %v3104_v22, %s10029_s21  ;;  %v3836_v30 = vshll.u32 %v9899_v4, 16  ;;  %14785 = vst [vmem:[#allocation98_spill] sm:$0xff] %v11280_v21 }
 0x2d3   : > { %v2905_v57 = vpop.f32.mrf.mxu3 }
 0x2d4   : > { %v3105_v18 = vrot.slane %v2905_v57, 1  ;;  %v3394_v8 = vrot.slane %v2905_v57, 2 }
 0x2d6   : > { %v3395_v9 = vsel %vm2025_vm6, %v3392_v1, %v3394_v8  ;;  %v3106_v56 = vsel %vm1735_vm5, %v3103_v29, %v3105_v18  ;;  %v3835_v8 = vrot.slane %v3833_v53, 3  ;;  %v3838_v1 = vrot.slane %v3836_v30, 4  ;;  %v11270_v18 = vpop.permute.xlu2 %2177  ;;  %v11272_v29 = vpop.permute.xlu0 %3454 }
 0x2d7   : > { %3490 = vrot.lane.b32.xlu0 %v3395_v9, %s10030_s22  ;;  %3201 = vrot.lane.b32.xlu1 %v3106_v56, %s10029_s21  ;;  %14782 = vst [vmem:[#allocation95_spill] sm:$0xff] %v11270_v18 }
 0x2d8   : > { %9417 = vmatmul.msk.bf16.gmra.mxu3 %vm586_vm2, %v3831_v10  ;;  %14783 = vst [vmem:[#allocation96_spill] sm:$0xff] %v11272_v29  ;;  %v3839_v22 = vor.u32 %v3838_v1, %v3835_v8  ;;  %v9900_v8 = vld [vmem:[#allocation3 + $0x50] sm:$0xff]  ;;  %v11294_v29 = vpop.permute.xlu1 %1889 }
 0x2d9   : > { %v3842_v18 = vshrl.u32 %v9900_v8, 16  ;;  %v3845_v21 = vshll.u32 %v9900_v8, 16  ;;  %14788 = vst [vmem:[#allocation101_spill] sm:$0xff] %v11294_v29 }
 0x2da   : > { %v3840_v30 = vsel %vm1250_vm3, %v3830_v19, %v3839_v22 }
 0x2db   : > { %v11268_v57 = vpop.f32.mrf.mxu3  ;;  %v3844_v19 = vrot.slane %v3842_v18, 3 }
 0x2dc   : > { %14781 = vst [vmem:[#allocation94_spill] sm:$0xff] %v11268_v57  ;;  %v3107_v45 = vrot.slane %v11268_v57, 1  ;;  %v3396_v60 = vrot.slane %v11268_v57, 2 }
 0x2de   : > { %v11288_v1 = vpop.permute.xlu2 %3169  ;;  %v11290_v57 = vpop.permute.xlu0 %1887 }
 0x2df   : > { %14786 = vst [vmem:[#allocation99_spill] sm:$0xff] %v11288_v1 }
 0x2e0   : > { %14787 = vst [vmem:[#allocation100_spill] sm:$0xff] %v11290_v57 }
 0x2e3   : > { %v11274_v9 = vpop.f32.mrf.mxu3 }
 0x2e4   : > { %14784 = vst [vmem:[#allocation97_spill] sm:$0xff] %v11274_v9  ;;  %v3109_v56 = vrot.slane %v11274_v9, 1  ;;  %v3398_v10 = vrot.slane %v11274_v9, 2 }
 0x2e6   : > { %v3399_v4 = vsel %vm2025_vm6, %v3396_v60, %v3398_v10  ;;  %v3110_v53 = vsel %vm1735_vm5, %v3107_v45, %v3109_v56  ;;  %v11300_v1 = vpop.permute.xlu2 %3460  ;;  %v11302_v8 = vpop.permute.xlu0 %2179 }
 0x2e7   : > { %3494 = vrot.lane.b32.xlu1 %v3399_v4, %s10030_s22  ;;  %3205 = vrot.lane.b32.xlu2 %v3110_v53, %s10029_s21  ;;  %v3847_v53 = vrot.slane %v3845_v21, 4  ;;  %14790 = vst [vmem:[#allocation103_spill] sm:$0xff] %v11300_v1 }
 0x2e8   : > { %9418 = vmatmul.msk.bf16.gmra.mxu3 %vm586_vm2, %v3840_v30  ;;  %14791 = vst [vmem:[#allocation104_spill] sm:$0xff] %v11302_v8 }
 0x2e9   : > { %v3848_v57 = vor.u32 %v3847_v53, %v3844_v19 }
 0x2eb   : > { %v2913_v9 = vpop.f32.mrf.mxu3 }
 0x2ec   : > { %v3111_v59 = vrot.slane %v2913_v9, 1  ;;  %v3400_v60 = vrot.slane %v2913_v9, 2  ;;  %v11304_v9 = vpop.permute.xlu1 %2183 }
 0x2ed   : > { %14792 = vst [vmem:[#allocation105_spill] sm:$0xff] %v11304_v9 }
 0x2ee   : > { %v3401_v45 = vsel %vm2025_vm6, %v3398_v10, %v3400_v60  ;;  %v3112_v4 = vsel %vm1735_vm5, %v3109_v56, %v3111_v59  ;;  %v3849_v10 = vsel %vm1250_vm3, %v3839_v22, %v3848_v57  ;;  %v9901_v59 = vld [vmem:[#allocation3 + $0x58] sm:$0xff]  ;;  %v11314_v53 = vpop.permute.xlu2 %1893  ;;  %v11318_v8 = vpop.permute.xlu0 %3171 }
 0x2ef   : > { %3496 = vrot.lane.b32.xlu2 %v3401_v45, %s10030_s22  ;;  %3207 = vrot.lane.b32.xlu0 %v3112_v4, %s10029_s21  ;;  %v3851_v60 = vshrl.u32 %v9901_v59, 16  ;;  %v3854_v45 = vshll.u32 %v9901_v59, 16  ;;  %14794 = vst [vmem:[#allocation107_spill] sm:$0xff] %v11314_v53 }
 0x2f0   : > { %14795 = vst [vmem:[#allocation108_spill] sm:$0xff] %v11318_v8 }
 0x2f1   : > { %v3856_v59 = vrot.slane %v3854_v45, 4 }
 0x2f3   : > { %v11298_v30 = vpop.f32.mrf.mxu3 }
 0x2f4   : > { %14789 = vst [vmem:[#allocation102_spill] sm:$0xff] %v11298_v30  ;;  %v3113_v21 = vrot.slane %v11298_v30, 1  ;;  %v3402_v18 = vrot.slane %v11298_v30, 2  ;;  %v11322_v1 = vpop.permute.xlu1 %3175 }
 0x2f5   : > { %14796 = vst [vmem:[#allocation109_spill] sm:$0xff] %v11322_v1 }
 0x2f6   : > { %v11326_v15 = vpop.permute.xlu0 %3464  ;;  %v11331_v45 = vpop.permute.xlu2 %2185 }
 0x2f7   : > { %14797 = vst [vmem:[#allocation110_spill] sm:$0xff] %v11326_v15 }
 0x2f8   : > { %9419 = vmatmul.msk.bf16.gmra.mxu3 %vm586_vm2, %v3849_v10  ;;  %v3853_v10 = vrot.slane %v3851_v60, 3  ;;  %v9902_v60 = vld [vmem:[#allocation3 + $0x60] sm:$0xff]  ;;  %14798 = vst [vmem:[#allocation111_spill] sm:$0xff] %v11331_v45 }
 0x2fa   : > { %v3857_v29 = vor.u32 %v3856_v59, %v3853_v10 }
 0x2fb   : > { %v11308_v56 = vpop.f32.mrf.mxu3 }
 0x2fc   : > { %14793 = vst [vmem:[#allocation106_spill] sm:$0xff] %v11308_v56  ;;  %v3115_v4 = vrot.slane %v11308_v56, 1  ;;  %v3404_v19 = vrot.slane %v11308_v56, 2 }
 0x2fe   : > { %v3405_v9 = vsel %vm2025_vm6, %v3402_v18, %v3404_v19  ;;  %v3116_v22 = vsel %vm1735_vm5, %v3113_v21, %v3115_v4  ;;  %v11334_v21 = vpop.permute.xlu1 %3466  ;;  %v11339_v10 = vpop.permute.xlu0 %1895 }
 0x2ff   : > { %3500 = vrot.lane.b32.xlu0 %v3405_v9, %s10030_s22  ;;  %3211 = vrot.lane.b32.xlu1 %v3116_v22, %s10029_s21  ;;  %v3858_v9 = vsel %vm1250_vm3, %v3848_v57, %v3857_v29  ;;  %14799 = vst [vmem:[#allocation112_spill] sm:$0xff] %v11334_v21  ;;  %v3860_v22 = vshrl.u32 %v9902_v60, 16  ;;  %v11341_v57 = vpop.permute.xlu2 %3177  ;;  %v9903_v21 = vld [vmem:[#allocation3 + $0x68] sm:$0xff] }
 0x300   : > { %14800 = vst [vmem:[#allocation113_spill] sm:$0xff] %v11339_v10 }
 0x301   : > { %14801 = vst [vmem:[#allocation114_spill] sm:$0xff] %v11341_v57 }
 0x303   : > { %v2920_v30 = vpop.f32.mrf.mxu3 }
 0x304   : > { %v3117_v49 = vrot.slane %v2920_v30, 1  ;;  %v3406_v56 = vrot.slane %v2920_v30, 2 }
 0x306   : > { %v3407_v53 = vsel %vm2025_vm6, %v3404_v19, %v3406_v56  ;;  %v3118_v18 = vsel %vm1735_vm5, %v3115_v4, %v3117_v49  ;;  %v3863_v56 = vshll.u32 %v9902_v60, 16  ;;  %v1977_v49 = vadd.f32 %v10910_v46, %v10244_v5  ;;  %v11344_v45 = vpop.permute.xlu1 %1899  ;;  %v11349_v5 = vpop.permute.xlu0 %2189 }
 0x307   : > { %3502 = vrot.lane.b32.xlu1 %v3407_v53, %s10030_s22  ;;  %3213 = vrot.lane.b32.xlu2 %v3118_v18, %s10029_s21  ;;  %v3862_v4 = vrot.slane %v3860_v22, 3  ;;  %14802 = vst [vmem:[#allocation115_spill] sm:$0xff] %v11344_v45 }
 0x308   : > { %9420 = vmatmul.msk.bf16.gmra.mxu3 %vm586_vm2, %v3858_v9  ;;  %v3865_v19 = vrot.slane %v3863_v56, 4  ;;  %v2267_v53 = vadd.f32 %v10874_v26, %v1977_v49  ;;  %14803 = vst [vmem:[#allocation116_spill] sm:$0xff] %v11349_v5  ;;  %v11352_v26 = vpop.permute.xlu2 %3470  ;;  %v3869_v56 = vshrl.u32 %v9903_v21, 16  ;;  %v3872_v49 = vshll.u32 %v9903_v21, 16 }
 0x309   : > { %14804 = vst [vmem:[#allocation117_spill] sm:$0xff] %v11352_v26 }
 0x30a   : > { %v3866_v18 = vor.u32 %v3865_v19, %v3862_v4  ;;  %v2927_v9 = vadd.f32 %v10445_v33, %v2267_v53  ;;  %v3871_v19 = vrot.slane %v3869_v56, 3 }
 0x30b   : > { %v2923_v30 = vpop.f32.mrf.mxu3 }
 0x30c   : > { %v3265_v30 = vadd.f32 %v10866_v20, %v2927_v9  ;;  %v3867_v60 = vsel %vm1250_vm3, %v3857_v29, %v3866_v18  ;;  %v3874_v20 = vrot.slane %v3872_v49, 4  ;;  %v9904_v49 = vld [vmem:[#allocation3 + $0x70] sm:$0xff] }
 0x30e   : > { %v3554_v46 = vadd.f32 %v10970_v31, %v3265_v30  ;;  %v11356_v33 = vpop.permute.xlu1 %2191  ;;  %v11358_v53 = vpop.permute.xlu0 %3181 }
 0x30f   : > { %14805 = vst [vmem:[#allocation118_spill] sm:$0xff] %v11356_v33  ;;  %v3881_v33 = vshll.u32 %v9904_v49, 16 }
 0x310   : > { %14806 = vst [vmem:[#allocation119_spill] sm:$0xff] %v11358_v53  ;;  %v11362_v9 = vpop.permute.xlu2 %1901 }
 0x311   : > { %14807 = vst [vmem:[#allocation120_spill] sm:$0xff] %v11362_v9 }
 0x313   : > { %v2925_v59 = vpop.f32.mrf.mxu3 }
 0x314   : > { %v3875_v59 = vor.u32 %v3874_v20, %v3871_v19  ;;  %v3878_v20 = vshrl.u32 %v9904_v49, 16 }
 0x316   : > { %v3876_v56 = vsel %vm1250_vm3, %v3866_v18, %v3875_v59  ;;  %v11372_v19 = vpop.permute.xlu1 %3183  ;;  %v11376_v26 = vpop.permute.xlu0 %3472  ;;  %v3880_v18 = vrot.slane %v3878_v20, 3 }
 0x317   : > { %14808 = vst [vmem:[#allocation121_spill] sm:$0xff] %v11372_v19 }
 0x318   : > { %9421 = vmatmul.msk.bf16.gmra.mxu3 %vm586_vm2, %v3867_v60  ;;  %v11374_v9 = vpop.permute.xlu2 %2195  ;;  %14810 = vst [vmem:[#allocation123_spill] sm:$0xff] %v11376_v26 }
 0x319   : > { %14809 = vst [vmem:[#allocation122_spill] sm:$0xff] %v11374_v9 }
 0x31b   : > { %v4090_v22 = vpop.f32.mrf.mxu3 }
 0x31c   : > { %v11354_v4 = vadd.f32 %v4090_v22, %v3554_v46  ;;  %v4311_v60 = vrot.slane %v4090_v22, 1  ;;  %v4600_v31 = vrot.slane %v4090_v22, 2 }
 0x320   : > { %v11386_v9 = vpop.permute.xlu2 %3187 }
 0x321   : > { %14812 = vst [vmem:[#allocation125_spill] sm:$0xff] %v11386_v9 }
 0x323   : > { %v11360_v29 = vpop.f32.mrf.mxu3 }
 0x324   : > { %v4312_v30 = vrot.slane %v11360_v29, 1  ;;  %v4601_v5 = vrot.slane %v11360_v29, 2 }
 0x326   : > { %v4602_v21 = vsel %vm2025_vm6, %v4600_v31, %v4601_v5  ;;  %v4313_v46 = vsel %vm1735_vm5, %v4311_v60, %v4312_v30 }
 0x327   : > { %4697 = vrot.lane.b32.xlu1 %v4602_v21, %s10030_s22  ;;  %4408 = vrot.lane.b32.xlu2 %v4313_v46, %s10029_s21  ;;  %v3883_v46 = vrot.slane %v3881_v33, 4 }
 0x328   : > { %9422 = vmatmul.msk.bf16.gmra.mxu3 %vm586_vm2, %v3876_v56  ;;  %v11382_v56 = vpop.permute.xlu1 %3476 }
 0x329   : > { %14811 = vst [vmem:[#allocation124_spill] sm:$0xff] %v11382_v56  ;;  %v3884_v49 = vor.u32 %v3883_v46, %v3880_v18 }
 0x32b   : > { %v4095_v22 = vpop.f32.mrf.mxu3  ;;  %v3885_v26 = vsel %vm1250_vm3, %v3875_v59, %v3884_v49 }
 0x32c   : > { %v4314_v45 = vrot.slane %v4095_v22, 1  ;;  %v4603_v31 = vrot.slane %v4095_v22, 2  ;;  %v11388_v22 = vpop.permute.xlu0 %1905 }
 0x32d   : > { %14813 = vst [vmem:[#allocation126_spill] sm:$0xff] %v11388_v22 }
 0x32e   : > { %v4604_v60 = vsel %vm2025_vm6, %v4601_v5, %v4603_v31  ;;  %v4315_v21 = vsel %vm1735_vm5, %v4312_v30, %v4314_v45  ;;  %v9905_v5 = vld [vmem:[#allocation3 + $0x78] sm:$0xff] }
 0x32f   : > { %4699 = vrot.lane.b32.xlu2 %v4604_v60, %s10030_s22  ;;  %4410 = vrot.lane.b32.xlu0 %v4315_v21, %s10029_s21  ;;  %v3887_v20 = vshrl.u32 %v9905_v5, 16  ;;  %v3890_v33 = vshll.u32 %v9905_v5, 16 }
 0x330   : > { %v11392_v45 = vpop.permute.xlu1 %1907 }
 0x331   : > { %14814 = vst [vmem:[#allocation127_spill] sm:$0xff] %v11392_v45  ;;  %v3892_v5 = vrot.slane %v3890_v33, 4  ;;  %v11406_v45 = vpop.permute.xlu2 %3478 }
 0x332   : > { %14816 = vst [vmem:[#allocation129_spill] sm:$0xff] %v11406_v45 }
 0x333   : > { %v11384_v19 = vpop.f32.mrf.mxu3 }
 0x334   : > { %v4316_v31 = vrot.slane %v11384_v19, 1  ;;  %v4605_v60 = vrot.slane %v11384_v19, 2  ;;  %v11402_v22 = vpop.permute.xlu0 %2197 }
 0x335   : > { %14815 = vst [vmem:[#allocation128_spill] sm:$0xff] %v11402_v22 }
 0x338   : > { %9423 = vmatmul.msk.bf16.gmra.mxu3 %vm586_vm2, %v3885_v26  ;;  %v3889_v26 = vrot.slane %v3887_v20, 3  ;;  %v11408_v56 = vpop.permute.xlu1 %2201  ;;  %v9906_v20 = vld [vmem:[#allocation3 + $0x80] sm:$0xff] }
 0x339   : > { %14817 = vst [vmem:[#allocation130_spill] sm:$0xff] %v11408_v56  ;;  %v11415_v33 = vpop.permute.xlu2 %1911 }
 0x33a   : > { %v3893_v10 = vor.u32 %v3892_v5, %v3889_v26  ;;  %14818 = vst [vmem:[#allocation131_spill] sm:$0xff] %v11415_v33  ;;  %v3899_v5 = vshll.u32 %v9906_v20, 16 }
 0x33b   : > { %v11394_v30 = vpop.f32.mrf.mxu3 }
 0x33c   : > { %v4318_v21 = vrot.slane %v11394_v30, 1  ;;  %v4607_v18 = vrot.slane %v11394_v30, 2 }
 0x33e   : > { %v4608_v46 = vsel %vm2025_vm6, %v4605_v60, %v4607_v18  ;;  %v4319_v59 = vsel %vm1735_vm5, %v4316_v31, %v4318_v21 }
 0x33f   : > { %4703 = vrot.lane.b32.xlu0 %v4608_v46, %s10030_s22  ;;  %4414 = vrot.lane.b32.xlu1 %v4319_v59, %s10029_s21  ;;  %v3894_v46 = vsel %vm1250_vm3, %v3884_v49, %v3893_v10  ;;  %v11418_v59 = vpop.permute.xlu0 %3189 }
 0x340   : > { %14819 = vst [vmem:[#allocation132_spill] sm:$0xff] %v11418_v59 }
 0x343   : > { %v4102_v9 = vpop.f32.mrf.mxu3 }
 0x344   : > { %v4320_v53 = vrot.slane %v4102_v9, 1  ;;  %v4609_v57 = vrot.slane %v4102_v9, 2  ;;  %v3896_v9 = vshrl.u32 %v9906_v20, 16 }
 0x346   : > { %v4610_v60 = vsel %vm2025_vm6, %v4607_v18, %v4609_v57  ;;  %v4321_v31 = vsel %vm1735_vm5, %v4318_v21, %v4320_v53  ;;  %v11422_v57 = vpop.permute.xlu1 %3193  ;;  %v3898_v53 = vrot.slane %v3896_v9, 3  ;;  %v3901_v21 = vrot.slane %v3899_v5, 4  ;;  %v11424_v18 = vpop.permute.xlu2 %2203 }
 0x347   : > { %4705 = vrot.lane.b32.xlu1 %v4610_v60, %s10030_s22  ;;  %4416 = vrot.lane.b32.xlu2 %v4321_v31, %s10029_s21  ;;  %14820 = vst [vmem:[#allocation133_spill] sm:$0xff] %v11422_v57  ;;  %v11426_v60 = vpop.permute.xlu0 %3482 }
 0x348   : > { %9424 = vmatmul.msk.bf16.gmra.mxu3 %vm586_vm2, %v3894_v46  ;;  %14821 = vst [vmem:[#allocation134_spill] sm:$0xff] %v11424_v18  ;;  %v3902_v31 = vor.u32 %v3901_v21, %v3898_v53  ;;  %v9907_v21 = vld [vmem:[#allocation3 + $0x88] sm:$0xff] }
 0x349   : > { %14822 = vst [vmem:[#allocation135_spill] sm:$0xff] %v11426_v60  ;;  %v3905_v15 = vshrl.u32 %v9907_v21, 16  ;;  %v3908_v1 = vshll.u32 %v9907_v21, 16 }
 0x34a   : > { %v3903_v53 = vsel %vm1250_vm3, %v3893_v10, %v3902_v31 }
 0x34b   : > { %v11420_v26 = vpop.f32.mrf.mxu3  ;;  %v3907_v10 = vrot.slane %v3905_v15, 3 }
 0x34c   : > { %v4322_v22 = vrot.slane %v11420_v26, 1  ;;  %v4611_v46 = vrot.slane %v11420_v26, 2 }
 0x34e   : > { %v11434_v20 = vpop.permute.xlu1 %1917  ;;  %v11442_v60 = vpop.permute.xlu2 %1919 }
 0x34f   : > { %14823 = vst [vmem:[#allocation136_spill] sm:$0xff] %v11434_v20  ;;  %v11444_v18 = vpop.permute.xlu0 %1913 }
 0x350   : > { %14824 = vst [vmem:[#allocation137_spill] sm:$0xff] %v11442_v60 }
 0x351   : > { %14825 = vst [vmem:[#allocation138_spill] sm:$0xff] %v11444_v18 }
 0x353   : > { %v11428_v49 = vpop.f32.mrf.mxu3 }
 0x354   : > { %v4324_v45 = vrot.slane %v11428_v49, 1  ;;  %v4613_v59 = vrot.slane %v11428_v49, 2 }
 0x356   : > { %v4614_v9 = vsel %vm2025_vm6, %v4611_v46, %v4613_v59  ;;  %v4325_v5 = vsel %vm1735_vm5, %v4322_v22, %v4324_v45 }
 0x357   : > { %4709 = vrot.lane.b32.xlu2 %v4614_v9, %s10030_s22  ;;  %4420 = vrot.lane.b32.xlu0 %v4325_v5, %s10029_s21  ;;  %v11448_v9 = vpop.permute.xlu1 %2209  ;;  %v3910_v5 = vrot.slane %v3908_v1, 4 }
 0x358   : > { %9425 = vmatmul.msk.bf16.gmra.mxu3 %vm586_vm2, %v3903_v53  ;;  %14826 = vst [vmem:[#allocation139_spill] sm:$0xff] %v11448_v9  ;;  %v11452_v53 = vpop.permute.xlu2 %2213 }
 0x359   : > { %14827 = vst [vmem:[#allocation140_spill] sm:$0xff] %v11452_v53  ;;  %v3911_v21 = vor.u32 %v3910_v5, %v3907_v10 }
 0x35b   : > { %v4110_v57 = vpop.f32.mrf.mxu3 }
 0x35c   : > { %v4326_v8 = vrot.slane %v4110_v57, 1  ;;  %v4615_v20 = vrot.slane %v4110_v57, 2  ;;  %v11456_v57 = vpop.permute.xlu0 %2207 }
 0x35d   : > { %14828 = vst [vmem:[#allocation141_spill] sm:$0xff] %v11456_v57 }
 0x35e   : > { %v4616_v22 = vsel %vm2025_vm6, %v4613_v59, %v4615_v20  ;;  %v4327_v46 = vsel %vm1735_vm5, %v4324_v45, %v4326_v8  ;;  %v3912_v59 = vsel %vm1250_vm3, %v3902_v31, %v3911_v21  ;;  %v9908_v8 = vld [vmem:[#allocation3 + $0x90] sm:$0xff] }
 0x35f   : > { %4711 = vrot.lane.b32.xlu0 %v4616_v22, %s10030_s22  ;;  %4422 = vrot.lane.b32.xlu1 %v4327_v46, %s10029_s21  ;;  %v11458_v18 = vpop.permute.xlu1 %1925  ;;  %v3914_v15 = vshrl.u32 %v9908_v8, 16  ;;  %v3917_v1 = vshll.u32 %v9908_v8, 16 }
 0x360   : > { %14829 = vst [vmem:[#allocation142_spill] sm:$0xff] %v11458_v18  ;;  %v11462_v45 = vpop.permute.xlu2 %3195 }
 0x361   : > { %14830 = vst [vmem:[#allocation143_spill] sm:$0xff] %v11462_v45  ;;  %v3916_v8 = vrot.slane %v3914_v15, 3  ;;  %v3919_v45 = vrot.slane %v3917_v1, 4  ;;  %v9909_v1 = vld [vmem:[#allocation3 + $0x98] sm:$0xff] }
 0x363   : > { %v11454_v60 = vpop.f32.mrf.mxu3  ;;  %v3920_v56 = vor.u32 %v3919_v45, %v3916_v8 }
 0x364   : > { %v4328_v22 = vrot.slane %v11454_v60, 1  ;;  %v4617_v46 = vrot.slane %v11454_v60, 2  ;;  %v11470_v18 = vpop.permute.xlu0 %1923 }
 0x365   : > { %14831 = vst [vmem:[#allocation144_spill] sm:$0xff] %v11470_v18  ;;  %v3921_v15 = vsel %vm1250_vm3, %v3911_v21, %v3920_v56 }
 0x367   : > { %v11474_v53 = vpop.permute.xlu1 %3484 }
 0x368   : > { %9426 = vmatmul.msk.bf16.gmra.mxu3 %vm586_vm2, %v3912_v59  ;;  %14832 = vst [vmem:[#allocation145_spill] sm:$0xff] %v11474_v53  ;;  %v11478_v9 = vpop.permute.xlu2 %3488 }
 0x369   : > { %14833 = vst [vmem:[#allocation146_spill] sm:$0xff] %v11478_v9 }
 0x36b   : > { %v11464_v20 = vpop.f32.mrf.mxu3 }
 0x36c   : > { %v4330_v10 = vrot.slane %v11464_v20, 1  ;;  %v4619_v5 = vrot.slane %v11464_v20, 2  ;;  %v11482_v36 = vpop.permute.xlu0 %2215 }
 0x36d   : > { %14834 = vst [vmem:[#allocation147_spill] sm:$0xff] %v11482_v36 }
 0x36e   : > { %v4620_v31 = vsel %vm2025_vm6, %v4617_v46, %v4619_v5  ;;  %v4331_v59 = vsel %vm1735_vm5, %v4328_v22, %v4330_v10 }
 0x36f   : > { %4715 = vrot.lane.b32.xlu1 %v4620_v31, %s10030_s22  ;;  %4426 = vrot.lane.b32.xlu2 %v4331_v59, %s10029_s21  ;;  %v11484_v22 = vpop.permute.xlu1 %3201 }
 0x370   : > { %14835 = vst [vmem:[#allocation148_spill] sm:$0xff] %v11484_v22  ;;  %v11490_v45 = vpop.permute.xlu2 %3205 }
 0x371   : > { %14836 = vst [vmem:[#allocation149_spill] sm:$0xff] %v11490_v45 }
 0x373   : > { %v4117_v57 = vpop.f32.mrf.mxu3 }
 0x374   : > { %v4332_v33 = vrot.slane %v4117_v57, 1  ;;  %v4621_v32 = vrot.slane %v4117_v57, 2 }
 0x376   : > { %v4622_v18 = vsel %vm2025_vm6, %v4619_v5, %v4621_v32  ;;  %v4333_v46 = vsel %vm1735_vm5, %v4330_v10, %v4332_v33  ;;  %v3923_v32 = vshrl.u32 %v9909_v1, 16  ;;  %v3926_v5 = vshll.u32 %v9909_v1, 16  ;;  %v11494_v33 = vpop.permute.xlu0 %3199 }
 0x377   : > { %4717 = vrot.lane.b32.xlu2 %v4622_v18, %s10030_s22  ;;  %4428 = vrot.lane.b32.xlu0 %v4333_v46, %s10029_s21  ;;  %14837 = vst [vmem:[#allocation150_spill] sm:$0xff] %v11494_v33  ;;  %v11496_v10 = vpop.permute.xlu1 %3494 }
 0x378   : > { %9427 = vmatmul.msk.bf16.gmra.mxu3 %vm586_vm2, %v3921_v15  ;;  %14838 = vst [vmem:[#allocation151_spill] sm:$0xff] %v11496_v10  ;;  %v3925_v31 = vrot.slane %v3923_v32, 3  ;;  %v3928_v59 = vrot.slane %v3926_v5, 4  ;;  %v11504_v36 = vpop.permute.xlu2 %3496  ;;  %v9910_v5 = vld [vmem:[#allocation3 + $0xa0] sm:$0xff] }
 0x379   : > { %14839 = vst [vmem:[#allocation152_spill] sm:$0xff] %v11504_v36  ;;  %v3932_v22 = vshrl.u32 %v9910_v5, 16  ;;  %v3935_v36 = vshll.u32 %v9910_v5, 16 }
 0x37a   : > { %v3929_v8 = vor.u32 %v3928_v59, %v3925_v31 }
 0x37b   : > { %v11492_v57 = vpop.f32.mrf.mxu3 }
 0x37c   : > { %v4334_v21 = vrot.slane %v11492_v57, 1  ;;  %v4623_v46 = vrot.slane %v11492_v57, 2  ;;  %v3930_v32 = vsel %vm1250_vm3, %v3920_v56, %v3929_v8  ;;  %v3934_v56 = vrot.slane %v3932_v22, 3 }
 0x37e   : > { %v11514_v31 = vpop.permute.xlu0 %3490 }
 0x37f   : > { %v11508_v10 = vpop.permute.xlu1 %3211  ;;  %14841 = vst [vmem:[#allocation154_spill] sm:$0xff] %v11514_v31  ;;  %v1980_v31 = vadd.f32 %v10879_v61, %v10449_v37 }
 0x380   : > { %14840 = vst [vmem:[#allocation153_spill] sm:$0xff] %v11508_v10  ;;  %v11516_v33 = vpop.permute.xlu2 %3213 }
 0x381   : > { %14842 = vst [vmem:[#allocation155_spill] sm:$0xff] %v11516_v33 }
 0x383   : > { %v11498_v18 = vpop.f32.mrf.mxu3 }
 0x384   : > { %v4336_v15 = vrot.slane %v11498_v18, 1  ;;  %v4625_v53 = vrot.slane %v11498_v18, 2 }
 0x386   : > { %v4626_v1 = vsel %vm2025_vm6, %v4623_v46, %v4625_v53  ;;  %v4337_v45 = vsel %vm1735_vm5, %v4334_v21, %v4336_v15  ;;  %v11524_v10 = vpop.permute.xlu0 %3207 }
 0x387   : > { %4721 = vrot.lane.b32.xlu0 %v4626_v1, %s10030_s22  ;;  %4432 = vrot.lane.b32.xlu1 %v4337_v45, %s10029_s21  ;;  %v3937_v45 = vrot.slane %v3935_v36, 4  ;;  %14843 = vst [vmem:[#allocation156_spill] sm:$0xff] %v11524_v10  ;;  %v11526_v5 = vpop.permute.xlu1 %3502  ;;  %v9912_v10 = vld [vmem:[#allocation3 + $0xb0] sm:$0xff] }
 0x388   : > { %9428 = vmatmul.msk.bf16.gmra.mxu3 %vm586_vm2, %v3930_v32  ;;  %v1978_v32 = vadd.f32 %v10925_v23, %v10252_v13  ;;  %14844 = vst [vmem:[#allocation157_spill] sm:$0xff] %v11526_v5  ;;  %v11538_v13 = vld [vmem:[%s14522_s5] ss:$0 sm:$0xff] }
 0x38b   : > { %v4125_v59 = vpop.f32.mrf.mxu3 }
 0x38c   : > { %v4338_v9 = vrot.slane %v4125_v59, 1  ;;  %v4627_v46 = vrot.slane %v4125_v59, 2  ;;  %v2268_v59 = vadd.f32 %v10951_v51, %v1978_v32 }
 0x38e   : > { %v4628_v21 = vsel %vm2025_vm6, %v4625_v53, %v4627_v46  ;;  %v4339_v1 = vsel %vm1735_vm5, %v4336_v15, %v4338_v9  ;;  %v3938_v53 = vor.u32 %v3937_v45, %v3934_v56  ;;  %v4409_v46 = vpop.permute.xlu2 %4408  ;;  %v2928_v9 = vadd.f32 %v10465_v25, %v2268_v59  ;;  %v11540_v23 = vpop.permute.xlu0 %3500 }
 0x38f   : > { %4723 = vrot.lane.b32.xlu1 %v4628_v21, %s10030_s22  ;;  %4434 = vrot.lane.b32.xlu2 %v4339_v1, %s10029_s21  ;;  %v9911_v21 = vld [vmem:[#allocation3 + $0xa8] sm:$0xff]  ;;  %v4552_v36 = vadd.f32 %v4409_v46, %v11354_v4  ;;  %14845 = vst [vmem:[#allocation158_spill] sm:$0xff] %v11540_v23 }
 0x390   : > { %v3939_v15 = vsel %vm1250_vm3, %v3929_v8, %v3938_v53  ;;  %v3266_v1 = vadd.f32 %v10915_v39, %v2928_v9  ;;  %v3941_v8 = vshrl.u32 %v9911_v21, 16  ;;  %v3944_v45 = vshll.u32 %v9911_v21, 16 }
 0x392   : > { %v3943_v9 = vrot.slane %v3941_v8, 3  ;;  %v3946_v21 = vrot.slane %v3944_v45, 4  ;;  %v3950_v8 = vshrl.u32 %v9912_v10, 16 }
 0x393   : > { %v11529_v33 = vpop.f32.mrf.mxu3 }
 0x394   : > { %v4340_v25 = vrot.slane %v11529_v33, 1  ;;  %v4629_v4 = vrot.slane %v11529_v33, 2 }
 0x398   : > { %9429 = vmatmul.msk.bf16.gmra.mxu3 %vm586_vm2, %v3939_v15  ;;  %v3555_v15 = vadd.f32 %v10948_v43, %v3266_v1  ;;  %v4700_v1 = vpop.permute.xlu2 %4699 }
 0x399   : > { %v4698_v51 = vpop.permute.xlu1 %4697 }
 0x39a   : > { %v4841_v22 = vadd.f32 %v4698_v51, %v4552_v36 }
 0x39b   : > { %v11544_v56 = vpop.f32.mrf.mxu3 }
 0x39c   : > { %v4893_v32 = vadd.f32 %v11538_v13, %v4841_v22  ;;  %v4342_v59 = vrot.slane %v11544_v56, 1  ;;  %v4631_v46 = vrot.slane %v11544_v56, 2  ;;  %v4215_v22 = vadd.f32 %v11360_v29, %v3555_v15 }
 0x39d   : > { %v3953_v15 = vshll.u32 %v9912_v10, 16 }
 0x39e   : > { %v4941_v5 = vmax.f32 %v4893_v32, 0.0  ;;  %v4632_v36 = vsel %vm2025_vm6, %v4629_v4, %v4631_v46  ;;  %v4343_v39 = vsel %vm1735_vm5, %v4340_v25, %v4342_v59  ;;  %v3947_v25 = vor.u32 %v3946_v21, %v3943_v9 }
 0x39f   : > { %4727 = vrot.lane.b32.xlu2 %v4632_v36, %s10030_s22  ;;  %4438 = vrot.lane.b32.xlu0 %v4343_v39, %s10029_s21  ;;  %v2270_v32 = vadd.f32 %v10904_v63, %v1980_v31  ;;  %v9566_v31 = vld [vmem:[#allocation4 + $0xc] sm:$0x8]  ;;  %v3955_v21 = vrot.slane %v3953_v15, 4 }
 0x3a0   : > { %v5037_v51 = vpack.c.bf16 %v4941_v5, %v4941_v5  ;;  %v1981_v5 = vadd.f32 %v10920_v16, %v10470_v62  ;;  %v3948_v37 = vsel %vm1250_vm3, %v3938_v53, %v3947_v25  ;;  %v3952_v16 = vrot.slane %v3950_v8, 3 }
 0x3a1   : > { %v4411_v23 = vpop.permute.xlu0 %4410  ;;  %v2930_v61 = vadd.f32 %v10514_v50, %v2270_v32 }
 0x3a2   : > { %5246 = vst.msk [vmem:[#allocation4 + $0x10] sm:$0xf] %vm289_vm7, %v5037_v51  ;;  %v4553_v43 = vadd.f32 %v4411_v23, %v4215_v22  ;;  %v2271_v62 = vadd.f32 %v10894_v44, %v1981_v5 }
 0x3a3   : > { %v4132_v4 = vpop.f32.mrf.mxu3 }
 0x3a4   : > { %v4842_v36 = vadd.f32 %v4700_v1, %v4553_v43  ;;  %v4344_v39 = vrot.slane %v4132_v4, 1  ;;  %v4633_v9 = vrot.slane %v4132_v4, 2  ;;  %v2931_v50 = vadd.f32 %v10534_v14, %v2271_v62 }
 0x3a5   : > { %v11577_v1 = vor.u32 %v3955_v21, %v3952_v16 }
 0x3a6   : > { %v4894_v29 = vadd.f32 %v11538_v13, %v4842_v36  ;;  %v4345_v45 = vsel %vm1735_vm5, %v4342_v59, %v4344_v39  ;;  %v3268_v59 = vadd.f32 %v11009_v24, %v2930_v61  ;;  %v4634_v43 = vsel %vm2025_vm6, %v4631_v46, %v4633_v9 }
 0x3a7   : > { %5101 = vrot.lane.b32.xlu0 %v5037_v51, %s10031_s11  ;;  %4440 = vrot.lane.b32.xlu1 %v4345_v45, %s10029_s21  ;;  %v3269_v44 = vadd.f32 %v10988_v6, %v2931_v50  ;;  %v3957_v14 = vsel %vm1250_vm3, %v3947_v25, %v11577_v1 }
 0x3a8   : > { %v4942_v63 = vmax.f32 %v4894_v29, 0.0  ;;  %9430 = vmatmul.msk.bf16.gmra.mxu3 %vm586_vm2, %v3948_v37  ;;  %v3557_v53 = vadd.f32 %v10959_v11, %v3268_v59 }
 0x3a9   : > { %v9943_v23 = vld [vmem:[#allocation4 + $0xc] sm:$0xf0]  ;;  %v3558_v11 = vadd.f32 %v11027_v27, %v3269_v44 }
 0x3aa   : > { %v5038_v10 = vpack.c.bf16 %v4942_v63, %v4942_v63  ;;  %v9567_v22 = vor.u32 %v9943_v23, %v9566_v31  ;;  %v4217_v4 = vadd.f32 %v11384_v19, %v3557_v53  ;;  %v4417_v31 = vpop.permute.xlu2 %4416 }
 0x3ab   : > { %v11571_v51 = vpop.f32.mrf.mxu3  ;;  %v4218_v23 = vadd.f32 %v11394_v30, %v3558_v11 }
 0x3ac   : > { %5247 = vst.msk [vmem:[#allocation4 + $0x14] sm:$0xf] %vm289_vm7, %v5038_v10  ;;  %v6548_v24 = vshrl.u32 %v9567_v22, 16  ;;  %v6551_v32 = vshll.u32 %v9567_v22, 16  ;;  %v4346_v46 = vrot.slane %v11571_v51, 1  ;;  %v4635_v5 = vrot.slane %v11571_v51, 2 }
 0x3ad   : > { %v4556_v44 = vadd.f32 %v4417_v31, %v4218_v23 }
 0x3ae   : > { %v6550_v15 = vrot.slane %v6548_v24, 3  ;;  %v6553_v63 = vrot.slane %v6551_v32, 4 }
 0x3af   : > { %4729 = vrot.lane.b32.xlu0 %v4634_v43, %s10030_s22  ;;  %5103 = vrot.lane.b32.xlu1 %v5038_v10, %s10031_s11  ;;  %v9913_v43 = vld [vmem:[#allocation3 + $0xb8] sm:$0xff] }
 0x3b0   : > { %v6554_v32 = vor.u32 %v6553_v63, %v6550_v15 }
 0x3b1   : > { %v4415_v36 = vpop.permute.xlu1 %4414  ;;  %v4704_v6 = vpop.permute.xlu0 %4703 }
 0x3b2   : > { %v4555_v39 = vadd.f32 %v4415_v36, %v4217_v4 }
 0x3b3   : > { %v11588_v8 = vpop.f32.mrf.mxu3  ;;  %v9920_v29 = vld [vmem:[#allocation4 + $0x10] sm:$0xff] }
 0x3b4   : > { %v9944_v45 = vld [vmem:[#allocation4 + $0x14] sm:$0xff]  ;;  %v4844_v37 = vadd.f32 %v4704_v6, %v4555_v39  ;;  %v4348_v19 = vrot.slane %v11588_v8, 1  ;;  %v4637_v61 = vrot.slane %v11588_v8, 2  ;;  %v5488_v25 = vshrl.u32 %v9920_v29, 16 }
 0x3b5   : > { %v5491_v62 = vshll.u32 %v9920_v29, 16  ;;  %v6556_v27 = vshrl.u32 %v9944_v45, 16  ;;  %v6559_v16 = vshll.u32 %v9944_v45, 16  ;;  %v3959_v29 = vshrl.u32 %v9913_v43, 16 }
 0x3b6   : > { %v4896_v59 = vadd.f32 %v11538_v13, %v4844_v37  ;;  %v4638_v10 = vsel %vm2025_vm6, %v4635_v5, %v4637_v61  ;;  %v4349_v9 = vsel %vm1735_vm5, %v4346_v46, %v4348_v19  ;;  %v5490_v21 = vrot.slane %v5488_v25, 3 }
 0x3b7   : > { %4733 = vrot.lane.b32.xlu1 %v4638_v10, %s10030_s22  ;;  %4444 = vrot.lane.b32.xlu2 %v4349_v9, %s10029_s21  ;;  %v5493_v22 = vrot.slane %v5491_v62, 4  ;;  %v6558_v50 = vrot.slane %v6556_v27, 3  ;;  %v6561_v53 = vrot.slane %v6559_v16, 4  ;;  %v3962_v45 = vshll.u32 %v9913_v43, 16  ;;  %v9914_v62 = vld [vmem:[#allocation3 + $0xc0] sm:$0xff] }
 0x3b8   : > { %v4944_v24 = vmax.f32 %v4896_v59, 0.0  ;;  %9431 = vmatmul.msk.bf16.gmra.mxu3 %vm586_vm2, %v3957_v14  ;;  %v1983_v14 = vadd.f32 %v10937_v41, %v10504_v35  ;;  %v3961_v25 = vrot.slane %v3959_v29, 3  ;;  %v1984_v27 = vadd.f32 %v10977_v3, %v10516_v55  ;;  %v9692_v16 = vld [vmem:[#allocation4 + $0x18] sm:$0x8] }
 0x3b9   : > { %v4706_v30 = vpop.permute.xlu1 %4705  ;;  %v11601_v4 = vor.u32 %v5493_v22, %v5490_v21  ;;  %v11603_v36 = vor.u32 %v6561_v53, %v6558_v50  ;;  %v3964_v35 = vrot.slane %v3962_v45, 4  ;;  %v3968_v53 = vshrl.u32 %v9914_v62, 16 }
 0x3ba   : > { %v5039_v39 = vpack.c.bf16 %v4944_v24, %v4944_v24  ;;  %v4845_v11 = vadd.f32 %v4706_v30, %v4556_v44  ;;  %v2273_v63 = vadd.f32 %v10984_v42, %v1983_v14  ;;  %v2274_v59 = vadd.f32 %v10968_v52, %v1984_v27 }
 0x3bb   : > { %v4140_v46 = vpop.f32.mrf.mxu3  ;;  %v5495_v5 = vsel %vm1250_vm3, %v10467_v58, %v11601_v4  ;;  %v6563_v6 = vsel %vm1250_vm3, %v6554_v32, %v11603_v36  ;;  %v11627_v10 = vor.u32 %v3964_v35, %v3961_v25  ;;  %v3971_v3 = vshll.u32 %v9914_v62, 16 }
 0x3bc   : > { %5249 = vst.msk [vmem:[#allocation4 + $0x1c] sm:$0xf] %vm289_vm7, %v5039_v39  ;;  %v4897_v15 = vadd.f32 %v11538_v13, %v4845_v11  ;;  %v4350_v37 = vrot.slane %v4140_v46, 1  ;;  %9539 = vmatmul.msk.bf16.gmra.mxu0 %vm5694_vm8, %v5495_v5  ;;  %9664 = vmatmul.msk.bf16.vlgmr.msrb.gmra.mxu1 %vm5694_vm8, %v6563_v6  ;;  %v2933_v23 = vadd.f32 %v10569_v54, %v2273_v63  ;;  %v4639_v42 = vrot.slane %v4140_v46, 2 }
 0x3bd   : > { %v2934_v24 = vadd.f32 %v10589_v17, %v2274_v59  ;;  %v3970_v11 = vrot.slane %v3968_v53, 3  ;;  %v3973_v45 = vrot.slane %v3971_v3, 4 }
 0x3be   : > { %v4945_v58 = vmax.f32 %v4897_v15, 0.0  ;;  %v4351_v31 = vsel %vm1735_vm5, %v4348_v19, %v4350_v37  ;;  %v3271_v22 = vadd.f32 %v11019_v40, %v2933_v23  ;;  %v4640_v44 = vsel %vm2025_vm6, %v4637_v61, %v4639_v42  ;;  %v4710_v37 = vpop.permute.xlu2 %4709 }
 0x3bf   : > { %5105 = vrot.lane.b32.xlu2 %v5039_v39, %s10031_s11  ;;  %4446 = vrot.lane.b32.xlu0 %v4351_v31, %s10029_s21  ;;  %v3966_v40 = vsel %vm1250_vm3, %v11577_v1, %v11627_v10  ;;  %v1986_v61 = vadd.f32 %v11051_v48, %v10553_v38  ;;  %v3272_v17 = vadd.f32 %v11086_v28, %v2934_v24 }
 0x3c0   : > { %v5040_v41 = vpack.c.bf16 %v4945_v58, %v4945_v58  ;;  %v3560_v54 = vadd.f32 %v11012_v12, %v3271_v22 }
 0x3c1   : > { %v3561_v59 = vadd.f32 %v11043_v0, %v3272_v17  ;;  %v2276_v24 = vadd.f32 %v11001_v47, %v1986_v61  ;;  %v1987_v47 = vadd.f32 %v11032_v34, %v10571_v2 }
 0x3c2   : > { %5250 = vst.msk [vmem:[#allocation4 + $0x20] sm:$0xf] %vm289_vm7, %v5040_v41  ;;  %v4220_v39 = vadd.f32 %v11420_v26, %v3560_v54 }
 0x3c3   : > { %v11625_v19 = vpop.f32.mrf.mxu3  ;;  %v9921_v9 = vld [vmem:[#allocation4 + $0x18] sm:$0xff]  ;;  %v4221_v0 = vadd.f32 %v11428_v49, %v3561_v59  ;;  %v3974_v49 = vor.u32 %v3973_v45, %v3970_v11  ;;  %v2936_v61 = vadd.f32 %v10617_v7, %v2276_v24  ;;  %v14847_v7 = vld [vmem:[#allocation45_spill] sm:$0xff] }
 0x3c4   : > { %v9968_v21 = vld [vmem:[#allocation4 + $0x18] sm:$0xf0]  ;;  %v5497_v43 = vshrl.u32 %v9921_v9, 16  ;;  %v5500_v55 = vshll.u32 %v9921_v9, 16  ;;  %v4352_v1 = vrot.slane %v11625_v19, 1  ;;  %v4641_v14 = vrot.slane %v11625_v19, 2 }
 0x3c5   : > { %v9693_v50 = vor.u32 %v9968_v21, %v9692_v16  ;;  %v3975_v11 = vsel %vm1250_vm3, %v11627_v10, %v3974_v49  ;;  %v2277_v34 = vadd.f32 %v14847_v7, %v1987_v47 }
 0x3c6   : > { %v5499_v30 = vrot.slane %v5497_v43, 3  ;;  %v5502_v32 = vrot.slane %v5500_v55, 4 }
 0x3c7   : > { %v7655_v52 = vshrl.u32 %v9693_v50, 16  ;;  %4735 = vrot.lane.b32.xlu2 %v4640_v44, %s10030_s22  ;;  %5107 = vrot.lane.b32.xlu0 %v5040_v41, %s10031_s11  ;;  %v7658_v12 = vshll.u32 %v9693_v50, 16 }
 0x3c8   : > { %9432 = vmatmul.msk.bf16.gmra.mxu3 %vm586_vm2, %v3966_v40  ;;  %v11645_v5 = vor.u32 %v5502_v32, %v5499_v30 }
 0x3c9   : > { %v4421_v46 = vpop.permute.xlu0 %4420  ;;  %v9945_v6 = vld [vmem:[#allocation4 + $0x1c] sm:$0xff]  ;;  %v7657_v15 = vrot.slane %v7655_v52, 3  ;;  %v7660_v62 = vrot.slane %v7658_v12, 4 }
 0x3ca   : > { %v9969_v29 = vld [vmem:[#allocation4 + $0x20] sm:$0xff]  ;;  %v4558_v26 = vadd.f32 %v4421_v46, %v4220_v39  ;;  %v5504_v38 = vsel %vm1250_vm3, %v11601_v4, %v11645_v5  ;;  %v6565_v48 = vshrl.u32 %v9945_v6, 16  ;;  %v6568_v28 = vshll.u32 %v9945_v6, 16  ;;  %v9915_v6 = vld [vmem:[#allocation3 + $0xc8] sm:$0xff] }
 0x3cb   : > { %v11649_v63 = vpop.f32.mrf.mxu3  ;;  %v7663_v58 = vshrl.u32 %v9969_v29, 16  ;;  %v9922_v31 = vld [vmem:[#allocation4 + $0x20] sm:$0xff]  ;;  %v7666_v42 = vshll.u32 %v9969_v29, 16  ;;  %v7661_v44 = vor.u32 %v7660_v62, %v7657_v15  ;;  %v3980_v15 = vshll.u32 %v9915_v6, 16 }
 0x3cc   : > { %v4847_v25 = vadd.f32 %v4710_v37, %v4558_v26  ;;  %v4354_v35 = vrot.slane %v11649_v63, 1  ;;  %v4643_v41 = vrot.slane %v11649_v63, 2  ;;  %9540 = vmatmul.msk.bf16.gmra.mxu0 %vm5694_vm8, %v5504_v38  ;;  %v6567_v27 = vrot.slane %v6565_v48, 3  ;;  %v14846_v37 = vld [vmem:[#allocation44_spill] sm:$0xff]  ;;  %v14848_v62 = vld [vmem:[#allocation53_spill] sm:$0xff] }
 0x3cd   : > { %v6570_v16 = vrot.slane %v6568_v28, 4  ;;  %v7665_v23 = vrot.slane %v7663_v58, 3  ;;  %v7668_v50 = vrot.slane %v7666_v42, 4  ;;  %v5506_v53 = vshrl.u32 %v9922_v31, 16  ;;  %v4427_v42 = vpop.permute.xlu2 %4426 }
 0x3ce   : > { %v4899_v4 = vadd.f32 %v11538_v13, %v4847_v25  ;;  %v4644_v9 = vsel %vm2025_vm6, %v4641_v14, %v4643_v41  ;;  %v4355_v21 = vsel %vm1735_vm5, %v4352_v1, %v4354_v35  ;;  %v5509_v43 = vshll.u32 %v9922_v31, 16 }
 0x3cf   : > { %4739 = vrot.lane.b32.xlu0 %v4644_v9, %s10030_s22  ;;  %4450 = vrot.lane.b32.xlu1 %v4355_v21, %s10029_s21  ;;  %v11665_v22 = vor.u32 %v6570_v16, %v6567_v27  ;;  %v11671_v52 = vor.u32 %v7668_v50, %v7665_v23  ;;  %v5508_v17 = vrot.slane %v5506_v53, 3  ;;  %v3977_v26 = vshrl.u32 %v9915_v6, 16  ;;  %v14849_v16 = vld [vmem:[#allocation7_spill] sm:$0xff] }
 0x3d0   : > { %v4947_v55 = vmax.f32 %v4899_v4, 0.0  ;;  %v5511_v46 = vrot.slane %v5509_v43, 4  ;;  %v3274_v38 = vadd.f32 %v14846_v37, %v2936_v61  ;;  %v2937_v23 = vadd.f32 %v14849_v16, %v2277_v34  ;;  %v14852_v34 = vld [vmem:[#allocation5_spill] sm:$0xff] }
 0x3d1   : > { %v4423_v3 = vpop.permute.xlu1 %4422  ;;  %v6572_v54 = vsel %vm1250_vm3, %v11603_v36, %v11665_v22  ;;  %v4712_v32 = vpop.permute.xlu0 %4711  ;;  %v7670_v12 = vsel %vm1250_vm3, %v7661_v44, %v11671_v52  ;;  %v3979_v25 = vrot.slane %v3977_v26, 3 }
 0x3d2   : > { %v5041_v40 = vpack.c.bf16 %v4947_v55, %v4947_v55  ;;  %v4559_v30 = vadd.f32 %v4423_v3, %v4221_v0  ;;  %9665 = vmatmul.msk.bf16.gmra.mxu1 %vm5694_vm8, %v6572_v54  ;;  %9790 = vmatmul.msk.bf16.vlgmr.msrb.gmra.mxu2 %vm5694_vm8, %v7670_v12  ;;  %v11688_v45 = vor.u32 %v5511_v46, %v5508_v17  ;;  %v14850_v55 = vld [vmem:[#allocation52_spill] sm:$0xff] }
 0x3d3   : > { %v4147_v39 = vpop.f32.mrf.mxu3  ;;  %v3563_v27 = vadd.f32 %v14848_v62, %v3274_v38  ;;  %v3275_v0 = vadd.f32 %v14850_v55, %v2937_v23  ;;  %v14855_v62 = vld [vmem:[#allocation56_spill] sm:$0xff] }
 0x3d4   : > { %5252 = vst.msk [vmem:[#allocation4 + $0x28] sm:$0xf] %vm289_vm7, %v5041_v40  ;;  %v4848_v36 = vadd.f32 %v4712_v32, %v4559_v30  ;;  %v4356_v29 = vrot.slane %v4147_v39, 1  ;;  %v4645_v28 = vrot.slane %v4147_v39, 2  ;;  %v5513_v31 = vsel %vm1250_vm3, %v11645_v5, %v11688_v45 }
 0x3d5   : > { %v4223_v9 = vadd.f32 %v11454_v60, %v3563_v27  ;;  %v14851_v60 = vld [vmem:[#allocation49_spill] sm:$0xff] }
 0x3d6   : > { %v4900_v1 = vadd.f32 %v11538_v13, %v4848_v36  ;;  %v4357_v14 = vsel %vm1735_vm5, %v4354_v35, %v4356_v29  ;;  %v3982_v35 = vrot.slane %v3980_v15, 4  ;;  %v4646_v5 = vsel %vm2025_vm6, %v4643_v41, %v4645_v28 }
 0x3d7   : > { %5109 = vrot.lane.b32.xlu1 %v5041_v40, %s10031_s11  ;;  %4452 = vrot.lane.b32.xlu2 %v4357_v14, %s10029_s21  ;;  %v4561_v43 = vadd.f32 %v4427_v42, %v4223_v9  ;;  %v3564_v24 = vadd.f32 %v14851_v60, %v3275_v0  ;;  %v9916_v14 = vld [vmem:[#allocation3 + $0xd0] sm:$0xff] }
 0x3d8   : > { %v4948_v2 = vmax.f32 %v4900_v1, 0.0  ;;  %9433 = vmatmul.msk.bf16.gmra.mxu3 %vm586_vm2, %v3975_v11  ;;  %v11708_v53 = vor.u32 %v3982_v35, %v3979_v25  ;;  %v14854_v35 = vld [vmem:[#allocation6_spill] sm:$0xff] }
 0x3d9   : > { %v1990_v27 = vadd.f32 %v14855_v62, %v14854_v35  ;;  %v9917_v35 = vld [vmem:[#allocation3 + $0xd8] sm:$0xff] }
 0x3da   : > { %v5042_v48 = vpack.c.bf16 %v4948_v2, %v4948_v2  ;;  %v3984_v32 = vsel %vm1250_vm3, %v3974_v49, %v11708_v53 }
 0x3db   : > { %v11693_v58 = vpop.f32.mrf.mxu3  ;;  %v9946_v10 = vld [vmem:[#allocation4 + $0x24] sm:$0xff] }
 0x3dc   : > { %5253 = vst.msk [vmem:[#allocation4 + $0x2c] sm:$0xf] %vm289_vm7, %v5042_v48  ;;  %9541 = vmatmul.msk.bf16.gmra.mxu0 %vm5694_vm8, %v5513_v31  ;;  %v6574_v59 = vshrl.u32 %v9946_v10, 16  ;;  %v6577_v4 = vshll.u32 %v9946_v10, 16  ;;  %v4358_v40 = vrot.slane %v11693_v58, 1  ;;  %v4647_v46 = vrot.slane %v11693_v58, 2 }
 0x3dd   : > { %v4224_v31 = vadd.f32 %v11464_v20, %v3564_v24  ;;  %v14856_v20 = vld [vmem:[#allocation41_spill] sm:$0xff]  ;;  %v14857_v24 = vld [vmem:[#allocation46_spill] sm:$0xff] }
 0x3de   : > { %v6576_v21 = vrot.slane %v6574_v59, 3  ;;  %v6579_v50 = vrot.slane %v6577_v4, 4  ;;  %v3986_v59 = vshrl.u32 %v9916_v14, 16 }
 0x3df   : > { %4741 = vrot.lane.b32.xlu1 %v4646_v5, %s10030_s22  ;;  %5111 = vrot.lane.b32.xlu2 %v5042_v48, %s10031_s11  ;;  %v14853_v48 = vld [vmem:[#allocation43_spill] sm:$0xff] }
 0x3e0   : > { %v11711_v54 = vor.u32 %v6579_v50, %v6576_v21  ;;  %v1989_v28 = vadd.f32 %v14853_v48, %v14852_v34  ;;  %v3989_v21 = vshll.u32 %v9916_v14, 16  ;;  %v14861_v34 = vld [vmem:[#allocation61_spill] sm:$0xff] }
 0x3e1   : > { %v4716_v3 = vpop.permute.xlu1 %4715 }
 0x3e2   : > { %v4850_v44 = vadd.f32 %v4716_v3, %v4561_v43  ;;  %v6581_v30 = vsel %vm1250_vm3, %v11665_v22, %v11711_v54  ;;  %v2279_v50 = vadd.f32 %v14856_v20, %v1989_v28  ;;  %v4718_v43 = vpop.permute.xlu2 %4717 }
 0x3e3   : > { %v11715_v41 = vpop.f32.mrf.mxu3  ;;  %v9923_v39 = vld [vmem:[#allocation4 + $0x28] sm:$0xff]  ;;  %9666 = vmatmul.msk.bf16.gmra.mxu1 %vm5694_vm8, %v6581_v30  ;;  %v3988_v30 = vrot.slane %v3986_v59, 3 }
 0x3e4   : > { %v9970_v12 = vld [vmem:[#allocation4 + $0x28] sm:$0xff]  ;;  %v4902_v6 = vadd.f32 %v11538_v13, %v4850_v44  ;;  %v4360_v36 = vrot.slane %v11715_v41, 1  ;;  %v4649_v29 = vrot.slane %v11715_v41, 2  ;;  %v5515_v47 = vshrl.u32 %v9923_v39, 16 }
 0x3e5   : > { %v9947_v17 = vld [vmem:[#allocation4 + $0x2c] sm:$0xff]  ;;  %v5518_v61 = vshll.u32 %v9923_v39, 16  ;;  %v7672_v1 = vshrl.u32 %v9970_v12, 16  ;;  %v7675_v22 = vshll.u32 %v9970_v12, 16 }
 0x3e6   : > { %v4950_v11 = vmax.f32 %v4902_v6, 0.0  ;;  %v4650_v49 = vsel %vm2025_vm6, %v4647_v46, %v4649_v29  ;;  %v4361_v26 = vsel %vm1735_vm5, %v4358_v40, %v4360_v36  ;;  %v6583_v15 = vshrl.u32 %v9947_v17, 16  ;;  %v14859_v6 = vld [vmem:[#allocation64_spill] sm:$0xff] }
 0x3e7   : > { %4745 = vrot.lane.b32.xlu2 %v4650_v49, %s10030_s22  ;;  %4456 = vrot.lane.b32.xlu0 %v4361_v26, %s10029_s21  ;;  %v5517_v37 = vrot.slane %v5515_v47, 3  ;;  %v5520_v38 = vrot.slane %v5518_v61, 4  ;;  %v7674_v2 = vrot.slane %v7672_v1, 3  ;;  %v7677_v7 = vrot.slane %v7675_v22, 4  ;;  %v14860_v61 = vld [vmem:[#allocation11_spill] sm:$0xff] }
 0x3e8   : > { %v5043_v10 = vpack.c.bf16 %v4950_v11, %v4950_v11  ;;  %9434 = vmatmul.msk.bf16.gmra.mxu3 %vm586_vm2, %v3984_v32  ;;  %v6586_v25 = vshll.u32 %v9947_v17, 16  ;;  %v6585_v9 = vrot.slane %v6583_v15, 3  ;;  %v2280_v40 = vadd.f32 %v14857_v24, %v1990_v27  ;;  %v14858_v17 = vld [vmem:[#allocation9_spill] sm:$0xff] }
 0x3e9   : > { %v4429_v16 = vpop.permute.xlu0 %4428  ;;  %v11739_v23 = vor.u32 %v5520_v38, %v5517_v37  ;;  %v11741_v42 = vor.u32 %v7677_v7, %v7674_v2  ;;  %v2939_v46 = vadd.f32 %v14858_v17, %v2279_v50  ;;  %v3998_v50 = vshll.u32 %v9917_v35, 16 }
 0x3ea   : > { %5255 = vst.msk [vmem:[#allocation4 + $0x34] sm:$0xf] %vm289_vm7, %v5043_v10  ;;  %v4562_v4 = vadd.f32 %v4429_v16, %v4224_v31  ;;  %v6588_v5 = vrot.slane %v6586_v25, 4  ;;  %v2940_v1 = vadd.f32 %v14860_v61, %v2280_v40 }
 0x3eb   : > { %v4155_v55 = vpop.f32.mrf.mxu3  ;;  %v5522_v0 = vsel %vm1250_vm3, %v11688_v45, %v11739_v23  ;;  %v7679_v3 = vsel %vm1250_vm3, %v11671_v52, %v11741_v42  ;;  %v3991_v45 = vrot.slane %v3989_v21, 4  ;;  %v3277_v47 = vadd.f32 %v14859_v6, %v2939_v46 }
 0x3ec   : > { %v4851_v44 = vadd.f32 %v4718_v43, %v4562_v4  ;;  %v4362_v60 = vrot.slane %v4155_v55, 1  ;;  %9542 = vmatmul.msk.bf16.gmra.mxu0 %vm5694_vm8, %v5522_v0  ;;  %9791 = vmatmul.msk.bf16.gmra.mxu2 %vm5694_vm8, %v7679_v3  ;;  %v11756_v12 = vor.u32 %v6588_v5, %v6585_v9  ;;  %v4651_v49 = vrot.slane %v4155_v55, 2  ;;  %v14863_v5 = vld [vmem:[#allocation68_spill] sm:$0xff] }
 0x3ed   : > { %v11766_v26 = vor.u32 %v3991_v45, %v3988_v30  ;;  %v3278_v48 = vadd.f32 %v14861_v34, %v2940_v1  ;;  %v4435_v45 = vpop.permute.xlu2 %4434  ;;  %v14864_v34 = vld [vmem:[#allocation8_spill] sm:$0xff] }
 0x3ee   : > { %v4903_v32 = vadd.f32 %v11538_v13, %v4851_v44  ;;  %v4363_v39 = vsel %vm1735_vm5, %v4360_v36, %v4362_v60  ;;  %v6590_v36 = vsel %vm1250_vm3, %v11711_v54, %v11756_v12  ;;  %v14862_v54 = vld [vmem:[#allocation55_spill] sm:$0xff]  ;;  %v4652_v27 = vsel %vm2025_vm6, %v4649_v29, %v4651_v49 }
 0x3ef   : > { %5113 = vrot.lane.b32.xlu0 %v5043_v10, %s10031_s11  ;;  %4458 = vrot.lane.b32.xlu1 %v4363_v39, %s10029_s21  ;;  %v3566_v62 = vadd.f32 %v14862_v54, %v3277_v47  ;;  %v3993_v16 = vsel %vm1250_vm3, %v11708_v53, %v11766_v26  ;;  %v3567_v21 = vadd.f32 %v14863_v5, %v3278_v48  ;;  %v3995_v29 = vshrl.u32 %v9917_v35, 16  ;;  %v14865_v48 = vld [vmem:[#allocation54_spill] sm:$0xff] }
 0x3f0   : > { %v4951_v52 = vmax.f32 %v4903_v32, 0.0 }
 0x3f1   : > { %v9924_v22 = vld [vmem:[#allocation4 + $0x30] sm:$0xff]  ;;  %v4226_v9 = vadd.f32 %v11492_v57, %v3566_v62  ;;  %v4227_v55 = vadd.f32 %v11498_v18, %v3567_v21  ;;  %v3997_v46 = vrot.slane %v3995_v29, 3 }
 0x3f2   : > { %v9971_v14 = vld [vmem:[#allocation4 + $0x30] sm:$0xff]  ;;  %v5044_v11 = vpack.c.bf16 %v4951_v52, %v4951_v52  ;;  %v5524_v37 = vshrl.u32 %v9924_v22, 16  ;;  %v5527_v38 = vshll.u32 %v9924_v22, 16  ;;  %v4000_v52 = vrot.slane %v3998_v50, 4 }
 0x3f3   : > { %v11768_v15 = vpop.f32.mrf.mxu3  ;;  %v7681_v2 = vshrl.u32 %v9971_v14, 16  ;;  %v7684_v7 = vshll.u32 %v9971_v14, 16  ;;  %9667 = vmatmul.msk.bf16.gmra.mxu1 %vm5694_vm8, %v6590_v36  ;;  %v4565_v49 = vadd.f32 %v4435_v45, %v4227_v55 }
 0x3f4   : > { %5256 = vst.msk [vmem:[#allocation4 + $0x38] sm:$0xf] %vm289_vm7, %v5044_v11  ;;  %v5526_v28 = vrot.slane %v5524_v37, 3  ;;  %v5529_v31 = vrot.slane %v5527_v38, 4  ;;  %v4364_v0 = vrot.slane %v11768_v15, 1  ;;  %v4653_v30 = vrot.slane %v11768_v15, 2 }
 0x3f5   : > { %v7683_v10 = vrot.slane %v7681_v2, 3  ;;  %v7686_v25 = vrot.slane %v7684_v7, 4  ;;  %v11811_v7 = vor.u32 %v4000_v52, %v3997_v46 }
 0x3f6   : > { %v11782_v59 = vor.u32 %v5529_v31, %v5526_v28  ;;  %v1992_v28 = vadd.f32 %v14865_v48, %v14864_v34  ;;  %v14874_v34 = vld [vmem:[#allocation72_spill] sm:$0xff] }
 0x3f7   : > { %4747 = vrot.lane.b32.xlu0 %v4652_v27, %s10030_s22  ;;  %5115 = vrot.lane.b32.xlu1 %v5044_v11, %s10031_s11  ;;  %v11784_v4 = vor.u32 %v7686_v25, %v7683_v10  ;;  %v4002_v21 = vsel %vm1250_vm3, %v11766_v26, %v11811_v7 }
 0x3f8   : > { %9435 = vmatmul.msk.bf16.gmra.mxu3 %vm586_vm2, %v3993_v16  ;;  %v5531_v44 = vsel %vm1250_vm3, %v11739_v23, %v11782_v59 }
 0x3f9   : > { %v4433_v20 = vpop.permute.xlu1 %4432  ;;  %v4722_v3 = vpop.permute.xlu0 %4721  ;;  %v7688_v57 = vsel %vm1250_vm3, %v11741_v42, %v11784_v4 }
 0x3fa   : > { %v4564_v43 = vadd.f32 %v4433_v20, %v4226_v9  ;;  %v14866_v20 = vld [vmem:[#allocation60_spill] sm:$0xff] }
 0x3fb   : > { %v11791_v53 = vpop.f32.mrf.mxu3  ;;  %v9948_v60 = vld [vmem:[#allocation4 + $0x34] sm:$0xff]  ;;  %v2282_v29 = vadd.f32 %v14866_v20, %v1992_v28 }
 0x3fc   : > { %v9925_v24 = vld [vmem:[#allocation4 + $0x38] sm:$0xff]  ;;  %v4853_v32 = vadd.f32 %v4722_v3, %v4564_v43  ;;  %v4366_v18 = vrot.slane %v11791_v53, 1  ;;  %v4655_v39 = vrot.slane %v11791_v53, 2  ;;  %9543 = vmatmul.msk.bf16.gmra.mxu0 %vm5694_vm8, %v5531_v44  ;;  %9792 = vmatmul.msk.bf16.gmra.mxu2 %vm5694_vm8, %v7688_v57  ;;  %v6592_v23 = vshrl.u32 %v9948_v60, 16  ;;  %v4728_v3 = vpop.permute.xlu2 %4727  ;;  %v14867_v44 = vld [vmem:[#allocation13_spill] sm:$0xff]  ;;  %v14875_v28 = vld [vmem:[#allocation15_spill] sm:$0xff] }
 0x3fd   : > { %v9972_v40 = vld [vmem:[#allocation4 + $0x38] sm:$0xff]  ;;  %v6595_v17 = vshll.u32 %v9948_v60, 16  ;;  %v5533_v61 = vshrl.u32 %v9925_v24, 16  ;;  %v5536_v14 = vshll.u32 %v9925_v24, 16  ;;  %v2942_v57 = vadd.f32 %v14867_v44, %v2282_v29 }
 0x3fe   : > { %v4905_v42 = vadd.f32 %v11538_v13, %v4853_v32  ;;  %v4656_v6 = vsel %vm2025_vm6, %v4653_v30, %v4655_v39  ;;  %v4367_v47 = vsel %vm1735_vm5, %v4364_v0, %v4366_v18  ;;  %v6594_v1 = vrot.slane %v6592_v23, 3  ;;  %v14868_v32 = vld [vmem:[#allocation10_spill] sm:$0xff] }
 0x3ff   : > { %4751 = vrot.lane.b32.xlu1 %v4656_v6, %s10030_s22  ;;  %4462 = vrot.lane.b32.xlu2 %v4367_v47, %s10029_s21  ;;  %v6597_v22 = vrot.slane %v6595_v17, 4  ;;  %v7690_v11 = vshrl.u32 %v9972_v40, 16  ;;  %v7693_v37 = vshll.u32 %v9972_v40, 16  ;;  %v5535_v25 = vrot.slane %v5533_v61, 3  ;;  %v14870_v23 = vld [vmem:[#allocation66_spill] sm:$0xff]  ;;  %v14872_v47 = vld [vmem:[#allocation65_spill] sm:$0xff] }
 0x400   : > { %v4953_v36 = vmax.f32 %v4905_v42, 0.0  ;;  %v5538_v62 = vrot.slane %v5536_v14, 4  ;;  %v3280_v17 = vadd.f32 %v14870_v23, %v2942_v57  ;;  %v14871_v42 = vld [vmem:[#allocation57_spill] sm:$0xff] }
 0x401   : > { %v4724_v38 = vpop.permute.xlu1 %4723  ;;  %v6598_v2 = vor.u32 %v6597_v22, %v6594_v1  ;;  %v7692_v27 = vrot.slane %v7690_v11, 3  ;;  %v7695_v16 = vrot.slane %v7693_v37, 4 }
 0x402   : > { %v5045_v31 = vpack.c.bf16 %v4953_v36, %v4953_v36  ;;  %v4854_v10 = vadd.f32 %v4724_v38, %v4565_v49  ;;  %v14873_v38 = vld [vmem:[#allocation12_spill] sm:$0xff] }
 0x403   : > { %v4162_v35 = vpop.f32.mrf.mxu3  ;;  %v6599_v54 = vsel %vm1250_vm3, %v11756_v12, %v6598_v2  ;;  %v11827_v12 = vor.u32 %v5538_v62, %v5535_v25  ;;  %v11829_v55 = vor.u32 %v7695_v16, %v7692_v27  ;;  %v1995_v48 = vadd.f32 %v14874_v34, %v14873_v38  ;;  %v14880_v38 = vld [vmem:[#allocation79_spill] sm:$0xff] }
 0x404   : > { %5258 = vst.msk [vmem:[#allocation4 + $0x40] sm:$0xf] %vm289_vm7, %v5045_v31  ;;  %v4906_v9 = vadd.f32 %v11538_v13, %v4854_v10  ;;  %v4368_v5 = vrot.slane %v4162_v35, 1  ;;  %9668 = vmatmul.msk.bf16.gmra.mxu1 %vm5694_vm8, %v6599_v54  ;;  %v4657_v26 = vrot.slane %v4162_v35, 2 }
 0x405   : > { %v5540_v24 = vsel %vm1250_vm3, %v11782_v59, %v11827_v12  ;;  %v7697_v40 = vsel %vm1250_vm3, %v11784_v4, %v11829_v55  ;;  %v3569_v59 = vadd.f32 %v14872_v47, %v3280_v17  ;;  %v14877_v17 = vld [vmem:[#allocation63_spill] sm:$0xff] }
 0x406   : > { %v4954_v50 = vmax.f32 %v4906_v9, 0.0  ;;  %v4369_v43 = vsel %vm1735_vm5, %v4366_v18, %v4368_v5  ;;  %v14869_v18 = vld [vmem:[#allocation59_spill] sm:$0xff]  ;;  %v4658_v4 = vsel %vm2025_vm6, %v4655_v39, %v4657_v26 }
 0x407   : > { %5117 = vrot.lane.b32.xlu2 %v5045_v31, %s10031_s11  ;;  %4464 = vrot.lane.b32.xlu0 %v4369_v43, %s10029_s21  ;;  %v1993_v45 = vadd.f32 %v14869_v18, %v14868_v32  ;;  %v4229_v22 = vadd.f32 %v11529_v33, %v3569_v59 }
 0x408   : > { %v5046_v0 = vpack.c.bf16 %v4954_v50, %v4954_v50  ;;  %9436 = vmatmul.msk.bf16.gmra.mxu3 %vm586_vm2, %v4002_v21 }
 0x409   : > { %v2283_v6 = vadd.f32 %v14871_v42, %v1993_v45 }
 0x40a   : > { %5259 = vst.msk [vmem:[#allocation4 + $0x44] sm:$0xf] %vm289_vm7, %v5046_v0 }
 0x40b   : > { %v11834_v60 = vpop.f32.mrf.mxu3  ;;  %v9949_v30 = vld [vmem:[#allocation4 + $0x3c] sm:$0xff]  ;;  %v2943_v39 = vadd.f32 %v14875_v28, %v2283_v6 }
 0x40c   : > { %9544 = vmatmul.msk.bf16.gmra.mxu0 %vm5694_vm8, %v5540_v24  ;;  %9793 = vmatmul.msk.bf16.gmra.mxu2 %vm5694_vm8, %v7697_v40  ;;  %v6601_v46 = vshrl.u32 %v9949_v30, 16  ;;  %v6604_v52 = vshll.u32 %v9949_v30, 16  ;;  %v4370_v31 = vrot.slane %v11834_v60, 1  ;;  %v4659_v16 = vrot.slane %v11834_v60, 2  ;;  %v14876_v40 = vld [vmem:[#allocation78_spill] sm:$0xff] }
 0x40d   : > { %v3281_v30 = vadd.f32 %v14876_v40, %v2943_v39 }
 0x40e   : > { %v6603_v61 = vrot.slane %v6601_v46, 3  ;;  %v6606_v1 = vrot.slane %v6604_v52, 4  ;;  %v2285_v46 = vadd.f32 %v14877_v17, %v1995_v48 }
 0x40f   : > { %4753 = vrot.lane.b32.xlu2 %v4658_v4, %s10030_s22  ;;  %5119 = vrot.lane.b32.xlu0 %v5046_v0, %s10031_s11 }
 0x410   : > { %v11857_v49 = vor.u32 %v6606_v1, %v6603_v61  ;;  %v14878_v61 = vld [vmem:[#allocation70_spill] sm:$0xff] }
 0x411   : > { %v4439_v14 = vpop.permute.xlu0 %4438  ;;  %v11855_v11 = vpop.permute.xlu2 %4444  ;;  %v9926_v36 = vld [vmem:[#allocation4 + $0x40] sm:$0xff]  ;;  %v3570_v1 = vadd.f32 %v14878_v61, %v3281_v30 }
 0x412   : > { %v9973_v37 = vld [vmem:[#allocation4 + $0x40] sm:$0xff]  ;;  %v4567_v10 = vadd.f32 %v4439_v14, %v4229_v22  ;;  %v6608_v33 = vsel %vm1250_vm3, %v6598_v2, %v11857_v49  ;;  %v5542_v35 = vshrl.u32 %v9926_v36, 16  ;;  %v5545_v54 = vshll.u32 %v9926_v36, 16  ;;  %v14879_v14 = vld [vmem:[#allocation19_spill] sm:$0xff] }
 0x413   : > { %v11863_v25 = vpop.f32.mrf.mxu3  ;;  %v7699_v62 = vshrl.u32 %v9973_v37, 16  ;;  %v9950_v27 = vld [vmem:[#allocation4 + $0x44] sm:$0xff]  ;;  %v7702_v43 = vshll.u32 %v9973_v37, 16  ;;  %v2945_v36 = vadd.f32 %v14879_v14, %v2285_v46  ;;  %v11947_v61 = vld [vmem:[%s14522_s5] ss:$0 sm:$0xff] }
 0x414   : > { %v4856_v9 = vadd.f32 %v4728_v3, %v4567_v10  ;;  %v4372_v5 = vrot.slane %v11863_v25, 1  ;;  %v4661_v21 = vrot.slane %v11863_v25, 2  ;;  %9669 = vmatmul.msk.bf16.gmra.mxu1 %vm5694_vm8, %v6608_v33  ;;  %v5544_v20 = vrot.slane %v5542_v35, 3  ;;  %v14882_v10 = vld [vmem:[#allocation69_spill] sm:$0xff] }
 0x415   : > { %v5547_v29 = vrot.slane %v5545_v54, 4  ;;  %v7701_v50 = vrot.slane %v7699_v62, 3  ;;  %v7704_v57 = vrot.slane %v7702_v43, 4  ;;  %v6610_v26 = vshrl.u32 %v9950_v27, 16 }
 0x416   : > { %v4908_v0 = vadd.f32 %v11538_v13, %v4856_v9  ;;  %v4662_v2 = vsel %vm2025_vm6, %v4659_v16, %v4661_v21  ;;  %v4373_v44 = vsel %vm1735_vm5, %v4370_v31, %v4372_v5  ;;  %v6613_v24 = vshll.u32 %v9950_v27, 16  ;;  %v14881_v31 = vld [vmem:[#allocation14_spill] sm:$0xff]  ;;  %v14883_v9 = vld [vmem:[#allocation81_spill] sm:$0xff] }
 0x417   : > { %4757 = vrot.lane.b32.xlu0 %v4662_v2, %s10030_s22  ;;  %4468 = vrot.lane.b32.xlu1 %v4373_v44, %s10029_s21  ;;  %v11878_v3 = vor.u32 %v5547_v29, %v5544_v20  ;;  %v11883_v23 = vor.u32 %v7704_v57, %v7701_v50  ;;  %v6612_v59 = vrot.slane %v6610_v26, 3  ;;  %v3283_v34 = vadd.f32 %v14880_v38, %v2945_v36  ;;  %v14884_v2 = vld [vmem:[#allocation75_spill] sm:$0xff] }
 0x418   : > { %v4956_v32 = vmax.f32 %v4908_v0, 0.0  ;;  %9437 = vmatmul.msk.bf16.gmra.mxu3 %vm586_vm2, %v11811_v7  ;;  %v6615_v4 = vrot.slane %v6613_v24, 4  ;;  %v1996_v33 = vadd.f32 %v14882_v10, %v14881_v31 }
 0x419   : > { %v5102_v18 = vpop.permute.xlu0 %5101  ;;  %v4441_v45 = vpop.permute.xlu1 %4440  ;;  %v5549_v47 = vsel %vm1250_vm3, %v11827_v12, %v11878_v3  ;;  %v7706_v7 = vsel %vm1250_vm3, %v11829_v55, %v11883_v23  ;;  %v4230_v12 = vadd.f32 %v11544_v56, %v3570_v1 }
 0x41a   : > { %v5047_v52 = vpack.c.bf16 %v4956_v32, %v4956_v32  ;;  %5198 = vst.msk [vmem:[%s10242_s20] sm:$0xf] %vm5197_vm9, %v5102_v18  ;;  %v5106_v42 = vpop.permute.xlu2 %5105  ;;  %v11905_v55 = vor.u32 %v6615_v4, %v6612_v59  ;;  %v2286_v44 = vadd.f32 %v14884_v2, %v1996_v33 }
 0x41b   : > { %5200 = vst.msk [vmem:[%s10242_s20 + $0x8] sm:$0xf] %vm5197_vm9, %v5106_v42  ;;  %v4170_v6 = vpop.f32.mrf.mxu3  ;;  %v4568_v48 = vadd.f32 %v4441_v45, %v4230_v12 }
 0x41c   : > { %5261 = vst.msk [vmem:[#allocation4 + $0x4c] sm:$0xf] %vm289_vm7, %v5047_v52  ;;  %v4374_v22 = vrot.slane %v4170_v6, 1  ;;  %9545 = vmatmul.msk.bf16.gmra.mxu0 %vm5694_vm8, %v5549_v47  ;;  %9794 = vmatmul.msk.bf16.gmra.mxu2 %vm5694_vm8, %v7706_v7  ;;  %v4663_v35 = vrot.slane %v4170_v6, 2  ;;  %v6617_v62 = vsel %vm1250_vm3, %v11857_v49, %v11905_v55  ;;  %v14886_v7 = vld [vmem:[#allocation83_spill] sm:$0xff] }
 0x41e   : > { %v4375_v37 = vsel %vm1735_vm5, %v4372_v5, %v4374_v22  ;;  %v3572_v5 = vadd.f32 %v14883_v9, %v3283_v34  ;;  %v4664_v49 = vsel %vm2025_vm6, %v4661_v21, %v4663_v35  ;;  %v14888_v35 = vld [vmem:[#allocation17_spill] sm:$0xff] }
 0x41f   : > { %5121 = vrot.lane.b32.xlu1 %v5047_v52, %s10031_s11  ;;  %4470 = vrot.lane.b32.xlu2 %v4375_v37, %s10029_s21 }
 0x420   : > { %v4232_v57 = vadd.f32 %v11571_v51, %v3572_v5  ;;  %v14885_v51 = vld [vmem:[#allocation21_spill] sm:$0xff] }
 0x421   : > { %v4730_v28 = vpop.permute.xlu0 %4729  ;;  %v5104_v39 = vpop.permute.xlu1 %5103  ;;  %v2946_v42 = vadd.f32 %v14885_v51, %v2286_v44 }
 0x422   : > { %v4857_v54 = vadd.f32 %v4730_v28, %v4568_v48  ;;  %5199 = vst.msk [vmem:[%s10242_s20 + $0x4] sm:$0xf] %vm5197_vm9, %v5104_v39  ;;  %v4570_v32 = vadd.f32 %v11855_v11, %v4232_v57  ;;  %v4736_v45 = vpop.permute.xlu2 %4735 }
 0x423   : > { %v11912_v56 = vpop.f32.mrf.mxu3  ;;  %v9927_v27 = vld [vmem:[#allocation4 + $0x48] sm:$0xff]  ;;  %v3284_v59 = vadd.f32 %v14886_v7, %v2946_v42 }
 0x424   : > { %v9974_v16 = vld [vmem:[#allocation4 + $0x48] sm:$0xff]  ;;  %v4909_v20 = vadd.f32 %v11538_v13, %v4857_v54  ;;  %9670 = vmatmul.msk.bf16.gmra.mxu1 %vm5694_vm8, %v6617_v62  ;;  %v5551_v29 = vshrl.u32 %v9927_v27, 16  ;;  %v5554_v50 = vshll.u32 %v9927_v27, 16  ;;  %v4376_v4 = vrot.slane %v11912_v56, 1  ;;  %v14889_v54 = vld [vmem:[#allocation77_spill] sm:$0xff] }
 0x425   : > { %v7708_v43 = vshrl.u32 %v9974_v16, 16  ;;  %v7711_v0 = vshll.u32 %v9974_v16, 16  ;;  %v4665_v37 = vrot.slane %v11912_v56, 2  ;;  %v1998_v62 = vadd.f32 %v14889_v54, %v14888_v35 }
 0x426   : > { %v4957_v26 = vmax.f32 %v4909_v20, 0.0  ;;  %v5553_v24 = vrot.slane %v5551_v29, 3  ;;  %v5556_v40 = vrot.slane %v5554_v50, 4  ;;  %v14890_v29 = vld [vmem:[#allocation76_spill] sm:$0xff] }
 0x427   : > { %4759 = vrot.lane.b32.xlu1 %v4664_v49, %s10030_s22  ;;  %v7710_v13 = vrot.slane %v7708_v43, 3  ;;  %v7713_v30 = vrot.slane %v7711_v0, 4  ;;  %v2288_v50 = vadd.f32 %v14890_v29, %v1998_v62  ;;  %v14901_v29 = vld [vmem:[#allocation25_spill] sm:$0xff] }
 0x428   : > { %v5048_v18 = vpack.c.bf16 %v4957_v26, %v4957_v26  ;;  %v11927_v46 = vor.u32 %v5556_v40, %v5553_v24 }
 0x429   : > { %v4734_v17 = vpop.permute.xlu1 %4733  ;;  %v11929_v52 = vor.u32 %v7713_v30, %v7710_v13 }
 0x42a   : > { %5262 = vst.msk [vmem:[#allocation4 + $0x50] sm:$0xf] %vm289_vm7, %v5048_v18  ;;  %v4859_v21 = vadd.f32 %v4734_v17, %v4570_v32  ;;  %5123 = vrot.lane.b32.xlu2 %v5048_v18, %s10031_s11  ;;  %v5558_v11 = vsel %vm1250_vm3, %v11878_v3, %v11927_v46 }
 0x42b   : > { %v11934_v6 = vpop.f32.mrf.mxu3  ;;  %v7715_v47 = vsel %vm1250_vm3, %v11883_v23, %v11929_v52  ;;  %v14887_v23 = vld [vmem:[#allocation82_spill] sm:$0xff] }
 0x42c   : > { %v4911_v1 = vadd.f32 %v11947_v61, %v4859_v21  ;;  %v4378_v22 = vrot.slane %v11934_v6, 1  ;;  %9546 = vmatmul.msk.bf16.gmra.mxu0 %vm5694_vm8, %v5558_v11  ;;  %9795 = vmatmul.msk.bf16.gmra.mxu2 %vm5694_vm8, %v7715_v47  ;;  %v4667_v3 = vrot.slane %v11934_v6, 2  ;;  %v3573_v14 = vadd.f32 %v14887_v23, %v3284_v59  ;;  %v14892_v21 = vld [vmem:[#allocation20_spill] sm:$0xff]  ;;  %v14893_v11 = vld [vmem:[#allocation85_spill] sm:$0xff] }
 0x42d   : > { %v1999_v47 = vadd.f32 %v14893_v11, %v14892_v21 }
 0x42e   : > { %v4959_v36 = vmax.f32 %v4911_v1, 0.0  ;;  %v4379_v12 = vsel %vm1735_vm5, %v4376_v4, %v4378_v22  ;;  %v4233_v34 = vadd.f32 %v11588_v8, %v3573_v14  ;;  %v4668_v39 = vsel %vm2025_vm6, %v4665_v37, %v4667_v3 }
 0x42f   : > { %4474 = vrot.lane.b32.xlu0 %v4379_v12, %s10029_s21 }
 0x430   : > { %v5049_v38 = vpack.c.bf16 %v4959_v36, %v4959_v36 }
 0x431   : > { %v4447_v48 = vpop.permute.xlu0 %4446  ;;  %v11959_v28 = vpop.permute.xlu2 %4452  ;;  %v9951_v31 = vld [vmem:[#allocation4 + $0x4c] sm:$0xff] }
 0x432   : > { %v9928_v10 = vld [vmem:[#allocation4 + $0x50] sm:$0xff]  ;;  %5264 = vst.msk [vmem:[#allocation4 + $0x58] sm:$0xf] %vm289_vm7, %v5049_v38  ;;  %v4571_v27 = vadd.f32 %v4447_v48, %v4233_v34  ;;  %4763 = vrot.lane.b32.xlu2 %v4668_v39, %s10030_s22  ;;  %v6619_v8 = vshrl.u32 %v9951_v31, 16  ;;  %v6622_v9 = vshll.u32 %v9951_v31, 16  ;;  %v14895_v39 = vld [vmem:[#allocation80_spill] sm:$0xff] }
 0x433   : > { %v9975_v33 = vld [vmem:[#allocation4 + $0x50] sm:$0xff]  ;;  %v4177_v16 = vpop.f32.mrf.mxu3  ;;  %v5560_v5 = vshrl.u32 %v9928_v10, 16  ;;  %v5563_v20 = vshll.u32 %v9928_v10, 16  ;;  %v2289_v31 = vadd.f32 %v14895_v39, %v1999_v47  ;;  %v14908_v39 = vld [vmem:[#allocation130_spill] sm:$0xff] }
 0x434   : > { %v4860_v43 = vadd.f32 %v4736_v45, %v4571_v27  ;;  %v4380_v0 = vrot.slane %v4177_v16, 1  ;;  %v7717_v2 = vshrl.u32 %v9975_v33, 16  ;;  %v6621_v44 = vrot.slane %v6619_v8, 3  ;;  %v14891_v45 = vld [vmem:[#allocation23_spill] sm:$0xff]  ;;  %v14898_v27 = vld [vmem:[#allocation88_spill] sm:$0xff] }
 0x435   : > { %v6624_v57 = vrot.slane %v6622_v9, 4  ;;  %v5562_v26 = vrot.slane %v5560_v5, 3  ;;  %v5565_v49 = vrot.slane %v5563_v20, 4  ;;  %v7720_v30 = vshll.u32 %v9975_v33, 16  ;;  %v14896_v33 = vld [vmem:[#allocation18_spill] sm:$0xff] }
 0x436   : > { %v4912_v24 = vadd.f32 %v11947_v61, %v4860_v43  ;;  %v4381_v40 = vsel %vm1735_vm5, %v4378_v22, %v4380_v0  ;;  %v7719_v13 = vrot.slane %v7717_v2, 3  ;;  %v2948_v17 = vadd.f32 %v14891_v45, %v2288_v50  ;;  %v14894_v22 = vld [vmem:[#allocation92_spill] sm:$0xff]  ;;  %v14899_v9 = vld [vmem:[#allocation22_spill] sm:$0xff]  ;;  %v14906_v45 = vld [vmem:[#allocation131_spill] sm:$0xff] }
 0x437   : > { %5125 = vrot.lane.b32.xlu0 %v5049_v38, %s10031_s11  ;;  %4476 = vrot.lane.b32.xlu1 %v4381_v40, %s10029_s21  ;;  %v11973_v32 = vor.u32 %v6624_v57, %v6621_v44  ;;  %v11975_v18 = vor.u32 %v5565_v49, %v5562_v26  ;;  %v7722_v42 = vrot.slane %v7720_v30, 4  ;;  %v4669_v36 = vrot.slane %v4177_v16, 2  ;;  %v14900_v5 = vld [vmem:[#allocation86_spill] sm:$0xff]  ;;  %v14904_v40 = vld [vmem:[#allocation93_spill] sm:$0xff]  ;;  %v14905_v30 = vld [vmem:[#allocation47_spill] sm:$0xff] }
 0x438   : > { %v4960_v51 = vmax.f32 %v4912_v24, 0.0  ;;  %v3286_v23 = vadd.f32 %v14894_v22, %v2948_v17  ;;  %v14897_v35 = vrot.slane %v14896_v33, 2  ;;  %v2001_v20 = vadd.f32 %v14900_v5, %v14899_v9 }
 0x439   : > { %v5108_v7 = vpop.permute.xlu0 %5107  ;;  %v5112_v59 = vpop.permute.xlu2 %5111  ;;  %v6626_v4 = vsel %vm1250_vm3, %v11905_v55, %v11973_v32  ;;  %v9952_v1 = vld [vmem:[#allocation4 + $0x54] sm:$0xff]  ;;  %v11989_v38 = vor.u32 %v7722_v42, %v7719_v13  ;;  %v5567_v55 = vsel %vm1250_vm3, %v11927_v46, %v11975_v18  ;;  %v4670_v46 = vsel %vm2025_vm6, %v4667_v3, %v4669_v36  ;;  %v14903_v3 = vld [vmem:[#allocation89_spill] sm:$0xff] }
 0x43a   : > { %v5050_v14 = vpack.c.bf16 %v4960_v51, %v4960_v51  ;;  %5201 = vst.msk [vmem:[%s10242_s20 + $0xc] sm:$0xf] %vm5197_vm9, %v5108_v7  ;;  %v5788_v12 = vpop.f32.mrf.mxu0  ;;  %v11986_v37 = vpop.f32.mrf.mxu1  ;;  %9671 = vmatmul.msk.bf16.gmra.mxu1 %vm5694_vm8, %v6626_v4  ;;  %v6628_v62 = vshrl.u32 %v9952_v1, 16  ;;  %v3575_v16 = vadd.f32 %v14898_v27, %v3286_v23  ;;  %v6631_v8 = vshll.u32 %v9952_v1, 16 }
 0x43b   : > { %5203 = vst.msk [vmem:[%s10242_s20 + $0x14] sm:$0xf] %vm5197_vm9, %v5112_v59  ;;  %v6165_v34 = vrot.slane %v5788_v12, 2  ;;  %v11993_v48 = vpop.f32.mrf.mxu3  ;;  %v7724_v10 = vsel %vm1250_vm3, %v11929_v52, %v11989_v38  ;;  %v2949_v50 = vadd.f32 %v14901_v29, %v2289_v31  ;;  %v5957_v43 = vrot.slane %v5788_v12, 1 }
 0x43c   : > { %5265 = vst.msk [vmem:[#allocation4 + $0x5c] sm:$0xf] %vm289_vm7, %v5050_v14  ;;  %9547 = vmatmul.msk.bf16.gmra.mxu0 %vm5694_vm8, %v5567_v55  ;;  %9796 = vmatmul.msk.bf16.gmra.mxu2 %vm5694_vm8, %v7724_v10  ;;  %v4235_v52 = vadd.f32 %v11625_v19, %v3575_v16  ;;  %v6630_v2 = vrot.slane %v6628_v62, 3  ;;  %v6633_v44 = vrot.slane %v6631_v8, 4  ;;  %v2291_v24 = vadd.f32 %v14903_v3, %v2001_v20 }
 0x43d   : > { %v6166_v54 = vsel %vm2025_vm6, %v14897_v35, %v6165_v34  ;;  %v3287_v13 = vadd.f32 %v14904_v40, %v2949_v50  ;;  %v2016_v17 = vadd.f32 %v14906_v45, %v14905_v30  ;;  %v7269_v11 = vrot.slane %v11986_v37, 2  ;;  %v14913_v30 = vld [vmem:[#allocation50_spill] sm:$0xff] }
 0x43e   : > { %6244 = vrot.lane.b32.xlu2 %v6166_v54, %s10030_s22  ;;  %v4671_v47 = vrot.slane %v11993_v48, 2  ;;  %v14907_v1 = vrot.slane %v14896_v33, 1  ;;  %v12036_v23 = vor.u32 %v6633_v44, %v6630_v2  ;;  %v14911_v44 = vld [vmem:[#allocation96_spill] sm:$0xff]  ;;  %v14914_v45 = vld [vmem:[#allocation138_spill] sm:$0xff] }
 0x43f   : > { %4765 = vrot.lane.b32.xlu0 %v4670_v46, %s10030_s22  ;;  %5127 = vrot.lane.b32.xlu1 %v5050_v14, %s10031_s11  ;;  %v2306_v31 = vadd.f32 %v14908_v39, %v2016_v17  ;;  %v14909_v46 = vld [vmem:[#allocation27_spill] sm:$0xff]  ;;  %v2017_v17 = vadd.f32 %v14914_v45, %v14913_v30 }
 0x440   : > { %v5958_v22 = vsel %vm1735_vm5, %v14907_v1, %v5957_v43  ;;  %v2951_v8 = vadd.f32 %v14909_v46, %v2291_v24  ;;  %v6635_v5 = vsel %vm1250_vm3, %v11973_v32, %v12036_v23  ;;  %v14917_v39 = vld [vmem:[#allocation99_spill] sm:$0xff] }
 0x441   : > { %v4451_v0 = vpop.permute.xlu1 %4450  ;;  %v4740_v57 = vpop.permute.xlu0 %4739  ;;  %v14922_v45 = vld [vmem:[#allocation87_spill] sm:$0xff] }
 0x442   : > { %v4573_v26 = vadd.f32 %v4451_v0, %v4235_v52  ;;  %v12019_v49 = vpop.f32.mrf.mxu0  ;;  %v12025_v51 = vpop.f32.mrf.mxu1 }
 0x443   : > { %14902 = vst [vmem:[#allocation44_spill] sm:$0xff] %v12019_v49  ;;  %v12027_v19 = vpop.f32.mrf.mxu3  ;;  %v9929_v42 = vld [vmem:[#allocation4 + $0x58] sm:$0xff]  ;;  %v7270_v59 = vrot.slane %v12025_v51, 2  ;;  %v7062_v50 = vrot.slane %v12025_v51, 1 }
 0x444   : > { %v9976_v21 = vld [vmem:[#allocation4 + $0x58] sm:$0xff]  ;;  %v4862_v7 = vadd.f32 %v4740_v57, %v4573_v26  ;;  %v4673_v4 = vrot.slane %v12027_v19, 2  ;;  %v5569_v14 = vshrl.u32 %v9929_v42, 16  ;;  %v5572_v34 = vshll.u32 %v9929_v42, 16 }
 0x445   : > { %v7271_v12 = vsel %vm2025_vm6, %v7269_v11, %v7270_v59  ;;  %v7726_v55 = vshrl.u32 %v9976_v21, 16  ;;  %v7729_v54 = vshll.u32 %v9976_v21, 16  ;;  %v9953_v52 = vld [vmem:[#allocation4 + $0x5c] sm:$0xff]  ;;  %v4384_v43 = vrot.slane %v12027_v19, 1 }
 0x446   : > { %v4914_v36 = vadd.f32 %v11947_v61, %v4862_v7  ;;  %7349 = vrot.lane.b32.xlu2 %v7271_v12, %s10030_s22  ;;  %v4674_v10 = vsel %vm2025_vm6, %v4671_v47, %v4673_v4  ;;  %v5571_v35 = vrot.slane %v5569_v14, 3  ;;  %v5574_v27 = vrot.slane %v5572_v34, 4  ;;  %v14912_v26 = vld [vmem:[#allocation84_spill] sm:$0xff]  ;;  %v14916_v34 = vld [vmem:[#allocation134_spill] sm:$0xff] }
 0x447   : > { %6036 = vrot.lane.b32.xlu0 %v5958_v22, %s10029_s21  ;;  %4769 = vrot.lane.b32.xlu1 %v4674_v10, %s10030_s22  ;;  %v7728_v16 = vrot.slane %v7726_v55, 3  ;;  %v7731_v20 = vrot.slane %v7729_v54, 4  ;;  %v3576_v57 = vadd.f32 %v14911_v44, %v3287_v13  ;;  %v2966_v3 = vadd.f32 %v14912_v26, %v2306_v31  ;;  %v14915_v22 = vld [vmem:[#allocation150_spill] sm:$0xff]  ;;  %v4746_v10 = vpop.permute.xlu2 %4745 }
 0x448   : > { %v4962_v62 = vmax.f32 %v4914_v36, 0.0  ;;  %v12060_v2 = vor.u32 %v5574_v27, %v5571_v35  ;;  %v7061_v42 = vrot.slane %v11986_v37, 1  ;;  %v4382_v21 = vrot.slane %v11993_v48, 1  ;;  %v14918_v27 = vld [vmem:[#allocation146_spill] sm:$0xff] }
 0x449   : > { %v5110_v9 = vpop.permute.xlu1 %5109  ;;  %v12067_v40 = vor.u32 %v7731_v20, %v7728_v16  ;;  %v5959_v11 = vrot.slane %v12019_v49, 1  ;;  %v6637_v7 = vshrl.u32 %v9953_v52, 16  ;;  %v6640_v1 = vshll.u32 %v9953_v52, 16  ;;  %v14919_v20 = vld [vmem:[#allocation24_spill] sm:$0xff]  ;;  %v14920_v52 = vld [vmem:[#allocation91_spill] sm:$0xff] }
 0x44a   : > { %v5051_v29 = vpack.c.bf16 %v4962_v62, %v4962_v62  ;;  %5202 = vst.msk [vmem:[%s10242_s20 + $0x10] sm:$0xf] %vm5197_vm9, %v5110_v9  ;;  %v12057_v0 = vpop.f32.mrf.mxu0  ;;  %9672 = vmatmul.msk.bf16.gmra.mxu1 %vm5694_vm8, %v6635_v5  ;;  %v5576_v13 = vsel %vm1250_vm3, %v11975_v18, %v12060_v2  ;;  %v3304_v14 = vadd.f32 %v14915_v22, %v2966_v3  ;;  %v14923_v22 = vld [vmem:[#allocation148_spill] sm:$0xff] }
 0x44b   : > { %14910 = vst [vmem:[#allocation45_spill] sm:$0xff] %v12057_v0  ;;  %v5960_v32 = vrot.slane %v12057_v0, 1  ;;  %v12065_v24 = vpop.f32.mrf.mxu3  ;;  %v7733_v47 = vsel %vm1250_vm3, %v11989_v38, %v12067_v40  ;;  %v4236_v36 = vadd.f32 %v11649_v63, %v3576_v57  ;;  %v4385_v18 = vsel %vm1735_vm5, %v4382_v21, %v4384_v43  ;;  %v14921_v57 = vld [vmem:[#allocation98_spill] sm:$0xff] }
 0x44c   : > { %5267 = vst.msk [vmem:[#allocation4 + $0x64] sm:$0xf] %vm289_vm7, %v5051_v29  ;;  %9548 = vmatmul.msk.bf16.gmra.mxu0 %vm5694_vm8, %v5576_v13  ;;  %9797 = vmatmul.msk.bf16.gmra.mxu2 %vm5694_vm8, %v7733_v47  ;;  %v7063_v12 = vsel %vm1735_vm5, %v7061_v42, %v7062_v50  ;;  %v2307_v63 = vadd.f32 %v14916_v34, %v2017_v17  ;;  %v6639_v54 = vrot.slane %v6637_v7, 3  ;;  %v6642_v62 = vrot.slane %v6640_v1, 4 }
 0x44d   : > { %v5961_v38 = vsel %vm1735_vm5, %v5959_v11, %v5960_v32  ;;  %v4574_v55 = vadd.f32 %v11959_v28, %v4236_v36  ;;  %v3289_v31 = vadd.f32 %v14917_v39, %v2951_v8  ;;  %v3593_v16 = vadd.f32 %v14918_v27, %v3304_v14  ;;  %v14924_v39 = vld [vmem:[#allocation90_spill] sm:$0xff] }
 0x44e   : > { %4480 = vrot.lane.b32.xlu2 %v4385_v18, %s10029_s21  ;;  %v6168_v46 = vrot.slane %v12057_v0, 2  ;;  %v2002_v44 = vadd.f32 %v14920_v52, %v14919_v20  ;;  %v2967_v17 = vadd.f32 %v14922_v45, %v2307_v63  ;;  %v6167_v42 = vrot.slane %v12019_v49, 2  ;;  %v14928_v20 = vld [vmem:[#allocation136_spill] sm:$0xff] }
 0x44f   : > { %7141 = vrot.lane.b32.xlu0 %v7063_v12, %s10029_s21  ;;  %6038 = vrot.lane.b32.xlu1 %v5961_v38, %s10029_s21  ;;  %v3578_v28 = vadd.f32 %v14921_v57, %v3289_v31  ;;  %v12116_v11 = vor.u32 %v6642_v62, %v6639_v54  ;;  %v14926_v54 = vld [vmem:[#allocation100_spill] sm:$0xff]  ;;  %v4675_v45 = vrot.slane %v12065_v24, 2 }
 0x450   : > { %v3305_v14 = vadd.f32 %v14923_v22, %v2967_v17  ;;  %v6169_v18 = vsel %vm2025_vm6, %v6167_v42, %v6168_v46  ;;  %v2292_v31 = vadd.f32 %v14924_v39, %v2002_v44  ;;  %v14931_v22 = vld [vmem:[#allocation95_spill] sm:$0xff] }
 0x451   : > { %v4742_v35 = vpop.permute.xlu1 %4741  ;;  %v4238_v27 = vadd.f32 %v11693_v58, %v3578_v28  ;;  %v6644_v44 = vsel %vm1250_vm3, %v12036_v23, %v12116_v11  ;;  %v14929_v58 = vld [vmem:[#allocation154_spill] sm:$0xff] }
 0x452   : > { %v4863_v9 = vadd.f32 %v4742_v35, %v4574_v55  ;;  %v12102_v5 = vpop.f32.mrf.mxu0  ;;  %v14925_v35 = vld [vmem:[#allocation26_spill] sm:$0xff]  ;;  %v3594_v28 = vadd.f32 %v14929_v58, %v3305_v14 }
 0x453   : > { %v6170_v26 = vrot.slane %v12102_v5, 2  ;;  %v12108_v3 = vpop.f32.mrf.mxu3  ;;  %v9930_v8 = vld [vmem:[#allocation4 + $0x60] sm:$0xff]  ;;  %v2004_v62 = vadd.f32 %v14926_v54, %v14925_v35  ;;  %v14935_v35 = vld [vmem:[#allocation28_spill] sm:$0xff]  ;;  %v14940_v58 = vld [vmem:[#allocation94_spill] sm:$0xff] }
 0x454   : > { %v9977_v30 = vld [vmem:[#allocation4 + $0x60] sm:$0xff]  ;;  %v4915_v21 = vadd.f32 %v11947_v61, %v4863_v9  ;;  %v12114_v13 = vadd.f32 %v12108_v3, %v3593_v16  ;;  %v5578_v47 = vshrl.u32 %v9930_v8, 16  ;;  %v5581_v7 = vshll.u32 %v9930_v8, 16  ;;  %v12127_v16 = vpop.f32.mrf.mxu1 }
 0x455   : > { %v7735_v1 = vshrl.u32 %v9977_v30, 16  ;;  %v7738_v12 = vshll.u32 %v9977_v30, 16  ;;  %v6171_v38 = vsel %vm2025_vm6, %v6168_v46, %v6170_v26  ;;  %v4386_v30 = vrot.slane %v12065_v24, 1 }
 0x456   : > { %v4963_v36 = vmax.f32 %v4915_v21, 0.0  ;;  %5129 = vrot.lane.b32.xlu2 %v5051_v29, %s10031_s11  ;;  %v5580_v34 = vrot.slane %v5578_v47, 3  ;;  %v5583_v63 = vrot.slane %v5581_v7, 4  ;;  %v14927_v29 = vld [vmem:[#allocation58_spill] sm:$0xff]  ;;  %v7064_v21 = vrot.slane %v12127_v16, 1 }
 0x457   : > { %6246 = vrot.lane.b32.xlu0 %v6169_v18, %s10030_s22  ;;  %v7737_v55 = vrot.slane %v7735_v1, 3  ;;  %6248 = vrot.lane.b32.xlu1 %v6171_v38, %s10030_s22  ;;  %v2019_v52 = vadd.f32 %v14928_v20, %v14927_v29  ;;  %v7740_v8 = vrot.slane %v7738_v12, 4  ;;  %v2294_v14 = vadd.f32 %v14931_v22, %v2004_v62  ;;  %v14933_v38 = vld [vmem:[#allocation141_spill] sm:$0xff]  ;;  %v14937_v62 = vld [vmem:[#allocation31_spill] sm:$0xff] }
 0x458   : > { %v12129_v9 = vpack.c.bf16 %v4963_v36, %v4963_v36  ;;  %v12139_v26 = vor.u32 %v5583_v63, %v5580_v34  ;;  %v14932_v36 = vld [vmem:[#allocation29_spill] sm:$0xff]  ;;  %v4387_v63 = vsel %vm1735_vm5, %v4384_v43, %v4386_v30 }
 0x459   : > { %v4457_v46 = vpop.permute.xlu0 %4456  ;;  %v12134_v57 = vpop.permute.xlu2 %4462  ;;  %v12155_v7 = vor.u32 %v7740_v8, %v7737_v55  ;;  %v2952_v18 = vadd.f32 %v14932_v36, %v2292_v31  ;;  %v2309_v34 = vadd.f32 %v14933_v38, %v2019_v52  ;;  %v14934_v55 = vld [vmem:[#allocation108_spill] sm:$0xff]  ;;  %v2954_v43 = vadd.f32 %v14937_v62, %v2294_v14  ;;  %v14944_v38 = vld [vmem:[#allocation139_spill] sm:$0xff] }
 0x45a   : > { %5268 = vst.msk [vmem:[#allocation4 + $0x68] sm:$0xf] %vm289_vm7, %v12129_v9  ;;  %v4576_v17 = vadd.f32 %v4457_v46, %v4238_v27  ;;  %v12146_v42 = vpop.f32.mrf.mxu0  ;;  %9673 = vmatmul.msk.bf16.gmra.mxu1 %vm5694_vm8, %v6644_v44  ;;  %v5585_v47 = vsel %vm1250_vm3, %v12060_v2, %v12139_v26  ;;  %v14938_v46 = vld [vmem:[#allocation62_spill] sm:$0xff]  ;;  %v14939_v44 = vld [vmem:[#allocation137_spill] sm:$0xff] }
 0x45b   : > { %14930 = vst [vmem:[#allocation53_spill] sm:$0xff] %v12146_v42  ;;  %v12150_v23 = vpop.f32.mrf.mxu3  ;;  %v7742_v12 = vsel %vm1250_vm3, %v12067_v40, %v12155_v7  ;;  %v3290_v39 = vadd.f32 %v14934_v55, %v2952_v18  ;;  %v7065_v40 = vsel %vm1735_vm5, %v7062_v50, %v7064_v21  ;;  %v2020_v8 = vadd.f32 %v14939_v44, %v14938_v46 }
 0x45c   : > { %v4865_v1 = vadd.f32 %v4746_v10, %v4576_v17  ;;  %v12158_v24 = vadd.f32 %v12150_v23, %v3594_v28  ;;  %9549 = vmatmul.msk.bf16.gmra.mxu0 %vm5694_vm8, %v5585_v47  ;;  %9798 = vmatmul.msk.bf16.gmra.mxu2 %vm5694_vm8, %v7742_v12  ;;  %v4676_v10 = vsel %vm2025_vm6, %v4673_v4, %v4675_v45  ;;  %v14936_v4 = vld [vmem:[#allocation101_spill] sm:$0xff]  ;;  %v5962_v28 = vrot.slane %v12102_v5, 1  ;;  %v14942_v47 = vld [vmem:[#allocation103_spill] sm:$0xff]  ;;  %v12205_v55 = vpop.f32.mrf.mxu1 }
 0x45d   : > { %v2005_v54 = vadd.f32 %v14936_v4, %v14935_v35  ;;  %v2969_v50 = vadd.f32 %v14940_v58, %v2309_v34  ;;  %v4390_v22 = vrot.slane %v12150_v23, 1  ;;  %v14943_v12 = vld [vmem:[#allocation109_spill] sm:$0xff]  ;;  %v2310_v34 = vadd.f32 %v14944_v38, %v2020_v8  ;;  %14946 = vst [vmem:[#allocation52_spill] sm:$0xff] %v12205_v55  ;;  %v12209_v4 = vpop.f32.mrf.mxu2  ;;  %v14948_v38 = vld [vmem:[#allocation104_spill] sm:$0xff] }
 0x45e   : > { %v4917_v2 = vadd.f32 %v11947_v61, %v4865_v1  ;;  %4771 = vrot.lane.b32.xlu2 %v4676_v10, %s10030_s22  ;;  %v3579_v1 = vadd.f32 %v14942_v47, %v3290_v39  ;;  %v3292_v5 = vadd.f32 %v14943_v12, %v2954_v43  ;;  %v5963_v43 = vsel %vm1735_vm5, %v5960_v32, %v5962_v28 }
 0x45f   : > { %4482 = vrot.lane.b32.xlu0 %v4387_v63, %s10029_s21  ;;  %7143 = vrot.lane.b32.xlu1 %v7065_v40, %s10029_s21  ;;  %v4388_v63 = vrot.slane %v12108_v3, 1 }
 0x460   : > { %v4965_v31 = vmax.f32 %v4917_v2, 0.0  ;;  %v14945_v2 = vld [vmem:[#allocation149_spill] sm:$0xff]  ;;  %v4239_v62 = vadd.f32 %v11715_v41, %v3579_v1  ;;  %v7272_v1 = vrot.slane %v12127_v16, 2 }
 0x461   : > { %v5114_v27 = vpop.permute.xlu0 %5113  ;;  %v4459_v29 = vpop.permute.xlu1 %4458  ;;  %v9954_v20 = vld [vmem:[#allocation4 + $0x64] sm:$0xff]  ;;  %v3307_v10 = vadd.f32 %v14945_v2, %v2969_v50  ;;  %v4391_v46 = vsel %vm1735_vm5, %v4388_v63, %v4390_v22  ;;  %v14947_v50 = vld [vmem:[#allocation151_spill] sm:$0xff]  ;;  %v2295_v2 = vadd.f32 %v14948_v38, %v2005_v54 }
 0x462   : > { %v9931_v52 = vld [vmem:[#allocation4 + $0x68] sm:$0xff]  ;;  %v12189_v30 = vpack.c.bf16 %v4965_v31, %v4965_v31  ;;  %5204 = vst.msk [vmem:[%s10242_s20 + $0x18] sm:$0xf] %vm5197_vm9, %v5114_v27  ;;  %v5118_v45 = vpop.permute.xlu2 %5117  ;;  %v12193_v17 = vpop.f32.mrf.mxu0  ;;  %v6646_v36 = vshrl.u32 %v9954_v20, 16  ;;  %v6649_v18 = vshll.u32 %v9954_v20, 16  ;;  %v4577_v8 = vadd.f32 %v4459_v29, %v4239_v62 }
 0x463   : > { %14941 = vst [vmem:[#allocation7_spill] sm:$0xff] %v12193_v17  ;;  %v9978_v21 = vld [vmem:[#allocation4 + $0x68] sm:$0xff]  ;;  %v12199_v14 = vpop.f32.mrf.mxu3  ;;  %v5587_v31 = vshrl.u32 %v9931_v52, 16  ;;  %v5590_v35 = vshll.u32 %v9931_v52, 16  ;;  %v3596_v28 = vadd.f32 %v14947_v50, %v3307_v10 }
 0x464   : > { %5206 = vst.msk [vmem:[%s10242_s20 + $0x20] sm:$0xf] %vm5197_vm9, %v5118_v45  ;;  %v6648_v39 = vrot.slane %v6646_v36, 3  ;;  %v6651_v40 = vrot.slane %v6649_v18, 4  ;;  %v7744_v27 = vshrl.u32 %v9978_v21, 16  ;;  %v7747_v20 = vshll.u32 %v9978_v21, 16 }
 0x465   : > { %5270 = vst.msk [vmem:[#allocation4 + $0x70] sm:$0xf] %vm289_vm7, %v12189_v30  ;;  %v5589_v44 = vrot.slane %v5587_v31, 3  ;;  %v5592_v41 = vrot.slane %v5590_v35, 4  ;;  %v14584_v36 = vrot.slane %v12193_v17, 2  ;;  %v14949_v10 = vld [vmem:[#allocation110_spill] sm:$0xff]  ;;  %v12245_v35 = vpop.f32.mrf.mxu1 }
 0x466   : > { %6040 = vrot.lane.b32.xlu2 %v5963_v43, %s10029_s21  ;;  %v12221_v52 = vor.u32 %v6651_v40, %v6648_v39  ;;  %v7746_v32 = vrot.slane %v7744_v27, 3  ;;  %v7749_v58 = vrot.slane %v7747_v20, 4  ;;  %v3581_v63 = vadd.f32 %v14949_v10, %v3292_v5  ;;  %14951 = vst [vmem:[#allocation49_spill] sm:$0xff] %v12245_v35  ;;  %v14952_v27 = vld [vmem:[#allocation156_spill] sm:$0xff] }
 0x467   : > { %5131 = vrot.lane.b32.xlu0 %v12129_v9, %s10031_s11  ;;  %4486 = vrot.lane.b32.xlu1 %v4391_v46, %s10029_s21  ;;  %v12228_v47 = vor.u32 %v5592_v41, %v5589_v44  ;;  %v6172_v31 = vrot.slane %v12146_v42, 2  ;;  %v14581_v10 = vrot.slane %v12245_v35, 1 }
 0x468   : > { %v6653_v9 = vsel %vm1250_vm3, %v12116_v11, %v12221_v52  ;;  %v12237_v12 = vor.u32 %v7749_v58, %v7746_v32  ;;  %v14950_v11 = vld [vmem:[#allocation97_spill] sm:$0xff]  ;;  %v12271_v58 = vpop.f32.mrf.mxu2 }
 0x469   : > { %v4748_v45 = vpop.permute.xlu0 %4747  ;;  %v5116_v21 = vpop.permute.xlu1 %5115  ;;  %v2970_v39 = vadd.f32 %v14950_v11, %v2310_v34  ;;  %v5594_v54 = vsel %vm1250_vm3, %v12139_v26, %v12228_v47  ;;  %v4241_v34 = vadd.f32 %v11768_v15, %v3581_v63  ;;  %v6174_v41 = vsel %vm2025_vm6, %v6172_v31, %v14584_v36  ;;  %v14953_v15 = vld [vmem:[#allocation33_spill] sm:$0xff]  ;;  %14954 = vst [vmem:[#allocation5_spill] sm:$0xff] %v12271_v58  ;;  %v14959_v11 = vld [vmem:[#allocation30_spill] sm:$0xff] }
 0x46a   : > { %v4866_v18 = vadd.f32 %v4748_v45, %v4577_v8  ;;  %5205 = vst.msk [vmem:[%s10242_s20 + $0x1c] sm:$0xf] %vm5197_vm9, %v5116_v21  ;;  %v12234_v29 = vpop.f32.mrf.mxu0  ;;  %9674 = vmatmul.msk.bf16.gmra.mxu1 %vm5694_vm8, %v6653_v9  ;;  %v7751_v20 = vsel %vm1250_vm3, %v12155_v7, %v12237_v12  ;;  %v7273_v26 = vsel %vm2025_vm6, %v7270_v59, %v7272_v1  ;;  %v14956_v45 = vld [vmem:[#allocation144_spill] sm:$0xff] }
 0x46b   : > { %v12242_v40 = vpop.f32.mrf.mxu3  ;;  %v3308_v5 = vadd.f32 %v14952_v27, %v2970_v39  ;;  %v2955_v32 = vadd.f32 %v14953_v15, %v2295_v2  ;;  %v4579_v7 = vadd.f32 %v12134_v57, %v4241_v34  ;;  %v4679_v2 = vrot.slane %v12150_v23, 2  ;;  %v4754_v34 = vpop.permute.xlu2 %4753  ;;  %v14981_v23 = vld [vmem:[#allocation157_spill] sm:$0xff] }
 0x46c   : > { %v9955_v16 = vld [vmem:[#allocation4 + $0x6c] sm:$0xff]  ;;  %v4918_v62 = vadd.f32 %v11947_v61, %v4866_v18  ;;  %v12249_v43 = vadd.f32 %v12242_v40, %v3596_v28  ;;  %9550 = vmatmul.msk.bf16.gmra.mxu0 %vm5694_vm8, %v5594_v54  ;;  %9799 = vmatmul.msk.bf16.gmra.mxu2 %vm5694_vm8, %v7751_v20  ;;  %v14957_v18 = vld [vmem:[#allocation152_spill] sm:$0xff]  ;;  %v4677_v27 = vrot.slane %v12108_v3, 2  ;;  %v8168_v15 = vrot.slane %v12209_v4, 1 }
 0x46d   : > { %v6655_v46 = vshrl.u32 %v9955_v16, 16  ;;  %v6658_v8 = vshll.u32 %v9955_v16, 16  ;;  %v14955_v28 = vld [vmem:[#allocation67_spill] sm:$0xff]  ;;  %v3597_v38 = vadd.f32 %v14957_v18, %v3308_v5  ;;  %v14961_v16 = vld [vmem:[#allocation114_spill] sm:$0xff]  ;;  %v7066_v5 = vrot.slane %v12205_v55, 1 }
 0x46e   : > { %v4966_v44 = vmax.f32 %v4918_v62, 0.0  ;;  %6250 = vrot.lane.b32.xlu2 %v6174_v41, %s10030_s22  ;;  %v2022_v21 = vadd.f32 %v14956_v45, %v14955_v28  ;;  %v3293_v31 = vadd.f32 %v14961_v16, %v2955_v32  ;;  %v14582_v62 = vrot.slane %v12271_v58, 1  ;;  %v12304_v45 = vpop.f32.mrf.mxu1 }
 0x46f   : > { %7351 = vrot.lane.b32.xlu0 %v7273_v26, %s10030_s22  ;;  %5133 = vrot.lane.b32.xlu1 %v12189_v30, %s10031_s11  ;;  %v6657_v9 = vrot.slane %v6655_v46, 3  ;;  %v6660_v1 = vrot.slane %v6658_v8, 4  ;;  %v14960_v30 = vld [vmem:[#allocation107_spill] sm:$0xff]  ;;  %v14963_v26 = vld [vmem:[#allocation112_spill] sm:$0xff]  ;;  %v4680_v18 = vsel %vm2025_vm6, %v4677_v27, %v4679_v2 }
 0x470   : > { %v12273_v50 = vpack.c.bf16 %v4966_v44, %v4966_v44  ;;  %v2007_v39 = vadd.f32 %v14960_v30, %v14959_v11  ;;  %v14962_v44 = vld [vmem:[#allocation105_spill] sm:$0xff]  ;;  %v3582_v8 = vadd.f32 %v14963_v26, %v3293_v31  ;;  %v14965_v31 = vld [vmem:[#allocation35_spill] sm:$0xff] }
 0x471   : > { %v4752_v59 = vpop.permute.xlu1 %4751  ;;  %v12301_v32 = vor.u32 %v6660_v1, %v6657_v9  ;;  %v8170_v9 = vsel %vm1735_vm5, %v8168_v15, %v14582_v62  ;;  %v14583_v1 = vrot.slane %v12271_v58, 2  ;;  %v14968_v15 = vld [vmem:[#allocation71_spill] sm:$0xff] }
 0x472   : > { %5271 = vst.msk [vmem:[#allocation4 + $0x74] sm:$0xf] %vm289_vm7, %v12273_v50  ;;  %v4868_v57 = vadd.f32 %v4752_v59, %v4579_v7  ;;  %v12284_v63 = vpop.f32.mrf.mxu0  ;;  %v2297_v41 = vadd.f32 %v14962_v44, %v2007_v39  ;;  %v14964_v7 = vld [vmem:[#allocation140_spill] sm:$0xff]  ;;  %v7068_v59 = vsel %vm1735_vm5, %v7066_v5, %v14581_v10  ;;  %v14966_v5 = vld [vmem:[#allocation102_spill] sm:$0xff] }
 0x473   : > { %14958 = vst [vmem:[#allocation43_spill] sm:$0xff] %v12284_v63  ;;  %v12290_v54 = vpop.f32.mrf.mxu3  ;;  %v2312_v28 = vadd.f32 %v14964_v7, %v2022_v21  ;;  %v4242_v21 = vadd.f32 %v11791_v53, %v3582_v8  ;;  %v6662_v30 = vsel %vm1250_vm3, %v12221_v52, %v12301_v32  ;;  %v8376_v53 = vrot.slane %v12209_v4, 2  ;;  %v14969_v7 = vld [vmem:[#allocation142_spill] sm:$0xff] }
 0x474   : > { %v4920_v20 = vadd.f32 %v11947_v61, %v4868_v57  ;;  %v12296_v46 = vadd.f32 %v12290_v54, %v3597_v38  ;;  %v4392_v57 = vrot.slane %v12199_v14, 1  ;;  %v2957_v27 = vadd.f32 %v14965_v31, %v2297_v41 }
 0x475   : > { %v2023_v52 = vadd.f32 %v14969_v7, %v14968_v15  ;;  %v7274_v31 = vrot.slane %v12205_v55, 2 }
 0x476   : > { %v4968_v3 = vmax.f32 %v4920_v20, 0.0  ;;  %7145 = vrot.lane.b32.xlu2 %v7068_v59, %s10029_s21  ;;  %v2972_v20 = vadd.f32 %v14966_v5, %v2312_v28 }
 0x477   : > { %4775 = vrot.lane.b32.xlu0 %v4680_v18, %s10030_s22  ;;  %8248 = vrot.lane.b32.xlu1 %v8170_v9, %s10029_s21  ;;  %v14970_v18 = vld [vmem:[#allocation153_spill] sm:$0xff] }
 0x478   : > { %v12319_v38 = vpack.c.bf16 %v4968_v3, %v4968_v3  ;;  %v14585_v3 = vrot.slane %v12245_v35, 2  ;;  %v3310_v9 = vadd.f32 %v14970_v18, %v2972_v20 }
 0x479   : > { %v4465_v11 = vpop.permute.xlu0 %4464  ;;  %v9932_v39 = vld [vmem:[#allocation4 + $0x70] sm:$0xff] }
 0x47a   : > { %v9979_v16 = vld [vmem:[#allocation4 + $0x70] sm:$0xff]  ;;  %5273 = vst.msk [vmem:[#allocation4 + $0x7c] sm:$0xf] %vm289_vm7, %v12319_v38  ;;  %v4580_v44 = vadd.f32 %v4465_v11, %v4242_v21  ;;  %v12331_v26 = vpop.f32.mrf.mxu0  ;;  %9675 = vmatmul.msk.bf16.gmra.mxu1 %vm5694_vm8, %v6662_v30  ;;  %v5596_v41 = vshrl.u32 %v9932_v39, 16  ;;  %v5599_v28 = vshll.u32 %v9932_v39, 16  ;;  %v12341_v21 = vpop.permute.xlu2 %4470  ;;  %v8378_v11 = vsel %vm2025_vm6, %v8376_v53, %v14583_v1  ;;  %v14974_v1 = vld [vmem:[#allocation158_spill] sm:$0xff] }
 0x47b   : > { %14967 = vst [vmem:[#allocation6_spill] sm:$0xff] %v12331_v26  ;;  %v9956_v8 = vld [vmem:[#allocation4 + $0x74] sm:$0xff]  ;;  %v12337_v59 = vpop.f32.mrf.mxu3  ;;  %v4393_v30 = vsel %vm1735_vm5, %v4390_v22, %v4392_v57  ;;  %v7753_v10 = vshrl.u32 %v9979_v16, 16  ;;  %v7756_v62 = vshll.u32 %v9979_v16, 16 }
 0x47c   : > { %v4869_v5 = vadd.f32 %v4754_v34, %v4580_v44  ;;  %v5598_v15 = vrot.slane %v5596_v41, 3  ;;  %v5601_v7 = vrot.slane %v5599_v28, 4  ;;  %v6664_v20 = vshrl.u32 %v9956_v8, 16  ;;  %v14971_v57 = vld [vmem:[#allocation119_spill] sm:$0xff]  ;;  %v12358_v41 = vpop.f32.mrf.mxu1 }
 0x47d   : > { %v6667_v18 = vshll.u32 %v9956_v8, 16  ;;  %v7276_v34 = vsel %vm2025_vm6, %v7274_v31, %v14585_v3  ;;  %v7755_v22 = vrot.slane %v7753_v10, 3  ;;  %v3295_v44 = vadd.f32 %v14971_v57, %v2957_v27  ;;  %14972 = vst [vmem:[#allocation56_spill] sm:$0xff] %v12358_v41  ;;  %v14973_v8 = vld [vmem:[#allocation147_spill] sm:$0xff] }
 0x47e   : > { %v4921_v39 = vadd.f32 %v11947_v61, %v4869_v5  ;;  %4488 = vrot.lane.b32.xlu2 %v4393_v30, %s10029_s21  ;;  %v12355_v53 = vor.u32 %v5601_v7, %v5598_v15  ;;  %v7758_v16 = vrot.slane %v7756_v62, 4  ;;  %v2313_v5 = vadd.f32 %v14973_v8, %v2023_v52  ;;  %v14979_v3 = vld [vmem:[#allocation111_spill] sm:$0xff] }
 0x47f   : > { %8456 = vrot.lane.b32.xlu0 %v8378_v11, %s10030_s22  ;;  %7353 = vrot.lane.b32.xlu1 %v7276_v34, %s10030_s22  ;;  %v6666_v31 = vrot.slane %v6664_v20, 3  ;;  %v6669_v15 = vrot.slane %v6667_v18, 4  ;;  %v3599_v10 = vadd.f32 %v14974_v1, %v3310_v9  ;;  %v5965_v27 = vrot.slane %v12193_v17, 1 }
 0x480   : > { %v4969_v28 = vmax.f32 %v4921_v39, 0.0  ;;  %v5603_v11 = vsel %vm1250_vm3, %v12228_v47, %v12355_v53  ;;  %v12374_v52 = vor.u32 %v7758_v16, %v7755_v22  ;;  %v14975_v39 = vld [vmem:[#allocation32_spill] sm:$0xff]  ;;  %v14976_v47 = vld [vmem:[#allocation113_spill] sm:$0xff]  ;;  %v4681_v18 = vrot.slane %v12199_v14, 2 }
 0x481   : > { %v5120_v30 = vpop.permute.xlu0 %5119  ;;  %v9933_v7 = vld [vmem:[#allocation4 + $0x78] sm:$0xff]  ;;  %9551 = vmatmul.msk.bf16.gmra.mxu0 %vm5694_vm8, %v5603_v11  ;;  %v2008_v20 = vadd.f32 %v14976_v47, %v14975_v39  ;;  %v5964_v1 = vrot.slane %v12146_v42, 1  ;;  %v12387_v8 = vor.u32 %v6669_v15, %v6666_v31  ;;  %v14978_v39 = vld [vmem:[#allocation106_spill] sm:$0xff]  ;;  %v14980_v15 = vld [vmem:[#allocation155_spill] sm:$0xff]  ;;  %v4687_v49 = vrot.slane %v12337_v59, 2 }
 0x482   : > { %v12367_v57 = vpack.c.bf16 %v4969_v28, %v4969_v28  ;;  %5207 = vst.msk [vmem:[%s10242_s20 + $0x24] sm:$0xf] %vm5197_vm9, %v5120_v30  ;;  %v12371_v62 = vpop.f32.mrf.mxu0  ;;  %v7760_v22 = vsel %vm1250_vm3, %v12237_v12, %v12374_v52  ;;  %v5605_v14 = vshrl.u32 %v9933_v7, 16  ;;  %v9980_v16 = vld [vmem:[#allocation4 + $0x78] sm:$0xff]  ;;  %v14977_v30 = vld [vmem:[#allocation117_spill] sm:$0xff]  ;;  %v2973_v47 = vadd.f32 %v14978_v39, %v2313_v5 }
 0x483   : > { %v12379_v34 = vpop.f32.mrf.mxu3  ;;  %v3584_v11 = vadd.f32 %v14977_v30, %v3295_v44  ;;  %9800 = vmatmul.msk.bf16.gmra.mxu2 %vm5694_vm8, %v7760_v22  ;;  %v5608_v36 = vshll.u32 %v9933_v7, 16  ;;  %v2298_v31 = vadd.f32 %v14979_v3, %v2008_v20  ;;  %v4682_v12 = vsel %vm2025_vm6, %v4679_v2, %v4681_v18 }
 0x484   : > { %5274 = vst.msk [vmem:[#allocation4 + $0x80] sm:$0xf] %vm289_vm7, %v12367_v57  ;;  %v12385_v9 = vadd.f32 %v12379_v34, %v3599_v10  ;;  %v5124_v28 = vpop.permute.xlu2 %5123  ;;  %v5966_v10 = vsel %vm1735_vm5, %v5964_v1, %v5965_v27  ;;  %v3311_v44 = vadd.f32 %v14980_v15, %v2973_v47  ;;  %v6671_v3 = vsel %vm1250_vm3, %v12301_v32, %v12387_v8  ;;  %v12414_v18 = vpop.f32.mrf.mxu1 }
 0x485   : > { %5209 = vst.msk [vmem:[%s10242_s20 + $0x2c] sm:$0xf] %vm5197_vm9, %v5124_v28  ;;  %v4244_v5 = vadd.f32 %v11834_v60, %v3584_v11  ;;  %v7277_v28 = vrot.slane %v12304_v45, 2  ;;  %v5610_v20 = vrot.slane %v5608_v36, 4  ;;  %v7762_v1 = vshrl.u32 %v9980_v16, 16 }
 0x486   : > { %5135 = vrot.lane.b32.xlu2 %v12273_v50, %s10031_s11  ;;  %v5607_v50 = vrot.slane %v5605_v14, 3  ;;  %v7765_v22 = vshll.u32 %v9980_v16, 16  ;;  %v3600_v30 = vadd.f32 %v14981_v23, %v3311_v44  ;;  %v6175_v2 = vrot.slane %v12234_v29, 2  ;;  %14982 = vst [vmem:[#allocation41_spill] sm:$0xff] %v12414_v18 }
 0x487   : > { %6042 = vrot.lane.b32.xlu0 %v5966_v10, %s10029_s21  ;;  %4777 = vrot.lane.b32.xlu1 %v4682_v12, %s10030_s22  ;;  %v5967_v11 = vrot.slane %v12234_v29, 1  ;;  %v14983_v10 = vld [vmem:[#allocation37_spill] sm:$0xff]  ;;  %v14985_v15 = vrot.slane %v12245_v35, 2  ;;  %v14986_v23 = vrot.slane %v12193_v17, 2  ;;  %v15003_v17 = vrot.slane %v12290_v54, 2 }
 0x488   : > { %v2958_v14 = vadd.f32 %v14983_v10, %v2298_v31  ;;  %v7767_v29 = vrot.slane %v7765_v22, 4  ;;  %v7970_v10 = vpop.f32.mrf.mxu2  ;;  %v14989_v22 = vld [vmem:[#allocation121_spill] sm:$0xff] }
 0x489   : > { %v4469_v7 = vpop.permute.xlu1 %4468  ;;  %v4758_v39 = vpop.permute.xlu0 %4757  ;;  %v7278_v44 = vsel %vm2025_vm6, %v14985_v15, %v7277_v28  ;;  %v6176_v31 = vsel %vm2025_vm6, %v14986_v23, %v6175_v2  ;;  %v5968_v28 = vsel %vm1735_vm5, %v5965_v27, %v5967_v11  ;;  %v7069_v11 = vrot.slane %v12304_v45, 1 }
 0x48a   : > { %v4582_v60 = vadd.f32 %v4469_v7, %v4244_v5  ;;  %9676 = vmatmul.msk.bf16.gmra.mxu1 %vm5694_vm8, %v6671_v3  ;;  %v12421_v12 = vpop.f32.mrf.mxu0  ;;  %v12429_v5 = vor.u32 %v5610_v20, %v5607_v50  ;;  %v7764_v3 = vrot.slane %v7762_v1, 3  ;;  %v14987_v50 = vld [vmem:[#allocation34_spill] sm:$0xff]  ;;  %v14988_v20 = vld [vmem:[#allocation115_spill] sm:$0xff] }
 0x48b   : > { %v12418_v47 = vpop.f32.mrf.mxu3  ;;  %v9957_v32 = vld [vmem:[#allocation4 + $0x7c] sm:$0xff]  ;;  %14984 = vst [vmem:[#allocation46_spill] sm:$0xff] %v12421_v12  ;;  %v2010_v1 = vadd.f32 %v14988_v20, %v14987_v50  ;;  %v8171_v50 = vrot.slane %v7970_v10, 1 }
 0x48c   : > { %v4871_v36 = vadd.f32 %v4758_v39, %v4582_v60  ;;  %v12424_v16 = vadd.f32 %v12418_v47, %v3600_v30  ;;  %v6673_v60 = vshrl.u32 %v9957_v32, 16  ;;  %v6676_v39 = vshll.u32 %v9957_v32, 16  ;;  %v12441_v15 = vpop.permute.xlu2 %4763  ;;  %v9934_v27 = vld [vmem:[#allocation4 + $0x80] sm:$0xff] }
 0x48d   : > { %v3296_v30 = vadd.f32 %v14989_v22, %v2958_v14  ;;  %v5612_v32 = vsel %vm1250_vm3, %v12355_v53, %v12429_v5  ;;  %v8379_v14 = vrot.slane %v7970_v10, 2  ;;  %v14991_v22 = vld [vmem:[#allocation123_spill] sm:$0xff]  ;;  %v12457_v53 = vpop.f32.mrf.mxu1 }
 0x48e   : > { %v4923_v7 = vadd.f32 %v11947_v61, %v4871_v36  ;;  %7355 = vrot.lane.b32.xlu2 %v7278_v44, %s10030_s22  ;;  %v12447_v44 = vor.u32 %v7767_v29, %v7764_v3  ;;  %v6675_v23 = vrot.slane %v6673_v60, 3  ;;  %v9981_v3 = vld [vmem:[#allocation4 + $0x80] sm:$0xff]  ;;  %v5614_v60 = vshrl.u32 %v9934_v27, 16 }
 0x48f   : > { %6252 = vrot.lane.b32.xlu0 %v6176_v31, %s10030_s22  ;;  %6044 = vrot.lane.b32.xlu1 %v5968_v28, %s10029_s21  ;;  %v6678_v31 = vrot.slane %v6676_v39, 4  ;;  %v3585_v42 = vadd.f32 %v14991_v22, %v3296_v30  ;;  %v5617_v39 = vshll.u32 %v9934_v27, 16 }
 0x490   : > { %v4971_v36 = vmax.f32 %v4923_v7, 0.0  ;;  %v14990_v7 = vld [vmem:[#allocation116_spill] sm:$0xff]  ;;  %v7769_v45 = vsel %vm1250_vm3, %v12374_v52, %v12447_v44  ;;  %v14995_v52 = vrot.slane %v12271_v58, 2  ;;  %v5616_v22 = vrot.slane %v5614_v60, 3 }
 0x491   : > { %v5122_v2 = vpop.permute.xlu1 %5121  ;;  %9552 = vmatmul.msk.bf16.gmra.mxu0 %vm5694_vm8, %v5612_v32  ;;  %v2300_v28 = vadd.f32 %v14990_v7, %v2010_v1  ;;  %v12464_v29 = vor.u32 %v6678_v31, %v6675_v23  ;;  %v4245_v10 = vadd.f32 %v11863_v25, %v3585_v42  ;;  %v14993_v1 = vrot.slane %v12271_v58, 1  ;;  %v14996_v42 = vld [vmem:[#allocation39_spill] sm:$0xff] }
 0x492   : > { %v12450_v20 = vpack.c.bf16 %v4971_v36, %v4971_v36  ;;  %5208 = vst.msk [vmem:[%s10242_s20 + $0x28] sm:$0xf] %vm5197_vm9, %v5122_v2  ;;  %v12467_v36 = vpop.f32.mrf.mxu0  ;;  %v14994_v2 = vrot.slane %v12245_v35, 1  ;;  %v8380_v25 = vsel %vm2025_vm6, %v14995_v52, %v8379_v14  ;;  %v4683_v60 = vrot.slane %v12242_v40, 2 }
 0x493   : > { %14992 = vst [vmem:[#allocation9_spill] sm:$0xff] %v12467_v36  ;;  %9801 = vmatmul.msk.bf16.gmra.mxu2 %vm5694_vm8, %v7769_v45  ;;  %v8172_v30 = vsel %vm1735_vm5, %v14993_v1, %v8171_v50  ;;  %v2960_v23 = vadd.f32 %v14996_v42, %v2300_v28  ;;  %v4583_v31 = vadd.f32 %v12341_v21, %v4245_v10  ;;  %v7771_v50 = vshrl.u32 %v9981_v3, 16  ;;  %v14997_v21 = vld [vmem:[#allocation36_spill] sm:$0xff] }
 0x494   : > { %5276 = vst.msk [vmem:[#allocation4 + $0x88] sm:$0xf] %vm289_vm7, %v12450_v20  ;;  %v7070_v32 = vsel %vm1735_vm5, %v14994_v2, %v7069_v11  ;;  %v6680_v11 = vsel %vm1250_vm3, %v12387_v8, %v12464_v29  ;;  %v5619_v45 = vrot.slane %v5617_v39, 4  ;;  %v7774_v1 = vshll.u32 %v9981_v3, 16  ;;  %v14998_v10 = vld [vmem:[#allocation120_spill] sm:$0xff] }
 0x495   : > { %v2011_v2 = vadd.f32 %v14998_v10, %v14997_v21  ;;  %v6177_v3 = vrot.slane %v12284_v63, 2  ;;  %v12505_v14 = vpop.f32.mrf.mxu1  ;;  %v15004_v35 = vrot.slane %v12290_v54, 1 }
 0x496   : > { %8250 = vrot.lane.b32.xlu2 %v8172_v30, %s10029_s21  ;;  %v7773_v30 = vrot.slane %v7771_v50, 3  ;;  %15002 = vst [vmem:[#allocation11_spill] sm:$0xff] %v12505_v14  ;;  %v15005_v50 = vld [vmem:[#allocation118_spill] sm:$0xff] }
 0x497   : > { %7147 = vrot.lane.b32.xlu0 %v7070_v32, %s10029_s21  ;;  %8458 = vrot.lane.b32.xlu1 %v8380_v25, %s10030_s22  ;;  %v14999_v32 = vld [vmem:[#allocation125_spill] sm:$0xff]  ;;  %v4394_v25 = vrot.slane %v12242_v40, 1  ;;  %v4686_v40 = vsel %vm2025_vm6, %v4683_v60, %v15003_v17 }
 0x498   : > { %v12484_v27 = vpop.permute.xlu2 %6244  ;;  %v3298_v52 = vadd.f32 %v14999_v32, %v2960_v23  ;;  %v15001_v23 = vld [vmem:[#allocation124_spill] sm:$0xff] }
 0x499   : > { %v4760_v7 = vpop.permute.xlu1 %4759 }
 0x49a   : > { %v4872_v28 = vadd.f32 %v4760_v7, %v4583_v31  ;;  %9677 = vmatmul.msk.bf16.gmra.mxu1 %vm5694_vm8, %v6680_v11  ;;  %v12500_v31 = vpop.f32.mrf.mxu2  ;;  %v12502_v7 = vor.u32 %v5619_v45, %v5616_v22  ;;  %v7776_v11 = vrot.slane %v7774_v1, 4  ;;  %v3587_v32 = vadd.f32 %v15001_v23, %v3298_v52  ;;  %v15008_v23 = vld [vmem:[#allocation126_spill] sm:$0xff] }
 0x49b   : > { %v9958_v8 = vld [vmem:[#allocation4 + $0x84] sm:$0xff]  ;;  %15000 = vst [vmem:[#allocation64_spill] sm:$0xff] %v12500_v31  ;;  %v15006_v22 = vrot.slane %v12331_v26, 2 }
 0x49c   : > { %v4924_v39 = vadd.f32 %v11947_v61, %v4872_v28  ;;  %v6682_v21 = vshrl.u32 %v9958_v8, 16  ;;  %v6685_v10 = vshll.u32 %v9958_v8, 16  ;;  %v4397_v61 = vsel %vm1735_vm5, %v4394_v25, %v15004_v35  ;;  %v12522_v8 = vpop.f32.mrf.mxu0 }
 0x49d   : > { %v2301_v28 = vadd.f32 %v15005_v50, %v2011_v2  ;;  %v6179_v45 = vsel %vm2025_vm6, %v6177_v3, %v15006_v22  ;;  %v4247_v1 = vadd.f32 %v11912_v56, %v3587_v32  ;;  %v5621_v2 = vsel %vm1250_vm3, %v12429_v5, %v12502_v7 }
 0x49e   : > { %v4972_v42 = vmax.f32 %v4924_v39, 0.0  ;;  %4781 = vrot.lane.b32.xlu2 %v4686_v40, %s10030_s22  ;;  %v12530_v25 = vor.u32 %v7776_v11, %v7773_v30  ;;  %v6684_v60 = vrot.slane %v6682_v21, 3  ;;  %v6687_v3 = vrot.slane %v6685_v10, 4  ;;  %v15009_v40 = vld [vmem:[#allocation42_spill] sm:$0xff]  ;;  %v15010_v11 = vld [vmem:[#allocation132_spill] sm:$0xff] }
 0x49f   : > { %4492 = vrot.lane.b32.xlu0 %v4397_v61, %s10029_s21  ;;  %6254 = vrot.lane.b32.xlu1 %v6179_v45, %s10030_s22  ;;  %v14589_v39 = vrot.slane %v12331_v26, 1  ;;  %v2961_v61 = vadd.f32 %v15009_v40, %v2301_v28  ;;  %v14590_v50 = vrot.slane %v12414_v18, 1  ;;  %v5969_v5 = vrot.slane %v12284_v63, 1  ;;  %v12552_v28 = vld [vmem:[%s14522_s5] ss:$0 sm:$0xff] }
 0x4a0   : > { %v12520_v52 = vpack.c.bf16 %v4972_v42, %v4972_v42  ;;  %v12525_v17 = vpop.permute.xlu2 %7349  ;;  %v15007_v42 = vld [vmem:[#allocation38_spill] sm:$0xff]  ;;  %v7071_v10 = vrot.slane %v12358_v41, 1  ;;  %v7778_v22 = vsel %vm1250_vm3, %v12447_v44, %v12530_v25  ;;  %v12547_v45 = vor.u32 %v6687_v3, %v6684_v60  ;;  %v12568_v60 = vpop.f32.mrf.mxu1 }
 0x4a1   : > { %v4475_v35 = vpop.permute.xlu0 %4474  ;;  %9553 = vmatmul.msk.bf16.gmra.mxu0 %vm5694_vm8, %v5621_v2  ;;  %v2013_v32 = vadd.f32 %v15008_v23, %v15007_v42  ;;  %v3299_v21 = vadd.f32 %v15010_v11, %v2961_v61  ;;  %15013 = vst [vmem:[#allocation55_spill] sm:$0xff] %v12568_v60  ;;  %v15014_v42 = vld [vmem:[#allocation129_spill] sm:$0xff]  ;;  %v15017_v63 = vrot.slane %v12414_v18, 2 }
 0x4a2   : > { %5277 = vst.msk [vmem:[#allocation4 + $0x8c] sm:$0xf] %vm289_vm7, %v12520_v52  ;;  %v4585_v56 = vadd.f32 %v4475_v35, %v4247_v1  ;;  %v15011_v35 = vld [vmem:[#allocation122_spill] sm:$0xff]  ;;  %v7073_v44 = vsel %vm1735_vm5, %v7071_v10, %v14590_v50  ;;  %v6689_v61 = vsel %vm1250_vm3, %v12464_v29, %v12547_v45  ;;  %v4398_v29 = vrot.slane %v12337_v59, 1  ;;  %v12593_v10 = vpop.f32.mrf.mxu3 }
 0x4a3   : > { %9802 = vmatmul.msk.bf16.gmra.mxu2 %vm5694_vm8, %v7778_v22  ;;  %v2303_v2 = vadd.f32 %v15011_v35, %v2013_v32  ;;  %v3588_v23 = vadd.f32 %v15014_v42, %v3299_v21  ;;  %v15015_v21 = vld [vmem:[#allocation48_spill] sm:$0xff]  ;;  %v8381_v50 = vrot.slane %v12500_v31, 2 }
 0x4a4   : > { %v4874_v30 = vadd.f32 %v12441_v15, %v4585_v56  ;;  %v5971_v15 = vsel %vm1735_vm5, %v5969_v5, %v14589_v39  ;;  %v12560_v56 = vpop.f32.mrf.mxu2  ;;  %v7279_v39 = vrot.slane %v12358_v41, 2 }
 0x4a5   : > { %15012 = vst [vmem:[#allocation61_spill] sm:$0xff] %v12560_v56  ;;  %v4248_v35 = vadd.f32 %v11934_v6, %v3588_v23 }
 0x4a6   : > { %v4926_v1 = vadd.f32 %v12552_v28, %v4874_v30  ;;  %6046 = vrot.lane.b32.xlu2 %v5971_v15, %s10029_s21  ;;  %v2963_v15 = vadd.f32 %v15015_v21, %v2303_v2  ;;  %v7281_v41 = vsel %vm2025_vm6, %v7279_v39, %v15017_v63  ;;  %v6180_v63 = vrot.slane %v12371_v62, 2 }
 0x4a7   : > { %5137 = vrot.lane.b32.xlu0 %v12319_v38, %s10031_s11  ;;  %7149 = vrot.lane.b32.xlu1 %v7073_v44, %s10029_s21  ;;  %v14596_v38 = vrot.slane %v12560_v56, 2  ;;  %v12587_v44 = vpop.f32.mrf.mxu0 }
 0x4a8   : > { %v4974_v3 = vmax.f32 %v4926_v1, 0.0  ;;  %v12572_v32 = vpop.permute.xlu2 %4480  ;;  %15016 = vst [vmem:[#allocation68_spill] sm:$0xff] %v12587_v44 }
 0x4a9   : > { %v5126_v40 = vpop.permute.xlu0 %5125  ;;  %v9935_v5 = vld [vmem:[#allocation4 + $0x88] sm:$0xff]  ;;  %v4477_v1 = vpop.permute.xlu1 %4476  ;;  %v8383_v23 = vsel %vm2025_vm6, %v8381_v50, %v14596_v38 }
 0x4aa   : > { %v9982_v30 = vld [vmem:[#allocation4 + $0x88] sm:$0xff]  ;;  %v12579_v22 = vpack.c.bf16 %v4974_v3, %v4974_v3  ;;  %5210 = vst.msk [vmem:[%s10242_s20 + $0x30] sm:$0xf] %vm5197_vm9, %v5126_v40  ;;  %9678 = vmatmul.msk.bf16.gmra.mxu1 %vm5694_vm8, %v6689_v61  ;;  %v5623_v42 = vshrl.u32 %v9935_v5, 16  ;;  %v5626_v3 = vshll.u32 %v9935_v5, 16  ;;  %v15018_v5 = vrot.slane %v12290_v54, 1 }
 0x4ab   : > { %v9959_v11 = vld [vmem:[#allocation4 + $0x8c] sm:$0xff]  ;;  %v7780_v40 = vshrl.u32 %v9982_v30, 16  ;;  %v7783_v2 = vshll.u32 %v9982_v30, 16  ;;  %v4586_v50 = vadd.f32 %v4477_v1, %v4248_v35 }
 0x4ac   : > { %5279 = vst.msk [vmem:[#allocation4 + $0x94] sm:$0xf] %vm289_vm7, %v12579_v22  ;;  %v5625_v61 = vrot.slane %v5623_v42, 3  ;;  %v6691_v21 = vshrl.u32 %v9959_v11, 16  ;;  %v6694_v6 = vshll.u32 %v9959_v11, 16  ;;  %v5628_v0 = vrot.slane %v5626_v3, 4 }
 0x4ad   : > { %v7782_v55 = vrot.slane %v7780_v40, 3  ;;  %v4399_v30 = vsel %vm1735_vm5, %v15018_v5, %v4398_v29  ;;  %v7785_v11 = vrot.slane %v7783_v2, 4  ;;  %v15019_v42 = vld [vmem:[#allocation133_spill] sm:$0xff]  ;;  %v15020_v2 = vld [vmem:[#allocation135_spill] sm:$0xff] }
 0x4ae   : > { %8460 = vrot.lane.b32.xlu2 %v8383_v23, %s10030_s22  ;;  %v3301_v58 = vadd.f32 %v15019_v42, %v2963_v15  ;;  %v12608_v38 = vor.u32 %v5628_v0, %v5625_v61  ;;  %v6696_v23 = vrot.slane %v6694_v6, 4  ;;  %v12619_v0 = vpop.f32.mrf.mxu1  ;;  %v4210_v61 = vpop.f32.mrf.mxu3 }
 0x4af   : > { %7357 = vrot.lane.b32.xlu0 %v7281_v41, %s10030_s22  ;;  %4494 = vrot.lane.b32.xlu1 %v4399_v30, %s10029_s21  ;;  %v12611_v40 = vor.u32 %v7785_v11, %v7782_v55  ;;  %v6693_v41 = vrot.slane %v6691_v21, 3  ;;  %v12629_v6 = vpop.f32.mrf.mxu0  ;;  %v8173_v61 = vrot.slane %v12500_v31, 1  ;;  %v15041_v31 = vrot.slane %v12560_v56, 2 }
 0x4b0   : > { %v5130_v39 = vpop.permute.xlu2 %5129  ;;  %v5630_v1 = vsel %vm1250_vm3, %v12502_v7, %v12608_v38  ;;  %v3590_v21 = vadd.f32 %v15020_v2, %v3301_v58  ;;  %15021 = vst [vmem:[#allocation8_spill] sm:$0xff] %v12629_v6  ;;  %v15022_v7 = vrot.slane %v12331_v26, 2 }
 0x4b1   : > { %v4766_v3 = vpop.permute.xlu0 %4765  ;;  %5212 = vst.msk [vmem:[%s10242_s20 + $0x38] sm:$0xf] %vm5197_vm9, %v5130_v39  ;;  %v5128_v15 = vpop.permute.xlu1 %5127  ;;  %9554 = vmatmul.msk.bf16.gmra.mxu0 %vm5694_vm8, %v5630_v1  ;;  %v7787_v55 = vsel %vm1250_vm3, %v12530_v25, %v12611_v40  ;;  %v12634_v30 = vor.u32 %v6696_v23, %v6693_v41  ;;  %v15023_v25 = vrot.slane %v12290_v54, 2  ;;  %v7074_v1 = vrot.slane %v12457_v53, 1 }
 0x4b2   : > { %v4875_v29 = vadd.f32 %v4766_v3, %v4586_v50  ;;  %5211 = vst.msk [vmem:[%s10242_s20 + $0x34] sm:$0xf] %vm5197_vm9, %v5128_v15  ;;  %v6181_v5 = vsel %vm2025_vm6, %v15022_v7, %v6180_v63  ;;  %v4250_v58 = vadd.f32 %v11993_v48, %v3590_v21  ;;  %v8174_v15 = vrot.slane %v12560_v56, 1 }
 0x4b3   : > { %v9936_v35 = vld [vmem:[#allocation4 + $0x90] sm:$0xff]  ;;  %9803 = vmatmul.msk.bf16.gmra.mxu2 %vm5694_vm8, %v7787_v55  ;;  %v4688_v50 = vsel %vm2025_vm6, %v15023_v25, %v4687_v49  ;;  %v6698_v49 = vsel %vm1250_vm3, %v12547_v45, %v12634_v30 }
 0x4b4   : > { %v4927_v59 = vadd.f32 %v12552_v28, %v4875_v29  ;;  %v9983_v11 = vld [vmem:[#allocation4 + $0x90] sm:$0xff]  ;;  %v5632_v39 = vshrl.u32 %v9936_v35, 16  ;;  %v5635_v3 = vshll.u32 %v9936_v35, 16  ;;  %v4588_v63 = vadd.f32 %v12572_v32, %v4250_v58 }
 0x4b5   : > { %v7789_v48 = vshrl.u32 %v9983_v11, 16  ;;  %v7792_v23 = vshll.u32 %v9983_v11, 16  ;;  %v7282_v35 = vrot.slane %v12457_v53, 2  ;;  %v15025_v11 = vrot.slane %v12414_v18, 1 }
 0x4b6   : > { %v4975_v42 = vmax.f32 %v4927_v59, 0.0  ;;  %6256 = vrot.lane.b32.xlu2 %v6181_v5, %s10030_s22  ;;  %v5634_v32 = vrot.slane %v5632_v39, 3  ;;  %v5637_v55 = vrot.slane %v5635_v3, 4  ;;  %v4212_v45 = vpop.f32.mrf.mxu3  ;;  %v12662_v2 = vpop.f32.mrf.mxu1  ;;  %v8175_v25 = vsel %vm1735_vm5, %v8173_v61, %v8174_v15 }
 0x4b7   : > { %4783 = vrot.lane.b32.xlu0 %v4688_v50, %s10030_s22  ;;  %5139 = vrot.lane.b32.xlu1 %v12367_v57, %s10031_s11  ;;  %15024 = vst [vmem:[#allocation54_spill] sm:$0xff] %v12662_v2  ;;  %v7791_v7 = vrot.slane %v7789_v48, 3  ;;  %v7794_v5 = vrot.slane %v7792_v23, 4  ;;  %v12671_v39 = vpop.f32.mrf.mxu0  ;;  %v15026_v3 = vrot.slane %v12414_v18, 2  ;;  %v15028_v48 = vld [vmem:[#allocation127_spill] sm:$0xff]  ;;  %v14599_v61 = vrot.slane %v12418_v47, 1 }
 0x4b8   : > { %v12643_v29 = vpack.c.bf16 %v4975_v42, %v4975_v42  ;;  %v12648_v41 = vpop.permute.xlu2 %4771  ;;  %v7075_v42 = vsel %vm1735_vm5, %v15025_v11, %v7074_v1  ;;  %v12669_v50 = vor.u32 %v5637_v55, %v5634_v32 }
 0x4b9   : > { %v12650_v54 = vpop.permute.xlu0 %6036  ;;  %v4770_v57 = vpop.permute.xlu1 %4769  ;;  %v7283_v58 = vsel %vm2025_vm6, %v15026_v3, %v7282_v35  ;;  %v12685_v32 = vor.u32 %v7794_v5, %v7791_v7 }
 0x4ba   : > { %5280 = vst.msk [vmem:[#allocation4 + $0x98] sm:$0xf] %vm289_vm7, %v12643_v29  ;;  %9679 = vmatmul.msk.bf16.gmra.mxu1 %vm5694_vm8, %v6698_v49  ;;  %v4877_v59 = vadd.f32 %v4770_v57, %v4588_v63  ;;  %v7977_v63 = vpop.f32.mrf.mxu2  ;;  %v15027_v49 = vld [vmem:[#allocation40_spill] sm:$0xff] }
 0x4bb   : > { %v2014_v23 = vadd.f32 %v15028_v48, %v15027_v49  ;;  %v7796_v3 = vsel %vm1250_vm3, %v12611_v40, %v12685_v32 }
 0x4bc   : > { %v4929_v21 = vadd.f32 %v12552_v28, %v4877_v59  ;;  %v5972_v59 = vrot.slane %v12371_v62, 1  ;;  %v4400_v62 = vrot.slane %v12379_v34, 1 }
 0x4be   : > { %v4977_v53 = vmax.f32 %v4929_v21, 0.0  ;;  %7151 = vrot.lane.b32.xlu2 %v7075_v42, %s10029_s21  ;;  %v5639_v21 = vsel %vm1250_vm3, %v12608_v38, %v12669_v50  ;;  %v8176_v42 = vrot.slane %v7977_v63, 1  ;;  %v4403_v48 = vsel %vm1735_vm5, %v4400_v62, %v14599_v61  ;;  %v15039_v61 = vld [vmem:[#allocation143_spill] sm:$0xff] }
 0x4bf   : > { %8252 = vrot.lane.b32.xlu0 %v8175_v25, %s10029_s21  ;;  %7359 = vrot.lane.b32.xlu1 %v7283_v58, %s10030_s22  ;;  %v15031_v25 = vld [vmem:[#allocation128_spill] sm:$0xff] }
 0x4c0   : > { %v12681_v1 = vpack.c.bf16 %v4977_v53, %v4977_v53  ;;  %v12683_v57 = vpop.permute.xlu2 %6040  ;;  %v2304_v53 = vadd.f32 %v15031_v25, %v2014_v23  ;;  %v12711_v23 = vpop.f32.mrf.mxu1  ;;  %v8177_v40 = vsel %vm1735_vm5, %v8174_v15, %v8176_v42 }
 0x4c1   : > { %15029 = vst [vmem:[#allocation60_spill] sm:$0xff] %v12683_v57  ;;  %v9960_v55 = vld [vmem:[#allocation4 + $0x94] sm:$0xff]  ;;  %v12689_v45 = vpop.permute.xlu0 %7141  ;;  %v12691_v35 = vpop.permute.xlu1 %6038  ;;  %9555 = vmatmul.msk.bf16.gmra.mxu0 %vm5694_vm8, %v5639_v21  ;;  %v15032_v21 = vrot.slane %v12331_v26, 1 }
 0x4c2   : > { %15030 = vst [vmem:[#allocation13_spill] sm:$0xff] %v12691_v35  ;;  %v9937_v11 = vld [vmem:[#allocation4 + $0x98] sm:$0xff]  ;;  %v6700_v7 = vshrl.u32 %v9960_v55, 16  ;;  %v6703_v5 = vshll.u32 %v9960_v55, 16 }
 0x4c3   : > { %5282 = vst.msk [vmem:[#allocation4 + $0xa0] sm:$0xf] %vm289_vm7, %v12681_v1  ;;  %v9984_v38 = vld [vmem:[#allocation4 + $0x98] sm:$0xff]  ;;  %9804 = vmatmul.msk.bf16.gmra.mxu2 %vm5694_vm8, %v7796_v3  ;;  %v5973_v55 = vsel %vm1735_vm5, %v15032_v21, %v5972_v59  ;;  %v5641_v18 = vshrl.u32 %v9937_v11, 16  ;;  %v5644_v57 = vshll.u32 %v9937_v11, 16  ;;  %v15036_v3 = vld [vmem:[#allocation51_spill] sm:$0xff] }
 0x4c4   : > { %v6702_v58 = vrot.slane %v6700_v7, 3  ;;  %v6705_v49 = vrot.slane %v6703_v5, 4  ;;  %15033 = vst [vmem:[#allocation10_spill] sm:$0xff] %v12711_v23  ;;  %v12719_v5 = vpop.f32.mrf.mxu0  ;;  %v7798_v11 = vshrl.u32 %v9984_v38, 16  ;;  %v7801_v25 = vshll.u32 %v9984_v38, 16 }
 0x4c5   : > { %15034 = vst [vmem:[#allocation59_spill] sm:$0xff] %v12719_v5  ;;  %v8384_v21 = vrot.slane %v7977_v63, 2  ;;  %v5643_v42 = vrot.slane %v5641_v18, 3  ;;  %v15042_v18 = vld [vmem:[#allocation145_spill] sm:$0xff] }
 0x4c6   : > { %4498 = vrot.lane.b32.xlu2 %v4403_v48, %s10029_s21  ;;  %v12716_v7 = vor.u32 %v6705_v49, %v6702_v58  ;;  %v2964_v48 = vadd.f32 %v15036_v3, %v2304_v53  ;;  %v5646_v58 = vrot.slane %v5644_v57, 4  ;;  %v7800_v38 = vrot.slane %v7798_v11, 3 }
 0x4c7   : > { %6048 = vrot.lane.b32.xlu0 %v5973_v55, %s10029_s21  ;;  %8254 = vrot.lane.b32.xlu1 %v8177_v40, %s10029_s21  ;;  %v4691_v40 = vrot.slane %v12418_v47, 2  ;;  %v7803_v53 = vrot.slane %v7801_v25, 4 }
 0x4c8   : > { %v12721_v62 = vpop.permute.xlu2 %6250  ;;  %v6707_v59 = vsel %vm1250_vm3, %v12634_v30, %v12716_v7  ;;  %v3302_v26 = vadd.f32 %v15039_v61, %v2964_v48  ;;  %v4689_v30 = vrot.slane %v12379_v34, 2 }
 0x4c9   : > { %15035 = vst [vmem:[#allocation66_spill] sm:$0xff] %v12721_v62  ;;  %v12727_v55 = vpop.permute.xlu0 %6246  ;;  %v12729_v15 = vpop.permute.xlu1 %6248 }
 0x4ca   : > { %15037 = vst [vmem:[#allocation57_spill] sm:$0xff] %v12727_v55  ;;  %9680 = vmatmul.msk.bf16.gmra.mxu1 %vm5694_vm8, %v6707_v59  ;;  %v9961_v49 = vld [vmem:[#allocation4 + $0x9c] sm:$0xff]  ;;  %v12735_v62 = vpop.f32.mrf.mxu2  ;;  %v12740_v59 = vor.u32 %v5646_v58, %v5643_v42  ;;  %v3591_v57 = vadd.f32 %v15042_v18, %v3302_v26  ;;  %v12743_v55 = vpop.f32.mrf.mxu1  ;;  %v4692_v34 = vsel %vm2025_vm6, %v4689_v30, %v4691_v40  ;;  %v14606_v26 = vrot.slane %v12467_v36, 2 }
 0x4cb   : > { %15038 = vst [vmem:[#allocation65_spill] sm:$0xff] %v12729_v15  ;;  %v6709_v63 = vshrl.u32 %v9961_v49, 16  ;;  %v6712_v3 = vshll.u32 %v9961_v49, 16  ;;  %v8385_v15 = vsel %vm2025_vm6, %v15041_v31, %v8384_v21  ;;  %v12753_v31 = vor.u32 %v7803_v53, %v7800_v38 }
 0x4cc   : > { %15040 = vst [vmem:[#allocation12_spill] sm:$0xff] %v12735_v62  ;;  %v4251_v61 = vadd.f32 %v12027_v19, %v3591_v57  ;;  %v14602_v21 = vrot.slane %v12568_v60, 2  ;;  %v14605_v58 = vrot.slane %v12467_v36, 1  ;;  %v12763_v19 = vpop.f32.mrf.mxu0  ;;  %v6182_v30 = vrot.slane %v12421_v12, 2 }
 0x4cd   : > { %v6711_v25 = vrot.slane %v6709_v63, 3  ;;  %v6714_v48 = vrot.slane %v6712_v3, 4  ;;  %15045 = vst [vmem:[#allocation78_spill] sm:$0xff] %v12763_v19  ;;  %v7284_v38 = vrot.slane %v12505_v14, 2  ;;  %v5974_v53 = vrot.slane %v12421_v12, 1 }
 0x4ce   : > { %5141 = vrot.lane.b32.xlu2 %v12450_v20, %s10031_s11  ;;  %v7805_v3 = vsel %vm1250_vm3, %v12685_v32, %v12753_v31 }
 0x4cf   : > { %8462 = vrot.lane.b32.xlu0 %v8385_v15, %s10030_s22  ;;  %4787 = vrot.lane.b32.xlu1 %v4692_v34, %s10030_s22  ;;  %v5648_v15 = vsel %vm1250_vm3, %v12669_v50, %v12740_v59  ;;  %v12773_v50 = vor.u32 %v6714_v48, %v6711_v25  ;;  %v7286_v57 = vsel %vm2025_vm6, %v7284_v38, %v14602_v21 }
 0x4d0   : > { %v12751_v11 = vpop.permute.xlu2 %7145  ;;  %v6184_v34 = vsel %vm2025_vm6, %v6182_v30, %v14606_v26  ;;  %v5976_v32 = vsel %vm1735_vm5, %v5974_v53, %v14605_v58 }
 0x4d1   : > { %15043 = vst [vmem:[#allocation72_spill] sm:$0xff] %v12751_v11  ;;  %v12757_v42 = vpop.permute.xlu1 %7143  ;;  %v4483_v20 = vpop.permute.xlu0 %4482  ;;  %9556 = vmatmul.msk.bf16.gmra.mxu0 %vm5694_vm8, %v5648_v15  ;;  %v14604_v15 = vrot.slane %v12568_v60, 1 }
 0x4d2   : > { %15044 = vst [vmem:[#allocation15_spill] sm:$0xff] %v12757_v42  ;;  %v4589_v49 = vadd.f32 %v4483_v20, %v4251_v61  ;;  %v12775_v18 = vpop.f32.mrf.mxu2  ;;  %v12791_v61 = vpop.f32.mrf.mxu1  ;;  %v6716_v20 = vsel %vm1250_vm3, %v12716_v7, %v12773_v50 }
 0x4d3   : > { %15046 = vst [vmem:[#allocation63_spill] sm:$0xff] %v12775_v18  ;;  %9805 = vmatmul.msk.bf16.gmra.mxu2 %vm5694_vm8, %v7805_v3  ;;  %v14603_v53 = vrot.slane %v12775_v18, 2  ;;  %v7076_v3 = vrot.slane %v12505_v14, 1 }
 0x4d4   : > { %v4878_v63 = vadd.f32 %v12648_v41, %v4589_v49  ;;  %15047 = vst [vmem:[#allocation70_spill] sm:$0xff] %v12791_v61  ;;  %v4693_v49 = vrot.slane %v12593_v10, 2  ;;  %v12808_v7 = vpop.f32.mrf.mxu0 }
 0x4d6   : > { %v4930_v41 = vadd.f32 %v12552_v28, %v4878_v63  ;;  %7361 = vrot.lane.b32.xlu2 %v7286_v57, %s10030_s22  ;;  %v8386_v57 = vrot.slane %v12735_v62, 2 }
 0x4d7   : > { %6258 = vrot.lane.b32.xlu0 %v6184_v34, %s10030_s22  ;;  %6050 = vrot.lane.b32.xlu1 %v5976_v32, %s10029_s21  ;;  %v4694_v34 = vsel %vm2025_vm6, %v4691_v40, %v4693_v49  ;;  %v4404_v40 = vrot.slane %v12593_v10, 1 }
 0x4d8   : > { %v4978_v25 = vmax.f32 %v4930_v41, 0.0  ;;  %v12793_v48 = vpop.permute.xlu2 %4488  ;;  %v7078_v41 = vsel %vm1735_vm5, %v7076_v3, %v14604_v15  ;;  %v8388_v32 = vsel %vm2025_vm6, %v8386_v57, %v14603_v53 }
 0x4d9   : > { %v5132_v30 = vpop.permute.xlu0 %5131  ;;  %v4487_v38 = vpop.permute.xlu1 %4486 }
 0x4da   : > { %9681 = vmatmul.msk.bf16.gmra.mxu1 %vm5694_vm8, %v6716_v20  ;;  %v12802_v63 = vpack.c.bf16 %v4978_v25, %v4978_v25  ;;  %5213 = vst.msk [vmem:[%s10242_s20 + $0x3c] sm:$0xf] %vm5197_vm9, %v5132_v30  ;;  %v14611_v25 = vrot.slane %v12775_v18, 1  ;;  %v12823_v20 = vpop.f32.mrf.mxu2  ;;  %v12832_v21 = vpop.f32.mrf.mxu1 }
 0x4db   : > { %15049 = vst [vmem:[#allocation79_spill] sm:$0xff] %v12832_v21 }
 0x4dc   : > { %5283 = vst.msk [vmem:[#allocation4 + $0xa4] sm:$0xf] %vm289_vm7, %v12802_v63 }
 0x4de   : > { %4789 = vrot.lane.b32.xlu2 %v4694_v34, %s10030_s22  ;;  %v8178_v34 = vrot.slane %v12735_v62, 1  ;;  %v12842_v62 = vpop.f32.mrf.mxu0 }
 0x4df   : > { %7153 = vrot.lane.b32.xlu0 %v7078_v41, %s10029_s21  ;;  %8464 = vrot.lane.b32.xlu1 %v8388_v32, %s10030_s22  ;;  %v6185_v41 = vrot.slane %v12522_v8, 2 }
 0x4e0   : > { %v5136_v49 = vpop.permute.xlu2 %5135  ;;  %v8180_v10 = vsel %vm1735_vm5, %v8178_v34, %v14611_v25 }
 0x4e1   : > { %5215 = vst.msk [vmem:[%s10242_s20 + $0x44] sm:$0xf] %vm5197_vm9, %v5136_v49  ;;  %v12828_v30 = vpop.permute.xlu0 %7351  ;;  %v5134_v3 = vpop.permute.xlu1 %5133  ;;  %v15050_v49 = vrot.slane %v12418_v47, 1  ;;  %v4591_v47 = vadd.f32 %v4487_v38, %v12114_v13 }
 0x4e2   : > { %15048 = vst [vmem:[#allocation19_spill] sm:$0xff] %v12828_v30  ;;  %v5977_v30 = vrot.slane %v12522_v8, 1 }
 0x4e3   : > { %5214 = vst.msk [vmem:[%s10242_s20 + $0x40] sm:$0xf] %vm5197_vm9, %v5134_v3  ;;  %v9938_v57 = vld [vmem:[#allocation4 + $0xa0] sm:$0xff]  ;;  %v4405_v15 = vsel %vm1735_vm5, %v15050_v49, %v4404_v40  ;;  %v15051_v3 = vrot.slane %v12467_v36, 2 }
 0x4e4   : > { %v9962_v32 = vld [vmem:[#allocation4 + $0xa4] sm:$0xff]  ;;  %v5650_v58 = vshrl.u32 %v9938_v57, 16  ;;  %v5653_v26 = vshll.u32 %v9938_v57, 16 }
 0x4e5   : > { %v9985_v53 = vld [vmem:[#allocation4 + $0xa0] sm:$0xff]  ;;  %v6718_v12 = vshrl.u32 %v9962_v32, 16  ;;  %v6721_v14 = vshll.u32 %v9962_v32, 16  ;;  %v6186_v56 = vsel %vm2025_vm6, %v15051_v3, %v6185_v41 }
 0x4e6   : > { %8256 = vrot.lane.b32.xlu2 %v8180_v10, %s10029_s21  ;;  %v7807_v11 = vshrl.u32 %v9985_v53, 16  ;;  %v7810_v34 = vshll.u32 %v9985_v53, 16  ;;  %v5652_v40 = vrot.slane %v5650_v58, 3  ;;  %v5655_v57 = vrot.slane %v5653_v26, 4  ;;  %v12863_v26 = vpop.f32.mrf.mxu2 }
 0x4e7   : > { %4500 = vrot.lane.b32.xlu0 %v4405_v15, %s10029_s21  ;;  %6260 = vrot.lane.b32.xlu1 %v6186_v56, %s10030_s22  ;;  %v6720_v32 = vrot.slane %v6718_v12, 3  ;;  %v6723_v25 = vrot.slane %v6721_v14, 4  ;;  %v7079_v53 = vrot.slane %v12619_v0, 1  ;;  %15053 = vst [vmem:[#allocation69_spill] sm:$0xff] %v12863_v26  ;;  %v12868_v14 = vpop.f32.mrf.mxu1 }
 0x4e8   : > { %v12851_v49 = vpop.permute.xlu2 %7355  ;;  %v7809_v35 = vrot.slane %v7807_v11, 3  ;;  %v7812_v10 = vrot.slane %v7810_v34, 4  ;;  %v12856_v15 = vor.u32 %v5655_v57, %v5652_v40 }
 0x4e9   : > { %15052 = vst [vmem:[#allocation14_spill] sm:$0xff] %v12851_v49  ;;  %v4776_v42 = vpop.permute.xlu0 %4775  ;;  %v12854_v41 = vpop.permute.xlu1 %8248  ;;  %v12859_v38 = vor.u32 %v6723_v25, %v6720_v32  ;;  %v15055_v25 = vrot.slane %v12568_v60, 1  ;;  %v15060_v32 = vrot.slane %v12775_v18, 2 }
 0x4ea   : > { %v4880_v13 = vadd.f32 %v4776_v42, %v4591_v47  ;;  %v12861_v56 = vor.u32 %v7812_v10, %v7809_v35  ;;  %v5657_v12 = vsel %vm1250_vm3, %v12740_v59, %v12856_v15  ;;  %v15054_v59 = vrot.slane %v12467_v36, 1 }
 0x4eb   : > { %9557 = vmatmul.msk.bf16.gmra.mxu0 %vm5694_vm8, %v5657_v12  ;;  %v6725_v11 = vsel %vm1250_vm3, %v12773_v50, %v12859_v38  ;;  %v7080_v3 = vsel %vm1735_vm5, %v15055_v25, %v7079_v53  ;;  %v8389_v47 = vrot.slane %v12823_v20, 2  ;;  %v15061_v53 = vrot.slane %v12568_v60, 2 }
 0x4ec   : > { %v4932_v8 = vadd.f32 %v12552_v28, %v4880_v13  ;;  %v7814_v35 = vsel %vm1250_vm3, %v12753_v31, %v12861_v56  ;;  %9682 = vmatmul.msk.bf16.gmra.mxu1 %vm5694_vm8, %v6725_v11  ;;  %v5978_v42 = vsel %vm1735_vm5, %v15054_v59, %v5977_v30  ;;  %v12890_v31 = vpop.f32.mrf.mxu0  ;;  %v7287_v30 = vrot.slane %v12619_v0, 2 }
 0x4ed   : > { %9806 = vmatmul.msk.bf16.gmra.mxu2 %vm5694_vm8, %v7814_v35  ;;  %15056 = vst [vmem:[#allocation81_spill] sm:$0xff] %v12890_v31  ;;  %v8390_v10 = vsel %vm2025_vm6, %v15060_v32, %v8389_v47  ;;  %v8181_v12 = vrot.slane %v12823_v20, 1  ;;  %v4592_v11 = vadd.f32 %v12793_v48, %v12158_v24  ;;  %v7289_v24 = vrot.slane %v12662_v2, 2 }
 0x4ee   : > { %v4980_v58 = vmax.f32 %v4932_v8, 0.0  ;;  %6052 = vrot.lane.b32.xlu2 %v5978_v42, %s10029_s21  ;;  %v7288_v13 = vsel %vm2025_vm6, %v15061_v53, %v7287_v30  ;;  %v14614_v8 = vrot.slane %v12629_v6, 2  ;;  %v15064_v36 = vrot.slane %v12775_v18, 1 }
 0x4ef   : > { %5143 = vrot.lane.b32.xlu0 %v12520_v52, %s10031_s11  ;;  %7155 = vrot.lane.b32.xlu1 %v7080_v3, %s10029_s21  ;;  %v12904_v52 = vpop.f32.mrf.mxu2  ;;  %v12912_v0 = vpop.f32.mrf.mxu1  ;;  %v6187_v3 = vrot.slane %v12587_v44, 2 }
 0x4f0   : > { %v12892_v50 = vpack.c.bf16 %v4980_v58, %v4980_v58  ;;  %v12894_v34 = vpop.permute.xlu2 %8250  ;;  %15059 = vst [vmem:[#allocation83_spill] sm:$0xff] %v12904_v52  ;;  %v8182_v60 = vsel %vm1735_vm5, %v15064_v36, %v8181_v12 }
 0x4f1   : > { %15057 = vst [vmem:[#allocation75_spill] sm:$0xff] %v12894_v34  ;;  %v12898_v40 = vpop.permute.xlu0 %8456  ;;  %v12900_v57 = vpop.permute.xlu1 %7353 }
 0x4f2   : > { %15058 = vst [vmem:[#allocation21_spill] sm:$0xff] %v12900_v57 }
 0x4f3   : > { %5285 = vst.msk [vmem:[#allocation4 + $0xac] sm:$0xf] %vm289_vm7, %v12892_v50 }
 0x4f4   : > { %15062 = vst [vmem:[#allocation82_spill] sm:$0xff] %v12912_v0  ;;  %v12928_v47 = vpop.f32.mrf.mxu0 }
 0x4f6   : > { %8466 = vrot.lane.b32.xlu2 %v8390_v10, %s10030_s22 }
 0x4f7   : > { %7363 = vrot.lane.b32.xlu0 %v7288_v13, %s10030_s22  ;;  %5145 = vrot.lane.b32.xlu1 %v12579_v22, %s10031_s11  ;;  %v6189_v13 = vsel %vm2025_vm6, %v6187_v3, %v14614_v8  ;;  %v12946_v3 = vpop.f32.mrf.mxu1 }
 0x4f8   : > { %v12922_v35 = vpop.permute.xlu2 %4781  ;;  %15066 = vst [vmem:[#allocation77_spill] sm:$0xff] %v12946_v3 }
 0x4f9   : > { %v12924_v59 = vpop.permute.xlu0 %6042  ;;  %v4778_v42 = vpop.permute.xlu1 %4777 }
 0x4fa   : > { %15063 = vst [vmem:[#allocation17_spill] sm:$0xff] %v12924_v59  ;;  %v9939_v58 = vld [vmem:[#allocation4 + $0xa8] sm:$0xff]  ;;  %v4881_v22 = vadd.f32 %v4778_v42, %v4592_v11 }
 0x4fb   : > { %v9986_v25 = vld [vmem:[#allocation4 + $0xa8] sm:$0xff]  ;;  %v5659_v20 = vshrl.u32 %v9939_v58, 16  ;;  %v5662_v32 = vshll.u32 %v9939_v58, 16  ;;  %v15065_v58 = vrot.slane %v12711_v23, 2 }
 0x4fc   : > { %v7816_v10 = vshrl.u32 %v9986_v25, 16  ;;  %v7819_v53 = vshll.u32 %v9986_v25, 16  ;;  %v4933_v48 = vadd.f32 %v12552_v28, %v4881_v22  ;;  %v12943_v22 = vpop.f32.mrf.mxu2 }
 0x4fd   : > { %v5661_v30 = vrot.slane %v5659_v20, 3  ;;  %v5664_v59 = vrot.slane %v5662_v32, 4  ;;  %v7291_v25 = vsel %vm2025_vm6, %v7289_v24, %v15065_v58 }
 0x4fe   : > { %v7818_v49 = vrot.slane %v7816_v10, 3  ;;  %v7821_v11 = vrot.slane %v7819_v53, 4  ;;  %v4981_v42 = vmax.f32 %v4933_v48, 0.0  ;;  %6262 = vrot.lane.b32.xlu2 %v6189_v13, %s10030_s22  ;;  %v5980_v10 = vrot.slane %v12629_v6, 1 }
 0x4ff   : > { %8258 = vrot.lane.b32.xlu0 %v8182_v60, %s10029_s21  ;;  %7365 = vrot.lane.b32.xlu1 %v7291_v25, %s10030_s22  ;;  %v5665_v20 = vor.u32 %v5664_v59, %v5661_v30  ;;  %v14615_v53 = vrot.slane %v12711_v23, 1  ;;  %v14617_v48 = vrot.slane %v12904_v52, 1  ;;  %v5979_v59 = vrot.slane %v12587_v44, 1 }
 0x500   : > { %v12948_v36 = vpack.c.bf16 %v4981_v42, %v4981_v42  ;;  %v12950_v12 = vpop.permute.xlu2 %6046  ;;  %v12952_v32 = vor.u32 %v7821_v11, %v7818_v49  ;;  %v7081_v30 = vrot.slane %v12662_v2, 1  ;;  %v8183_v11 = vrot.slane %v12863_v26, 1  ;;  %v12973_v42 = vpop.f32.mrf.mxu0 }
 0x501   : > { %15067 = vst [vmem:[#allocation76_spill] sm:$0xff] %v12950_v12  ;;  %v12956_v24 = vpop.permute.xlu0 %6252  ;;  %v12958_v60 = vpop.permute.xlu1 %6044  ;;  %v5666_v13 = vsel %vm1250_vm3, %v12856_v15, %v5665_v20  ;;  %v5981_v58 = vsel %vm1735_vm5, %v5979_v59, %v5980_v10  ;;  %v8392_v25 = vrot.slane %v12904_v52, 2  ;;  %v5982_v44 = vrot.slane %v12671_v39, 1 }
 0x502   : > { %15068 = vst [vmem:[#allocation23_spill] sm:$0xff] %v12956_v24  ;;  %v7823_v49 = vsel %vm1250_vm3, %v12861_v56, %v12952_v32  ;;  %9558 = vmatmul.msk.bf16.gmra.mxu0 %vm5694_vm8, %v5666_v13  ;;  %v7083_v15 = vsel %vm1735_vm5, %v7081_v30, %v14615_v53  ;;  %v8185_v56 = vsel %vm1735_vm5, %v8183_v11, %v14617_v48 }
 0x503   : > { %15069 = vst [vmem:[#allocation20_spill] sm:$0xff] %v12958_v60  ;;  %9807 = vmatmul.msk.bf16.gmra.mxu2 %vm5694_vm8, %v7823_v49 }
 0x504   : > { %5286 = vst.msk [vmem:[#allocation4 + $0xb0] sm:$0xf] %vm289_vm7, %v12948_v36  ;;  %v12994_v11 = vpop.f32.mrf.mxu2 }
 0x505   : > { %15070 = vst [vmem:[#allocation85_spill] sm:$0xff] %v12973_v42 }
 0x506   : > { %7157 = vrot.lane.b32.xlu2 %v7083_v15, %s10029_s21  ;;  %v8391_v15 = vrot.slane %v12863_v26, 2  ;;  %15074 = vst [vmem:[#allocation88_spill] sm:$0xff] %v12994_v11  ;;  %v5983_v26 = vsel %vm1735_vm5, %v5980_v10, %v5982_v44 }
 0x507   : > { %6054 = vrot.lane.b32.xlu0 %v5981_v58, %s10029_s21  ;;  %8260 = vrot.lane.b32.xlu1 %v8185_v56, %s10029_s21  ;;  %v12996_v58 = vpop.f32.mrf.mxu1 }
 0x508   : > { %v12986_v13 = vpop.permute.xlu2 %8460  ;;  %v8393_v18 = vsel %vm2025_vm6, %v8391_v15, %v8392_v25 }
 0x509   : > { %15071 = vst [vmem:[#allocation92_spill] sm:$0xff] %v12986_v13  ;;  %v12988_v49 = vpop.permute.xlu0 %7147  ;;  %v12990_v8 = vpop.permute.xlu1 %8458 }
 0x50a   : > { %15072 = vst [vmem:[#allocation80_spill] sm:$0xff] %v12988_v49 }
 0x50b   : > { %15073 = vst [vmem:[#allocation18_spill] sm:$0xff] %v12990_v8  ;;  %v9940_v30 = vld [vmem:[#allocation4 + $0xb0] sm:$0xff]  ;;  %v12999_v8 = vpop.f32.mrf.mxu0 }
 0x50c   : > { %v9963_v59 = vld [vmem:[#allocation4 + $0xac] sm:$0xff]  ;;  %v5668_v56 = vshrl.u32 %v9940_v30, 16  ;;  %v5671_v48 = vshll.u32 %v9940_v30, 16 }
 0x50d   : > { %v9987_v53 = vld [vmem:[#allocation4 + $0xb0] sm:$0xff]  ;;  %v6727_v2 = vshrl.u32 %v9963_v59, 16  ;;  %v6730_v12 = vshll.u32 %v9963_v59, 16 }
 0x50e   : > { %v7825_v24 = vshrl.u32 %v9987_v53, 16  ;;  %v7828_v60 = vshll.u32 %v9987_v53, 16  ;;  %v5670_v49 = vrot.slane %v5668_v56, 3  ;;  %v5673_v13 = vrot.slane %v5671_v48, 4  ;;  %5147 = vrot.lane.b32.xlu2 %v12643_v29, %s10031_s11 }
 0x50f   : > { %v6729_v42 = vrot.slane %v6727_v2, 3  ;;  %v6732_v57 = vrot.slane %v6730_v12, 4  ;;  %8468 = vrot.lane.b32.xlu0 %v8393_v18, %s10030_s22  ;;  %6056 = vrot.lane.b32.xlu1 %v5983_v26, %s10029_s21  ;;  %v6190_v12 = vrot.slane %v12671_v39, 2  ;;  %v7292_v29 = vrot.slane %v12743_v55, 2 }
 0x510   : > { %v7827_v30 = vrot.slane %v7825_v24, 3  ;;  %v7830_v34 = vrot.slane %v7828_v60, 4  ;;  %v13006_v59 = vpop.permute.xlu2 %6256  ;;  %v13008_v53 = vor.u32 %v5673_v13, %v5670_v49  ;;  %v8394_v18 = vrot.slane %v12943_v22, 2  ;;  %v13032_v24 = vpop.f32.mrf.mxu1 }
 0x511   : > { %15075 = vst [vmem:[#allocation22_spill] sm:$0xff] %v13006_v59  ;;  %v13010_v48 = vor.u32 %v6732_v57, %v6729_v42  ;;  %v13016_v15 = vpop.permute.xlu1 %6254  ;;  %v4493_v44 = vpop.permute.xlu0 %4492  ;;  %v15079_v60 = vrot.slane %v12629_v6, 2  ;;  %v7089_v6 = vrot.slane %v12868_v14, 1 }
 0x512   : > { %v13012_v2 = vor.u32 %v7830_v34, %v7827_v30  ;;  %15076 = vst [vmem:[#allocation86_spill] sm:$0xff] %v13016_v15  ;;  %v4594_v10 = vadd.f32 %v4493_v44, %v12249_v43  ;;  %v5675_v26 = vsel %vm1250_vm3, %v5665_v20, %v13008_v53  ;;  %v13030_v34 = vpop.f32.mrf.mxu2  ;;  %v15078_v20 = vrot.slane %v12711_v23, 2 }
 0x513   : > { %v6734_v57 = vsel %vm1250_vm3, %v12859_v38, %v13010_v48  ;;  %9559 = vmatmul.msk.bf16.gmra.mxu0 %vm5694_vm8, %v5675_v26  ;;  %15077 = vst [vmem:[#allocation25_spill] sm:$0xff] %v13030_v34  ;;  %v6191_v42 = vsel %vm2025_vm6, %v15079_v60, %v6190_v12  ;;  %v13042_v13 = vpop.f32.mrf.mxu0  ;;  %v8395_v49 = vsel %vm2025_vm6, %v8392_v25, %v8394_v18  ;;  %v7084_v30 = vrot.slane %v12743_v55, 1 }
 0x514   : > { %9683 = vmatmul.msk.bf16.gmra.mxu1 %vm5694_vm8, %v6734_v57  ;;  %v7832_v39 = vsel %vm1250_vm3, %v12952_v32, %v13012_v2  ;;  %v4883_v43 = vadd.f32 %v12922_v35, %v4594_v10  ;;  %v7293_v38 = vsel %vm2025_vm6, %v15078_v20, %v7292_v29  ;;  %v8186_v29 = vrot.slane %v12943_v22, 1 }
 0x515   : > { %9808 = vmatmul.msk.bf16.gmra.mxu2 %vm5694_vm8, %v7832_v39  ;;  %v14623_v10 = vrot.slane %v12763_v19, 2  ;;  %v6192_v25 = vrot.slane %v12719_v5, 2  ;;  %v15081_v18 = vrot.slane %v12904_v52, 1  ;;  %v15082_v22 = vrot.slane %v12711_v23, 1 }
 0x516   : > { %v4935_v32 = vadd.f32 %v12552_v28, %v4883_v43  ;;  %7367 = vrot.lane.b32.xlu2 %v7293_v38, %s10030_s22  ;;  %v14622_v60 = vrot.slane %v12763_v19, 1  ;;  %v5987_v52 = vrot.slane %v12808_v7, 1 }
 0x517   : > { %6264 = vrot.lane.b32.xlu0 %v6191_v42, %s10030_s22  ;;  %8470 = vrot.lane.b32.xlu1 %v8395_v49, %s10030_s22  ;;  %v8187_v55 = vsel %vm1735_vm5, %v15081_v18, %v8186_v29  ;;  %v7085_v57 = vsel %vm1735_vm5, %v15082_v22, %v7084_v30  ;;  %v6194_v43 = vsel %vm2025_vm6, %v6192_v25, %v14623_v10  ;;  %v14624_v49 = vrot.slane %v12832_v21, 1 }
 0x518   : > { %v4983_v35 = vmax.f32 %v4935_v32, 0.0  ;;  %v13049_v56 = vpop.permute.xlu2 %7151  ;;  %v13069_v39 = vpop.f32.mrf.mxu1  ;;  %v7086_v29 = vrot.slane %v12791_v61, 1 }
 0x519   : > { %v13053_v12 = vpop.permute.xlu1 %7149  ;;  %v5138_v44 = vpop.permute.xlu0 %5137 }
 0x51a   : > { %15080 = vst [vmem:[#allocation89_spill] sm:$0xff] %v13053_v12  ;;  %v13056_v26 = vpack.c.bf16 %v4983_v35, %v4983_v35  ;;  %v5984_v35 = vrot.slane %v12719_v5, 1 }
 0x51b   : > { %5216 = vst.msk [vmem:[%s10242_s20 + $0x48] sm:$0xf] %vm5197_vm9, %v5138_v44  ;;  %v13077_v20 = vpop.f32.mrf.mxu0 }
 0x51c   : > { %5288 = vst.msk [vmem:[#allocation4 + $0xb8] sm:$0xf] %vm289_vm7, %v13056_v26  ;;  %v5986_v44 = vsel %vm1735_vm5, %v5984_v35, %v14622_v60 }
 0x51e   : > { %8262 = vrot.lane.b32.xlu2 %v8187_v55, %s10029_s21  ;;  %v7088_v55 = vsel %vm1735_vm5, %v7086_v29, %v14624_v49 }
 0x51f   : > { %7159 = vrot.lane.b32.xlu0 %v7085_v57, %s10029_s21  ;;  %6266 = vrot.lane.b32.xlu1 %v6194_v43, %s10030_s22 }
 0x520   : > { %v13079_v38 = vpop.permute.xlu2 %4498  ;;  %v13097_v22 = vpop.f32.mrf.mxu1 }
 0x521   : > { %v13082_v42 = vpop.permute.xlu0 %7357  ;;  %v4495_v32 = vpop.permute.xlu1 %4494 }
 0x522   : > { %15083 = vst [vmem:[#allocation93_spill] sm:$0xff] %v13082_v42  ;;  %v4595_v57 = vadd.f32 %v4495_v32, %v12296_v46  ;;  %v7294_v46 = vrot.slane %v12791_v61, 2  ;;  %v8396_v32 = vrot.slane %v12994_v11, 2 }
 0x523   : > { %v9964_v30 = vld [vmem:[#allocation4 + $0xb4] sm:$0xff]  ;;  %v13104_v49 = vpop.f32.mrf.mxu0 }
 0x524   : > { %v6736_v25 = vshrl.u32 %v9964_v30, 16  ;;  %v6739_v18 = vshll.u32 %v9964_v30, 16  ;;  %v7295_v30 = vrot.slane %v12832_v21, 2  ;;  %15084 = vst [vmem:[#allocation47_spill] sm:$0xff] %v13104_v49 }
 0x526   : > { %6058 = vrot.lane.b32.xlu2 %v5986_v44, %s10029_s21  ;;  %v6738_v35 = vrot.slane %v6736_v25, 3  ;;  %v6741_v60 = vrot.slane %v6739_v18, 4  ;;  %v14625_v44 = vrot.slane %v13030_v34, 2 }
 0x527   : > { %5149 = vrot.lane.b32.xlu0 %v12681_v1, %s10031_s11  ;;  %7161 = vrot.lane.b32.xlu1 %v7088_v55, %s10029_s21 }
 0x528   : > { %v5142_v43 = vpop.permute.xlu2 %5141  ;;  %v13108_v55 = vor.u32 %v6741_v60, %v6738_v35  ;;  %v6195_v35 = vrot.slane %v12808_v7, 2 }
 0x529   : > { %5218 = vst.msk [vmem:[%s10242_s20 + $0x50] sm:$0xf] %vm5197_vm9, %v5142_v43  ;;  %v4784_v10 = vpop.permute.xlu0 %4783  ;;  %v5140_v29 = vpop.permute.xlu1 %5139 }
 0x52a   : > { %v4884_v1 = vadd.f32 %v4784_v10, %v4595_v57  ;;  %5217 = vst.msk [vmem:[%s10242_s20 + $0x4c] sm:$0xf] %vm5197_vm9, %v5140_v29  ;;  %v6743_v18 = vsel %vm1250_vm3, %v13010_v48, %v13108_v55  ;;  %v8398_v10 = vsel %vm2025_vm6, %v8396_v32, %v14625_v44  ;;  %v7296_v57 = vsel %vm2025_vm6, %v7294_v46, %v7295_v30  ;;  %v15087_v46 = vld [vmem:[#allocation16_spill] sm:$0xff]  ;;  %v15088_v32 = vld [vmem:[#allocation74_spill] sm:$0xff] }
 0x52b   : > { %9684 = vmatmul.msk.bf16.gmra.mxu1 %vm5694_vm8, %v6743_v18  ;;  %v8189_v48 = vrot.slane %v13030_v34, 1  ;;  %v7297_v18 = vrot.slane %v12868_v14, 2  ;;  %v15090_v44 = vrot.slane %v12763_v19, 2  ;;  %v15093_v14 = vrot.slane %v12832_v21, 1 }
 0x52c   : > { %v4936_v25 = vadd.f32 %v12552_v28, %v4884_v1 }
 0x52d   : > { %v6196_v61 = vsel %vm2025_vm6, %v15090_v44, %v6195_v35  ;;  %v7298_v5 = vsel %vm2025_vm6, %v7295_v30, %v7297_v18 }
 0x52e   : > { %v4984_v60 = vmax.f32 %v4936_v25, 0.0  ;;  %8472 = vrot.lane.b32.xlu2 %v8398_v10, %s10030_s22  ;;  %v6130_v25 = vadd.f32 %v15088_v32, %v15087_v46  ;;  %v13138_v10 = vpop.f32.mrf.mxu1  ;;  %v15091_v46 = vld [vmem:[#allocation73_spill] sm:$0xff] }
 0x52f   : > { %7369 = vrot.lane.b32.xlu0 %v7296_v57, %s10030_s22  ;;  %5151 = vrot.lane.b32.xlu1 %v12802_v63, %s10031_s11  ;;  %v8188_v63 = vrot.slane %v12994_v11, 1  ;;  %v13143_v57 = vpop.f32.mrf.mxu2 }
 0x530   : > { %v13125_v28 = vpack.c.bf16 %v4984_v60, %v4984_v60  ;;  %v13127_v43 = vpop.permute.xlu2 %7361  ;;  %v13145_v60 = vpop.f32.mrf.mxu0  ;;  %v6338_v32 = vadd.f32 %v15091_v46, %v6130_v25 }
 0x531   : > { %15085 = vst [vmem:[#allocation131_spill] sm:$0xff] %v13127_v43  ;;  %v13131_v29 = vpop.permute.xlu0 %8252  ;;  %v13133_v1 = vpop.permute.xlu1 %7359  ;;  %v8190_v23 = vsel %vm1735_vm5, %v8188_v63, %v8189_v48 }
 0x532   : > { %15086 = vst [vmem:[#allocation130_spill] sm:$0xff] %v13133_v1  ;;  %v6981_v11 = vadd.f32 %v11986_v37, %v6338_v32  ;;  %v7090_v32 = vsel %vm1735_vm5, %v15093_v14, %v7089_v6 }
 0x533   : > { %5289 = vst.msk [vmem:[#allocation4 + $0xbc] sm:$0xf] %vm289_vm7, %v13125_v28 }
 0x534   : > { %15089 = vst [vmem:[#allocation27_spill] sm:$0xff] %v13145_v60  ;;  %v7237_v30 = vadd.f32 %v12689_v45, %v6981_v11 }
 0x536   : > { %6268 = vrot.lane.b32.xlu2 %v6196_v61, %s10030_s22  ;;  %v13167_v7 = vpop.f32.mrf.mxu1 }
 0x537   : > { %8264 = vrot.lane.b32.xlu0 %v8190_v23, %s10029_s21  ;;  %7371 = vrot.lane.b32.xlu1 %v7298_v5, %s10030_s22  ;;  %v8191_v23 = vrot.slane %v13143_v57, 1  ;;  %v13175_v42 = vpop.f32.mrf.mxu2 }
 0x538   : > { %v13159_v59 = vpop.permute.xlu2 %4789  ;;  %15095 = vst [vmem:[#allocation84_spill] sm:$0xff] %v13175_v42  ;;  %v13177_v12 = vpop.f32.mrf.mxu0 }
 0x539   : > { %v13161_v44 = vpop.permute.xlu0 %6048  ;;  %v13163_v35 = vpop.permute.xlu1 %8254  ;;  %15096 = vst [vmem:[#allocation50_spill] sm:$0xff] %v13177_v12 }
 0x53a   : > { %15092 = vst [vmem:[#allocation96_spill] sm:$0xff] %v13161_v44  ;;  %v9941_v25 = vld [vmem:[#allocation4 + $0xb8] sm:$0xff]  ;;  %v15094_v44 = vrot.slane %v12763_v19, 1 }
 0x53b   : > { %v9965_v61 = vld [vmem:[#allocation4 + $0xbc] sm:$0xff]  ;;  %v5677_v5 = vshrl.u32 %v9941_v25, 16  ;;  %v5680_v18 = vshll.u32 %v9941_v25, 16 }
 0x53c   : > { %v9988_v63 = vld [vmem:[#allocation4 + $0xb8] sm:$0xff]  ;;  %v6745_v37 = vshrl.u32 %v9965_v61, 16  ;;  %v6748_v46 = vshll.u32 %v9965_v61, 16  ;;  %v5988_v43 = vsel %vm1735_vm5, %v15094_v44, %v5987_v52  ;;  %v8192_v61 = vsel %vm1735_vm5, %v8189_v48, %v8191_v23 }
 0x53d   : > { %v7834_v15 = vshrl.u32 %v9988_v63, 16  ;;  %v7837_v60 = vshll.u32 %v9988_v63, 16  ;;  %v5679_v45 = vrot.slane %v5677_v5, 3  ;;  %v5682_v11 = vrot.slane %v5680_v18, 4 }
 0x53e   : > { %v6747_v1 = vrot.slane %v6745_v37, 3  ;;  %v6750_v25 = vrot.slane %v6748_v46, 4  ;;  %7163 = vrot.lane.b32.xlu2 %v7090_v32, %s10029_s21  ;;  %v7445_v63 = vadd.f32 %v12525_v17, %v7237_v30  ;;  %v4597_v5 = vadd.f32 %v13079_v38, %v12385_v9  ;;  %v13222_v32 = vpop.f32.mrf.mxu1 }
 0x53f   : > { %6060 = vrot.lane.b32.xlu0 %v5988_v43, %s10029_s21  ;;  %v7836_v6 = vrot.slane %v7834_v15, 3  ;;  %v7839_v14 = vrot.slane %v7837_v60, 4  ;;  %8266 = vrot.lane.b32.xlu1 %v8192_v61, %s10029_s21  ;;  %v13183_v52 = vor.u32 %v5682_v11, %v5679_v45  ;;  %v8399_v48 = vrot.slane %v13143_v57, 2  ;;  %v13215_v57 = vld [vmem:[%s14522_s5] ss:$0 sm:$0xff]  ;;  %v13230_v11 = vpop.f32.mrf.mxu2 }
 0x540   : > { %v13185_v44 = vor.u32 %v6750_v25, %v6747_v1  ;;  %v13190_v18 = vpop.permute.xlu2 %8256  ;;  %v14635_v1 = vrot.slane %v12890_v31, 1  ;;  %v5989_v38 = vrot.slane %v12842_v62, 1  ;;  %v13239_v61 = vpop.f32.mrf.mxu0 }
 0x541   : > { %v13192_v37 = vor.u32 %v7839_v14, %v7836_v6  ;;  %v13195_v43 = vpop.permute.xlu0 %8462  ;;  %v4788_v15 = vpop.permute.xlu1 %4787  ;;  %v5684_v60 = vsel %vm1250_vm3, %v13008_v53, %v13183_v52  ;;  %v8088_v53 = vadd.f32 %v12209_v4, %v7445_v63  ;;  %15098 = vst [vmem:[#allocation138_spill] sm:$0xff] %v13239_v61  ;;  %v6198_v14 = vrot.slane %v12890_v31, 2 }
 0x542   : > { %v4886_v23 = vadd.f32 %v4788_v15, %v4597_v5  ;;  %9560 = vmatmul.msk.bf16.gmra.mxu0 %vm5694_vm8, %v5684_v60  ;;  %v6752_v9 = vsel %vm1250_vm3, %v13108_v55, %v13185_v44  ;;  %v15097_v55 = vrot.slane %v13030_v34, 2  ;;  %v5991_v4 = vsel %vm1735_vm5, %v5989_v38, %v14635_v1 }
 0x543   : > { %v7841_v17 = vsel %vm1250_vm3, %v13012_v2, %v13192_v37  ;;  %9685 = vmatmul.msk.bf16.gmra.mxu1 %vm5694_vm8, %v6752_v9  ;;  %v8344_v2 = vadd.f32 %v12854_v41, %v8088_v53  ;;  %v13236_v41 = vld [vmem:[%s14523_s6] ss:$0 sm:$0xff]  ;;  %v14634_v63 = vrot.slane %v12946_v3, 2  ;;  %v14633_v15 = vrot.slane %v13230_v11, 2 }
 0x544   : > { %9809 = vmatmul.msk.bf16.gmra.mxu2 %vm5694_vm8, %v7841_v17  ;;  %v4938_v30 = vadd.f32 %v13215_v57, %v4886_v23  ;;  %v8400_v46 = vsel %vm2025_vm6, %v15097_v55, %v8399_v48  ;;  %v7299_v60 = vrot.slane %v12912_v0, 2  ;;  %v8401_v23 = vrot.slane %v13175_v42, 2 }
 0x545   : > { %v8552_v25 = vadd.f32 %v12898_v40, %v8344_v2  ;;  %v6197_v40 = vrot.slane %v12842_v62, 2 }
 0x546   : > { %v4986_v45 = vmax.f32 %v4938_v30, 0.0  ;;  %5153 = vrot.lane.b32.xlu2 %v12892_v50, %s10031_s11  ;;  %v7301_v17 = vsel %vm2025_vm6, %v7299_v60, %v14634_v63  ;;  %v8403_v53 = vsel %vm2025_vm6, %v8401_v23, %v14633_v15  ;;  %v7092_v30 = vrot.slane %v12946_v3, 1 }
 0x547   : > { %8474 = vrot.lane.b32.xlu0 %v8400_v46, %s10030_s22  ;;  %6062 = vrot.lane.b32.xlu1 %v5991_v4, %s10029_s21  ;;  %v8588_v9 = vadd.f32 %v13236_v41, %v8552_v25  ;;  %v6199_v38 = vsel %vm2025_vm6, %v6197_v40, %v6198_v14  ;;  %v13269_v46 = vpop.f32.mrf.mxu1  ;;  %v7091_v60 = vrot.slane %v12912_v0, 1  ;;  %v6200_v23 = vrot.slane %v12928_v47, 2  ;;  %v13284_v21 = vpop.f32.mrf.mxu2 }
 0x548   : > { %v13241_v50 = vpack.c.bf16 %v4986_v45, %v4986_v45  ;;  %v13243_v6 = vpop.permute.xlu2 %6052  ;;  %v6131_v63 = vadd.f32 %v12650_v54, %v14896_v33 }
 0x549   : > { %15099 = vst [vmem:[#allocation150_spill] sm:$0xff] %v13243_v6  ;;  %v13247_v5 = vpop.permute.xlu0 %6258  ;;  %v13249_v48 = vpop.permute.xlu1 %6050  ;;  %v8620_v55 = vmax.f32 %v8588_v9, 0.0  ;;  %v7093_v34 = vsel %vm1735_vm5, %v7091_v60, %v7092_v30  ;;  %v6201_v0 = vsel %vm2025_vm6, %v6198_v14, %v6200_v23 }
 0x54a   : > { %15100 = vst [vmem:[#allocation134_spill] sm:$0xff] %v13247_v5  ;;  %v6339_v54 = vadd.f32 %v12484_v27, %v6131_v63  ;;  %v8193_v27 = vrot.slane %v13175_v42, 1 }
 0x54b   : > { %15101 = vst [vmem:[#allocation99_spill] sm:$0xff] %v13249_v48  ;;  %v8684_v1 = vpack.c.bf16 %v8620_v55, %v8620_v55 }
 0x54c   : > { %5291 = vst.msk [vmem:[#allocation4 + $0xc4] sm:$0xf] %vm289_vm7, %v13241_v50  ;;  %v6982_v14 = vadd.f32 %v12025_v51, %v6339_v54  ;;  %v15106_v51 = vld [vmem:[#allocation19_spill] sm:$0xff]  ;;  %v5992_v54 = vrot.slane %v12928_v47, 1 }
 0x54e   : > { %7373 = vrot.lane.b32.xlu2 %v7301_v17, %s10030_s22  ;;  %v13279_v17 = vpop.f32.mrf.mxu0 }
 0x54f   : > { %6270 = vrot.lane.b32.xlu0 %v6199_v38, %s10030_s22  ;;  %8476 = vrot.lane.b32.xlu1 %v8403_v53, %s10030_s22 }
 0x550   : > { %v13271_v2 = vpop.permute.xlu2 %8466 }
 0x551   : > { %v13273_v45 = vpop.permute.xlu0 %7153  ;;  %v13275_v4 = vpop.permute.xlu1 %8464 }
 0x553   : > { %v9942_v25 = vld [vmem:[#allocation4 + $0xc0] sm:$0xff] }
 0x554   : > { %v9989_v40 = vld [vmem:[#allocation4 + $0xc0] sm:$0xff]  ;;  %v5686_v38 = vshrl.u32 %v9942_v25, 16  ;;  %v5689_v53 = vshll.u32 %v9942_v25, 16 }
 0x555   : > { %v7843_v15 = vshrl.u32 %v9989_v40, 16  ;;  %v7846_v9 = vshll.u32 %v9989_v40, 16 }
 0x556   : > { %v5688_v6 = vrot.slane %v5686_v38, 3  ;;  %v5691_v19 = vrot.slane %v5689_v53, 4  ;;  %8748 = vrot.lane.b32.xlu2 %v8684_v1, %s10032_s23  ;;  %v13311_v63 = vpop.f32.mrf.mxu0  ;;  %v13323_v53 = vpop.f32.mrf.mxu2 }
 0x557   : > { %v7845_v5 = vrot.slane %v7843_v15, 3  ;;  %v7848_v48 = vrot.slane %v7846_v9, 4  ;;  %7165 = vrot.lane.b32.xlu0 %v7093_v34, %s10029_s21  ;;  %6272 = vrot.lane.b32.xlu1 %v6201_v0, %s10030_s22  ;;  %v8194_v15 = vrot.slane %v13230_v11, 1  ;;  %15104 = vst [vmem:[#allocation91_spill] sm:$0xff] %v13311_v63  ;;  %v8198_v42 = vrot.slane %v13323_v53, 1 }
 0x558   : > { %v5692_v25 = vor.u32 %v5691_v19, %v5688_v6  ;;  %v13293_v55 = vpop.permute.xlu2 %6262  ;;  %v7094_v19 = vrot.slane %v12996_v58, 1  ;;  %v13308_v6 = vpop.f32.mrf.mxu1  ;;  %15107 = vst [vmem:[#allocation98_spill] sm:$0xff] %v13323_v53 }
 0x559   : > { %v13290_v33 = vor.u32 %v7848_v48, %v7845_v5  ;;  %15102 = vst [vmem:[#allocation146_spill] sm:$0xff] %v13293_v55  ;;  %v13296_v40 = vpop.permute.xlu1 %6260  ;;  %v4501_v60 = vpop.permute.xlu0 %4500  ;;  %v15105_v5 = vld [vmem:[#allocation15_spill] sm:$0xff] }
 0x55a   : > { %15103 = vst [vmem:[#allocation24_spill] sm:$0xff] %v13296_v40  ;;  %v5693_v1 = vsel %vm1250_vm3, %v13183_v52, %v5692_v25  ;;  %v4598_v0 = vadd.f32 %v4501_v60, %v12424_v16  ;;  %v7238_v48 = vadd.f32 %v15105_v5, %v6982_v14  ;;  %v7095_v23 = vsel %vm1735_vm5, %v7092_v30, %v7094_v19  ;;  %v15112_v14 = vld [vmem:[#allocation57_spill] sm:$0xff] }
 0x55b   : > { %v7850_v34 = vsel %vm1250_vm3, %v13192_v37, %v13290_v33  ;;  %9561 = vmatmul.msk.bf16.gmra.mxu0 %vm5694_vm8, %v5693_v1  ;;  %v8195_v37 = vsel %vm1735_vm5, %v8193_v27, %v8194_v15  ;;  %v15114_v5 = vrot.slane %v12946_v3, 2  ;;  %v7096_v40 = vrot.slane %v13032_v24, 1 }
 0x55c   : > { %9810 = vmatmul.msk.bf16.gmra.mxu2 %vm5694_vm8, %v7850_v34  ;;  %v4887_v52 = vadd.f32 %v13159_v59, %v4598_v0  ;;  %v7446_v38 = vadd.f32 %v15106_v51, %v7238_v48  ;;  %v15110_v34 = vld [vmem:[#allocation13_spill] sm:$0xff]  ;;  %v15135_v3 = vrot.slane %v13069_v39, 1 }
 0x55d   : > { %v15111_v0 = vld [vmem:[#allocation5_spill] sm:$0xff] }
 0x55e   : > { %v4939_v16 = vadd.f32 %v13215_v57, %v4887_v52  ;;  %8268 = vrot.lane.b32.xlu2 %v8195_v37, %s10029_s21  ;;  %v7302_v57 = vrot.slane %v12996_v58, 2  ;;  %v8089_v27 = vadd.f32 %v15111_v0, %v7446_v38  ;;  %v15113_v58 = vrot.slane %v12890_v31, 1  ;;  %v13350_v51 = vpop.f32.mrf.mxu0 }
 0x55f   : > { %5155 = vrot.lane.b32.xlu0 %v12948_v36, %s10031_s11  ;;  %7167 = vrot.lane.b32.xlu1 %v7095_v23, %s10029_s21  ;;  %v15109_v36 = vld [vmem:[#allocation44_spill] sm:$0xff]  ;;  %15116 = vst [vmem:[#allocation148_spill] sm:$0xff] %v13350_v51  ;;  %v8196_v38 = vrot.slane %v13284_v21, 1 }
 0x560   : > { %v4987_v59 = vmax.f32 %v4939_v16, 0.0  ;;  %v13325_v9 = vpop.permute.xlu2 %7157  ;;  %v6132_v19 = vadd.f32 %v15110_v34, %v15109_v36  ;;  %v13341_v52 = vpop.f32.mrf.mxu1  ;;  %v5993_v37 = vsel %vm1735_vm5, %v15113_v58, %v5992_v54  ;;  %v7303_v48 = vsel %vm2025_vm6, %v15114_v5, %v7302_v57  ;;  %v15115_v16 = vld [vmem:[#allocation75_spill] sm:$0xff]  ;;  %v15117_v54 = vld [vmem:[#allocation18_spill] sm:$0xff]  ;;  %v15118_v57 = vld [vmem:[#allocation52_spill] sm:$0xff] }
 0x561   : > { %15108 = vst [vmem:[#allocation87_spill] sm:$0xff] %v13325_v9  ;;  %v13329_v60 = vpop.permute.xlu1 %7155  ;;  %v5144_v1 = vpop.permute.xlu0 %5143  ;;  %v8345_v23 = vadd.f32 %v15115_v16, %v8089_v27  ;;  %v7304_v5 = vrot.slane %v13032_v24, 2  ;;  %v15121_v27 = vld [vmem:[#allocation21_spill] sm:$0xff] }
 0x562   : > { %v13331_v30 = vpack.c.bf16 %v4987_v59, %v4987_v59  ;;  %5219 = vst.msk [vmem:[%s10242_s20 + $0x54] sm:$0xf] %vm5197_vm9, %v5144_v1  ;;  %v6340_v47 = vadd.f32 %v15112_v14, %v6132_v19  ;;  %v8404_v59 = vrot.slane %v13284_v21, 2  ;;  %v13365_v14 = vpop.f32.mrf.mxu2  ;;  %v15136_v9 = vld [vmem:[#allocation65_spill] sm:$0xff] }
 0x563   : > { %v8553_v1 = vadd.f32 %v15117_v54, %v8345_v23  ;;  %v8197_v23 = vsel %vm1735_vm5, %v8194_v15, %v8196_v38 }
 0x564   : > { %5292 = vst.msk [vmem:[#allocation4 + $0xc8] sm:$0xf] %vm289_vm7, %v13331_v30  ;;  %v6983_v34 = vadd.f32 %v15118_v57, %v6340_v47 }
 0x565   : > { %v8589_v47 = vadd.f32 %v13236_v41, %v8553_v1 }
 0x566   : > { %6064 = vrot.lane.b32.xlu2 %v5993_v37, %s10029_s21 }
 0x567   : > { %7375 = vrot.lane.b32.xlu0 %v7303_v48, %s10030_s22  ;;  %5157 = vrot.lane.b32.xlu1 %v13056_v26, %s10031_s11  ;;  %v15119_v26 = vld [vmem:[#allocation72_spill] sm:$0xff]  ;;  %v15120_v48 = vrot.slane %v13230_v11, 2 }
 0x568   : > { %v5148_v36 = vpop.permute.xlu2 %5147  ;;  %v7239_v21 = vadd.f32 %v15119_v26, %v6983_v34  ;;  %v15122_v34 = vrot.slane %v13069_v39, 2  ;;  %v13383_v1 = vpop.f32.mrf.mxu1 }
 0x569   : > { %5221 = vst.msk [vmem:[%s10242_s20 + $0x5c] sm:$0xf] %vm5197_vm9, %v5148_v36  ;;  %v5146_v19 = vpop.permute.xlu1 %5145  ;;  %v13362_v0 = vpop.permute.xlu0 %7363  ;;  %v8405_v16 = vsel %vm2025_vm6, %v15120_v48, %v8404_v59  ;;  %v8621_v48 = vmax.f32 %v8589_v47, 0.0 }
 0x56a   : > { %5220 = vst.msk [vmem:[%s10242_s20 + $0x58] sm:$0xf] %vm5197_vm9, %v5146_v19  ;;  %v7306_v26 = vsel %vm2025_vm6, %v7304_v5, %v15122_v34 }
 0x56b   : > { %9562 = vmatmul.msk.bf16.gmra.mxu0 %vm5694_vm8, %v5692_v25  ;;  %v9966_v58 = vld [vmem:[#allocation4 + $0xc4] sm:$0xff]  ;;  %v7447_v25 = vadd.f32 %v15121_v27, %v7239_v21  ;;  %v8685_v55 = vpack.c.bf16 %v8621_v48, %v8621_v48 }
 0x56c   : > { %v9990_v37 = vld [vmem:[#allocation4 + $0xc8] sm:$0xff]  ;;  %v6754_v54 = vshrl.u32 %v9966_v58, 16  ;;  %v6757_v36 = vshll.u32 %v9966_v58, 16 }
 0x56d   : > { %v7852_v57 = vshrl.u32 %v9990_v37, 16  ;;  %v7855_v19 = vshll.u32 %v9990_v37, 16  ;;  %v13386_v37 = vpop.f32.mrf.mxu0 }
 0x56e   : > { %8478 = vrot.lane.b32.xlu2 %v8405_v16, %s10030_s22  ;;  %v6756_v59 = vrot.slane %v6754_v54, 3  ;;  %v6759_v15 = vrot.slane %v6757_v36, 4  ;;  %15123 = vst [vmem:[#allocation90_spill] sm:$0xff] %v13386_v37  ;;  %v14642_v54 = vrot.slane %v13365_v14, 1  ;;  %v13400_v36 = vpop.f32.mrf.mxu2 }
 0x56f   : > { %8270 = vrot.lane.b32.xlu0 %v8197_v23, %s10029_s21  ;;  %7377 = vrot.lane.b32.xlu1 %v7306_v26, %s10030_s22  ;;  %v7854_v38 = vrot.slane %v7852_v57, 3  ;;  %v7857_v58 = vrot.slane %v7855_v19, 4  ;;  %v15126_v57 = vld [vmem:[#allocation85_spill] sm:$0xff]  ;;  %v15127_v19 = vld [vmem:[#allocation64_spill] sm:$0xff] }
 0x570   : > { %v13388_v27 = vpop.permute.xlu2 %7367  ;;  %v13395_v23 = vor.u32 %v6759_v15, %v6756_v59  ;;  %v6202_v47 = vrot.slane %v15126_v57, 2  ;;  %v8090_v26 = vadd.f32 %v15127_v19, %v7447_v25  ;;  %v9967_v15 = vld [vmem:[#allocation4 + $0xcc] sm:$0xff]  ;;  %v15128_v25 = vrot.slane %v12999_v8, 2 }
 0x571   : > { %15124 = vst [vmem:[#allocation26_spill] sm:$0xff] %v13388_v27  ;;  %v13391_v16 = vpop.permute.xlu1 %7365  ;;  %v13393_v5 = vpop.permute.xlu0 %8258  ;;  %v13397_v34 = vor.u32 %v7857_v58, %v7854_v38  ;;  %v9991_v38 = vld [vmem:[#allocation4 + $0xd0] sm:$0xff] }
 0x572   : > { %15125 = vst [vmem:[#allocation100_spill] sm:$0xff] %v13391_v16  ;;  %v6761_v21 = vsel %vm1250_vm3, %v13185_v44, %v13395_v23  ;;  %v8346_v58 = vadd.f32 %v13131_v29, %v8090_v26  ;;  %v6204_v48 = vsel %vm2025_vm6, %v6202_v47, %v15128_v25  ;;  %v8200_v44 = vsel %vm1735_vm5, %v8198_v42, %v14642_v54  ;;  %v15129_v25 = vld [vmem:[#allocation92_spill] sm:$0xff]  ;;  %v15132_v54 = vld [vmem:[#allocation45_spill] sm:$0xff] }
 0x573   : > { %v7859_v59 = vsel %vm1250_vm3, %v13290_v33, %v13397_v34  ;;  %9686 = vmatmul.msk.bf16.gmra.mxu1 %vm5694_vm8, %v6761_v21  ;;  %v6763_v29 = vshrl.u32 %v9967_v15, 16  ;;  %v6766_v21 = vshll.u32 %v9967_v15, 16  ;;  %v7861_v19 = vshrl.u32 %v9991_v38, 16  ;;  %v15133_v15 = vld [vmem:[#allocation60_spill] sm:$0xff] }
 0x574   : > { %9811 = vmatmul.msk.bf16.gmra.mxu2 %vm5694_vm8, %v7859_v59  ;;  %v7864_v26 = vshll.u32 %v9991_v38, 16  ;;  %v5995_v59 = vrot.slane %v12999_v8, 1  ;;  %v5997_v42 = vrot.slane %v13042_v13, 1  ;;  %v6133_v37 = vadd.f32 %v15133_v15, %v15132_v54 }
 0x575   : > { %v5994_v38 = vrot.slane %v15126_v57, 1  ;;  %v7863_v63 = vrot.slane %v7861_v19, 3  ;;  %v7098_v16 = vsel %vm1735_vm5, %v7096_v40, %v15135_v3 }
 0x576   : > { %6274 = vrot.lane.b32.xlu2 %v6204_v48, %s10030_s22  ;;  %v8554_v48 = vadd.f32 %v15129_v25, %v8346_v58  ;;  %v13441_v47 = vpop.f32.mrf.mxu2  ;;  %v6765_v58 = vrot.slane %v6763_v29, 3  ;;  %v6768_v25 = vrot.slane %v6766_v21, 4  ;;  %v7866_v51 = vrot.slane %v7864_v26, 4 }
 0x577   : > { %8750 = vrot.lane.b32.xlu0 %v8685_v55, %s10032_s23  ;;  %8272 = vrot.lane.b32.xlu1 %v8200_v44, %s10029_s21  ;;  %v13433_v55 = vpop.f32.mrf.mxu1  ;;  %v13435_v44 = vpop.f32.mrf.mxu0  ;;  %15134 = vst [vmem:[#allocation154_spill] sm:$0xff] %v13441_v47  ;;  %v6341_v54 = vadd.f32 %v15136_v9, %v6133_v37  ;;  %v5998_v15 = vsel %vm1735_vm5, %v5995_v59, %v5997_v42  ;;  %v8407_v26 = vrot.slane %v13365_v14, 2  ;;  %v15137_v9 = vld [vmem:[#allocation49_spill] sm:$0xff]  ;;  %v15138_v42 = vld [vmem:[#allocation80_spill] sm:$0xff] }
 0x578   : > { %v13423_v33 = vpop.permute.xlu2 %8262  ;;  %15131 = vst [vmem:[#allocation136_spill] sm:$0xff] %v13435_v44  ;;  %v5996_v44 = vsel %vm1735_vm5, %v5994_v38, %v5995_v59  ;;  %v6769_v21 = vor.u32 %v6768_v25, %v6765_v58  ;;  %v7867_v19 = vor.u32 %v7866_v51, %v7863_v63  ;;  %v8406_v59 = vrot.slane %v13323_v53, 2 }
 0x579   : > { %v13428_v31 = vpop.permute.xlu1 %8260  ;;  %v13430_v27 = vpop.permute.xlu0 %6054  ;;  %v6984_v37 = vadd.f32 %v15137_v9, %v6341_v54 }
 0x57a   : > { %15130 = vst [vmem:[#allocation58_spill] sm:$0xff] %v13430_v27  ;;  %v8590_v27 = vadd.f32 %v13236_v41, %v8554_v48  ;;  %v6770_v63 = vsel %vm1250_vm3, %v13395_v23, %v6769_v21  ;;  %v7868_v51 = vsel %vm1250_vm3, %v13397_v34, %v7867_v19  ;;  %v8408_v58 = vsel %vm2025_vm6, %v8406_v59, %v8407_v26  ;;  %v15142_v23 = vld [vmem:[#allocation14_spill] sm:$0xff] }
 0x57c   : > { %v8622_v48 = vmax.f32 %v8590_v27, 0.0 }
 0x57e   : > { %7169 = vrot.lane.b32.xlu2 %v7098_v16, %s10029_s21  ;;  %v9992_v16 = vld [vmem:[#allocation4 + $0xd8] sm:$0xff]  ;;  %v8686_v27 = vpack.c.bf16 %v8622_v48, %v8622_v48  ;;  %v13474_v25 = vpop.f32.mrf.mxu2 }
 0x57f   : > { %6066 = vrot.lane.b32.xlu0 %v5996_v44, %s10029_s21  ;;  %6068 = vrot.lane.b32.xlu1 %v5998_v15, %s10029_s21  ;;  %v7240_v44 = vadd.f32 %v15138_v42, %v6984_v37  ;;  %v13463_v38 = vpop.f32.mrf.mxu1  ;;  %v13465_v15 = vpop.f32.mrf.mxu0  ;;  %15141 = vst [vmem:[#allocation141_spill] sm:$0xff] %v13474_v25  ;;  %v7870_v54 = vshrl.u32 %v9992_v16, 16  ;;  %v7873_v9 = vshll.u32 %v9992_v16, 16  ;;  %v6205_v37 = vrot.slane %v13042_v13, 2 }
 0x580   : > { %v13453_v29 = vpop.permute.xlu2 %6058  ;;  %15139 = vst [vmem:[#allocation95_spill] sm:$0xff] %v13463_v38  ;;  %v7307_v42 = vrot.slane %v13097_v22, 2  ;;  %v15146_v13 = vrot.slane %v12999_v8, 2 }
 0x581   : > { %v13456_v3 = vpop.permute.xlu1 %6056  ;;  %v13458_v40 = vpop.permute.xlu0 %8468  ;;  %15140 = vst [vmem:[#allocation29_spill] sm:$0xff] %v13465_v15  ;;  %v7448_v34 = vadd.f32 %v15142_v23, %v7240_v44  ;;  %v15143_v15 = vld [vmem:[#allocation61_spill] sm:$0xff]  ;;  %v15145_v44 = vrot.slane %v13069_v39, 2 }
 0x582   : > { %v6206_v23 = vsel %vm2025_vm6, %v15146_v13, %v6205_v37  ;;  %v8201_v37 = vrot.slane %v13400_v36, 1 }
 0x583   : > { %9687 = vmatmul.msk.bf16.gmra.mxu1 %vm5694_vm8, %v6770_v63  ;;  %v8091_v16 = vadd.f32 %v15143_v15, %v7448_v34 }
 0x584   : > { %9812 = vmatmul.msk.bf16.gmra.mxu2 %vm5694_vm8, %v7868_v51  ;;  %v7872_v51 = vrot.slane %v7870_v54, 3 }
 0x585   : > { %v8347_v53 = vadd.f32 %v13163_v35, %v8091_v16 }
 0x586   : > { %5159 = vrot.lane.b32.xlu2 %v13125_v28, %s10031_s11  ;;  %v8409_v28 = vrot.slane %v13400_v36, 2 }
 0x587   : > { %8480 = vrot.lane.b32.xlu0 %v8408_v58, %s10030_s22  ;;  %8752 = vrot.lane.b32.xlu1 %v8686_v27, %s10032_s23  ;;  %v7875_v58 = vrot.slane %v7873_v9, 4  ;;  %v13491_v38 = vpop.f32.mrf.mxu0  ;;  %v7308_v27 = vsel %vm2025_vm6, %v15145_v44, %v7307_v42  ;;  %v13500_v57 = vpop.f32.mrf.mxu1  ;;  %v8555_v34 = vadd.f32 %v13195_v43, %v8347_v53  ;;  %v7099_v42 = vrot.slane %v13097_v22, 1 }
 0x588   : > { %v13481_v48 = vpop.permute.xlu2 %8472  ;;  %15144 = vst [vmem:[#allocation108_spill] sm:$0xff] %v13491_v38  ;;  %v8410_v54 = vsel %vm2025_vm6, %v8407_v26, %v8409_v28  ;;  %v13506_v9 = vpop.f32.mrf.mxu2  ;;  %v14652_v44 = vrot.slane %v13104_v49, 2  ;;  %v15148_v22 = vrot.slane %v13365_v14, 1  ;;  %v15149_v53 = vrot.slane %v13069_v39, 1 }
 0x589   : > { %v13485_v59 = vpop.permute.xlu1 %8470  ;;  %v13487_v63 = vpop.permute.xlu0 %6264  ;;  %15147 = vst [vmem:[#allocation28_spill] sm:$0xff] %v13500_v57  ;;  %v7876_v15 = vor.u32 %v7875_v58, %v7872_v51  ;;  %v6207_v51 = vrot.slane %v13077_v20, 2  ;;  %v8591_v58 = vadd.f32 %v13236_v41, %v8555_v34 }
 0x58a   : > { %v8202_v43 = vsel %vm1735_vm5, %v15148_v22, %v8201_v37  ;;  %v7100_v36 = vsel %vm1735_vm5, %v15149_v53, %v7099_v42  ;;  %v15153_v37 = vld [vmem:[#allocation7_spill] sm:$0xff]  ;;  %v15157_v53 = vld [vmem:[#allocation17_spill] sm:$0xff] }
 0x58b   : > { %v7877_v28 = vsel %vm1250_vm3, %v7867_v19, %v7876_v15  ;;  %v6209_v19 = vsel %vm2025_vm6, %v6207_v51, %v14652_v44  ;;  %v8623_v13 = vmax.f32 %v8591_v58, 0.0  ;;  %v15156_v51 = vld [vmem:[#allocation53_spill] sm:$0xff] }
 0x58c   : > { %v6134_v58 = vadd.f32 %v15157_v53, %v15156_v51  ;;  %v15160_v51 = vld [vmem:[#allocation66_spill] sm:$0xff] }
 0x58e   : > { %7379 = vrot.lane.b32.xlu2 %v7308_v27, %s10030_s22  ;;  %v6342_v53 = vadd.f32 %v15160_v51, %v6134_v58  ;;  %v15164_v58 = vld [vmem:[#allocation56_spill] sm:$0xff] }
 0x58f   : > { %6276 = vrot.lane.b32.xlu0 %v6206_v23, %s10030_s22  ;;  %8482 = vrot.lane.b32.xlu1 %v8410_v54, %s10030_s22  ;;  %v13529_v27 = vpop.f32.mrf.mxu0  ;;  %v13537_v23 = vpop.f32.mrf.mxu1 }
 0x590   : > { %v13511_v35 = vpop.permute.xlu2 %6268  ;;  %15150 = vst [vmem:[#allocation101_spill] sm:$0xff] %v13529_v27  ;;  %v7310_v27 = vrot.slane %v13167_v7, 2  ;;  %v6985_v51 = vadd.f32 %v15164_v58, %v6342_v53  ;;  %v15170_v58 = vld [vmem:[#allocation63_spill] sm:$0xff] }
 0x591   : > { %v13513_v16 = vpop.permute.xlu1 %6266  ;;  %v13516_v26 = vpop.permute.xlu0 %7159  ;;  %15151 = vst [vmem:[#allocation31_spill] sm:$0xff] %v13537_v23 }
 0x593   : > { %9688 = vmatmul.msk.bf16.gmra.mxu1 %vm5694_vm8, %v6769_v21  ;;  %v14656_v21 = vrot.slane %v13167_v7, 1 }
 0x594   : > { %9813 = vmatmul.msk.bf16.gmra.mxu2 %vm5694_vm8, %v7877_v28  ;;  %v15154_v28 = vld [vmem:[#allocation20_spill] sm:$0xff] }
 0x595   : > { %v6135_v22 = vadd.f32 %v15154_v28, %v15153_v37 }
 0x596   : > { %8274 = vrot.lane.b32.xlu2 %v8202_v43, %s10029_s21  ;;  %v13546_v43 = vpop.f32.mrf.mxu2 }
 0x597   : > { %7171 = vrot.lane.b32.xlu0 %v7100_v36, %s10029_s21  ;;  %6278 = vrot.lane.b32.xlu1 %v6209_v19, %s10030_s22  ;;  %15155 = vst [vmem:[#allocation137_spill] sm:$0xff] %v13546_v43  ;;  %v7101_v36 = vrot.slane %v13138_v10, 1  ;;  %v8687_v19 = vpack.c.bf16 %v8623_v13, %v8623_v13  ;;  %v13553_v44 = vpop.f32.mrf.mxu0  ;;  %v6000_v13 = vrot.slane %v13104_v49, 1  ;;  %v13566_v38 = vpop.f32.mrf.mxu1 }
 0x598   : > { %v13539_v54 = vpop.permute.xlu2 %7163  ;;  %15158 = vst [vmem:[#allocation94_spill] sm:$0xff] %v13553_v44 }
 0x599   : > { %v13541_v34 = vpop.permute.xlu1 %7161  ;;  %v5150_v42 = vpop.permute.xlu0 %5149  ;;  %v7103_v37 = vsel %vm1735_vm5, %v7101_v36, %v14656_v21  ;;  %15161 = vst [vmem:[#allocation103_spill] sm:$0xff] %v13566_v38 }
 0x59a   : > { %15152 = vst [vmem:[#allocation62_spill] sm:$0xff] %v13541_v34 }
 0x59b   : > { %5222 = vst.msk [vmem:[%s10242_s20 + $0x60] sm:$0xf] %vm5197_vm9, %v5150_v42  ;;  %v15159_v42 = vld [vmem:[#allocation23_spill] sm:$0xff] }
 0x59c   : > { %v6343_v28 = vadd.f32 %v15159_v42, %v6135_v22  ;;  %v7309_v22 = vrot.slane %v13138_v10, 2  ;;  %v15163_v42 = vld [vmem:[#allocation41_spill] sm:$0xff] }
 0x59e   : > { %8754 = vrot.lane.b32.xlu2 %v8687_v19, %s10032_s23  ;;  %v13579_v34 = vpop.f32.mrf.mxu2 }
 0x59f   : > { %5161 = vrot.lane.b32.xlu0 %v13241_v50, %s10031_s11  ;;  %7173 = vrot.lane.b32.xlu1 %v7103_v37, %s10029_s21  ;;  %v5999_v50 = vrot.slane %v13077_v20, 1  ;;  %v6986_v37 = vadd.f32 %v15163_v42, %v6343_v28  ;;  %v15166_v28 = vld [vmem:[#allocation130_spill] sm:$0xff]  ;;  %v13591_v42 = vpop.f32.mrf.mxu0 }
 0x5a0   : > { %v5154_v44 = vpop.permute.xlu2 %5153  ;;  %15168 = vst [vmem:[#allocation139_spill] sm:$0xff] %v13591_v42 }
 0x5a1   : > { %v5152_v19 = vpop.permute.xlu1 %5151  ;;  %5224 = vst.msk [vmem:[%s10242_s20 + $0x68] sm:$0xf] %vm5197_vm9, %v5154_v44  ;;  %v13570_v36 = vpop.permute.xlu0 %7369  ;;  %v7242_v21 = vadd.f32 %v13049_v56, %v6986_v37  ;;  %v6001_v38 = vsel %vm1735_vm5, %v5999_v50, %v6000_v13  ;;  %v7311_v44 = vsel %vm2025_vm6, %v7309_v22, %v7310_v27  ;;  %v15167_v56 = vld [vmem:[#allocation93_spill] sm:$0xff]  ;;  %v8204_v50 = vrot.slane %v13474_v25, 1 }
 0x5a2   : > { %15162 = vst [vmem:[#allocation109_spill] sm:$0xff] %v13570_v36  ;;  %v15165_v36 = vld [vmem:[#allocation89_spill] sm:$0xff]  ;;  %v14663_v22 = vrot.slane %v13474_v25, 2  ;;  %v13600_v37 = vpop.f32.mrf.mxu1 }
 0x5a3   : > { %5223 = vst.msk [vmem:[%s10242_s20 + $0x64] sm:$0xf] %vm5197_vm9, %v5152_v19  ;;  %v7241_v57 = vadd.f32 %v15165_v36, %v6985_v51  ;;  %v7450_v19 = vadd.f32 %v15166_v28, %v7242_v21 }
 0x5a4   : > { %9814 = vmatmul.msk.bf16.gmra.mxu2 %vm5694_vm8, %v7876_v15  ;;  %15169 = vst [vmem:[#allocation149_spill] sm:$0xff] %v13600_v37 }
 0x5a5   : > { %v7449_v53 = vadd.f32 %v15167_v56, %v7241_v57  ;;  %v8411_v57 = vrot.slane %v13441_v47, 2  ;;  %v8093_v51 = vadd.f32 %v15170_v58, %v7450_v19  ;;  %v15172_v19 = vld [vmem:[#allocation27_spill] sm:$0xff] }
 0x5a6   : > { %6070 = vrot.lane.b32.xlu2 %v6001_v38, %s10029_s21  ;;  %v7312_v38 = vrot.slane %v13222_v32, 2  ;;  %v6210_v58 = vrot.slane %v15172_v19, 2 }
 0x5a7   : > { %7381 = vrot.lane.b32.xlu0 %v7311_v44, %s10030_s22  ;;  %5163 = vrot.lane.b32.xlu1 %v13331_v30, %s10031_s11  ;;  %v8203_v30 = vrot.slane %v13441_v47, 1  ;;  %v15171_v44 = vld [vmem:[#allocation12_spill] sm:$0xff]  ;;  %v8349_v56 = vadd.f32 %v13393_v5, %v8093_v51  ;;  %v8413_v42 = vsel %vm2025_vm6, %v8411_v57, %v14663_v22  ;;  %v6005_v22 = vrot.slane %v13239_v61, 1 }
 0x5a8   : > { %v13595_v15 = vpop.permute.xlu2 %7373  ;;  %v8092_v28 = vadd.f32 %v15171_v44, %v7449_v53  ;;  %v7313_v47 = vsel %vm2025_vm6, %v7310_v27, %v7312_v38  ;;  %v6002_v53 = vrot.slane %v15172_v19, 1  ;;  %v13629_v27 = vpop.f32.mrf.mxu0  ;;  %v15175_v38 = vrot.slane %v13104_v49, 2 }
 0x5a9   : > { %v13597_v36 = vpop.permute.xlu1 %7371  ;;  %v13602_v21 = vpop.permute.xlu0 %8264  ;;  %v8205_v23 = vsel %vm1735_vm5, %v8203_v30, %v8204_v50  ;;  %v8557_v57 = vadd.f32 %v13271_v2, %v8349_v56  ;;  %15173 = vst [vmem:[#allocation151_spill] sm:$0xff] %v13629_v27  ;;  %v7104_v56 = vrot.slane %v13222_v32, 1  ;;  %v15180_v32 = vrot.slane %v13167_v7, 1  ;;  %v15183_v27 = vld [vmem:[#allocation11_spill] sm:$0xff] }
 0x5aa   : > { %v8348_v37 = vadd.f32 %v13190_v18, %v8092_v28  ;;  %v8206_v18 = vrot.slane %v13506_v9, 1  ;;  %v6211_v2 = vsel %vm2025_vm6, %v15175_v38, %v6210_v58 }
 0x5ac   : > { %v8556_v5 = vadd.f32 %v13275_v4, %v8348_v37  ;;  %v13632_v4 = vpop.f32.mrf.mxu1  ;;  %v6003_v37 = vsel %vm1735_vm5, %v6000_v13, %v6002_v53  ;;  %v8207_v44 = vsel %vm1735_vm5, %v8204_v50, %v8206_v18  ;;  %v15176_v13 = vld [vmem:[#allocation43_spill] sm:$0xff]  ;;  %v15177_v53 = vld [vmem:[#allocation76_spill] sm:$0xff] }
 0x5ad   : > { %15174 = vst [vmem:[#allocation104_spill] sm:$0xff] %v13632_v4  ;;  %v6136_v38 = vadd.f32 %v15177_v53, %v15176_v13  ;;  %v8414_v13 = vrot.slane %v13506_v9, 2 }
 0x5ae   : > { %8484 = vrot.lane.b32.xlu2 %v8413_v42, %s10030_s22  ;;  %v8593_v42 = vadd.f32 %v13236_v41, %v8557_v57 }
 0x5af   : > { %8276 = vrot.lane.b32.xlu0 %v8205_v23, %s10029_s21  ;;  %7383 = vrot.lane.b32.xlu1 %v7313_v47, %s10030_s22  ;;  %v8592_v47 = vadd.f32 %v13236_v41, %v8556_v5 }
 0x5b0   : > { %v8749_v30 = vpop.permute.xlu2 %8748  ;;  %v8625_v5 = vmax.f32 %v8593_v42, 0.0  ;;  %v13656_v18 = vpop.f32.mrf.mxu0  ;;  %v15181_v42 = vld [vmem:[#allocation86_spill] sm:$0xff] }
 0x5b1   : > { %v13622_v51 = vpop.permute.xlu1 %8266  ;;  %8845 = vst.msk [vmem:[%s10242_s20] sm:$0xf] %vm8844_vm10, %v8749_v30  ;;  %v13627_v23 = vpop.permute.xlu0 %6060  ;;  %v8624_v28 = vmax.f32 %v8592_v47, 0.0  ;;  %v7105_v47 = vsel %vm1735_vm5, %v15180_v32, %v7104_v56 }
 0x5b2   : > { %v13648_v30 = vpop.f32.mrf.mxu2  ;;  %v8689_v50 = vpack.c.bf16 %v8625_v5, %v8625_v5  ;;  %15179 = vst [vmem:[#allocation97_spill] sm:$0xff] %v13656_v18  ;;  %v15185_v18 = vrot.slane %v13474_v25, 2 }
 0x5b6   : > { %6280 = vrot.lane.b32.xlu2 %v6211_v2, %s10030_s22  ;;  %v8688_v2 = vpack.c.bf16 %v8624_v28, %v8624_v28  ;;  %v14668_v28 = vrot.slane %v13308_v6, 2 }
 0x5b7   : > { %6072 = vrot.lane.b32.xlu0 %v6003_v37, %s10029_s21  ;;  %8278 = vrot.lane.b32.xlu1 %v8207_v44, %s10029_s21  ;;  %v13654_v37 = vpop.f32.mrf.mxu1  ;;  %v6344_v44 = vadd.f32 %v15181_v42, %v6136_v38  ;;  %v7314_v38 = vrot.slane %v13269_v46, 2 }
 0x5b8   : > { %v13644_v19 = vpop.permute.xlu2 %8268  ;;  %15178 = vst [vmem:[#allocation110_spill] sm:$0xff] %v13654_v37 }
 0x5b9   : > { %v13646_v57 = vpop.permute.xlu1 %6062  ;;  %v13650_v58 = vpop.permute.xlu0 %8474  ;;  %v6987_v56 = vadd.f32 %v15183_v27, %v6344_v44  ;;  %v7316_v42 = vsel %vm2025_vm6, %v7314_v38, %v14668_v28  ;;  %v8415_v27 = vsel %vm2025_vm6, %v15185_v18, %v8414_v13  ;;  %v14675_v38 = vrot.slane %v13579_v34, 1 }
 0x5bb   : > { %v7243_v9 = vadd.f32 %v13273_v45, %v6987_v56  ;;  %v15187_v45 = vld [vmem:[#allocation131_spill] sm:$0xff] }
 0x5bd   : > { %v7451_v56 = vadd.f32 %v15187_v45, %v7243_v9  ;;  %v15189_v9 = vld [vmem:[#allocation96_spill] sm:$0xff] }
 0x5be   : > { %7175 = vrot.lane.b32.xlu2 %v7105_v47, %s10029_s21  ;;  %v13677_v47 = vpop.f32.mrf.mxu2 }
 0x5bf   : > { %8756 = vrot.lane.b32.xlu0 %v8688_v2, %s10032_s23  ;;  %8758 = vrot.lane.b32.xlu1 %v8689_v50, %s10032_s23  ;;  %v6004_v2 = vrot.slane %v13177_v12, 1  ;;  %v13680_v50 = vpop.f32.mrf.mxu0  ;;  %v13688_v44 = vpop.f32.mrf.mxu1 }
 0x5c0   : > { %v13667_v53 = vpop.permute.xlu2 %6064  ;;  %15184 = vst [vmem:[#allocation33_spill] sm:$0xff] %v13680_v50  ;;  %v6213_v50 = vrot.slane %v13239_v61, 2 }
 0x5c1   : > { %v13669_v5 = vpop.permute.xlu1 %8476  ;;  %v13673_v32 = vpop.permute.xlu0 %6270  ;;  %15186 = vst [vmem:[#allocation67_spill] sm:$0xff] %v13688_v44  ;;  %v6006_v37 = vsel %vm1735_vm5, %v6004_v2, %v6005_v22  ;;  %v8208_v2 = vrot.slane %v13546_v43, 1  ;;  %v15190_v44 = vld [vmem:[#allocation69_spill] sm:$0xff] }
 0x5c2   : > { %15182 = vst [vmem:[#allocation156_spill] sm:$0xff] %v13669_v5  ;;  %v8094_v61 = vadd.f32 %v15190_v44, %v7451_v56 }
 0x5c3   : > { %v8210_v49 = vsel %vm1735_vm5, %v8208_v2, %v14675_v38 }
 0x5c4   : > { %v8350_v5 = vadd.f32 %v13428_v31, %v8094_v61  ;;  %v7107_v31 = vrot.slane %v13308_v6, 1  ;;  %v6007_v61 = vrot.slane %v13279_v17, 1 }
 0x5c6   : > { %7385 = vrot.lane.b32.xlu2 %v7316_v42, %s10030_s22  ;;  %v6212_v42 = vrot.slane %v13177_v12, 2  ;;  %v13714_v18 = vpop.f32.mrf.mxu2 }
 0x5c7   : > { %8486 = vrot.lane.b32.xlu0 %v8415_v27, %s10030_s22  ;;  %6074 = vrot.lane.b32.xlu1 %v6006_v37, %s10029_s21  ;;  %v8416_v37 = vrot.slane %v13546_v43, 2  ;;  %v15188_v27 = vld [vmem:[#allocation6_spill] sm:$0xff]  ;;  %v13717_v12 = vpop.f32.mrf.mxu1  ;;  %v13724_v56 = vpop.f32.mrf.mxu0 }
 0x5c8   : > { %v13697_v28 = vpop.permute.xlu2 %8478  ;;  %v6137_v45 = vadd.f32 %v15189_v9, %v15188_v27  ;;  %v6214_v25 = vsel %vm2025_vm6, %v6212_v42, %v6213_v50  ;;  %15191 = vst [vmem:[#allocation144_spill] sm:$0xff] %v13717_v12  ;;  %v15192_v27 = vrot.slane %v13579_v34, 2  ;;  %v15194_v42 = vld [vmem:[#allocation22_spill] sm:$0xff]  ;;  %v8558_v9 = vadd.f32 %v13458_v40, %v8350_v5 }
 0x5c9   : > { %v13699_v4 = vpop.permute.xlu1 %6272  ;;  %v13702_v13 = vpop.permute.xlu0 %7165  ;;  %15193 = vst [vmem:[#allocation152_spill] sm:$0xff] %v13724_v56  ;;  %v6008_v56 = vsel %vm1735_vm5, %v6005_v22, %v6007_v61  ;;  %v15197_v61 = vld [vmem:[#allocation79_spill] sm:$0xff] }
 0x5ca   : > { %v8418_v44 = vsel %vm2025_vm6, %v8416_v37, %v15192_v27  ;;  %v6345_v2 = vadd.f32 %v15194_v42, %v6137_v45  ;;  %v7106_v37 = vrot.slane %v13269_v46, 1  ;;  %v15195_v27 = vld [vmem:[#allocation8_spill] sm:$0xff]  ;;  %v15196_v45 = vld [vmem:[#allocation55_spill] sm:$0xff]  ;;  %v8594_v5 = vadd.f32 %v13236_v41, %v8558_v9 }
 0x5cc   : > { %v6988_v40 = vadd.f32 %v15196_v45, %v6345_v2  ;;  %v7108_v43 = vsel %vm1735_vm5, %v7106_v37, %v7107_v31  ;;  %v8626_v22 = vmax.f32 %v8594_v5, 0.0  ;;  %v15199_v45 = vld [vmem:[#allocation99_spill] sm:$0xff] }
 0x5ce   : > { %8280 = vrot.lane.b32.xlu2 %v8210_v49, %s10029_s21  ;;  %v13753_v2 = vpop.f32.mrf.mxu2 }
 0x5cf   : > { %6282 = vrot.lane.b32.xlu0 %v6214_v25, %s10030_s22  ;;  %8488 = vrot.lane.b32.xlu1 %v8418_v44, %s10030_s22  ;;  %v6215_v25 = vrot.slane %v13279_v17, 2  ;;  %v6141_v44 = vadd.f32 %v13456_v3, %v15195_v27  ;;  %v7244_v17 = vadd.f32 %v13329_v60, %v6988_v40  ;;  %v13756_v9 = vpop.f32.mrf.mxu1  ;;  %v6144_v60 = vadd.f32 %v13646_v57, %v12842_v62 }
 0x5d0   : > { %v13731_v38 = vpop.permute.xlu2 %6274  ;;  %v8690_v57 = vpack.c.bf16 %v8626_v22, %v8626_v22 }
 0x5d1   : > { %v13733_v49 = vpop.permute.xlu1 %7167  ;;  %v5156_v12 = vpop.permute.xlu0 %5155  ;;  %v6349_v42 = vadd.f32 %v13487_v63, %v6141_v44  ;;  %v6216_v3 = vsel %vm2025_vm6, %v6213_v50, %v6215_v25  ;;  %v7452_v63 = vadd.f32 %v13362_v0, %v7244_v17  ;;  %v7109_v25 = vrot.slane %v13341_v52, 1  ;;  %v15198_v0 = vld [vmem:[#allocation46_spill] sm:$0xff]  ;;  %v15200_v17 = vld [vmem:[#allocation83_spill] sm:$0xff] }
 0x5d2   : > { %5225 = vst.msk [vmem:[%s10242_s20 + $0x6c] sm:$0xf] %vm5197_vm9, %v5156_v12  ;;  %v6352_v27 = vadd.f32 %v13673_v32, %v6144_v60  ;;  %v6138_v40 = vadd.f32 %v15199_v45, %v15198_v0  ;;  %v15202_v60 = vld [vmem:[#allocation134_spill] sm:$0xff]  ;;  %v7320_v45 = vrot.slane %v13433_v55, 2 }
 0x5d3   : > { %v8095_v62 = vadd.f32 %v15200_v17, %v7452_v63 }
 0x5d4   : > { %v6995_v32 = vadd.f32 %v13032_v24, %v6352_v27  ;;  %v6346_v63 = vadd.f32 %v15202_v60, %v6138_v40  ;;  %v8419_v27 = vrot.slane %v13648_v30, 2 }
 0x5d6   : > { %6076 = vrot.lane.b32.xlu2 %v6008_v56, %s10029_s21  ;;  %v7317_v56 = vrot.slane %v13341_v52, 2  ;;  %v8351_v52 = vadd.f32 %v13423_v33, %v8095_v62  ;;  %v13792_v40 = vpop.f32.mrf.mxu2  ;;  %v7319_v62 = vrot.slane %v13383_v1, 2 }
 0x5d7   : > { %7177 = vrot.lane.b32.xlu0 %v7108_v43, %s10029_s21  ;;  %6284 = vrot.lane.b32.xlu1 %v6216_v3, %s10030_s22  ;;  %v6992_v43 = vadd.f32 %v15197_v61, %v6349_v42  ;;  %v15201_v42 = vrot.slane %v13308_v6, 2 }
 0x5d8   : > { %v13751_v12 = vpop.f32.mrf.mxu0  ;;  %v7170_v37 = vpop.permute.xlu2 %7169  ;;  %v8559_v22 = vadd.f32 %v13485_v59, %v8351_v52 }
 0x5d9   : > { %v5158_v50 = vpop.permute.xlu1 %5157  ;;  %v7376_v44 = vpop.permute.xlu0 %7375  ;;  %v7248_v5 = vadd.f32 %v13539_v54, %v6992_v43  ;;  %v7318_v61 = vsel %vm2025_vm6, %v15201_v42, %v7317_v56  ;;  %v7110_v54 = vsel %vm1735_vm5, %v7107_v31, %v7109_v25  ;;  %v15203_v56 = vld [vmem:[#allocation78_spill] sm:$0xff]  ;;  %v7251_v24 = vadd.f32 %v7170_v37, %v6995_v32  ;;  %v15205_v42 = vld [vmem:[#allocation87_spill] sm:$0xff] }
 0x5da   : > { %5226 = vst.msk [vmem:[%s10242_s20 + $0x70] sm:$0xf] %vm5197_vm9, %v5158_v50  ;;  %v6143_v33 = vadd.f32 %v13627_v23, %v15203_v56  ;;  %v13786_v43 = vpop.f32.mrf.mxu1  ;;  %v8211_v50 = vrot.slane %v13648_v30, 1  ;;  %v8595_v30 = vadd.f32 %v13236_v41, %v8559_v22  ;;  %v15207_v32 = vrot.slane %v13579_v34, 1 }
 0x5db   : > { %v7456_v3 = vadd.f32 %v13597_v36, %v7248_v5  ;;  %v15204_v5 = vld [vmem:[#allocation54_spill] sm:$0xff]  ;;  %v7321_v41 = vsel %vm2025_vm6, %v7319_v62, %v7320_v45 }
 0x5dc   : > { %v6989_v17 = vadd.f32 %v15204_v5, %v6346_v63  ;;  %v8627_v56 = vmax.f32 %v8595_v30, 0.0 }
 0x5dd   : > { %v8099_v25 = vadd.f32 %v13230_v11, %v7456_v3 }
 0x5de   : > { %8760 = vrot.lane.b32.xlu2 %v8690_v57, %s10032_s23  ;;  %v6351_v57 = vadd.f32 %v13511_v35, %v6143_v33  ;;  %v7245_v11 = vadd.f32 %v15205_v42, %v6989_v17  ;;  %v15208_v35 = vld [vmem:[#allocation100_spill] sm:$0xff]  ;;  %v15210_v33 = vld [vmem:[#allocation77_spill] sm:$0xff] }
 0x5df   : > { %7387 = vrot.lane.b32.xlu0 %v7318_v61, %s10030_s22  ;;  %7179 = vrot.lane.b32.xlu1 %v7110_v54, %s10029_s21  ;;  %v15206_v61 = vrot.slane %v13579_v34, 2  ;;  %v8212_v54 = vsel %vm1735_vm5, %v15207_v32, %v8211_v50  ;;  %v15211_v50 = vld [vmem:[#allocation148_spill] sm:$0xff]  ;;  %v8691_v32 = vpack.c.bf16 %v8627_v56, %v8627_v56 }
 0x5e0   : > { %v13781_v36 = vpop.f32.mrf.mxu0  ;;  %v5160_v0 = vpop.permute.xlu2 %5159  ;;  %v7453_v60 = vadd.f32 %v15208_v35, %v7245_v11  ;;  %v15214_v42 = vld [vmem:[#allocation88_spill] sm:$0xff]  ;;  %v15215_v11 = vld [vmem:[#allocation9_spill] sm:$0xff]  ;;  %v15217_v35 = vld [vmem:[#allocation82_spill] sm:$0xff] }
 0x5e1   : > { %v7378_v31 = vpop.permute.xlu1 %7377  ;;  %5227 = vst.msk [vmem:[%s10242_s20 + $0x74] sm:$0xf] %vm5197_vm9, %v5160_v0  ;;  %v8271_v23 = vpop.permute.xlu0 %8270  ;;  %v8420_v52 = vsel %vm2025_vm6, %v15206_v61, %v8419_v27  ;;  %v6218_v27 = vrot.slane %v15211_v50, 2 }
 0x5e2   : > { %v13796_v59 = vadd.f32 %v7378_v31, %v7251_v24  ;;  %v8355_v37 = vadd.f32 %v8271_v23, %v8099_v25  ;;  %v6994_v24 = vadd.f32 %v15210_v33, %v6351_v57  ;;  %v8214_v23 = vrot.slane %v13714_v18, 1  ;;  %v13827_v5 = vpop.f32.mrf.mxu1 }
 0x5e3   : > { %15212 = vst [vmem:[#allocation30_spill] sm:$0xff] %v13827_v5  ;;  %v8096_v30 = vadd.f32 %v15214_v42, %v7453_v60  ;;  %v8213_v57 = vrot.slane %v13677_v47, 1  ;;  %v15218_v60 = vld [vmem:[#allocation24_spill] sm:$0xff]  ;;  %v6010_v33 = vrot.slane %v15211_v50, 1 }
 0x5e4   : > { %v13804_v3 = vadd.f32 %v13697_v28, %v8355_v37  ;;  %v15209_v28 = vld [vmem:[#allocation59_spill] sm:$0xff]  ;;  %v7250_v17 = vadd.f32 %v13733_v49, %v6994_v24  ;;  %v7112_v24 = vrot.slane %v13433_v55, 1 }
 0x5e5   : > { %v6142_v63 = vadd.f32 %v13453_v29, %v15209_v28  ;;  %v15213_v37 = vld [vmem:[#allocation91_spill] sm:$0xff] }
 0x5e6   : > { %8490 = vrot.lane.b32.xlu2 %v8420_v52, %s10030_s22  ;;  %v6217_v62 = vrot.slane %v15213_v37, 2  ;;  %v13837_v52 = vpop.f32.mrf.mxu2 }
 0x5e7   : > { %8282 = vrot.lane.b32.xlu0 %v8212_v54, %s10029_s21  ;;  %7389 = vrot.lane.b32.xlu1 %v7321_v41, %s10030_s22  ;;  %v6350_v0 = vadd.f32 %v13513_v16, %v6142_v63  ;;  %v15216_v16 = vld [vmem:[#allocation150_spill] sm:$0xff]  ;;  %v7458_v54 = vadd.f32 %v7376_v44, %v7250_v17  ;;  %v8352_v41 = vadd.f32 %v13602_v21, %v8096_v30 }
 0x5e8   : > { %v5903_v22 = vpop.f32.mrf.mxu0  ;;  %v13824_v31 = vpop.permute.xlu2 %7379  ;;  %v6139_v61 = vadd.f32 %v15216_v16, %v15215_v11  ;;  %v6219_v28 = vsel %vm2025_vm6, %v6217_v62, %v6218_v27  ;;  %v15219_v62 = vld [vmem:[#allocation90_spill] sm:$0xff] }
 0x5e9   : > { %v8273_v25 = vpop.permute.xlu1 %8272  ;;  %v8751_v29 = vpop.permute.xlu0 %8750  ;;  %v6993_v49 = vadd.f32 %v15217_v35, %v6350_v0  ;;  %v8215_v22 = vsel %vm1735_vm5, %v8213_v57, %v8214_v23  ;;  %v8101_v56 = vadd.f32 %v13365_v14, %v7458_v54  ;;  %v8560_v0 = vadd.f32 %v13481_v48, %v8352_v41  ;;  %v15220_v30 = vld [vmem:[#allocation10_spill] sm:$0xff]  ;;  %v15221_v54 = vld [vmem:[#allocation85_spill] sm:$0xff] }
 0x5ea   : > { %8846 = vst.msk [vmem:[%s10242_s20 + $0x4] sm:$0xf] %vm8844_vm10, %v8751_v29  ;;  %v6347_v63 = vadd.f32 %v15218_v60, %v6139_v61  ;;  %v6012_v42 = vrot.slane %v15219_v62, 1  ;;  %v6009_v61 = vrot.slane %v15213_v37, 1  ;;  %v7111_v14 = vrot.slane %v13383_v1, 1 }
 0x5eb   : > { %v7249_v44 = vadd.f32 %v13702_v13, %v6993_v49  ;;  %v13870_v41 = vld [vmem:[%s14523_s6] ss:$0 sm:$0xff] }
 0x5ec   : > { %v6990_v11 = vadd.f32 %v15220_v30, %v6347_v63  ;;  %v6011_v63 = vsel %vm1735_vm5, %v6009_v61, %v6010_v33 }
 0x5ee   : > { %6286 = vrot.lane.b32.xlu2 %v6219_v28, %s10030_s22  ;;  %v13864_v49 = vpop.f32.mrf.mxu2  ;;  %v7246_v48 = vadd.f32 %v13516_v26, %v6990_v11  ;;  %v8596_v28 = vadd.f32 %v13870_v41, %v8560_v0  ;;  %v6013_v26 = vsel %vm1735_vm5, %v6010_v33, %v6012_v42  ;;  %v15224_v0 = vld [vmem:[#allocation95_spill] sm:$0xff]  ;;  %v8421_v33 = vrot.slane %v13677_v47, 2 }
 0x5ef   : > { %8762 = vrot.lane.b32.xlu0 %v8691_v32, %s10032_s23  ;;  %8284 = vrot.lane.b32.xlu1 %v8215_v22, %s10029_s21  ;;  %v7457_v32 = vadd.f32 %v13595_v15, %v7249_v44  ;;  %v7113_v15 = vsel %vm1735_vm5, %v7111_v14, %v7112_v24  ;;  %v15222_v22 = vld [vmem:[#allocation98_spill] sm:$0xff] }
 0x5f0   : > { %v5904_v21 = vpop.f32.mrf.mxu0  ;;  %v8275_v17 = vpop.permute.xlu2 %8274  ;;  %v8628_v30 = vmax.f32 %v8596_v28, 0.0 }
 0x5f1   : > { %v6069_v29 = vpop.permute.xlu1 %6068  ;;  %v8357_v57 = vadd.f32 %v8275_v17, %v8101_v56  ;;  %v6067_v16 = vpop.permute.xlu0 %6066  ;;  %v8100_v44 = vadd.f32 %v15222_v22, %v7457_v32  ;;  %v15223_v21 = vld [vmem:[#allocation26_spill] sm:$0xff]  ;;  %v8422_v56 = vrot.slane %v13714_v18, 2  ;;  %v7322_v17 = vrot.slane %v15224_v0, 2  ;;  %v15225_v32 = vld [vmem:[#allocation25_spill] sm:$0xff] }
 0x5f2   : > { %v13858_v13 = vpop.f32.mrf.mxu1  ;;  %v6146_v35 = vadd.f32 %v6067_v16, %v15221_v54  ;;  %v6220_v22 = vrot.slane %v15219_v62, 2 }
 0x5f3   : > { %v8356_v11 = vadd.f32 %v8273_v25, %v8100_v44  ;;  %v7323_v25 = vsel %vm2025_vm6, %v7320_v45, %v7322_v17  ;;  %v8423_v28 = vsel %vm2025_vm6, %v8421_v33, %v8422_v56  ;;  %v8216_v44 = vrot.slane %v13753_v2, 1 }
 0x5f4   : > { %v13874_v60 = vadd.f32 %v13731_v38, %v6146_v35  ;;  %v7454_v38 = vadd.f32 %v15223_v21, %v7246_v48  ;;  %v8692_v48 = vpack.c.bf16 %v8628_v30, %v8628_v30  ;;  %v6147_v45 = vadd.f32 %v6069_v29, %v12999_v8 }
 0x5f5   : > { %v8424_v17 = vrot.slane %v13753_v2, 2  ;;  %v8217_v8 = vsel %vm1735_vm5, %v8214_v23, %v8216_v44  ;;  %v6221_v2 = vsel %vm2025_vm6, %v6218_v27, %v6220_v22  ;;  %v7114_v33 = vrot.slane %v15224_v0, 1  ;;  %v15230_v44 = vld [vmem:[#allocation68_spill] sm:$0xff] }
 0x5f6   : > { %7181 = vrot.lane.b32.xlu2 %v7113_v15, %s10029_s21  ;;  %v8097_v35 = vadd.f32 %v15225_v32, %v7454_v38  ;;  %v13902_v15 = vpop.f32.mrf.mxu2 }
 0x5f7   : > { %6078 = vrot.lane.b32.xlu0 %v6011_v63, %s10029_s21  ;;  %6080 = vrot.lane.b32.xlu1 %v6013_v26, %s10029_s21  ;;  %15226 = vst [vmem:[#allocation107_spill] sm:$0xff] %v13902_v15 }
 0x5f8   : > { %v8755_v16 = vpop.permute.xlu2 %8754  ;;  %v8353_v63 = vadd.f32 %v13622_v51, %v8097_v35  ;;  %v15228_v35 = vld [vmem:[#allocation29_spill] sm:$0xff] }
 0x5f9   : > { %v8753_v61 = vpop.permute.xlu1 %8752  ;;  %8848 = vst.msk [vmem:[%s10242_s20 + $0xc] sm:$0xf] %vm8844_vm10, %v8755_v16  ;;  %v8481_v14 = vpop.permute.xlu0 %8480  ;;  %v15227_v16 = vld [vmem:[#allocation81_spill] sm:$0xff] }
 0x5fa   : > { %v13890_v54 = vpop.f32.mrf.mxu1  ;;  %8847 = vst.msk [vmem:[%s10242_s20 + $0x8] sm:$0xf] %vm8844_vm10, %v8753_v61  ;;  %v13895_v42 = vadd.f32 %v8481_v14, %v8356_v11  ;;  %v8561_v26 = vadd.f32 %v13650_v58, %v8353_v63  ;;  %v6145_v61 = vadd.f32 %v13667_v53, %v15227_v16  ;;  %v8425_v53 = vsel %vm2025_vm6, %v8422_v56, %v8424_v17  ;;  %v15232_v17 = vld [vmem:[#allocation146_spill] sm:$0xff] }
 0x5fc   : > { %v8597_v58 = vadd.f32 %v13870_v41, %v8561_v26  ;;  %v6353_v62 = vadd.f32 %v13699_v4, %v6145_v61  ;;  %v15229_v26 = vld [vmem:[#allocation136_spill] sm:$0xff]  ;;  %v15233_v61 = vld [vmem:[#allocation31_spill] sm:$0xff] }
 0x5fd   : > { %v6222_v22 = vrot.slane %v15229_v26, 2 }
 0x5fe   : > { %7391 = vrot.lane.b32.xlu2 %v7323_v25, %s10030_s22  ;;  %v13927_v29 = vpop.f32.mrf.mxu2  ;;  %v6996_v27 = vadd.f32 %v13069_v39, %v6353_v62  ;;  %v7115_v39 = vsel %vm1735_vm5, %v7112_v24, %v7114_v33  ;;  %v6015_v24 = vrot.slane %v15228_v35, 1  ;;  %v6014_v33 = vrot.slane %v15229_v26, 1 }
 0x5ff   : > { %8492 = vrot.lane.b32.xlu0 %v8423_v28, %s10030_s22  ;;  %8764 = vrot.lane.b32.xlu1 %v8692_v48, %s10032_s23  ;;  %v6223_v48 = vrot.slane %v15228_v35, 2 }
 0x600   : > { %v6071_v21 = vpop.permute.xlu2 %6070 }
 0x601   : > { %v8483_v38 = vpop.permute.xlu1 %8482  ;;  %v6277_v51 = vpop.permute.xlu0 %6276  ;;  %v6148_v4 = vadd.f32 %v6071_v21, %v13077_v20 }
 0x602   : > { %v13913_v30 = vadd.f32 %v8483_v38, %v8357_v57  ;;  %v13915_v11 = vpop.f32.mrf.mxu1  ;;  %v6355_v14 = vadd.f32 %v6277_v51, %v6147_v45  ;;  %v8629_v57 = vmax.f32 %v8597_v58, 0.0  ;;  %v15231_v45 = vld [vmem:[#allocation58_spill] sm:$0xff]  ;;  %v6224_v38 = vsel %vm2025_vm6, %v6222_v22, %v6223_v48 }
 0x603   : > { %v6140_v20 = vadd.f32 %v15231_v45, %v15230_v44  ;;  %v7325_v58 = vrot.slane %v15233_v61, 2  ;;  %v15236_v44 = vld [vmem:[#allocation62_spill] sm:$0xff] }
 0x604   : > { %v8693_v21 = vpack.c.bf16 %v8629_v57, %v8629_v57 }
 0x605   : > { %v6348_v51 = vadd.f32 %v15232_v17, %v6140_v20  ;;  %v8219_v17 = vrot.slane %v13837_v52, 1 }
 0x606   : > { %8286 = vrot.lane.b32.xlu2 %v8217_v8, %s10029_s21  ;;  %v13959_v16 = vpop.f32.mrf.mxu2 }
 0x607   : > { %6288 = vrot.lane.b32.xlu0 %v6221_v2, %s10030_s22  ;;  %8494 = vrot.lane.b32.xlu1 %v8425_v53, %s10030_s22  ;;  %v7117_v2 = vrot.slane %v15233_v61, 1 }
 0x608   : > { %v13935_v23 = vpop.permute.xlu2 %8484 }
 0x609   : > { %v6279_v32 = vpop.permute.xlu1 %6278  ;;  %v7172_v28 = vpop.permute.xlu0 %7171 }
 0x60a   : > { %v13939_v25 = vadd.f32 %v6279_v32, %v6148_v4  ;;  %v13941_v63 = vpop.f32.mrf.mxu1  ;;  %v7252_v56 = vadd.f32 %v7172_v28, %v6996_v27  ;;  %v15234_v32 = vld [vmem:[#allocation28_spill] sm:$0xff] }
 0x60b   : > { %v7324_v27 = vrot.slane %v15234_v32, 2 }
 0x60c   : > { %v13947_v0 = vadd.f32 %v13824_v31, %v7252_v56  ;;  %v6997_v31 = vadd.f32 %v13138_v10, %v13874_v60  ;;  %v7116_v10 = vrot.slane %v15234_v32, 1  ;;  %v15235_v60 = vld [vmem:[#allocation70_spill] sm:$0xff]  ;;  %v6016_v56 = vsel %vm1735_vm5, %v6014_v33, %v6015_v24 }
 0x60d   : > { %v6991_v28 = vadd.f32 %v15235_v60, %v6348_v51  ;;  %v7326_v22 = vsel %vm2025_vm6, %v7324_v27, %v7325_v58  ;;  %v8427_v51 = vrot.slane %v13837_v52, 2 }
 0x60e   : > { %8766 = vrot.lane.b32.xlu2 %v8693_v21, %s10032_s23  ;;  %v7118_v20 = vsel %vm1735_vm5, %v7116_v10, %v7117_v2  ;;  %v15237_v21 = vld [vmem:[#allocation109_spill] sm:$0xff]  ;;  %v8218_v10 = vrot.slane %v13792_v40, 1 }
 0x60f   : > { %7183 = vrot.lane.b32.xlu0 %v7115_v39, %s10029_s21  ;;  %6290 = vrot.lane.b32.xlu1 %v6224_v38, %s10030_s22  ;;  %v7247_v45 = vadd.f32 %v15236_v44, %v6991_v28  ;;  %v6998_v38 = vadd.f32 %v13167_v7, %v6355_v14  ;;  %v8426_v28 = vrot.slane %v13792_v40, 2  ;;  %v15239_v7 = vld [vmem:[#allocation84_spill] sm:$0xff] }
 0x610   : > { %v13965_v62 = vpop.permute.xlu2 %6280 }
 0x611   : > { %v7174_v8 = vpop.permute.xlu1 %7173  ;;  %v5162_v57 = vpop.permute.xlu0 %5161  ;;  %v7455_v39 = vadd.f32 %v15237_v21, %v7247_v45  ;;  %v8428_v44 = vsel %vm2025_vm6, %v8426_v28, %v8427_v51  ;;  %v8220_v45 = vsel %vm1735_vm5, %v8218_v10, %v8219_v17  ;;  %v15242_v10 = vld [vmem:[#allocation154_spill] sm:$0xff]  ;;  %v8221_v28 = vrot.slane %v13864_v49, 1 }
 0x612   : > { %v7253_v53 = vadd.f32 %v7174_v8, %v6997_v31  ;;  %v6978_v4 = vpop.f32.mrf.mxu1  ;;  %5228 = vst.msk [vmem:[%s10242_s20 + $0x78] sm:$0xf] %vm5197_vm9, %v5162_v57  ;;  %v15238_v57 = vld [vmem:[#allocation103_spill] sm:$0xff] }
 0x613   : > { %v7327_v4 = vrot.slane %v15238_v57, 2  ;;  %v8098_v14 = vadd.f32 %v15239_v7, %v7455_v39 }
 0x615   : > { %v7328_v21 = vsel %vm2025_vm6, %v7325_v58, %v7327_v4 }
 0x616   : > { %6082 = vrot.lane.b32.xlu2 %v6016_v56, %s10029_s21 }
 0x617   : > { %7393 = vrot.lane.b32.xlu0 %v7326_v22, %s10030_s22  ;;  %7185 = vrot.lane.b32.xlu1 %v7118_v20, %s10029_s21  ;;  %v13992_v22 = vpop.f32.mrf.mxu2  ;;  %v8354_v20 = vadd.f32 %v13644_v19, %v8098_v14  ;;  %v8102_v19 = vadd.f32 %v15242_v10, %v13796_v59 }
 0x618   : > { %v7176_v31 = vpop.permute.xlu2 %7175 }
 0x619   : > { %v5164_v8 = vpop.permute.xlu1 %5163  ;;  %v7254_v33 = vadd.f32 %v7176_v31, %v6998_v38  ;;  %v7382_v27 = vpop.permute.xlu0 %7381  ;;  %v15241_v31 = vld [vmem:[#allocation108_spill] sm:$0xff] }
 0x61a   : > { %5229 = vst.msk [vmem:[%s10242_s20 + $0x7c] sm:$0xf] %vm5197_vm9, %v5164_v8  ;;  %v6979_v60 = vpop.f32.mrf.mxu1  ;;  %v7461_v56 = vadd.f32 %v7382_v27, %v7253_v53  ;;  %v15240_v53 = vld [vmem:[#allocation156_spill] sm:$0xff]  ;;  %v6017_v39 = vrot.slane %v15241_v31, 1  ;;  %v6225_v8 = vrot.slane %v15241_v31, 2 }
 0x61b   : > { %v8562_v38 = vadd.f32 %v15240_v53, %v8354_v20  ;;  %v15243_v53 = vld [vmem:[#allocation137_spill] sm:$0xff] }
 0x61c   : > { %v6226_v20 = vsel %vm2025_vm6, %v6223_v48, %v6225_v8  ;;  %v6018_v59 = vsel %vm1735_vm5, %v6015_v24, %v6017_v39  ;;  %v7119_v48 = vrot.slane %v15238_v57, 1 }
 0x61d   : > { %v8598_v4 = vadd.f32 %v13870_v41, %v8562_v38  ;;  %v15244_v38 = vld [vmem:[#allocation141_spill] sm:$0xff] }
 0x61e   : > { %8496 = vrot.lane.b32.xlu2 %v8428_v44, %s10030_s22  ;;  %v8599_v44 = vadd.f32 %v13870_v41, %v13804_v3  ;;  %v8103_v31 = vadd.f32 %v15244_v38, %v13947_v0  ;;  %v7120_v0 = vsel %vm1735_vm5, %v7117_v2, %v7119_v48  ;;  %v15248_v2 = vld [vmem:[#allocation149_spill] sm:$0xff] }
 0x61f   : > { %8288 = vrot.lane.b32.xlu0 %v8220_v45, %s10029_s21  ;;  %7395 = vrot.lane.b32.xlu1 %v7328_v21, %s10030_s22  ;;  %v14024_v21 = vpop.f32.mrf.mxu2  ;;  %v8630_v3 = vmax.f32 %v8598_v4, 0.0  ;;  %v15249_v38 = vld [vmem:[#allocation101_spill] sm:$0xff] }
 0x620   : > { %v14007_v27 = vpop.permute.xlu2 %7385  ;;  %v8631_v8 = vmax.f32 %v8599_v44, 0.0  ;;  %v15246_v44 = vld [vmem:[#allocation104_spill] sm:$0xff] }
 0x621   : > { %v7384_v60 = vpop.permute.xlu1 %7383  ;;  %v8277_v14 = vpop.permute.xlu0 %8276 }
 0x622   : > { %v14012_v7 = vadd.f32 %v7384_v60, %v7254_v33  ;;  %v8358_v58 = vadd.f32 %v8277_v14, %v8102_v19  ;;  %v8222_v33 = vsel %vm1735_vm5, %v8219_v17, %v8221_v28  ;;  %v15245_v14 = vld [vmem:[#allocation47_spill] sm:$0xff]  ;;  %v8694_v17 = vpack.c.bf16 %v8630_v3, %v8630_v3 }
 0x623   : > { %v8695_v28 = vpack.c.bf16 %v8631_v8, %v8631_v8 }
 0x624   : > { %v14018_v45 = vadd.f32 %v13935_v23, %v8358_v58  ;;  %v8104_v23 = vadd.f32 %v15243_v53, %v7461_v56  ;;  %v8429_v56 = vrot.slane %v13864_v49, 2 }
 0x626   : > { %6292 = vrot.lane.b32.xlu2 %v6226_v20, %s10030_s22  ;;  %v14679_v20 = vrot.slane %v15246_v44, 2  ;;  %v8430_v48 = vsel %vm2025_vm6, %v8427_v51, %v8429_v56 }
 0x627   : > { %6084 = vrot.lane.b32.xlu0 %v6018_v59, %s10029_s21  ;;  %8290 = vrot.lane.b32.xlu1 %v8222_v33, %s10029_s21  ;;  %v14041_v57 = vpop.f32.mrf.mxu2 }
 0x628   : > { %v8281_v24 = vpop.permute.xlu2 %8280 }
 0x629   : > { %v8279_v39 = vpop.permute.xlu1 %8278  ;;  %v8360_v60 = vadd.f32 %v8281_v24, %v8104_v23  ;;  %v6073_v19 = vpop.permute.xlu0 %6072  ;;  %v7329_v23 = vrot.slane %v15248_v2, 2 }
 0x62a   : > { %v8359_v10 = vadd.f32 %v8279_v39, %v8103_v31  ;;  %v6149_v58 = vadd.f32 %v6073_v19, %v15245_v14  ;;  %v6019_v31 = vrot.slane %v15249_v38, 1  ;;  %v14680_v19 = vrot.slane %v13927_v29, 1 }
 0x62b   : > { %v7331_v49 = vsel %vm2025_vm6, %v7329_v23, %v14679_v20 }
 0x62c   : > { %v14036_v4 = vadd.f32 %v13965_v62, %v6149_v58  ;;  %v15247_v62 = vld [vmem:[#allocation94_spill] sm:$0xff] }
 0x62d   : > { %v6020_v3 = vrot.slane %v15247_v62, 1  ;;  %v6228_v39 = vrot.slane %v15247_v62, 2 }
 0x62e   : > { %7187 = vrot.lane.b32.xlu2 %v7120_v0, %s10029_s21  ;;  %v8223_v0 = vrot.slane %v13902_v15, 1 }
 0x62f   : > { %8768 = vrot.lane.b32.xlu0 %v8694_v17, %s10032_s23  ;;  %8770 = vrot.lane.b32.xlu1 %v8695_v28, %s10032_s23  ;;  %v6021_v8 = vsel %vm1735_vm5, %v6019_v31, %v6020_v3  ;;  %v14065_v24 = vpop.f32.mrf.mxu2  ;;  %v8432_v17 = vrot.slane %v13927_v29, 2  ;;  %v6227_v28 = vrot.slane %v15249_v38, 2 }
 0x630   : > { %v6077_v59 = vpop.permute.xlu2 %6076 }
 0x631   : > { %v8759_v33 = vpop.permute.xlu1 %8758  ;;  %v8757_v53 = vpop.permute.xlu0 %8756  ;;  %v6229_v23 = vsel %vm2025_vm6, %v6227_v28, %v6228_v39 }
 0x632   : > { %8850 = vst.msk [vmem:[%s10242_s20 + $0x14] sm:$0xf] %vm8844_vm10, %v8759_v33  ;;  %v8431_v33 = vrot.slane %v13902_v15, 2 }
 0x633   : > { %8849 = vst.msk [vmem:[%s10242_s20 + $0x10] sm:$0xf] %vm8844_vm10, %v8757_v53  ;;  %v8225_v53 = vsel %vm1735_vm5, %v8223_v0, %v14680_v19 }
 0x634   : > { %v8433_v31 = vsel %vm2025_vm6, %v8431_v33, %v8432_v17  ;;  %v7121_v33 = vrot.slane %v15248_v2, 1 }
 0x636   : > { %7397 = vrot.lane.b32.xlu2 %v7331_v49, %s10030_s22 }
 0x637   : > { %8498 = vrot.lane.b32.xlu0 %v8430_v48, %s10030_s22  ;;  %6086 = vrot.lane.b32.xlu1 %v6021_v8, %s10029_s21  ;;  %v14085_v49 = vpop.f32.mrf.mxu2  ;;  %v15250_v48 = vld [vmem:[#allocation139_spill] sm:$0xff] }
 0x638   : > { %v8761_v14 = vpop.permute.xlu2 %8760  ;;  %v6022_v8 = vrot.slane %v15250_v48, 1  ;;  %v6230_v28 = vrot.slane %v15250_v48, 2 }
 0x639   : > { %v6075_v58 = vpop.permute.xlu1 %6074  ;;  %8851 = vst.msk [vmem:[%s10242_s20 + $0x18] sm:$0xf] %vm8844_vm10, %v8761_v14  ;;  %v8487_v51 = vpop.permute.xlu0 %8486  ;;  %v15251_v14 = vld [vmem:[#allocation50_spill] sm:$0xff] }
 0x63a   : > { %v14074_v56 = vadd.f32 %v8487_v51, %v8359_v10  ;;  %v7122_v10 = vrot.slane %v15246_v44, 1  ;;  %v6150_v51 = vadd.f32 %v6075_v58, %v15251_v14  ;;  %v6231_v58 = vsel %vm2025_vm6, %v6228_v39, %v6230_v28  ;;  %v15252_v14 = vld [vmem:[#allocation138_spill] sm:$0xff] }
 0x63b   : > { %v6151_v48 = vadd.f32 %v6077_v59, %v15252_v14  ;;  %v7000_v14 = vadd.f32 %v13308_v6, %v14036_v4 }
 0x63c   : > { %v7123_v38 = vsel %vm1735_vm5, %v7121_v33, %v7122_v10 }
 0x63e   : > { %8292 = vrot.lane.b32.xlu2 %v8225_v53, %s10029_s21 }
 0x63f   : > { %6294 = vrot.lane.b32.xlu0 %v6229_v23, %s10030_s22  ;;  %8500 = vrot.lane.b32.xlu1 %v8433_v31, %s10030_s22  ;;  %v6023_v31 = vsel %vm1735_vm5, %v6020_v3, %v6022_v8  ;;  %v6999_v3 = vadd.f32 %v13269_v46, %v13939_v25 }
 0x640   : > { %v14090_v20 = vpop.permute.xlu2 %8490 }
 0x641   : > { %v8489_v0 = vpop.permute.xlu1 %8488  ;;  %v6283_v23 = vpop.permute.xlu0 %6282 }
 0x642   : > { %v14093_v53 = vadd.f32 %v8489_v0, %v8360_v60  ;;  %v6358_v19 = vadd.f32 %v6283_v23, %v6150_v51  ;;  %v8434_v60 = vrot.slane %v13959_v16, 2  ;;  %v15253_v0 = vld [vmem:[#allocation110_spill] sm:$0xff]  ;;  %v14110_v23 = vpop.f32.mrf.mxu2 }
 0x643   : > { %v7332_v35 = vrot.slane %v15253_v0, 2  ;;  %v7124_v8 = vrot.slane %v15253_v0, 1 }
 0x644   : > { %v8435_v33 = vsel %vm2025_vm6, %v8432_v17, %v8434_v60  ;;  %v7001_v25 = vadd.f32 %v13383_v1, %v6358_v19  ;;  %v15255_v17 = vld [vmem:[#allocation97_spill] sm:$0xff] }
 0x645   : > { %v7125_v46 = vsel %vm1735_vm5, %v7122_v10, %v7124_v8  ;;  %v15257_v8 = vld [vmem:[#allocation151_spill] sm:$0xff] }
 0x646   : > { %6088 = vrot.lane.b32.xlu2 %v6023_v31, %s10029_s21  ;;  %v15254_v31 = vrot.slane %v15246_v44, 2 }
 0x647   : > { %7189 = vrot.lane.b32.xlu0 %v7123_v38, %s10029_s21  ;;  %6296 = vrot.lane.b32.xlu1 %v6231_v58, %s10030_s22 }
 0x648   : > { %v14105_v15 = vpop.permute.xlu2 %6286  ;;  %v7333_v58 = vsel %vm2025_vm6, %v15254_v31, %v7332_v35  ;;  %v15256_v35 = vld [vmem:[#allocation144_spill] sm:$0xff]  ;;  %v15258_v31 = vld [vmem:[#allocation67_spill] sm:$0xff] }
 0x649   : > { %v6285_v51 = vpop.permute.xlu1 %6284  ;;  %v7178_v39 = vpop.permute.xlu0 %7177  ;;  %v7334_v1 = vrot.slane %v15258_v31, 2 }
 0x64a   : > { %v14112_v38 = vadd.f32 %v6285_v51, %v6151_v48  ;;  %v7255_v28 = vadd.f32 %v7178_v39, %v6999_v3  ;;  %v14685_v48 = vrot.slane %v15255_v17, 2  ;;  %v7335_v51 = vrot.slane %v15256_v35, 2  ;;  %v14129_v3 = vpop.f32.mrf.mxu2 }
 0x64c   : > { %v7463_v59 = vadd.f32 %v14007_v27, %v7255_v28  ;;  %v8226_v27 = vrot.slane %v13959_v16, 1  ;;  %v15259_v16 = vrot.slane %v13927_v29, 1 }
 0x64e   : > { %8502 = vrot.lane.b32.xlu2 %v8435_v33, %s10030_s22  ;;  %v6232_v33 = vrot.slane %v15257_v8, 2  ;;  %v8227_v4 = vsel %vm1735_vm5, %v15259_v16, %v8226_v27  ;;  %v8229_v27 = vrot.slane %v14024_v21, 1  ;;  %v8228_v16 = vrot.slane %v13992_v22, 1 }
 0x64f   : > { %7399 = vrot.lane.b32.xlu0 %v7333_v58, %s10030_s22  ;;  %7191 = vrot.lane.b32.xlu1 %v7125_v46, %s10029_s21  ;;  %v7336_v58 = vsel %vm2025_vm6, %v7334_v1, %v7335_v51  ;;  %v6025_v46 = vrot.slane %v15255_v17, 1  ;;  %v7126_v1 = vrot.slane %v15258_v31, 1 }
 0x650   : > { %v7182_v60 = vpop.permute.xlu2 %7181  ;;  %v6234_v6 = vsel %vm2025_vm6, %v6232_v33, %v14685_v48  ;;  %v6024_v33 = vrot.slane %v15257_v8, 1 }
 0x651   : > { %v7180_v0 = vpop.permute.xlu1 %7179  ;;  %v7257_v39 = vadd.f32 %v7182_v60, %v7001_v25  ;;  %v7388_v10 = vpop.permute.xlu0 %7387  ;;  %v14684_v25 = vrot.slane %v15256_v35, 1 }
 0x652   : > { %v7256_v28 = vadd.f32 %v7180_v0, %v7000_v14  ;;  %v8105_v0 = vadd.f32 %v13579_v34, %v14012_v7  ;;  %v6026_v7 = vsel %vm1735_vm5, %v6024_v33, %v6025_v46  ;;  %v15261_v33 = vld [vmem:[#allocation33_spill] sm:$0xff] }
 0x653   : > { %v7128_v34 = vsel %vm1735_vm5, %v7126_v1, %v14684_v25  ;;  %v6027_v25 = vrot.slane %v15261_v33, 1 }
 0x654   : > { %v7464_v19 = vadd.f32 %v7388_v10, %v7256_v28 }
 0x656   : > { %6298 = vrot.lane.b32.xlu2 %v6234_v6, %s10030_s22 }
 0x657   : > { %8294 = vrot.lane.b32.xlu0 %v8227_v4, %s10029_s21  ;;  %7401 = vrot.lane.b32.xlu1 %v7336_v58, %s10030_s22  ;;  %v14155_v4 = vpop.f32.mrf.mxu2 }
 0x658   : > { %v14145_v14 = vpop.permute.xlu2 %7391  ;;  %15260 = vst [vmem:[#allocation114_spill] sm:$0xff] %v14155_v4 }
 0x659   : > { %v7390_v60 = vpop.permute.xlu1 %7389  ;;  %v8283_v10 = vpop.permute.xlu0 %8282 }
 0x65a   : > { %v14150_v28 = vadd.f32 %v7390_v60, %v7257_v39  ;;  %v8361_v6 = vadd.f32 %v8283_v10, %v8105_v0  ;;  %v8230_v39 = vsel %vm1735_vm5, %v8228_v16, %v8229_v27  ;;  %v8107_v60 = vadd.f32 %v13714_v18, %v7464_v19 }
 0x65b   : > { %v8437_v0 = vrot.slane %v14024_v21, 2  ;;  %v7337_v10 = vrot.slane %v13756_v9, 2  ;;  %v8436_v16 = vrot.slane %v13992_v22, 2  ;;  %v6028_v19 = vsel %vm1735_vm5, %v6025_v46, %v6027_v25 }
 0x65c   : > { %v14158_v58 = vadd.f32 %v14090_v20, %v8361_v6  ;;  %v8106_v20 = vadd.f32 %v13677_v47, %v7463_v59  ;;  %v15262_v25 = vrot.slane %v15255_v17, 2 }
 0x65d   : > { %v7338_v18 = vsel %vm2025_vm6, %v7335_v51, %v7337_v10  ;;  %v8438_v47 = vsel %vm2025_vm6, %v8436_v16, %v8437_v0  ;;  %v8439_v51 = vrot.slane %v14041_v57, 2 }
 0x65e   : > { %7193 = vrot.lane.b32.xlu2 %v7128_v34, %s10029_s21 }
 0x65f   : > { %6090 = vrot.lane.b32.xlu0 %v6026_v7, %s10029_s21  ;;  %8296 = vrot.lane.b32.xlu1 %v8230_v39, %s10029_s21  ;;  %v14178_v59 = vpop.f32.mrf.mxu2  ;;  %v6235_v39 = vrot.slane %v15261_v33, 2 }
 0x660   : > { %v8287_v1 = vpop.permute.xlu2 %8286 }
 0x661   : > { %v8285_v6 = vpop.permute.xlu1 %8284  ;;  %v8363_v48 = vadd.f32 %v8287_v1, %v8107_v60  ;;  %v8763_v7 = vpop.permute.xlu0 %8762  ;;  %v8231_v60 = vrot.slane %v14041_v57, 1  ;;  %v6236_v33 = vsel %vm2025_vm6, %v15262_v25, %v6235_v39  ;;  %v8440_v57 = vsel %vm2025_vm6, %v8437_v0, %v8439_v51  ;;  %v15263_v39 = vld [vmem:[#allocation152_spill] sm:$0xff] }
 0x662   : > { %v8362_v34 = vadd.f32 %v8285_v6, %v8106_v20  ;;  %8852 = vst.msk [vmem:[%s10242_s20 + $0x1c] sm:$0xf] %vm8844_vm10, %v8763_v7  ;;  %v6237_v0 = vrot.slane %v15263_v39, 2 }
 0x663   : > { %v8232_v46 = vsel %vm1735_vm5, %v8229_v27, %v8231_v60  ;;  %v6029_v60 = vrot.slane %v15263_v39, 1 }
 0x666   : > { %7403 = vrot.lane.b32.xlu2 %v7338_v18, %s10030_s22 }
 0x667   : > { %8504 = vrot.lane.b32.xlu0 %v8438_v47, %s10030_s22  ;;  %6092 = vrot.lane.b32.xlu1 %v6028_v19, %s10029_s21  ;;  %v14201_v16 = vpop.f32.mrf.mxu2  ;;  %v6238_v47 = vrot.slane %v13751_v12, 2 }
 0x668   : > { %v8767_v20 = vpop.permute.xlu2 %8766 }
 0x669   : > { %v6081_v1 = vpop.permute.xlu1 %6080  ;;  %8854 = vst.msk [vmem:[%s10242_s20 + $0x24] sm:$0xf] %vm8844_vm10, %v8767_v20  ;;  %v6079_v10 = vpop.permute.xlu0 %6078 }
 0x66a   : > { %v6152_v6 = vadd.f32 %v6079_v10, %v15213_v37  ;;  %v7129_v37 = vrot.slane %v13756_v9, 1  ;;  %v15264_v10 = vrot.slane %v15256_v35, 1  ;;  %v6153_v25 = vadd.f32 %v6081_v1, %v15211_v50 }
 0x66c   : > { %v14191_v7 = vadd.f32 %v14105_v15, %v6152_v6  ;;  %v6030_v15 = vrot.slane %v13751_v12, 1  ;;  %v7130_v9 = vsel %vm1735_vm5, %v15264_v10, %v7129_v37  ;;  %v6239_v6 = vsel %vm2025_vm6, %v6237_v0, %v6238_v47 }
 0x66e   : > { %8298 = vrot.lane.b32.xlu2 %v8232_v46, %s10029_s21  ;;  %v6031_v51 = vsel %vm1735_vm5, %v6029_v60, %v6030_v15  ;;  %v7340_v46 = vrot.slane %v13827_v5, 2  ;;  %v7339_v60 = vrot.slane %v13786_v43, 2 }
 0x66f   : > { %6300 = vrot.lane.b32.xlu0 %v6236_v33, %s10030_s22  ;;  %8506 = vrot.lane.b32.xlu1 %v8440_v57, %s10030_s22  ;;  %v14228_v0 = vpop.f32.mrf.mxu2 }
 0x670   : > { %v6083_v18 = vpop.permute.xlu2 %6082  ;;  %v7341_v1 = vsel %vm2025_vm6, %v7339_v60, %v7340_v46  ;;  %v7002_v60 = vadd.f32 %v13433_v55, %v14112_v38  ;;  %v7134_v38 = vrot.slane %v13858_v13, 1 }
 0x671   : > { %v8765_v27 = vpop.permute.xlu1 %8764  ;;  %v8493_v19 = vpop.permute.xlu0 %8492 }
 0x672   : > { %8853 = vst.msk [vmem:[%s10242_s20 + $0x20] sm:$0xf] %vm8844_vm10, %v8765_v27  ;;  %v14209_v20 = vadd.f32 %v8493_v19, %v8362_v34  ;;  %v14687_v34 = vrot.slane %v14085_v49, 2  ;;  %v7132_v27 = vrot.slane %v13827_v5, 1 }
 0x676   : > { %6094 = vrot.lane.b32.xlu2 %v6031_v51, %s10029_s21  ;;  %v8441_v51 = vrot.slane %v14065_v24, 2 }
 0x677   : > { %7195 = vrot.lane.b32.xlu0 %v7130_v9, %s10029_s21  ;;  %6302 = vrot.lane.b32.xlu1 %v6239_v6, %s10030_s22  ;;  %v7131_v9 = vrot.slane %v13786_v43, 1  ;;  %v6154_v6 = vadd.f32 %v6083_v18, %v15229_v26 }
 0x678   : > { %v8497_v33 = vpop.permute.xlu2 %8496  ;;  %v8443_v50 = vsel %vm2025_vm6, %v8441_v51, %v14687_v34  ;;  %v7342_v51 = vrot.slane %v13858_v13, 2  ;;  %v14252_v34 = vpop.f32.mrf.mxu2  ;;  %v8444_v13 = vrot.slane %v14110_v23, 2 }
 0x679   : > { %v8495_v57 = vpop.permute.xlu1 %8494  ;;  %v6289_v37 = vpop.permute.xlu0 %6288 }
 0x67a   : > { %v14224_v19 = vadd.f32 %v8495_v57, %v8363_v48  ;;  %v14230_v10 = vadd.f32 %v6289_v37, %v6153_v25  ;;  %v7133_v48 = vsel %vm1735_vm5, %v7131_v9, %v7132_v27  ;;  %v8234_v25 = vrot.slane %v14085_v49, 1 }
 0x67b   : > { %v6240_v57 = vrot.slane %v13781_v36, 2  ;;  %v8233_v9 = vrot.slane %v14065_v24, 1  ;;  %v7343_v55 = vsel %vm2025_vm6, %v7340_v46, %v7342_v51  ;;  %v7345_v46 = vrot.slane %v13915_v11, 2 }
 0x67d   : > { %v6241_v18 = vsel %vm2025_vm6, %v6238_v47, %v6240_v57  ;;  %v8235_v39 = vsel %vm1735_vm5, %v8233_v9, %v8234_v25  ;;  %v8236_v47 = vrot.slane %v14110_v23, 1 }
 0x67e   : > { %8508 = vrot.lane.b32.xlu2 %v8443_v50, %s10030_s22 }
 0x67f   : > { %7405 = vrot.lane.b32.xlu0 %v7341_v1, %s10030_s22  ;;  %7197 = vrot.lane.b32.xlu1 %v7133_v48, %s10029_s21 }
 0x680   : > { %v14244_v37 = vpop.permute.xlu2 %6292 }
 0x681   : > { %v6291_v5 = vpop.permute.xlu1 %6290  ;;  %v7184_v1 = vpop.permute.xlu0 %7183 }
 0x682   : > { %v14249_v50 = vadd.f32 %v6291_v5, %v6154_v6  ;;  %v7258_v48 = vadd.f32 %v7184_v1, %v7002_v60  ;;  %v6032_v5 = vrot.slane %v13781_v36, 1  ;;  %v8085_v60 = vpop.f32.mrf.mxu2  ;;  %v7135_v1 = vsel %vm1735_vm5, %v7132_v27, %v7134_v38 }
 0x683   : > { %v8237_v36 = vsel %vm1735_vm5, %v8234_v25, %v8236_v47  ;;  %v8108_v27 = vadd.f32 %v13792_v40, %v14150_v28  ;;  %v15265_v47 = vrot.slane %v14085_v49, 2  ;;  %v8239_v28 = vrot.slane %v14155_v4, 1 }
 0x684   : > { %v14255_v26 = vadd.f32 %v14145_v14, %v7258_v48 }
 0x685   : > { %v8445_v60 = vsel %vm2025_vm6, %v15265_v47, %v8444_v13 }
 0x686   : > { %6304 = vrot.lane.b32.xlu2 %v6241_v18, %s10030_s22  ;;  %v7344_v18 = vrot.slane %v13890_v54, 2 }
 0x687   : > { %8300 = vrot.lane.b32.xlu0 %v8235_v39, %s10029_s21  ;;  %7407 = vrot.lane.b32.xlu1 %v7343_v55, %s10030_s22  ;;  %v6033_v39 = vsel %vm1735_vm5, %v6030_v15, %v6032_v5  ;;  %v8447_v15 = vrot.slane %v14155_v4, 2  ;;  %v8446_v5 = vrot.slane %v14129_v3, 2 }
 0x688   : > { %v14265_v6 = vpop.permute.xlu2 %7187  ;;  %v7346_v23 = vsel %vm2025_vm6, %v7344_v18, %v7345_v46 }
 0x689   : > { %v14267_v14 = vpop.permute.xlu1 %7185  ;;  %v14270_v57 = vpop.permute.xlu0 %7393  ;;  %v8448_v40 = vsel %vm2025_vm6, %v8446_v5, %v8447_v15  ;;  %v8449_v5 = vrot.slane %v14178_v59, 2 }
 0x68a   : > { %v8086_v25 = vpop.f32.mrf.mxu2 }
 0x68e   : > { %7199 = vrot.lane.b32.xlu2 %v7135_v1, %s10029_s21  ;;  %v7137_v1 = vrot.slane %v13915_v11, 1 }
 0x68f   : > { %6096 = vrot.lane.b32.xlu0 %v6033_v39, %s10029_s21  ;;  %8302 = vrot.lane.b32.xlu1 %v8237_v36, %s10029_s21  ;;  %v7139_v36 = vrot.slane %v13941_v63, 1 }
 0x690   : > { %v14280_v51 = vpop.permute.xlu2 %7397 }
 0x691   : > { %v14282_v9 = vpop.permute.xlu1 %7395  ;;  %v8289_v48 = vpop.permute.xlu0 %8288  ;;  %v7140_v25 = vsel %vm1735_vm5, %v7137_v1, %v7139_v36  ;;  %v8241_v36 = vrot.slane %v14178_v59, 1 }
 0x692   : > { %v8364_v55 = vadd.f32 %v8289_v48, %v8108_v27  ;;  %v8238_v27 = vrot.slane %v14129_v3, 1  ;;  %v7136_v48 = vrot.slane %v13890_v54, 1 }
 0x693   : > { %v8242_v59 = vsel %vm1735_vm5, %v8239_v28, %v8241_v36  ;;  %v8603_v36 = vadd.f32 %v13870_v41, %v14074_v56 }
 0x694   : > { %v14289_v38 = vadd.f32 %v8497_v33, %v8364_v55  ;;  %v8240_v18 = vsel %vm1735_vm5, %v8238_v27, %v8239_v28  ;;  %v7138_v55 = vsel %vm1735_vm5, %v7136_v48, %v7137_v1  ;;  %v8243_v48 = vrot.slane %v14201_v16, 1 }
 0x695   : > { %v8451_v28 = vrot.slane %v14201_v16, 2 }
 0x696   : > { %7409 = vrot.lane.b32.xlu2 %v7346_v23, %s10030_s22  ;;  %v7347_v23 = vrot.slane %v13941_v63, 2 }
 0x697   : > { %8510 = vrot.lane.b32.xlu0 %v8445_v60, %s10030_s22  ;;  %8512 = vrot.lane.b32.xlu1 %v8448_v40, %s10030_s22  ;;  %v8244_v40 = vrot.slane %v14228_v0, 1 }
 0x698   : > { %v14301_v33 = vpop.permute.xlu2 %8292  ;;  %v7348_v1 = vsel %vm2025_vm6, %v7345_v46, %v7347_v23  ;;  %v8600_v46 = vadd.f32 %v13870_v41, %v13895_v42  ;;  %v8452_v23 = vrot.slane %v14228_v0, 2 }
 0x699   : > { %v14303_v39 = vpop.permute.xlu1 %8290  ;;  %v14306_v13 = vpop.permute.xlu0 %6084  ;;  %v8245_v63 = vsel %vm1735_vm5, %v8243_v48, %v8244_v40 }
 0x69e   : > { %8304 = vrot.lane.b32.xlu2 %v8240_v18, %s10029_s21  ;;  %v8450_v18 = vsel %vm2025_vm6, %v8447_v15, %v8449_v5  ;;  %v8454_v15 = vrot.slane %v14252_v34, 2 }
 0x69f   : > { %7201 = vrot.lane.b32.xlu0 %v7138_v55, %s10029_s21  ;;  %7203 = vrot.lane.b32.xlu1 %v7140_v25, %s10029_s21  ;;  %v8246_v55 = vrot.slane %v14252_v34, 1  ;;  %v8632_v34 = vmax.f32 %v8600_v46, 0.0  ;;  %v8453_v46 = vsel %vm2025_vm6, %v8451_v28, %v8452_v23 }
 0x6a0   : > { %v6089_v47 = vpop.permute.xlu2 %6088 }
 0x6a1   : > { %v8771_v60 = vpop.permute.xlu1 %8770  ;;  %v8769_v27 = vpop.permute.xlu0 %8768  ;;  %v8247_v48 = vsel %vm1735_vm5, %v8244_v40, %v8246_v55  ;;  %v8696_v40 = vpack.c.bf16 %v8632_v34, %v8632_v34  ;;  %v7005_v34 = vadd.f32 %v15248_v2, %v14249_v50  ;;  %v8109_v2 = vadd.f32 %v13837_v52, %v14255_v26 }
 0x6a2   : > { %8856 = vst.msk [vmem:[%s10242_s20 + $0x2c] sm:$0xf] %vm8844_vm10, %v8771_v60  ;;  %v7004_v52 = vadd.f32 %v15233_v61, %v14230_v10 }
 0x6a3   : > { %8855 = vst.msk [vmem:[%s10242_s20 + $0x28] sm:$0xf] %vm8844_vm10, %v8769_v27  ;;  %v8602_v27 = vadd.f32 %v13870_v41, %v14018_v45  ;;  %v8601_v45 = vadd.f32 %v13870_v41, %v13913_v30  ;;  %v8635_v30 = vmax.f32 %v8603_v36, 0.0 }
 0x6a5   : > { %v8699_v36 = vpack.c.bf16 %v8635_v30, %v8635_v30 }
 0x6a6   : > { %8514 = vrot.lane.b32.xlu2 %v8450_v18, %s10030_s22  ;;  %v8455_v18 = vsel %vm2025_vm6, %v8452_v23, %v8454_v15  ;;  %v8605_v15 = vadd.f32 %v13870_v41, %v14158_v58  ;;  %v7003_v58 = vadd.f32 %v15234_v32, %v14191_v7  ;;  %v8608_v32 = vadd.f32 %v13870_v41, %v14289_v38 }
 0x6a7   : > { %7411 = vrot.lane.b32.xlu0 %v7348_v1, %s10030_s22  ;;  %8308 = vrot.lane.b32.xlu1 %v8245_v63, %s10029_s21  ;;  %v8634_v1 = vmax.f32 %v8602_v27, 0.0  ;;  %v8633_v27 = vmax.f32 %v8601_v45, 0.0  ;;  %v8604_v45 = vadd.f32 %v13870_v41, %v14093_v53 }
 0x6a8   : > { %v14332_v25 = vpop.permute.xlu2 %8502  ;;  %v8640_v26 = vmax.f32 %v8608_v32, 0.0 }
 0x6a9   : > { %v14334_v60 = vpop.permute.xlu1 %6086  ;;  %v8499_v5 = vpop.permute.xlu0 %8498  ;;  %v8698_v55 = vpack.c.bf16 %v8634_v1, %v8634_v1  ;;  %v8697_v28 = vpack.c.bf16 %v8633_v27, %v8633_v27  ;;  %v8636_v53 = vmax.f32 %v8604_v45, 0.0  ;;  %v7260_v27 = vadd.f32 %v14265_v6, %v7004_v52  ;;  %v15267_v45 = vld [vmem:[#allocation29_spill] sm:$0xff] }
 0x6ae   : > { %8310 = vrot.lane.b32.xlu2 %v8247_v48, %s10029_s21  ;;  %v6157_v48 = vadd.f32 %v6089_v47, %v15247_v62  ;;  %v8606_v62 = vadd.f32 %v13870_v41, %v14209_v20  ;;  %v7259_v47 = vadd.f32 %v14267_v14, %v7003_v58 }
 0x6af   : > { %8306 = vrot.lane.b32.xlu0 %v8242_v59, %s10029_s21  ;;  %8518 = vrot.lane.b32.xlu1 %v8455_v18, %s10030_s22  ;;  %v8637_v59 = vmax.f32 %v8605_v15, 0.0 }
 0x6b0   : > { %v14348_v42 = vpop.permute.xlu2 %6298  ;;  %v8638_v20 = vmax.f32 %v8606_v62, 0.0  ;;  %v7467_v14 = vadd.f32 %v14270_v57, %v7259_v47 }
 0x6b1   : > { %v8501_v63 = vpop.permute.xlu1 %8500  ;;  %v14350_v4 = vpop.permute.xlu0 %6294  ;;  %v8701_v50 = vpack.c.bf16 %v8637_v59, %v8637_v59  ;;  %v15266_v59 = vld [vmem:[#allocation107_spill] sm:$0xff] }
 0x6b2   : > { %v8702_v30 = vpack.c.bf16 %v8638_v20, %v8638_v20 }
 0x6b6   : > { %8772 = vrot.lane.b32.xlu2 %v8696_v40, %s10032_s23 }
 0x6b7   : > { %8516 = vrot.lane.b32.xlu0 %v8453_v46, %s10030_s22  ;;  %8776 = vrot.lane.b32.xlu1 %v8698_v55, %s10032_s23  ;;  %v8365_v55 = vadd.f32 %v14303_v39, %v8109_v2  ;;  %v8700_v39 = vpack.c.bf16 %v8636_v53, %v8636_v53 }
 0x6b8   : > { %v14364_v18 = vpop.permute.xlu2 %7193 }
 0x6b9   : > { %v6297_v56 = vpop.permute.xlu1 %6296  ;;  %v7190_v1 = vpop.permute.xlu0 %7189  ;;  %v8573_v15 = vadd.f32 %v8499_v5, %v8365_v55  ;;  %v7468_v5 = vadd.f32 %v14282_v9, %v7260_v27 }
 0x6ba   : > { %v14370_v23 = vadd.f32 %v6297_v56, %v6157_v48  ;;  %v7261_v40 = vadd.f32 %v7190_v1, %v7005_v34  ;;  %v8607_v48 = vadd.f32 %v13870_v41, %v14224_v19  ;;  %v8110_v56 = vadd.f32 %v15266_v59, %v7467_v14 }
 0x6bb   : > { %v8609_v57 = vadd.f32 %v13870_v41, %v8573_v15  ;;  %v8704_v34 = vpack.c.bf16 %v8640_v26, %v8640_v26 }
 0x6bc   : > { %v7469_v7 = vadd.f32 %v14280_v51, %v7261_v40  ;;  %v8366_v61 = vadd.f32 %v14301_v33, %v8110_v56  ;;  %v8639_v10 = vmax.f32 %v8607_v48, 0.0  ;;  %v6155_v40 = vadd.f32 %v14306_v13, %v15267_v45 }
 0x6bd   : > { %v8641_v6 = vmax.f32 %v8609_v57, 0.0 }
 0x6be   : > { %8778 = vrot.lane.b32.xlu2 %v8699_v36, %s10032_s23  ;;  %v8574_v58 = vadd.f32 %v8501_v63, %v8366_v61  ;;  %v8703_v62 = vpack.c.bf16 %v8639_v10, %v8639_v10 }
 0x6bf   : > { %8774 = vrot.lane.b32.xlu0 %v8697_v28, %s10032_s23  ;;  %8782 = vrot.lane.b32.xlu1 %v8701_v50, %s10032_s23  ;;  %v8111_v28 = vadd.f32 %v13927_v29, %v7468_v5  ;;  %v8705_v33 = vpack.c.bf16 %v8641_v6, %v8641_v6  ;;  %v6363_v50 = vadd.f32 %v14244_v37, %v6155_v40 }
 0x6c0   : > { %v14389_v38 = vpop.permute.xlu2 %7403  ;;  %v8610_v47 = vadd.f32 %v13870_v41, %v8574_v58  ;;  %v8112_v37 = vadd.f32 %v13992_v22, %v7469_v7  ;;  %v7008_v58 = vadd.f32 %v15256_v35, %v14370_v23 }
 0x6c1   : > { %v7192_v51 = vpop.permute.xlu1 %7191  ;;  %v7400_v46 = vpop.permute.xlu0 %7399  ;;  %v7006_v53 = vadd.f32 %v15246_v44, %v6363_v50  ;;  %v14422_v44 = vld [vmem:[%s14523_s6] ss:$0 sm:$0xff] }
 0x6c2   : > { %v8642_v29 = vmax.f32 %v8610_v47, 0.0 }
 0x6c3   : > { %v7262_v52 = vadd.f32 %v7192_v51, %v7006_v53 }
 0x6c4   : > { %v8706_v15 = vpack.c.bf16 %v8642_v29, %v8642_v29 }
 0x6c6   : > { %8784 = vrot.lane.b32.xlu2 %v8702_v30, %s10032_s23 }
 0x6c7   : > { %8780 = vrot.lane.b32.xlu0 %v8700_v39, %s10032_s23  ;;  %8788 = vrot.lane.b32.xlu1 %v8704_v34, %s10032_s23 }
 0x6c8   : > { %v8299_v1 = vpop.permute.xlu2 %8298 }
 0x6c9   : > { %v7402_v19 = vpop.permute.xlu1 %7401  ;;  %v8295_v9 = vpop.permute.xlu0 %8294 }
 0x6ca   : > { %v8367_v36 = vadd.f32 %v8295_v9, %v8111_v28 }
 0x6cc   : > { %v8575_v2 = vadd.f32 %v14332_v25, %v8367_v36  ;;  %v7470_v25 = vadd.f32 %v7400_v46, %v7262_v52 }
 0x6ce   : > { %8790 = vrot.lane.b32.xlu2 %v8705_v33, %s10032_s23  ;;  %v8611_v63 = vadd.f32 %v13870_v41, %v8575_v2  ;;  %v8113_v48 = vadd.f32 %v14024_v21, %v7470_v25 }
 0x6cf   : > { %8786 = vrot.lane.b32.xlu0 %v8703_v62, %s10032_s23 }
 0x6d0   : > { %v8643_v32 = vmax.f32 %v8611_v63, 0.0  ;;  %v14410_v55 = vpop.permute.xlu2 %6094  ;;  %v8369_v56 = vadd.f32 %v8299_v1, %v8113_v48  ;;  %v15268_v1 = vld [vmem:[#allocation101_spill] sm:$0xff] }
 0x6d1   : > { %v8297_v13 = vpop.permute.xlu1 %8296  ;;  %v6091_v20 = vpop.permute.xlu0 %6090  ;;  %v6156_v45 = vadd.f32 %v14334_v60, %v15268_v1 }
 0x6d2   : > { %v8707_v14 = vpack.c.bf16 %v8643_v32, %v8643_v32  ;;  %v8368_v26 = vadd.f32 %v8297_v13, %v8112_v37  ;;  %v6158_v2 = vadd.f32 %v6091_v20, %v15257_v8 }
 0x6d3   : > { %v6364_v9 = vadd.f32 %v14350_v4, %v6156_v45  ;;  %v15270_v45 = vld [vmem:[#allocation30_spill] sm:$0xff] }
 0x6d4   : > { %8794 = vrot.lane.b32.xlu1 %v8707_v14, %s10032_s23  ;;  %v6366_v63 = vadd.f32 %v14348_v42, %v6158_v2 }
 0x6d5   : > { %v7007_v62 = vadd.f32 %v15258_v31, %v6364_v9 }
 0x6d6   : > { %v7009_v4 = vadd.f32 %v13786_v43, %v6366_v63 }
 0x6d7   : > { %8792 = vrot.lane.b32.xlu0 %v8706_v15, %s10032_s23  ;;  %v7263_v35 = vadd.f32 %v14364_v18, %v7007_v62 }
 0x6d8   : > { %v8509_v41 = vpop.permute.xlu2 %8508 }
 0x6d9   : > { %v14416_v39 = vpop.permute.xlu1 %6092  ;;  %v8505_v27 = vpop.permute.xlu0 %8504  ;;  %v7471_v23 = vadd.f32 %v7402_v19, %v7263_v35 }
 0x6da   : > { %v8576_v30 = vadd.f32 %v8505_v27, %v8368_v26 }
 0x6db   : > { %v8114_v32 = vadd.f32 %v14065_v24, %v7471_v23 }
 0x6dc   : > { %v8612_v51 = vadd.f32 %v14422_v44, %v8576_v30 }
 0x6de   : > { %v8644_v59 = vmax.f32 %v8612_v51, 0.0 }
 0x6e0   : > { %v8708_v57 = vpack.c.bf16 %v8644_v59, %v8644_v59  ;;  %v14425_v22 = vpop.permute.xlu2 %6304 }
 0x6e1   : > { %v8507_v7 = vpop.permute.xlu1 %8506  ;;  %v6301_v5 = vpop.permute.xlu0 %6300 }
 0x6e2   : > { %v8577_v46 = vadd.f32 %v8507_v7, %v8369_v56  ;;  %8796 = vrot.lane.b32.xlu2 %v8708_v57, %s10032_s23 }
 0x6e4   : > { %v8613_v34 = vadd.f32 %v14422_v44, %v8577_v46 }
 0x6e6   : > { %v8645_v21 = vmax.f32 %v8613_v34, 0.0 }
 0x6e8   : > { %v8709_v61 = vpack.c.bf16 %v8645_v21, %v8645_v21  ;;  %v14429_v10 = vpop.permute.xlu2 %7199  ;;  %v6159_v21 = vadd.f32 %v14416_v39, %v15255_v17 }
 0x6e9   : > { %v6303_v6 = vpop.permute.xlu1 %6302  ;;  %v7196_v28 = vpop.permute.xlu0 %7195 }
 0x6ea   : > { %8798 = vrot.lane.b32.xlu0 %v8709_v61, %s10032_s23  ;;  %v7264_v40 = vadd.f32 %v7196_v28, %v7008_v58  ;;  %v6367_v58 = vadd.f32 %v6301_v5, %v6159_v21 }
 0x6ec   : > { %v7472_v36 = vadd.f32 %v14389_v38, %v7264_v40  ;;  %v7010_v40 = vadd.f32 %v15270_v45, %v6367_v58 }
 0x6ee   : > { %v8115_v24 = vadd.f32 %v14085_v49, %v7472_v36  ;;  %v7266_v39 = vadd.f32 %v14429_v10, %v7010_v40 }
 0x6f0   : > { %v14439_v33 = vpop.permute.xlu2 %7409 }
 0x6f1   : > { %v7198_v47 = vpop.permute.xlu1 %7197  ;;  %v7406_v50 = vpop.permute.xlu0 %7405 }
 0x6f2   : > { %v7265_v31 = vadd.f32 %v7198_v47, %v7009_v4 }
 0x6f4   : > { %v7473_v15 = vadd.f32 %v7406_v50, %v7265_v31 }
 0x6f6   : > { %v8116_v42 = vadd.f32 %v14129_v3, %v7473_v15 }
 0x6f8   : > { %v8305_v29 = vpop.permute.xlu2 %8304 }
 0x6f9   : > { %v7408_v60 = vpop.permute.xlu1 %7407  ;;  %v8301_v38 = vpop.permute.xlu0 %8300  ;;  %v8372_v37 = vadd.f32 %v8305_v29, %v8116_v42 }
 0x6fa   : > { %v8370_v13 = vadd.f32 %v8301_v38, %v8114_v32  ;;  %v7474_v2 = vadd.f32 %v7408_v60, %v7266_v39 }
 0x6fc   : > { %v8578_v53 = vadd.f32 %v8509_v41, %v8370_v13 }
 0x6fe   : > { %v8614_v14 = vadd.f32 %v14422_v44, %v8578_v53 }
 0x700   : > { %v8646_v8 = vmax.f32 %v8614_v14, 0.0  ;;  %v8515_v20 = vpop.permute.xlu2 %8514 }
 0x701   : > { %v8303_v52 = vpop.permute.xlu1 %8302  ;;  %v6097_v18 = vpop.permute.xlu0 %6096 }
 0x702   : > { %v8710_v19 = vpack.c.bf16 %v8646_v8, %v8646_v8  ;;  %v8371_v43 = vadd.f32 %v8303_v52, %v8115_v24  ;;  %v6161_v56 = vadd.f32 %v6097_v18, %v13751_v12  ;;  %v15269_v12 = vld [vmem:[#allocation152_spill] sm:$0xff] }
 0x703   : > { %v6160_v28 = vadd.f32 %v14410_v55, %v15269_v12 }
 0x704   : > { %8800 = vrot.lane.b32.xlu1 %v8710_v19, %s10032_s23  ;;  %v6369_v61 = vadd.f32 %v14425_v22, %v6161_v56 }
 0x705   : > { %v6368_v9 = vadd.f32 %v6303_v6, %v6160_v28  ;;  %v15271_v6 = vld [vmem:[#allocation114_spill] sm:$0xff] }
 0x706   : > { %v7012_v1 = vadd.f32 %v13915_v11, %v6369_v61  ;;  %v8117_v63 = vadd.f32 %v15271_v6, %v7474_v2 }
 0x707   : > { %v7011_v5 = vadd.f32 %v13890_v54, %v6368_v9 }
 0x708   : > { %v8311_v25 = vpop.permute.xlu2 %8310 }
 0x709   : > { %v8513_v26 = vpop.permute.xlu1 %8512  ;;  %v8511_v27 = vpop.permute.xlu0 %8510 }
 0x70a   : > { %v8580_v41 = vadd.f32 %v8513_v26, %v8372_v37  ;;  %v8579_v30 = vadd.f32 %v8511_v27, %v8371_v43 }
 0x70c   : > { %v8616_v48 = vadd.f32 %v14422_v44, %v8580_v41  ;;  %v8615_v51 = vadd.f32 %v14422_v44, %v8579_v30 }
 0x70e   : > { %v8648_v59 = vmax.f32 %v8616_v48, 0.0  ;;  %v8647_v3 = vmax.f32 %v8615_v51, 0.0 }
 0x710   : > { %v8712_v57 = vpack.c.bf16 %v8648_v59, %v8648_v59  ;;  %v8711_v7 = vpack.c.bf16 %v8647_v3, %v8647_v3  ;;  %v8773_v46 = vpop.permute.xlu2 %8772 }
 0x711   : > { %v7204_v49 = vpop.permute.xlu1 %7203  ;;  %8857 = vst.msk [vmem:[%s10242_s20 + $0x30] sm:$0xf] %vm8844_vm10, %v8773_v46  ;;  %v7202_v34 = vpop.permute.xlu0 %7201 }
 0x712   : > { %8804 = vrot.lane.b32.xlu0 %v8712_v57, %s10032_s23  ;;  %8802 = vrot.lane.b32.xlu2 %v8711_v7, %s10032_s23  ;;  %v7268_v36 = vadd.f32 %v7204_v49, %v7012_v1  ;;  %v7267_v50 = vadd.f32 %v7202_v34, %v7011_v5 }
 0x714   : > { %v7475_v4 = vadd.f32 %v14439_v33, %v7267_v50 }
 0x718   : > { %v8779_v62 = vpop.permute.xlu2 %8778 }
 0x719   : > { %v8309_v47 = vpop.permute.xlu1 %8308  ;;  %8860 = vst.msk [vmem:[%s10242_s20 + $0x3c] sm:$0xf] %vm8844_vm10, %v8779_v62  ;;  %v7412_v17 = vpop.permute.xlu0 %7411 }
 0x71a   : > { %v7476_v22 = vadd.f32 %v7412_v17, %v7268_v36 }
 0x71c   : > { %v8119_v55 = vadd.f32 %v14228_v0, %v7476_v22  ;;  %v8118_v0 = vadd.f32 %v14201_v16, %v7475_v4 }
 0x71e   : > { %v8375_v11 = vadd.f32 %v8311_v25, %v8119_v55  ;;  %v8374_v53 = vadd.f32 %v8309_v47, %v8118_v0 }
 0x720   : > { %v8785_v35 = vpop.permute.xlu2 %8784 }
 0x721   : > { %v8519_v23 = vpop.permute.xlu1 %8518  ;;  %8863 = vst.msk [vmem:[%s10242_s20 + $0x48] sm:$0xf] %vm8844_vm10, %v8785_v35  ;;  %v8307_v32 = vpop.permute.xlu0 %8306 }
 0x722   : > { %v8583_v29 = vadd.f32 %v8519_v23, %v8375_v11  ;;  %v8373_v10 = vadd.f32 %v8307_v32, %v8117_v63 }
 0x724   : > { %v8619_v60 = vadd.f32 %v14422_v44, %v8583_v29  ;;  %v8581_v54 = vadd.f32 %v8515_v20, %v8373_v10 }
 0x726   : > { %v8651_v38 = vmax.f32 %v8619_v60, 0.0  ;;  %v8617_v13 = vadd.f32 %v14422_v44, %v8581_v54 }
 0x728   : > { %v8715_v31 = vpack.c.bf16 %v8651_v38, %v8651_v38  ;;  %v8649_v14 = vmax.f32 %v8617_v13, 0.0  ;;  %v8791_v15 = vpop.permute.xlu2 %8790 }
 0x729   : > { %v8777_v8 = vpop.permute.xlu1 %8776  ;;  %8866 = vst.msk [vmem:[%s10242_s20 + $0x54] sm:$0xf] %vm8844_vm10, %v8791_v15  ;;  %v8517_v33 = vpop.permute.xlu0 %8516 }
 0x72a   : > { %8810 = vrot.lane.b32.xlu0 %v8715_v31, %s10032_s23  ;;  %v8713_v20 = vpack.c.bf16 %v8649_v14, %v8649_v14  ;;  %8859 = vst.msk [vmem:[%s10242_s20 + $0x38] sm:$0xf] %vm8844_vm10, %v8777_v8  ;;  %v8582_v16 = vadd.f32 %v8517_v33, %v8374_v53 }
 0x72c   : > { %v8618_v52 = vadd.f32 %v14422_v44, %v8582_v16  ;;  %8806 = vrot.lane.b32.xlu1 %v8713_v20, %s10032_s23 }
 0x72e   : > { %v8650_v18 = vmax.f32 %v8618_v52, 0.0 }
 0x730   : > { %v8714_v19 = vpack.c.bf16 %v8650_v18, %v8650_v18 }
 0x731   : > { %v8783_v42 = vpop.permute.xlu1 %8782  ;;  %v8775_v24 = vpop.permute.xlu0 %8774 }
 0x732   : > { %8862 = vst.msk [vmem:[%s10242_s20 + $0x44] sm:$0xf] %vm8844_vm10, %v8783_v42  ;;  %8808 = vrot.lane.b32.xlu2 %v8714_v19, %s10032_s23 }
 0x733   : > { %8858 = vst.msk [vmem:[%s10242_s20 + $0x34] sm:$0xf] %vm8844_vm10, %v8775_v24 }
 0x739   : > { %v8789_v37 = vpop.permute.xlu1 %8788  ;;  %v8781_v44 = vpop.permute.xlu0 %8780 }
 0x73a   : > { %8865 = vst.msk [vmem:[%s10242_s20 + $0x50] sm:$0xf] %vm8844_vm10, %v8789_v37 }
 0x73b   : > { %8861 = vst.msk [vmem:[%s10242_s20 + $0x40] sm:$0xf] %vm8844_vm10, %v8781_v44 }
 0x73c   : > { %v8797_v43 = vpop.permute.xlu2 %8796 }
 0x73d   : > { %8869 = vst.msk [vmem:[%s10242_s20 + $0x60] sm:$0xf] %vm8844_vm10, %v8797_v43 }
 0x741   : > { %v8787_v25 = vpop.permute.xlu0 %8786 }
 0x742   : > { %8864 = vst.msk [vmem:[%s10242_s20 + $0x4c] sm:$0xf] %vm8844_vm10, %v8787_v25 }
 0x746   : > { %v8795_v26 = vpop.permute.xlu1 %8794 }
 0x747   : > { %8868 = vst.msk [vmem:[%s10242_s20 + $0x5c] sm:$0xf] %vm8844_vm10, %v8795_v26 }
 0x749   : > { %v8793_v41 = vpop.permute.xlu0 %8792 }
 0x74a   : > { %8867 = vst.msk [vmem:[%s10242_s20 + $0x58] sm:$0xf] %vm8844_vm10, %v8793_v41 }
 0x75c   : > { %v8799_v27 = vpop.permute.xlu0 %8798 }
 0x75d   : > { %8870 = vst.msk [vmem:[%s10242_s20 + $0x64] sm:$0xf] %vm8844_vm10, %v8799_v27 }
 0x76c   : > { %v8803_v30 = vpop.permute.xlu2 %8802 }
 0x76d   : > { %8872 = vst.msk [vmem:[%s10242_s20 + $0x6c] sm:$0xf] %vm8844_vm10, %v8803_v30 }
 0x776   : > { %v8801_v48 = vpop.permute.xlu1 %8800 }
 0x777   : > { %8871 = vst.msk [vmem:[%s10242_s20 + $0x68] sm:$0xf] %vm8844_vm10, %v8801_v48 }
 0x784   : > { %v8805_v51 = vpop.permute.xlu0 %8804 }
 0x785   : > { %8873 = vst.msk [vmem:[%s10242_s20 + $0x70] sm:$0xf] %vm8844_vm10, %v8805_v51 }
 0x78c   : > { %v8809_v59 = vpop.permute.xlu2 %8808 }
 0x78d   : > { %8875 = vst.msk [vmem:[%s10242_s20 + $0x78] sm:$0xf] %vm8844_vm10, %v8809_v59 }
 0x79c   : > { %v8811_v56 = vpop.permute.xlu0 %8810 }
 0x79d   : > { %8876 = vst.msk [vmem:[%s10242_s20 + $0x7c] sm:$0xf] %vm8844_vm10, %v8811_v56 }
 0x79e   : > { %v8807_v3 = vpop.permute.xlu1 %8806 }
 0x79f   : > { %8874 = vst.msk [vmem:[%s10242_s20 + $0x74] sm:$0xf] %vm8844_vm10, %v8807_v3 }
 0x7a0 PF: > { %s17_s24 = sadd.s32 1, %s10025_s24  }
 0x7a1   : > { %p14_p4 = scmp.ge.s32.totalorder %s17_s24, 4  }
 0x7a3   :  { %16 = sbr.rel (!%p14_p4) target bundleno = 1 (0x1), region = 82 }

</bundles_post_ra>
